<compile_context>
chip_gen: v7x
topology: tpu7x:2x2x1
jax: 0.10.0
libtpu: 0.0.40
codegen_flags: <defaults>
</compile_context>

<pallas_src>
from functools import partial

import jax
import jax.numpy as jnp
from jax import lax
from jax.experimental import pallas as pl
from jax.experimental.pallas import tpu as pltpu


# ---------------------------------------------------------------------------
# Kernels
# ---------------------------------------------------------------------------
def _attention_kernel_batched(xq_ref, xkv_ref, wqkv_ref, bqkv_ref, wproj_ref,
                              bproj_ref, o_ref, *, num_heads, compute_dtype):
    """Fused MHSA for one (batch, query-tile) grid step, batched over heads."""
    H = num_heads
    _, TQ, C = xq_ref.shape
    N = xkv_ref.shape[1]
    D = C // H
    cd = compute_dtype

    xq = xq_ref[0].astype(cd)       # (TQ, C)
    xkv = xkv_ref[0].astype(cd)     # (N, C)

    # Static ref slices of the fused qkv weight (no (rows, 3C) intermediate).
    wq = wqkv_ref[:, 0:C]
    wk = wqkv_ref[:, C:2 * C]
    wv = wqkv_ref[:, 2 * C:3 * C]

    # Full-width projections, f32 accumulation. Softmax scale is pre-folded
    # into wq / bq by the wrapper.
    q = jnp.dot(xq, wq, preferred_element_type=jnp.float32) + bqkv_ref[:, 0:C]
    k = jnp.dot(xkv, wk, preferred_element_type=jnp.float32) + bqkv_ref[:, C:2 * C]
    v = jnp.dot(xkv, wv, preferred_element_type=jnp.float32) + bqkv_ref[:, 2 * C:3 * C]

    # One head-major layout transform up front instead of 3*H lane-misaligned
    # slices and an H-way concatenate.
    qh = pltpu.einshape("nhd->hnd", q.reshape(TQ, H, D)).astype(cd)  # (H, TQ, D)
    kh = pltpu.einshape("nhd->hnd", k.reshape(N, H, D)).astype(cd)   # (H, N, D)
    vh = pltpu.einshape("nhd->hnd", v.reshape(N, H, D)).astype(cd)   # (H, N, D)

    # Batched-head scores, contracting the last axes (no explicit k^T).
    s = lax.dot_general(qh, kh, (((2,), (2,)), ((0,), (0,))),
                        preferred_element_type=jnp.float32)          # (H, TQ, N)

    # Numerically-stable softmax in f32; reciprocal on the EUP slot.
    s = s - jnp.max(s, axis=-1, keepdims=True)
    p = jnp.exp(s)
    p = p * pl.reciprocal(jnp.sum(p, axis=-1, keepdims=True), approx=True)
    # attn_drop is identity (rate 0.0)

    ctx = lax.dot_general(p.astype(cd), vh, (((2,), (1,)), ((0,), (0,))),
                          preferred_element_type=jnp.float32)        # (H, TQ, D)

    # Concatenate heads back along channels: (H, TQ, D) -> (TQ, C).
    ctx = pltpu.einshape("hnd->nhd", ctx).reshape(TQ, C)

    # Output projection (+ bias); proj_drop is identity (rate 0.0).
    y = jnp.dot(ctx.astype(cd), wproj_ref[...], preferred_element_type=jnp.float32)
    y = y + bproj_ref[...]
    o_ref[0] = y.astype(o_ref.dtype)


def _attention_kernel_loop(xq_ref, xkv_ref, wqkv_ref, bqkv_ref, wproj_ref,
                           bproj_ref, o_ref, *, num_heads, compute_dtype):
    """Fallback variant: static per-head loop (no major-dim relayouts needed)."""
    H = num_heads
    _, TQ, C = xq_ref.shape
    N = xkv_ref.shape[1]
    D = C // H
    cd = compute_dtype

    xq = xq_ref[0].astype(cd)
    xkv = xkv_ref[0].astype(cd)

    wq = wqkv_ref[:, 0:C]
    wk = wqkv_ref[:, C:2 * C]
    wv = wqkv_ref[:, 2 * C:3 * C]

    q = jnp.dot(xq, wq, preferred_element_type=jnp.float32) + bqkv_ref[:, 0:C]
    k = jnp.dot(xkv, wk, preferred_element_type=jnp.float32) + bqkv_ref[:, C:2 * C]
    v = jnp.dot(xkv, wv, preferred_element_type=jnp.float32) + bqkv_ref[:, 2 * C:3 * C]

    head_outs = []
    for h in range(H):
        qh = q[:, h * D:(h + 1) * D].astype(cd)
        kh = k[:, h * D:(h + 1) * D].astype(cd)
        vh = v[:, h * D:(h + 1) * D].astype(cd)
        # A @ B^T form via dimension numbers -> no materialized transpose.
        s = lax.dot_general(qh, kh, (((1,), (1,)), ((), ())),
                            preferred_element_type=jnp.float32)      # (TQ, N)
        s = s - jnp.max(s, axis=-1, keepdims=True)
        p = jnp.exp(s)
        p = p * pl.reciprocal(jnp.sum(p, axis=-1, keepdims=True), approx=True)
        head_outs.append(jnp.dot(p.astype(cd), vh,
                                 preferred_element_type=jnp.float32))
    ctx = jnp.concatenate(head_outs, axis=-1)                        # (TQ, C)

    y = jnp.dot(ctx.astype(cd), wproj_ref[...], preferred_element_type=jnp.float32)
    y = y + bproj_ref[...]
    o_ref[0] = y.astype(o_ref.dtype)


# ---------------------------------------------------------------------------
# Wrapper
# ---------------------------------------------------------------------------
def attention_forward(x, w_qkv, b_qkv, w_proj, b_proj, *, num_heads,
                      q_block=None, compute_dtype=jnp.bfloat16,
                      head_mode="batched", single_buffer_weights=True,
                      vmem_limit_bytes=None):
    """x: (B, N, C) -> (B, N, C)."""
    B, N, C = x.shape
    assert C % num_heads == 0, "dim should be divisible by num_heads"
    D = C // num_heads
    scale = D ** (-0.5)

    if q_block is None:
        q_block = N   # TODO(synk): pad N to a multiple of 128 (and mask padded
                      #             key columns before softmax) for real ViT seq lens.
    assert N % q_block == 0
    n_q = N // q_block

    cd = jnp.dtype(compute_dtype)

    # Fold the softmax scale into the q third of W_qkv / b_qkv (zero in-kernel cost).
    w_qkv = w_qkv.astype(jnp.float32).at[:, :C].multiply(scale)
    b_qkv = b_qkv.reshape(1, 3 * C).astype(jnp.float32).at[:, :C].multiply(scale)

    # Weights in the MXU compute dtype (halves weight DMA for bf16); biases stay
    # f32 and are added to the f32 accumulators.
    w_qkv_c = w_qkv.astype(cd)
    w_proj_c = w_proj.astype(cd)
    b_proj_f = b_proj.reshape(1, C).astype(jnp.float32)

    if head_mode == "batched":
        kernel_fn = _attention_kernel_batched
    elif head_mode == "loop":
        kernel_fn = _attention_kernel_loop
    else:
        raise ValueError(f"unknown head_mode: {head_mode}")
    kernel = partial(kernel_fn, num_heads=num_heads, compute_dtype=cd)

    def _const_spec(shape):
        index_map = lambda b, qi: (0,) * len(shape)
        if single_buffer_weights:
            # Constant index across the grid -> no need to double-buffer weights.
            return pl.BlockSpec(shape, index_map,
                                pipeline_mode=pl.Buffered(buffer_count=1))
        return pl.BlockSpec(shape, index_map)

    # Rough resident-set estimate -> explicit scoped-VMEM budget
    # (v5e default scoped limit is 16 MiB; v7x physical VMEM is 64 MiB).
    w_bytes = 4 * C * C * cd.itemsize + 4 * C * 4
    act_bytes = 4 * 2 * (2 * q_block * C + N * C)            # pipelined f32 blocks
    tmp_bytes = 4 * (3 * N * C + 3 * q_block * C + num_heads * q_block * N)
    est = 2 * w_bytes + act_bytes + 2 * tmp_bytes + (1 << 20)
    if vmem_limit_bytes is None:
        vmem_limit_bytes = int(min(max(est, 32 * 1024 * 1024), 64 * 1024 * 1024))

    return pl.pallas_call(
        kernel,
        out_shape=jax.ShapeDtypeStruct((B, N, C), x.dtype),
        grid=(B, n_q),
        in_specs=[
            pl.BlockSpec((1, q_block, C), lambda b, qi: (b, qi, 0)),  # x (query rows)
            pl.BlockSpec((1, N, C), lambda b, qi: (b, 0, 0)),         # x (key/value rows)
            _const_spec((C, 3 * C)),                                  # W_qkv (q pre-scaled)
            _const_spec((1, 3 * C)),                                  # b_qkv (q pre-scaled)
            _const_spec((C, C)),                                      # W_proj
            _const_spec((1, C)),                                      # b_proj
        ],
        out_specs=pl.BlockSpec((1, q_block, C), lambda b, qi: (b, qi, 0)),
        compiler_params=pltpu.CompilerParams(
            dimension_semantics=("parallel", "parallel"),
            vmem_limit_bytes=vmem_limit_bytes),
    )(x, x, w_qkv_c, b_qkv, w_proj_c, b_proj_f)


# ---------------------------------------------------------------------------
# Plain-JAX reference (mirrors the PyTorch forward exactly)
# ---------------------------------------------------------------------------
def attention_reference(x, w_qkv, b_qkv, w_proj, b_proj, *, num_heads):
    B, N, C = x.shape
    D = C // num_heads
    scale = D ** (-0.5)
    qkv = x @ w_qkv + b_qkv.reshape(3 * C)
    qkv = qkv.reshape(B, N, 3, num_heads, D).transpose(2, 0, 3, 1, 4)
    q, k, v = qkv[0], qkv[1], qkv[2]                                  # (B, H, N, D)
    attn = (q @ jnp.swapaxes(k, -2, -1)) * scale
    attn = jax.nn.softmax(attn, axis=-1)
    out = (attn @ v).transpose(0, 2, 1, 3).reshape(B, N, C)
    return out @ w_proj + b_proj.reshape(C)


# ---------------------------------------------------------------------------
# Demo / self-test
# ---------------------------------------------------------------------------
if __name__ == "__main__":
    # Small shapes consistent with the module: B=2, seq N=16, dim C=32, 8 heads.
    B, N, C, H = 2, 16, 32, 8
    key = jax.random.PRNGKey(0)
    kx, kq, kbq, kp, kbp = jax.random.split(key, 5)

    x = jax.random.normal(kx, (B, N, C), dtype=jnp.float32)
    w_qkv = jax.random.normal(kq, (C, 3 * C), dtype=jnp.float32) * 0.05
    b_qkv = jax.random.normal(kbq, (1, 3 * C), dtype=jnp.float32) * 0.02
    w_proj = jax.random.normal(kp, (C, C), dtype=jnp.float32) * 0.05
    b_proj = jax.random.normal(kbp, (1, C), dtype=jnp.float32) * 0.02

    ref = attention_reference(x, w_qkv, b_qkv, w_proj, b_proj, num_heads=H)

    def verify(head_mode, single_buffer_weights):
        # f32 compute path (tolerance accounts for the approx reciprocal).
        o32 = attention_forward(x, w_qkv, b_qkv, w_proj, b_proj, num_heads=H,
                                q_block=8, compute_dtype=jnp.float32,
                                head_mode=head_mode,
                                single_buffer_weights=single_buffer_weights)
        o32 = jax.block_until_ready(o32)
        assert o32.shape == (B, N, C)
        assert jnp.allclose(o32, ref, atol=2e-3, rtol=2e-3), "f32 mismatch vs reference"
        # bf16 MXU operands with f32 accumulation (looser tolerance).
        obf = attention_forward(x, w_qkv, b_qkv, w_proj, b_proj, num_heads=H,
                                q_block=8, compute_dtype=jnp.bfloat16,
                                head_mode=head_mode,
                                single_buffer_weights=single_buffer_weights)
        obf = jax.block_until_ready(obf)
        assert jnp.allclose(obf, ref, atol=5e-2, rtol=5e-2), "bf16 mismatch vs reference"

    # Feature detection: prefer the head-batched contraction with single-buffered
    # weights; progressively fall back if this JAX/Mosaic build rejects either.
    configs = [("batched", True), ("batched", False), ("loop", True), ("loop", False)]
    last_err = None
    for head_mode, single_buf in configs:
        try:
            verify(head_mode, single_buf)
            last_err = None
            break
        except Exception as e:   # noqa: BLE001 - fall back to a simpler structure
            last_err = e
    if last_err is not None:
        raise last_err

    print("KERNEL_OK")
</pallas_src>

<mosaic_0001>
module attributes {stable_mosaic.version = 11 : i64} {
  func.func @_attention_kernel_batched(%arg0: i32, %arg1: i32, %arg2: memref<1x8x32xf32, #tpu.memory_space<vmem>>, %arg3: memref<1x16x32xf32, #tpu.memory_space<vmem>>, %arg4: memref<32x96xf32, #tpu.memory_space<vmem>>, %arg5: memref<1x96xf32, #tpu.memory_space<vmem>>, %arg6: memref<32x32xf32, #tpu.memory_space<vmem>>, %arg7: memref<1x32xf32, #tpu.memory_space<vmem>>, %arg8: memref<1x8x32xf32, #tpu.memory_space<vmem>>) attributes {dimension_semantics = [#tpu.dimension_semantics<parallel>, #tpu.dimension_semantics<parallel>], iteration_bounds = array<i64: 2, 2>, scalar_prefetch = 0 : i64, scratch_operands = 0 : i64, tpu.core_type = #tpu.core_type<tc>, window_params = [{transform_indices = @transform_0, window_bounds = array<i64: 1, 8, 32>}, {transform_indices = @transform_1, window_bounds = array<i64: 1, 16, 32>}, {pipeline_mode = #tpu.pipeline_mode<synchronous>, transform_indices = @transform_2, window_bounds = array<i64: 32, 96>}, {pipeline_mode = #tpu.pipeline_mode<synchronous>, transform_indices = @transform_3, window_bounds = array<i64: 1, 96>}, {pipeline_mode = #tpu.pipeline_mode<synchronous>, transform_indices = @transform_4, window_bounds = array<i64: 32, 32>}, {pipeline_mode = #tpu.pipeline_mode<synchronous>, transform_indices = @transform_5, window_bounds = array<i64: 1, 32>}, {transform_indices = @transform_6, window_bounds = array<i64: 1, 8, 32>}]} {
    %c0 = arith.constant 0 : index
    %c0_0 = arith.constant 0 : index
    %c0_1 = arith.constant 0 : index
    %0 = vector.load %arg2[%c0, %c0_0, %c0_1] : memref<1x8x32xf32, #tpu.memory_space<vmem>>, vector<1x8x32xf32>
    %1 = vector.shape_cast %0 : vector<1x8x32xf32> to vector<8x32xf32>
    %c0_2 = arith.constant 0 : index
    %c0_3 = arith.constant 0 : index
    %c0_4 = arith.constant 0 : index
    %2 = vector.load %arg3[%c0_2, %c0_3, %c0_4] : memref<1x16x32xf32, #tpu.memory_space<vmem>>, vector<1x16x32xf32>
    %3 = vector.shape_cast %2 : vector<1x16x32xf32> to vector<16x32xf32>
    %c0_5 = arith.constant 0 : index
    %c0_6 = arith.constant 0 : index
    %4 = vector.load %arg4[%c0_5, %c0_6] : memref<32x96xf32, #tpu.memory_space<vmem>>, vector<32x32xf32>
    %c0_7 = arith.constant 0 : index
    %c32 = arith.constant 32 : index
    %5 = vector.load %arg4[%c0_7, %c32] : memref<32x96xf32, #tpu.memory_space<vmem>>, vector<32x32xf32>
    %c0_8 = arith.constant 0 : index
    %c64 = arith.constant 64 : index
    %6 = vector.load %arg4[%c0_8, %c64] : memref<32x96xf32, #tpu.memory_space<vmem>>, vector<32x32xf32>
    %cst = arith.constant dense<0.000000e+00> : vector<8x32xf32>
    %7 = tpu.matmul %1, %4, %cst {dimension_numbers = #tpu.dot_dimension_numbers<[1], [0], [0], [1], [0, 0, 1, 1], [], []>} : vector<8x32xf32>, vector<32x32xf32>, vector<8x32xf32> -> vector<8x32xf32>
    %c0_9 = arith.constant 0 : index
    %c0_10 = arith.constant 0 : index
    %8 = vector.load %arg5[%c0_9, %c0_10] : memref<1x96xf32, #tpu.memory_space<vmem>>, vector<1x32xf32>
    %9 = vector.broadcast %8 : vector<1x32xf32> to vector<8x32xf32>
    %10 = arith.addf %7, %9 : vector<8x32xf32>
    %cst_11 = arith.constant dense<0.000000e+00> : vector<16x32xf32>
    %11 = tpu.matmul %3, %5, %cst_11 {dimension_numbers = #tpu.dot_dimension_numbers<[1], [0], [0], [1], [0, 0, 1, 1], [], []>} : vector<16x32xf32>, vector<32x32xf32>, vector<16x32xf32> -> vector<16x32xf32>
    %c0_12 = arith.constant 0 : index
    %c32_13 = arith.constant 32 : index
    %12 = vector.load %arg5[%c0_12, %c32_13] : memref<1x96xf32, #tpu.memory_space<vmem>>, vector<1x32xf32>
    %13 = vector.broadcast %12 : vector<1x32xf32> to vector<16x32xf32>
    %14 = arith.addf %11, %13 : vector<16x32xf32>
    %cst_14 = arith.constant dense<0.000000e+00> : vector<16x32xf32>
    %15 = tpu.matmul %3, %6, %cst_14 {dimension_numbers = #tpu.dot_dimension_numbers<[1], [0], [0], [1], [0, 0, 1, 1], [], []>} : vector<16x32xf32>, vector<32x32xf32>, vector<16x32xf32> -> vector<16x32xf32>
    %c0_15 = arith.constant 0 : index
    %c64_16 = arith.constant 64 : index
    %16 = vector.load %arg5[%c0_15, %c64_16] : memref<1x96xf32, #tpu.memory_space<vmem>>, vector<1x32xf32>
    %17 = vector.broadcast %16 : vector<1x32xf32> to vector<16x32xf32>
    %18 = arith.addf %15, %17 : vector<16x32xf32>
    %19 = vector.shape_cast %10 : vector<8x32xf32> to vector<8x8x4xf32>
    %20 = tpu.transpose %19, [1, 0, 2] : vector<8x8x4xf32> -> vector<8x8x4xf32>
    %21 = vector.shape_cast %14 : vector<16x32xf32> to vector<16x8x4xf32>
    %22 = tpu.transpose %21, [1, 0, 2] : vector<16x8x4xf32> -> vector<8x16x4xf32>
    %23 = vector.shape_cast %18 : vector<16x32xf32> to vector<16x8x4xf32>
    %24 = tpu.transpose %23, [1, 0, 2] : vector<16x8x4xf32> -> vector<8x16x4xf32>
    %cst_17 = arith.constant dense<0.000000e+00> : vector<8x8x16xf32>
    %25 = tpu.matmul %20, %22, %cst_17 {dimension_numbers = #tpu.dot_dimension_numbers<[2], [2], [1], [1], [0, 0, 0, 1, 1, 1], [0], [0]>} : vector<8x8x4xf32>, vector<8x16x4xf32>, vector<8x8x16xf32> -> vector<8x8x16xf32>
    %cst_18 = arith.constant dense<0xFF800000> : vector<8x8xf32>
    %26 = vector.multi_reduction <maximumf>, %25, %cst_18 [2] : vector<8x8x16xf32> to vector<8x8xf32>
    %27 = vector.shape_cast %26 : vector<8x8xf32> to vector<8x8x1xf32>
    %28 = vector.broadcast %27 : vector<8x8x1xf32> to vector<8x8x16xf32>
    %29 = arith.subf %25, %28 : vector<8x8x16xf32>
    %30 = math.exp %29 : vector<8x8x16xf32>
    %cst_19 = arith.constant dense<0.000000e+00> : vector<8x8xf32>
    %31 = vector.multi_reduction <add>, %30, %cst_19 [2] : vector<8x8x16xf32> to vector<8x8xf32>
    %32 = vector.shape_cast %31 : vector<8x8xf32> to vector<8x8x1xf32>
    %33 = tpu.reciprocal %32 {approx = true} : vector<8x8x1xf32> -> vector<8x8x1xf32>
    %34 = vector.broadcast %33 : vector<8x8x1xf32> to vector<8x8x16xf32>
    %35 = arith.mulf %30, %34 : vector<8x8x16xf32>
    %cst_20 = arith.constant dense<0.000000e+00> : vector<8x8x4xf32>
    %36 = tpu.matmul %35, %24, %cst_20 {dimension_numbers = #tpu.dot_dimension_numbers<[2], [1], [1], [2], [0, 0, 0, 1, 1, 2], [0], [0]>} : vector<8x8x16xf32>, vector<8x16x4xf32>, vector<8x8x4xf32> -> vector<8x8x4xf32>
    %37 = tpu.transpose %36, [1, 0, 2] : vector<8x8x4xf32> -> vector<8x8x4xf32>
    %38 = vector.shape_cast %37 : vector<8x8x4xf32> to vector<8x32xf32>
    %c0_21 = arith.constant 0 : index
    %c0_22 = arith.constant 0 : index
    %39 = vector.load %arg6[%c0_21, %c0_22] : memref<32x32xf32, #tpu.memory_space<vmem>>, vector<32x32xf32>
    %cst_23 = arith.constant dense<0.000000e+00> : vector<8x32xf32>
    %40 = tpu.matmul %38, %39, %cst_23 {dimension_numbers = #tpu.dot_dimension_numbers<[1], [0], [0], [1], [0, 0, 1, 1], [], []>} : vector<8x32xf32>, vector<32x32xf32>, vector<8x32xf32> -> vector<8x32xf32>
    %c0_24 = arith.constant 0 : index
    %c0_25 = arith.constant 0 : index
    %41 = vector.load %arg7[%c0_24, %c0_25] : memref<1x32xf32, #tpu.memory_space<vmem>>, vector<1x32xf32>
    %42 = vector.broadcast %41 : vector<1x32xf32> to vector<8x32xf32>
    %43 = arith.addf %40, %42 : vector<8x32xf32>
    %c0_26 = arith.constant 0 : index
    %c0_27 = arith.constant 0 : index
    %c0_28 = arith.constant 0 : index
    %44 = vector.load %arg8[%c0_26, %c0_27, %c0_28] : memref<1x8x32xf32, #tpu.memory_space<vmem>>, vector<1x8x32xf32>
    %45 = vector.shape_cast %44 : vector<1x8x32xf32> to vector<8x32xf32>
    %46 = vector.shape_cast %43 : vector<8x32xf32> to vector<1x8x32xf32>
    tpu.vector_store %arg8[%c0_26, %c0_27, %c0_28], %46 {strides = array<i32>} : memref<1x8x32xf32, #tpu.memory_space<vmem>>, vector<1x8x32xf32>,
    return
  }
  func.func @transform_0(%arg0: i32, %arg1: i32) -> (i32, i32, i32) {
    %c0_i32 = arith.constant 0 : i32
    %c0_i32_0 = arith.constant 0 : i32
    return %arg0, %arg1, %c0_i32 : i32, i32, i32
  }
  func.func @transform_1(%arg0: i32, %arg1: i32) -> (i32, i32, i32) {
    %c0_i32 = arith.constant 0 : i32
    %c0_i32_0 = arith.constant 0 : i32
    %c0_i32_1 = arith.constant 0 : i32
    return %arg0, %c0_i32, %c0_i32_0 : i32, i32, i32
  }
  func.func @transform_2(%arg0: i32, %arg1: i32) -> (i32, i32) {
    %c0_i32 = arith.constant 0 : i32
    %c0_i32_0 = arith.constant 0 : i32
    %c0_i32_1 = arith.constant 0 : i32
    return %c0_i32, %c0_i32_0 : i32, i32
  }
  func.func @transform_3(%arg0: i32, %arg1: i32) -> (i32, i32) {
    %c0_i32 = arith.constant 0 : i32
    %c0_i32_0 = arith.constant 0 : i32
    %c0_i32_1 = arith.constant 0 : i32
    return %c0_i32, %c0_i32_0 : i32, i32
  }
  func.func @transform_4(%arg0: i32, %arg1: i32) -> (i32, i32) {
    %c0_i32 = arith.constant 0 : i32
    %c0_i32_0 = arith.constant 0 : i32
    %c0_i32_1 = arith.constant 0 : i32
    return %c0_i32, %c0_i32_0 : i32, i32
  }
  func.func @transform_5(%arg0: i32, %arg1: i32) -> (i32, i32) {
    %c0_i32 = arith.constant 0 : i32
    %c0_i32_0 = arith.constant 0 : i32
    %c0_i32_1 = arith.constant 0 : i32
    return %c0_i32, %c0_i32_0 : i32, i32
  }
  func.func @transform_6(%arg0: i32, %arg1: i32) -> (i32, i32, i32) {
    %c0_i32 = arith.constant 0 : i32
    %c0_i32_0 = arith.constant 0 : i32
    return %arg0, %arg1, %c0_i32 : i32, i32, i32
  }
}

module attributes {stable_mosaic.version = 11 : i64} {
  func.func @_attention_kernel_batched(%arg0: i32, %arg1: i32, %arg2: memref<1x8x32xf32, #tpu.memory_space<vmem>>, %arg3: memref<1x16x32xf32, #tpu.memory_space<vmem>>, %arg4: memref<32x96xf32, #tpu.memory_space<vmem>>, %arg5: memref<1x96xf32, #tpu.memory_space<vmem>>, %arg6: memref<32x32xf32, #tpu.memory_space<vmem>>, %arg7: memref<1x32xf32, #tpu.memory_space<vmem>>, %arg8: memref<1x8x32xf32, #tpu.memory_space<vmem>>) attributes {dimension_semantics = [#tpu.dimension_semantics<parallel>, #tpu.dimension_semantics<parallel>], iteration_bounds = array<i64: 2, 2>, scalar_prefetch = 0 : i64, scratch_operands = 0 : i64, tpu.core_type = #tpu.core_type<tc>, window_params = [{transform_indices = @transform_0, window_bounds = array<i64: 1, 8, 32>}, {transform_indices = @transform_1, window_bounds = array<i64: 1, 16, 32>}, {pipeline_mode = #tpu.pipeline_mode<synchronous>, transform_indices = @transform_2, window_bounds = array<i64: 32, 96>}, {pipeline_mode = #tpu.pipeline_mode<synchronous>, transform_indices = @transform_3, window_bounds = array<i64: 1, 96>}, {pipeline_mode = #tpu.pipeline_mode<synchronous>, transform_indices = @transform_4, window_bounds = array<i64: 32, 32>}, {pipeline_mode = #tpu.pipeline_mode<synchronous>, transform_indices = @transform_5, window_bounds = array<i64: 1, 32>}, {transform_indices = @transform_6, window_bounds = array<i64: 1, 8, 32>}]} {
    %c0 = arith.constant 0 : index
    %c0_0 = arith.constant 0 : index
    %c0_1 = arith.constant 0 : index
    %0 = vector.load %arg2[%c0, %c0_0, %c0_1] : memref<1x8x32xf32, #tpu.memory_space<vmem>>, vector<1x8x32xf32>
    %1 = vector.shape_cast %0 : vector<1x8x32xf32> to vector<8x32xf32>
    %c0_2 = arith.constant 0 : index
    %c0_3 = arith.constant 0 : index
    %c0_4 = arith.constant 0 : index
    %2 = vector.load %arg3[%c0_2, %c0_3, %c0_4] : memref<1x16x32xf32, #tpu.memory_space<vmem>>, vector<1x16x32xf32>
    %3 = vector.shape_cast %2 : vector<1x16x32xf32> to vector<16x32xf32>
    %c0_5 = arith.constant 0 : index
    %c0_6 = arith.constant 0 : index
    %4 = vector.load %arg4[%c0_5, %c0_6] : memref<32x96xf32, #tpu.memory_space<vmem>>, vector<32x32xf32>
    %c0_7 = arith.constant 0 : index
    %c32 = arith.constant 32 : index
    %5 = vector.load %arg4[%c0_7, %c32] : memref<32x96xf32, #tpu.memory_space<vmem>>, vector<32x32xf32>
    %c0_8 = arith.constant 0 : index
    %c64 = arith.constant 64 : index
    %6 = vector.load %arg4[%c0_8, %c64] : memref<32x96xf32, #tpu.memory_space<vmem>>, vector<32x32xf32>
    %cst = arith.constant dense<0.000000e+00> : vector<8x32xf32>
    %7 = tpu.matmul %1, %4, %cst {dimension_numbers = #tpu.dot_dimension_numbers<[1], [0], [0], [1], [0, 0, 1, 1], [], []>} : vector<8x32xf32>, vector<32x32xf32>, vector<8x32xf32> -> vector<8x32xf32>
    %c0_9 = arith.constant 0 : index
    %c0_10 = arith.constant 0 : index
    %8 = vector.load %arg5[%c0_9, %c0_10] : memref<1x96xf32, #tpu.memory_space<vmem>>, vector<1x32xf32>
    %9 = vector.broadcast %8 : vector<1x32xf32> to vector<8x32xf32>
    %10 = arith.addf %7, %9 : vector<8x32xf32>
    %cst_11 = arith.constant dense<0.000000e+00> : vector<16x32xf32>
    %11 = tpu.matmul %3, %5, %cst_11 {dimension_numbers = #tpu.dot_dimension_numbers<[1], [0], [0], [1], [0, 0, 1, 1], [], []>} : vector<16x32xf32>, vector<32x32xf32>, vector<16x32xf32> -> vector<16x32xf32>
    %c0_12 = arith.constant 0 : index
    %c32_13 = arith.constant 32 : index
    %12 = vector.load %arg5[%c0_12, %c32_13] : memref<1x96xf32, #tpu.memory_space<vmem>>, vector<1x32xf32>
    %13 = vector.broadcast %12 : vector<1x32xf32> to vector<16x32xf32>
    %14 = arith.addf %11, %13 : vector<16x32xf32>
    %cst_14 = arith.constant dense<0.000000e+00> : vector<16x32xf32>
    %15 = tpu.matmul %3, %6, %cst_14 {dimension_numbers = #tpu.dot_dimension_numbers<[1], [0], [0], [1], [0, 0, 1, 1], [], []>} : vector<16x32xf32>, vector<32x32xf32>, vector<16x32xf32> -> vector<16x32xf32>
    %c0_15 = arith.constant 0 : index
    %c64_16 = arith.constant 64 : index
    %16 = vector.load %arg5[%c0_15, %c64_16] : memref<1x96xf32, #tpu.memory_space<vmem>>, vector<1x32xf32>
    %17 = vector.broadcast %16 : vector<1x32xf32> to vector<16x32xf32>
    %18 = arith.addf %15, %17 : vector<16x32xf32>
    %19 = vector.shape_cast %10 : vector<8x32xf32> to vector<8x8x4xf32>
    %20 = tpu.transpose %19, [1, 0, 2] : vector<8x8x4xf32> -> vector<8x8x4xf32>
    %21 = vector.shape_cast %14 : vector<16x32xf32> to vector<16x8x4xf32>
    %22 = tpu.transpose %21, [1, 0, 2] : vector<16x8x4xf32> -> vector<8x16x4xf32>
    %23 = vector.shape_cast %18 : vector<16x32xf32> to vector<16x8x4xf32>
    %24 = tpu.transpose %23, [1, 0, 2] : vector<16x8x4xf32> -> vector<8x16x4xf32>
    %cst_17 = arith.constant dense<0.000000e+00> : vector<8x8x16xf32>
    %25 = tpu.matmul %20, %22, %cst_17 {dimension_numbers = #tpu.dot_dimension_numbers<[2], [2], [1], [1], [0, 0, 0, 1, 1, 1], [0], [0]>} : vector<8x8x4xf32>, vector<8x16x4xf32>, vector<8x8x16xf32> -> vector<8x8x16xf32>
    %cst_18 = arith.constant dense<0xFF800000> : vector<8x8xf32>
    %26 = vector.multi_reduction <maximumf>, %25, %cst_18 [2] : vector<8x8x16xf32> to vector<8x8xf32>
    %27 = vector.shape_cast %26 : vector<8x8xf32> to vector<8x8x1xf32>
    %28 = vector.broadcast %27 : vector<8x8x1xf32> to vector<8x8x16xf32>
    %29 = arith.subf %25, %28 : vector<8x8x16xf32>
    %30 = math.exp %29 : vector<8x8x16xf32>
    %cst_19 = arith.constant dense<0.000000e+00> : vector<8x8xf32>
    %31 = vector.multi_reduction <add>, %30, %cst_19 [2] : vector<8x8x16xf32> to vector<8x8xf32>
    %32 = vector.shape_cast %31 : vector<8x8xf32> to vector<8x8x1xf32>
    %33 = tpu.reciprocal %32 {approx = true} : vector<8x8x1xf32> -> vector<8x8x1xf32>
    %34 = vector.broadcast %33 : vector<8x8x1xf32> to vector<8x8x16xf32>
    %35 = arith.mulf %30, %34 : vector<8x8x16xf32>
    %cst_20 = arith.constant dense<0.000000e+00> : vector<8x8x4xf32>
    %36 = tpu.matmul %35, %24, %cst_20 {dimension_numbers = #tpu.dot_dimension_numbers<[2], [1], [1], [2], [0, 0, 0, 1, 1, 2], [0], [0]>} : vector<8x8x16xf32>, vector<8x16x4xf32>, vector<8x8x4xf32> -> vector<8x8x4xf32>
    %37 = tpu.transpose %36, [1, 0, 2] : vector<8x8x4xf32> -> vector<8x8x4xf32>
    %38 = vector.shape_cast %37 : vector<8x8x4xf32> to vector<8x32xf32>
    %c0_21 = arith.constant 0 : index
    %c0_22 = arith.constant 0 : index
    %39 = vector.load %arg6[%c0_21, %c0_22] : memref<32x32xf32, #tpu.memory_space<vmem>>, vector<32x32xf32>
    %cst_23 = arith.constant dense<0.000000e+00> : vector<8x32xf32>
    %40 = tpu.matmul %38, %39, %cst_23 {dimension_numbers = #tpu.dot_dimension_numbers<[1], [0], [0], [1], [0, 0, 1, 1], [], []>} : vector<8x32xf32>, vector<32x32xf32>, vector<8x32xf32> -> vector<8x32xf32>
    %c0_24 = arith.constant 0 : index
    %c0_25 = arith.constant 0 : index
    %41 = vector.load %arg7[%c0_24, %c0_25] : memref<1x32xf32, #tpu.memory_space<vmem>>, vector<1x32xf32>
    %42 = vector.broadcast %41 : vector<1x32xf32> to vector<8x32xf32>
    %43 = arith.addf %40, %42 : vector<8x32xf32>
    %c0_26 = arith.constant 0 : index
    %c0_27 = arith.constant 0 : index
    %c0_28 = arith.constant 0 : index
    %44 = vector.load %arg8[%c0_26, %c0_27, %c0_28] : memref<1x8x32xf32, #tpu.memory_space<vmem>>, vector<1x8x32xf32>
    %45 = vector.shape_cast %44 : vector<1x8x32xf32> to vector<8x32xf32>
    %46 = vector.shape_cast %43 : vector<8x32xf32> to vector<1x8x32xf32>
    tpu.vector_store %arg8[%c0_26, %c0_27, %c0_28], %46 {strides = array<i32>} : memref<1x8x32xf32, #tpu.memory_space<vmem>>, vector<1x8x32xf32>,
    return
  }
  func.func @transform_0(%arg0: i32, %arg1: i32) -> (i32, i32, i32) {
    %c0_i32 = arith.constant 0 : i32
    %c0_i32_0 = arith.constant 0 : i32
    return %arg0, %arg1, %c0_i32 : i32, i32, i32
  }
  func.func @transform_1(%arg0: i32, %arg1: i32) -> (i32, i32, i32) {
    %c0_i32 = arith.constant 0 : i32
    %c0_i32_0 = arith.constant 0 : i32
    %c0_i32_1 = arith.constant 0 : i32
    return %arg0, %c0_i32, %c0_i32_0 : i32, i32, i32
  }
  func.func @transform_2(%arg0: i32, %arg1: i32) -> (i32, i32) {
    %c0_i32 = arith.constant 0 : i32
    %c0_i32_0 = arith.constant 0 : i32
    %c0_i32_1 = arith.constant 0 : i32
    return %c0_i32, %c0_i32_0 : i32, i32
  }
  func.func @transform_3(%arg0: i32, %arg1: i32) -> (i32, i32) {
    %c0_i32 = arith.constant 0 : i32
    %c0_i32_0 = arith.constant 0 : i32
    %c0_i32_1 = arith.constant 0 : i32
    return %c0_i32, %c0_i32_0 : i32, i32
  }
  func.func @transform_4(%arg0: i32, %arg1: i32) -> (i32, i32) {
    %c0_i32 = arith.constant 0 : i32
    %c0_i32_0 = arith.constant 0 : i32
    %c0_i32_1 = arith.constant 0 : i32
    return %c0_i32, %c0_i32_0 : i32, i32
  }
  func.func @transform_5(%arg0: i32, %arg1: i32) -> (i32, i32) {
    %c0_i32 = arith.constant 0 : i32
    %c0_i32_0 = arith.constant 0 : i32
    %c0_i32_1 = arith.constant 0 : i32
    return %c0_i32, %c0_i32_0 : i32, i32
  }
  func.func @transform_6(%arg0: i32, %arg1: i32) -> (i32, i32, i32) {
    %c0_i32 = arith.constant 0 : i32
    %c0_i32_0 = arith.constant 0 : i32
    return %arg0, %arg1, %c0_i32 : i32, i32, i32
  }
}

module attributes {stable_mosaic.version = 11 : i64} {
  func.func @_attention_kernel_loop(%arg0: i32, %arg1: i32, %arg2: memref<1x8x32xf32, #tpu.memory_space<vmem>>, %arg3: memref<1x16x32xf32, #tpu.memory_space<vmem>>, %arg4: memref<32x96xf32, #tpu.memory_space<vmem>>, %arg5: memref<1x96xf32, #tpu.memory_space<vmem>>, %arg6: memref<32x32xf32, #tpu.memory_space<vmem>>, %arg7: memref<1x32xf32, #tpu.memory_space<vmem>>, %arg8: memref<1x8x32xf32, #tpu.memory_space<vmem>>) attributes {dimension_semantics = [#tpu.dimension_semantics<parallel>, #tpu.dimension_semantics<parallel>], iteration_bounds = array<i64: 2, 2>, scalar_prefetch = 0 : i64, scratch_operands = 0 : i64, tpu.core_type = #tpu.core_type<tc>, window_params = [{transform_indices = @transform_0, window_bounds = array<i64: 1, 8, 32>}, {transform_indices = @transform_1, window_bounds = array<i64: 1, 16, 32>}, {pipeline_mode = #tpu.pipeline_mode<synchronous>, transform_indices = @transform_2, window_bounds = array<i64: 32, 96>}, {pipeline_mode = #tpu.pipeline_mode<synchronous>, transform_indices = @transform_3, window_bounds = array<i64: 1, 96>}, {pipeline_mode = #tpu.pipeline_mode<synchronous>, transform_indices = @transform_4, window_bounds = array<i64: 32, 32>}, {pipeline_mode = #tpu.pipeline_mode<synchronous>, transform_indices = @transform_5, window_bounds = array<i64: 1, 32>}, {transform_indices = @transform_6, window_bounds = array<i64: 1, 8, 32>}]} {
    %c0 = arith.constant 0 : index
    %c0_0 = arith.constant 0 : index
    %c0_1 = arith.constant 0 : index
    %0 = vector.load %arg2[%c0, %c0_0, %c0_1] : memref<1x8x32xf32, #tpu.memory_space<vmem>>, vector<1x8x32xf32>
    %1 = vector.shape_cast %0 : vector<1x8x32xf32> to vector<8x32xf32>
    %c0_2 = arith.constant 0 : index
    %c0_3 = arith.constant 0 : index
    %c0_4 = arith.constant 0 : index
    %2 = vector.load %arg3[%c0_2, %c0_3, %c0_4] : memref<1x16x32xf32, #tpu.memory_space<vmem>>, vector<1x16x32xf32>
    %3 = vector.shape_cast %2 : vector<1x16x32xf32> to vector<16x32xf32>
    %c0_5 = arith.constant 0 : index
    %c0_6 = arith.constant 0 : index
    %4 = vector.load %arg4[%c0_5, %c0_6] : memref<32x96xf32, #tpu.memory_space<vmem>>, vector<32x32xf32>
    %c0_7 = arith.constant 0 : index
    %c32 = arith.constant 32 : index
    %5 = vector.load %arg4[%c0_7, %c32] : memref<32x96xf32, #tpu.memory_space<vmem>>, vector<32x32xf32>
    %c0_8 = arith.constant 0 : index
    %c64 = arith.constant 64 : index
    %6 = vector.load %arg4[%c0_8, %c64] : memref<32x96xf32, #tpu.memory_space<vmem>>, vector<32x32xf32>
    %cst = arith.constant dense<0.000000e+00> : vector<8x32xf32>
    %7 = tpu.matmul %1, %4, %cst {dimension_numbers = #tpu.dot_dimension_numbers<[1], [0], [0], [1], [0, 0, 1, 1], [], []>} : vector<8x32xf32>, vector<32x32xf32>, vector<8x32xf32> -> vector<8x32xf32>
    %c0_9 = arith.constant 0 : index
    %c0_10 = arith.constant 0 : index
    %8 = vector.load %arg5[%c0_9, %c0_10] : memref<1x96xf32, #tpu.memory_space<vmem>>, vector<1x32xf32>
    %9 = vector.broadcast %8 : vector<1x32xf32> to vector<8x32xf32>
    %10 = arith.addf %7, %9 : vector<8x32xf32>
    %cst_11 = arith.constant dense<0.000000e+00> : vector<16x32xf32>
    %11 = tpu.matmul %3, %5, %cst_11 {dimension_numbers = #tpu.dot_dimension_numbers<[1], [0], [0], [1], [0, 0, 1, 1], [], []>} : vector<16x32xf32>, vector<32x32xf32>, vector<16x32xf32> -> vector<16x32xf32>
    %c0_12 = arith.constant 0 : index
    %c32_13 = arith.constant 32 : index
    %12 = vector.load %arg5[%c0_12, %c32_13] : memref<1x96xf32, #tpu.memory_space<vmem>>, vector<1x32xf32>
    %13 = vector.broadcast %12 : vector<1x32xf32> to vector<16x32xf32>
    %14 = arith.addf %11, %13 : vector<16x32xf32>
    %cst_14 = arith.constant dense<0.000000e+00> : vector<16x32xf32>
    %15 = tpu.matmul %3, %6, %cst_14 {dimension_numbers = #tpu.dot_dimension_numbers<[1], [0], [0], [1], [0, 0, 1, 1], [], []>} : vector<16x32xf32>, vector<32x32xf32>, vector<16x32xf32> -> vector<16x32xf32>
    %c0_15 = arith.constant 0 : index
    %c64_16 = arith.constant 64 : index
    %16 = vector.load %arg5[%c0_15, %c64_16] : memref<1x96xf32, #tpu.memory_space<vmem>>, vector<1x32xf32>
    %17 = vector.broadcast %16 : vector<1x32xf32> to vector<16x32xf32>
    %18 = arith.addf %15, %17 : vector<16x32xf32>
    %19 = vector.extract_strided_slice %10 {offsets = [0, 0], sizes = [8, 4], strides = [1, 1]} : vector<8x32xf32> to vector<8x4xf32>
    %20 = vector.extract_strided_slice %14 {offsets = [0, 0], sizes = [16, 4], strides = [1, 1]} : vector<16x32xf32> to vector<16x4xf32>
    %21 = vector.extract_strided_slice %18 {offsets = [0, 0], sizes = [16, 4], strides = [1, 1]} : vector<16x32xf32> to vector<16x4xf32>
    %cst_17 = arith.constant dense<0.000000e+00> : vector<8x16xf32>
    %22 = tpu.matmul %19, %20, %cst_17 {dimension_numbers = #tpu.dot_dimension_numbers<[1], [1], [0], [0], [0, 0, 1, 0], [], []>} : vector<8x4xf32>, vector<16x4xf32>, vector<8x16xf32> -> vector<8x16xf32>
    %cst_18 = arith.constant dense<0xFF800000> : vector<8xf32>
    %23 = vector.multi_reduction <maximumf>, %22, %cst_18 [1] : vector<8x16xf32> to vector<8xf32>
    %24 = vector.shape_cast %23 : vector<8xf32> to vector<8x1xf32>
    %25 = vector.broadcast %24 : vector<8x1xf32> to vector<8x16xf32>
    %26 = arith.subf %22, %25 : vector<8x16xf32>
    %27 = math.exp %26 : vector<8x16xf32>
    %cst_19 = arith.constant dense<0.000000e+00> : vector<8xf32>
    %28 = vector.multi_reduction <add>, %27, %cst_19 [1] : vector<8x16xf32> to vector<8xf32>
    %29 = vector.shape_cast %28 : vector<8xf32> to vector<8x1xf32>
    %30 = tpu.reciprocal %29 {approx = true} : vector<8x1xf32> -> vector<8x1xf32>
    %31 = vector.broadcast %30 : vector<8x1xf32> to vector<8x16xf32>
    %32 = arith.mulf %27, %31 : vector<8x16xf32>
    %cst_20 = arith.constant dense<0.000000e+00> : vector<8x4xf32>
    %33 = tpu.matmul %32, %21, %cst_20 {dimension_numbers = #tpu.dot_dimension_numbers<[1], [0], [0], [1], [0, 0, 1, 1], [], []>} : vector<8x16xf32>, vector<16x4xf32>, vector<8x4xf32> -> vector<8x4xf32>
    %34 = vector.extract_strided_slice %10 {offsets = [0, 4], sizes = [8, 4], strides = [1, 1]} : vector<8x32xf32> to vector<8x4xf32>
    %35 = vector.extract_strided_slice %14 {offsets = [0, 4], sizes = [16, 4], strides = [1, 1]} : vector<16x32xf32> to vector<16x4xf32>
    %36 = vector.extract_strided_slice %18 {offsets = [0, 4], sizes = [16, 4], strides = [1, 1]} : vector<16x32xf32> to vector<16x4xf32>
    %cst_21 = arith.constant dense<0.000000e+00> : vector<8x16xf32>
    %37 = tpu.matmul %34, %35, %cst_21 {dimension_numbers = #tpu.dot_dimension_numbers<[1], [1], [0], [0], [0, 0, 1, 0], [], []>} : vector<8x4xf32>, vector<16x4xf32>, vector<8x16xf32> -> vector<8x16xf32>
    %cst_22 = arith.constant dense<0xFF800000> : vector<8xf32>
    %38 = vector.multi_reduction <maximumf>, %37, %cst_22 [1] : vector<8x16xf32> to vector<8xf32>
    %39 = vector.shape_cast %38 : vector<8xf32> to vector<8x1xf32>
    %40 = vector.broadcast %39 : vector<8x1xf32> to vector<8x16xf32>
    %41 = arith.subf %37, %40 : vector<8x16xf32>
    %42 = math.exp %41 : vector<8x16xf32>
    %cst_23 = arith.constant dense<0.000000e+00> : vector<8xf32>
    %43 = vector.multi_reduction <add>, %42, %cst_23 [1] : vector<8x16xf32> to vector<8xf32>
    %44 = vector.shape_cast %43 : vector<8xf32> to vector<8x1xf32>
    %45 = tpu.reciprocal %44 {approx = true} : vector<8x1xf32> -> vector<8x1xf32>
    %46 = vector.broadcast %45 : vector<8x1xf32> to vector<8x16xf32>
    %47 = arith.mulf %42, %46 : vector<8x16xf32>
    %cst_24 = arith.constant dense<0.000000e+00> : vector<8x4xf32>
    %48 = tpu.matmul %47, %36, %cst_24 {dimension_numbers = #tpu.dot_dimension_numbers<[1], [0], [0], [1], [0, 0, 1, 1], [], []>} : vector<8x16xf32>, vector<16x4xf32>, vector<8x4xf32> -> vector<8x4xf32>
    %49 = vector.extract_strided_slice %10 {offsets = [0, 8], sizes = [8, 4], strides = [1, 1]} : vector<8x32xf32> to vector<8x4xf32>
    %50 = vector.extract_strided_slice %14 {offsets = [0, 8], sizes = [16, 4], strides = [1, 1]} : vector<16x32xf32> to vector<16x4xf32>
    %51 = vector.extract_strided_slice %18 {offsets = [0, 8], sizes = [16, 4], strides = [1, 1]} : vector<16x32xf32> to vector<16x4xf32>
    %cst_25 = arith.constant dense<0.000000e+00> : vector<8x16xf32>
    %52 = tpu.matmul %49, %50, %cst_25 {dimension_numbers = #tpu.dot_dimension_numbers<[1], [1], [0], [0], [0, 0, 1, 0], [], []>} : vector<8x4xf32>, vector<16x4xf32>, vector<8x16xf32> -> vector<8x16xf32>
    %cst_26 = arith.constant dense<0xFF800000> : vector<8xf32>
    %53 = vector.multi_reduction <maximumf>, %52, %cst_26 [1] : vector<8x16xf32> to vector<8xf32>
    %54 = vector.shape_cast %53 : vector<8xf32> to vector<8x1xf32>
    %55 = vector.broadcast %54 : vector<8x1xf32> to vector<8x16xf32>
    %56 = arith.subf %52, %55 : vector<8x16xf32>
    %57 = math.exp %56 : vector<8x16xf32>
    %cst_27 = arith.constant dense<0.000000e+00> : vector<8xf32>
    %58 = vector.multi_reduction <add>, %57, %cst_27 [1] : vector<8x16xf32> to vector<8xf32>
    %59 = vector.shape_cast %58 : vector<8xf32> to vector<8x1xf32>
    %60 = tpu.reciprocal %59 {approx = true} : vector<8x1xf32> -> vector<8x1xf32>
    %61 = vector.broadcast %60 : vector<8x1xf32> to vector<8x16xf32>
    %62 = arith.mulf %57, %61 : vector<8x16xf32>
    %cst_28 = arith.constant dense<0.000000e+00> : vector<8x4xf32>
    %63 = tpu.matmul %62, %51, %cst_28 {dimension_numbers = #tpu.dot_dimension_numbers<[1], [0], [0], [1], [0, 0, 1, 1], [], []>} : vector<8x16xf32>, vector<16x4xf32>, vector<8x4xf32> -> vector<8x4xf32>
    %64 = vector.extract_strided_slice %10 {offsets = [0, 12], sizes = [8, 4], strides = [1, 1]} : vector<8x32xf32> to vector<8x4xf32>
    %65 = vector.extract_strided_slice %14 {offsets = [0, 12], sizes = [16, 4], strides = [1, 1]} : vector<16x32xf32> to vector<16x4xf32>
    %66 = vector.extract_strided_slice %18 {offsets = [0, 12], sizes = [16, 4], strides = [1, 1]} : vector<16x32xf32> to vector<16x4xf32>
    %cst_29 = arith.constant dense<0.000000e+00> : vector<8x16xf32>
    %67 = tpu.matmul %64, %65, %cst_29 {dimension_numbers = #tpu.dot_dimension_numbers<[1], [1], [0], [0], [0, 0, 1, 0], [], []>} : vector<8x4xf32>, vector<16x4xf32>, vector<8x16xf32> -> vector<8x16xf32>
    %cst_30 = arith.constant dense<0xFF800000> : vector<8xf32>
    %68 = vector.multi_reduction <maximumf>, %67, %cst_30 [1] : vector<8x16xf32> to vector<8xf32>
    %69 = vector.shape_cast %68 : vector<8xf32> to vector<8x1xf32>
    %70 = vector.broadcast %69 : vector<8x1xf32> to vector<8x16xf32>
    %71 = arith.subf %67, %70 : vector<8x16xf32>
    %72 = math.exp %71 : vector<8x16xf32>
    %cst_31 = arith.constant dense<0.000000e+00> : vector<8xf32>
    %73 = vector.multi_reduction <add>, %72, %cst_31 [1] : vector<8x16xf32> to vector<8xf32>
    %74 = vector.shape_cast %73 : vector<8xf32> to vector<8x1xf32>
    %75 = tpu.reciprocal %74 {approx = true} : vector<8x1xf32> -> vector<8x1xf32>
    %76 = vector.broadcast %75 : vector<8x1xf32> to vector<8x16xf32>
    %77 = arith.mulf %72, %76 : vector<8x16xf32>
    %cst_32 = arith.constant dense<0.000000e+00> : vector<8x4xf32>
    %78 = tpu.matmul %77, %66, %cst_32 {dimension_numbers = #tpu.dot_dimension_numbers<[1], [0], [0], [1], [0, 0, 1, 1], [], []>} : vector<8x16xf32>, vector<16x4xf32>, vector<8x4xf32> -> vector<8x4xf32>
    %79 = vector.extract_strided_slice %10 {offsets = [0, 16], sizes = [8, 4], strides = [1, 1]} : vector<8x32xf32> to vector<8x4xf32>
    %80 = vector.extract_strided_slice %14 {offsets = [0, 16], sizes = [16, 4], strides = [1, 1]} : vector<16x32xf32> to vector<16x4xf32>
    %81 = vector.extract_strided_slice %18 {offsets = [0, 16], sizes = [16, 4], strides = [1, 1]} : vector<16x32xf32> to vector<16x4xf32>
    %cst_33 = arith.constant dense<0.000000e+00> : vector<8x16xf32>
    %82 = tpu.matmul %79, %80, %cst_33 {dimension_numbers = #tpu.dot_dimension_numbers<[1], [1], [0], [0], [0, 0, 1, 0], [], []>} : vector<8x4xf32>, vector<16x4xf32>, vector<8x16xf32> -> vector<8x16xf32>
    %cst_34 = arith.constant dense<0xFF800000> : vector<8xf32>
    %83 = vector.multi_reduction <maximumf>, %82, %cst_34 [1] : vector<8x16xf32> to vector<8xf32>
    %84 = vector.shape_cast %83 : vector<8xf32> to vector<8x1xf32>
    %85 = vector.broadcast %84 : vector<8x1xf32> to vector<8x16xf32>
    %86 = arith.subf %82, %85 : vector<8x16xf32>
    %87 = math.exp %86 : vector<8x16xf32>
    %cst_35 = arith.constant dense<0.000000e+00> : vector<8xf32>
    %88 = vector.multi_reduction <add>, %87, %cst_35 [1] : vector<8x16xf32> to vector<8xf32>
    %89 = vector.shape_cast %88 : vector<8xf32> to vector<8x1xf32>
    %90 = tpu.reciprocal %89 {approx = true} : vector<8x1xf32> -> vector<8x1xf32>
    %91 = vector.broadcast %90 : vector<8x1xf32> to vector<8x16xf32>
    %92 = arith.mulf %87, %91 : vector<8x16xf32>
    %cst_36 = arith.constant dense<0.000000e+00> : vector<8x4xf32>
    %93 = tpu.matmul %92, %81, %cst_36 {dimension_numbers = #tpu.dot_dimension_numbers<[1], [0], [0], [1], [0, 0, 1, 1], [], []>} : vector<8x16xf32>, vector<16x4xf32>, vector<8x4xf32> -> vector<8x4xf32>
    %94 = vector.extract_strided_slice %10 {offsets = [0, 20], sizes = [8, 4], strides = [1, 1]} : vector<8x32xf32> to vector<8x4xf32>
    %95 = vector.extract_strided_slice %14 {offsets = [0, 20], sizes = [16, 4], strides = [1, 1]} : vector<16x32xf32> to vector<16x4xf32>
    %96 = vector.extract_strided_slice %18 {offsets = [0, 20], sizes = [16, 4], strides = [1, 1]} : vector<16x32xf32> to vector<16x4xf32>
    %cst_37 = arith.constant dense<0.000000e+00> : vector<8x16xf32>
    %97 = tpu.matmul %94, %95, %cst_37 {dimension_numbers = #tpu.dot_dimension_numbers<[1], [1], [0], [0], [0, 0, 1, 0], [], []>} : vector<8x4xf32>, vector<16x4xf32>, vector<8x16xf32> -> vector<8x16xf32>
    %cst_38 = arith.constant dense<0xFF800000> : vector<8xf32>
    %98 = vector.multi_reduction <maximumf>, %97, %cst_38 [1] : vector<8x16xf32> to vector<8xf32>
    %99 = vector.shape_cast %98 : vector<8xf32> to vector<8x1xf32>
    %100 = vector.broadcast %99 : vector<8x1xf32> to vector<8x16xf32>
    %101 = arith.subf %97, %100 : vector<8x16xf32>
    %102 = math.exp %101 : vector<8x16xf32>
    %cst_39 = arith.constant dense<0.000000e+00> : vector<8xf32>
    %103 = vector.multi_reduction <add>, %102, %cst_39 [1] : vector<8x16xf32> to vector<8xf32>
    %104 = vector.shape_cast %103 : vector<8xf32> to vector<8x1xf32>
    %105 = tpu.reciprocal %104 {approx = true} : vector<8x1xf32> -> vector<8x1xf32>
    %106 = vector.broadcast %105 : vector<8x1xf32> to vector<8x16xf32>
    %107 = arith.mulf %102, %106 : vector<8x16xf32>
    %cst_40 = arith.constant dense<0.000000e+00> : vector<8x4xf32>
    %108 = tpu.matmul %107, %96, %cst_40 {dimension_numbers = #tpu.dot_dimension_numbers<[1], [0], [0], [1], [0, 0, 1, 1], [], []>} : vector<8x16xf32>, vector<16x4xf32>, vector<8x4xf32> -> vector<8x4xf32>
    %109 = vector.extract_strided_slice %10 {offsets = [0, 24], sizes = [8, 4], strides = [1, 1]} : vector<8x32xf32> to vector<8x4xf32>
    %110 = vector.extract_strided_slice %14 {offsets = [0, 24], sizes = [16, 4], strides = [1, 1]} : vector<16x32xf32> to vector<16x4xf32>
    %111 = vector.extract_strided_slice %18 {offsets = [0, 24], sizes = [16, 4], strides = [1, 1]} : vector<16x32xf32> to vector<16x4xf32>
    %cst_41 = arith.constant dense<0.000000e+00> : vector<8x16xf32>
    %112 = tpu.matmul %109, %110, %cst_41 {dimension_numbers = #tpu.dot_dimension_numbers<[1], [1], [0], [0], [0, 0, 1, 0], [], []>} : vector<8x4xf32>, vector<16x4xf32>, vector<8x16xf32> -> vector<8x16xf32>
    %cst_42 = arith.constant dense<0xFF800000> : vector<8xf32>
    %113 = vector.multi_reduction <maximumf>, %112, %cst_42 [1] : vector<8x16xf32> to vector<8xf32>
    %114 = vector.shape_cast %113 : vector<8xf32> to vector<8x1xf32>
    %115 = vector.broadcast %114 : vector<8x1xf32> to vector<8x16xf32>
    %116 = arith.subf %112, %115 : vector<8x16xf32>
    %117 = math.exp %116 : vector<8x16xf32>
    %cst_43 = arith.constant dense<0.000000e+00> : vector<8xf32>
    %118 = vector.multi_reduction <add>, %117, %cst_43 [1] : vector<8x16xf32> to vector<8xf32>
    %119 = vector.shape_cast %118 : vector<8xf32> to vector<8x1xf32>
    %120 = tpu.reciprocal %119 {approx = true} : vector<8x1xf32> -> vector<8x1xf32>
    %121 = vector.broadcast %120 : vector<8x1xf32> to vector<8x16xf32>
    %122 = arith.mulf %117, %121 : vector<8x16xf32>
    %cst_44 = arith.constant dense<0.000000e+00> : vector<8x4xf32>
    %123 = tpu.matmul %122, %111, %cst_44 {dimension_numbers = #tpu.dot_dimension_numbers<[1], [0], [0], [1], [0, 0, 1, 1], [], []>} : vector<8x16xf32>, vector<16x4xf32>, vector<8x4xf32> -> vector<8x4xf32>
    %124 = vector.extract_strided_slice %10 {offsets = [0, 28], sizes = [8, 4], strides = [1, 1]} : vector<8x32xf32> to vector<8x4xf32>
    %125 = vector.extract_strided_slice %14 {offsets = [0, 28], sizes = [16, 4], strides = [1, 1]} : vector<16x32xf32> to vector<16x4xf32>
    %126 = vector.extract_strided_slice %18 {offsets = [0, 28], sizes = [16, 4], strides = [1, 1]} : vector<16x32xf32> to vector<16x4xf32>
    %cst_45 = arith.constant dense<0.000000e+00> : vector<8x16xf32>
    %127 = tpu.matmul %124, %125, %cst_45 {dimension_numbers = #tpu.dot_dimension_numbers<[1], [1], [0], [0], [0, 0, 1, 0], [], []>} : vector<8x4xf32>, vector<16x4xf32>, vector<8x16xf32> -> vector<8x16xf32>
    %cst_46 = arith.constant dense<0xFF800000> : vector<8xf32>
    %128 = vector.multi_reduction <maximumf>, %127, %cst_46 [1] : vector<8x16xf32> to vector<8xf32>
    %129 = vector.shape_cast %128 : vector<8xf32> to vector<8x1xf32>
    %130 = vector.broadcast %129 : vector<8x1xf32> to vector<8x16xf32>
    %131 = arith.subf %127, %130 : vector<8x16xf32>
    %132 = math.exp %131 : vector<8x16xf32>
    %cst_47 = arith.constant dense<0.000000e+00> : vector<8xf32>
    %133 = vector.multi_reduction <add>, %132, %cst_47 [1] : vector<8x16xf32> to vector<8xf32>
    %134 = vector.shape_cast %133 : vector<8xf32> to vector<8x1xf32>
    %135 = tpu.reciprocal %134 {approx = true} : vector<8x1xf32> -> vector<8x1xf32>
    %136 = vector.broadcast %135 : vector<8x1xf32> to vector<8x16xf32>
    %137 = arith.mulf %132, %136 : vector<8x16xf32>
    %cst_48 = arith.constant dense<0.000000e+00> : vector<8x4xf32>
    %138 = tpu.matmul %137, %126, %cst_48 {dimension_numbers = #tpu.dot_dimension_numbers<[1], [0], [0], [1], [0, 0, 1, 1], [], []>} : vector<8x16xf32>, vector<16x4xf32>, vector<8x4xf32> -> vector<8x4xf32>
    %139 = tpu.concatenate %33, %48, %63, %78, %93, %108, %123, %138 in 1 : vector<8x4xf32>, vector<8x4xf32>, vector<8x4xf32>, vector<8x4xf32>, vector<8x4xf32>, vector<8x4xf32>, vector<8x4xf32>, vector<8x4xf32> -> vector<8x32xf32>
    %c0_49 = arith.constant 0 : index
    %c0_50 = arith.constant 0 : index
    %140 = vector.load %arg6[%c0_49, %c0_50] : memref<32x32xf32, #tpu.memory_space<vmem>>, vector<32x32xf32>
    %cst_51 = arith.constant dense<0.000000e+00> : vector<8x32xf32>
    %141 = tpu.matmul %139, %140, %cst_51 {dimension_numbers = #tpu.dot_dimension_numbers<[1], [0], [0], [1], [0, 0, 1, 1], [], []>} : vector<8x32xf32>, vector<32x32xf32>, vector<8x32xf32> -> vector<8x32xf32>
    %c0_52 = arith.constant 0 : index
    %c0_53 = arith.constant 0 : index
    %142 = vector.load %arg7[%c0_52, %c0_53] : memref<1x32xf32, #tpu.memory_space<vmem>>, vector<1x32xf32>
    %143 = vector.broadcast %142 : vector<1x32xf32> to vector<8x32xf32>
    %144 = arith.addf %141, %143 : vector<8x32xf32>
    %c0_54 = arith.constant 0 : index
    %c0_55 = arith.constant 0 : index
    %c0_56 = arith.constant 0 : index
    %145 = vector.load %arg8[%c0_54, %c0_55, %c0_56] : memref<1x8x32xf32, #tpu.memory_space<vmem>>, vector<1x8x32xf32>
    %146 = vector.shape_cast %145 : vector<1x8x32xf32> to vector<8x32xf32>
    %147 = vector.shape_cast %144 : vector<8x32xf32> to vector<1x8x32xf32>
    tpu.vector_store %arg8[%c0_54, %c0_55, %c0_56], %147 {strides = array<i32>} : memref<1x8x32xf32, #tpu.memory_space<vmem>>, vector<1x8x32xf32>,
    return
  }
  func.func @transform_0(%arg0: i32, %arg1: i32) -> (i32, i32, i32) {
    %c0_i32 = arith.constant 0 : i32
    %c0_i32_0 = arith.constant 0 : i32
    return %arg0, %arg1, %c0_i32 : i32, i32, i32
  }
  func.func @transform_1(%arg0: i32, %arg1: i32) -> (i32, i32, i32) {
    %c0_i32 = arith.constant 0 : i32
    %c0_i32_0 = arith.constant 0 : i32
    %c0_i32_1 = arith.constant 0 : i32
    return %arg0, %c0_i32, %c0_i32_0 : i32, i32, i32
  }
  func.func @transform_2(%arg0: i32, %arg1: i32) -> (i32, i32) {
    %c0_i32 = arith.constant 0 : i32
    %c0_i32_0 = arith.constant 0 : i32
    %c0_i32_1 = arith.constant 0 : i32
    return %c0_i32, %c0_i32_0 : i32, i32
  }
  func.func @transform_3(%arg0: i32, %arg1: i32) -> (i32, i32) {
    %c0_i32 = arith.constant 0 : i32
    %c0_i32_0 = arith.constant 0 : i32
    %c0_i32_1 = arith.constant 0 : i32
    return %c0_i32, %c0_i32_0 : i32, i32
  }
  func.func @transform_4(%arg0: i32, %arg1: i32) -> (i32, i32) {
    %c0_i32 = arith.constant 0 : i32
    %c0_i32_0 = arith.constant 0 : i32
    %c0_i32_1 = arith.constant 0 : i32
    return %c0_i32, %c0_i32_0 : i32, i32
  }
  func.func @transform_5(%arg0: i32, %arg1: i32) -> (i32, i32) {
    %c0_i32 = arith.constant 0 : i32
    %c0_i32_0 = arith.constant 0 : i32
    %c0_i32_1 = arith.constant 0 : i32
    return %c0_i32, %c0_i32_0 : i32, i32
  }
  func.func @transform_6(%arg0: i32, %arg1: i32) -> (i32, i32, i32) {
    %c0_i32 = arith.constant 0 : i32
    %c0_i32_0 = arith.constant 0 : i32
    return %arg0, %arg1, %c0_i32 : i32, i32, i32
  }
}

module attributes {stable_mosaic.version = 11 : i64} {
  func.func @_attention_kernel_loop(%arg0: i32, %arg1: i32, %arg2: memref<1x8x32xf32, #tpu.memory_space<vmem>>, %arg3: memref<1x16x32xf32, #tpu.memory_space<vmem>>, %arg4: memref<32x96xf32, #tpu.memory_space<vmem>>, %arg5: memref<1x96xf32, #tpu.memory_space<vmem>>, %arg6: memref<32x32xf32, #tpu.memory_space<vmem>>, %arg7: memref<1x32xf32, #tpu.memory_space<vmem>>, %arg8: memref<1x8x32xf32, #tpu.memory_space<vmem>>) attributes {dimension_semantics = [#tpu.dimension_semantics<parallel>, #tpu.dimension_semantics<parallel>], iteration_bounds = array<i64: 2, 2>, scalar_prefetch = 0 : i64, scratch_operands = 0 : i64, tpu.core_type = #tpu.core_type<tc>, window_params = [{transform_indices = @transform_0, window_bounds = array<i64: 1, 8, 32>}, {transform_indices = @transform_1, window_bounds = array<i64: 1, 16, 32>}, {pipeline_mode = #tpu.pipeline_mode<synchronous>, transform_indices = @transform_2, window_bounds = array<i64: 32, 96>}, {pipeline_mode = #tpu.pipeline_mode<synchronous>, transform_indices = @transform_3, window_bounds = array<i64: 1, 96>}, {pipeline_mode = #tpu.pipeline_mode<synchronous>, transform_indices = @transform_4, window_bounds = array<i64: 32, 32>}, {pipeline_mode = #tpu.pipeline_mode<synchronous>, transform_indices = @transform_5, window_bounds = array<i64: 1, 32>}, {transform_indices = @transform_6, window_bounds = array<i64: 1, 8, 32>}]} {
    %c0 = arith.constant 0 : index
    %c0_0 = arith.constant 0 : index
    %c0_1 = arith.constant 0 : index
    %0 = vector.load %arg2[%c0, %c0_0, %c0_1] : memref<1x8x32xf32, #tpu.memory_space<vmem>>, vector<1x8x32xf32>
    %1 = vector.shape_cast %0 : vector<1x8x32xf32> to vector<8x32xf32>
    %c0_2 = arith.constant 0 : index
    %c0_3 = arith.constant 0 : index
    %c0_4 = arith.constant 0 : index
    %2 = vector.load %arg3[%c0_2, %c0_3, %c0_4] : memref<1x16x32xf32, #tpu.memory_space<vmem>>, vector<1x16x32xf32>
    %3 = vector.shape_cast %2 : vector<1x16x32xf32> to vector<16x32xf32>
    %c0_5 = arith.constant 0 : index
    %c0_6 = arith.constant 0 : index
    %4 = vector.load %arg4[%c0_5, %c0_6] : memref<32x96xf32, #tpu.memory_space<vmem>>, vector<32x32xf32>
    %c0_7 = arith.constant 0 : index
    %c32 = arith.constant 32 : index
    %5 = vector.load %arg4[%c0_7, %c32] : memref<32x96xf32, #tpu.memory_space<vmem>>, vector<32x32xf32>
    %c0_8 = arith.constant 0 : index
    %c64 = arith.constant 64 : index
    %6 = vector.load %arg4[%c0_8, %c64] : memref<32x96xf32, #tpu.memory_space<vmem>>, vector<32x32xf32>
    %cst = arith.constant dense<0.000000e+00> : vector<8x32xf32>
    %7 = tpu.matmul %1, %4, %cst {dimension_numbers = #tpu.dot_dimension_numbers<[1], [0], [0], [1], [0, 0, 1, 1], [], []>} : vector<8x32xf32>, vector<32x32xf32>, vector<8x32xf32> -> vector<8x32xf32>
    %c0_9 = arith.constant 0 : index
    %c0_10 = arith.constant 0 : index
    %8 = vector.load %arg5[%c0_9, %c0_10] : memref<1x96xf32, #tpu.memory_space<vmem>>, vector<1x32xf32>
    %9 = vector.broadcast %8 : vector<1x32xf32> to vector<8x32xf32>
    %10 = arith.addf %7, %9 : vector<8x32xf32>
    %cst_11 = arith.constant dense<0.000000e+00> : vector<16x32xf32>
    %11 = tpu.matmul %3, %5, %cst_11 {dimension_numbers = #tpu.dot_dimension_numbers<[1], [0], [0], [1], [0, 0, 1, 1], [], []>} : vector<16x32xf32>, vector<32x32xf32>, vector<16x32xf32> -> vector<16x32xf32>
    %c0_12 = arith.constant 0 : index
    %c32_13 = arith.constant 32 : index
    %12 = vector.load %arg5[%c0_12, %c32_13] : memref<1x96xf32, #tpu.memory_space<vmem>>, vector<1x32xf32>
    %13 = vector.broadcast %12 : vector<1x32xf32> to vector<16x32xf32>
    %14 = arith.addf %11, %13 : vector<16x32xf32>
    %cst_14 = arith.constant dense<0.000000e+00> : vector<16x32xf32>
    %15 = tpu.matmul %3, %6, %cst_14 {dimension_numbers = #tpu.dot_dimension_numbers<[1], [0], [0], [1], [0, 0, 1, 1], [], []>} : vector<16x32xf32>, vector<32x32xf32>, vector<16x32xf32> -> vector<16x32xf32>
    %c0_15 = arith.constant 0 : index
    %c64_16 = arith.constant 64 : index
    %16 = vector.load %arg5[%c0_15, %c64_16] : memref<1x96xf32, #tpu.memory_space<vmem>>, vector<1x32xf32>
    %17 = vector.broadcast %16 : vector<1x32xf32> to vector<16x32xf32>
    %18 = arith.addf %15, %17 : vector<16x32xf32>
    %19 = vector.extract_strided_slice %10 {offsets = [0, 0], sizes = [8, 4], strides = [1, 1]} : vector<8x32xf32> to vector<8x4xf32>
    %20 = vector.extract_strided_slice %14 {offsets = [0, 0], sizes = [16, 4], strides = [1, 1]} : vector<16x32xf32> to vector<16x4xf32>
    %21 = vector.extract_strided_slice %18 {offsets = [0, 0], sizes = [16, 4], strides = [1, 1]} : vector<16x32xf32> to vector<16x4xf32>
    %cst_17 = arith.constant dense<0.000000e+00> : vector<8x16xf32>
    %22 = tpu.matmul %19, %20, %cst_17 {dimension_numbers = #tpu.dot_dimension_numbers<[1], [1], [0], [0], [0, 0, 1, 0], [], []>} : vector<8x4xf32>, vector<16x4xf32>, vector<8x16xf32> -> vector<8x16xf32>
    %cst_18 = arith.constant dense<0xFF800000> : vector<8xf32>
    %23 = vector.multi_reduction <maximumf>, %22, %cst_18 [1] : vector<8x16xf32> to vector<8xf32>
    %24 = vector.shape_cast %23 : vector<8xf32> to vector<8x1xf32>
    %25 = vector.broadcast %24 : vector<8x1xf32> to vector<8x16xf32>
    %26 = arith.subf %22, %25 : vector<8x16xf32>
    %27 = math.exp %26 : vector<8x16xf32>
    %cst_19 = arith.constant dense<0.000000e+00> : vector<8xf32>
    %28 = vector.multi_reduction <add>, %27, %cst_19 [1] : vector<8x16xf32> to vector<8xf32>
    %29 = vector.shape_cast %28 : vector<8xf32> to vector<8x1xf32>
    %30 = tpu.reciprocal %29 {approx = true} : vector<8x1xf32> -> vector<8x1xf32>
    %31 = vector.broadcast %30 : vector<8x1xf32> to vector<8x16xf32>
    %32 = arith.mulf %27, %31 : vector<8x16xf32>
    %cst_20 = arith.constant dense<0.000000e+00> : vector<8x4xf32>
    %33 = tpu.matmul %32, %21, %cst_20 {dimension_numbers = #tpu.dot_dimension_numbers<[1], [0], [0], [1], [0, 0, 1, 1], [], []>} : vector<8x16xf32>, vector<16x4xf32>, vector<8x4xf32> -> vector<8x4xf32>
    %34 = vector.extract_strided_slice %10 {offsets = [0, 4], sizes = [8, 4], strides = [1, 1]} : vector<8x32xf32> to vector<8x4xf32>
    %35 = vector.extract_strided_slice %14 {offsets = [0, 4], sizes = [16, 4], strides = [1, 1]} : vector<16x32xf32> to vector<16x4xf32>
    %36 = vector.extract_strided_slice %18 {offsets = [0, 4], sizes = [16, 4], strides = [1, 1]} : vector<16x32xf32> to vector<16x4xf32>
    %cst_21 = arith.constant dense<0.000000e+00> : vector<8x16xf32>
    %37 = tpu.matmul %34, %35, %cst_21 {dimension_numbers = #tpu.dot_dimension_numbers<[1], [1], [0], [0], [0, 0, 1, 0], [], []>} : vector<8x4xf32>, vector<16x4xf32>, vector<8x16xf32> -> vector<8x16xf32>
    %cst_22 = arith.constant dense<0xFF800000> : vector<8xf32>
    %38 = vector.multi_reduction <maximumf>, %37, %cst_22 [1] : vector<8x16xf32> to vector<8xf32>
    %39 = vector.shape_cast %38 : vector<8xf32> to vector<8x1xf32>
    %40 = vector.broadcast %39 : vector<8x1xf32> to vector<8x16xf32>
    %41 = arith.subf %37, %40 : vector<8x16xf32>
    %42 = math.exp %41 : vector<8x16xf32>
    %cst_23 = arith.constant dense<0.000000e+00> : vector<8xf32>
    %43 = vector.multi_reduction <add>, %42, %cst_23 [1] : vector<8x16xf32> to vector<8xf32>
    %44 = vector.shape_cast %43 : vector<8xf32> to vector<8x1xf32>
    %45 = tpu.reciprocal %44 {approx = true} : vector<8x1xf32> -> vector<8x1xf32>
    %46 = vector.broadcast %45 : vector<8x1xf32> to vector<8x16xf32>
    %47 = arith.mulf %42, %46 : vector<8x16xf32>
    %cst_24 = arith.constant dense<0.000000e+00> : vector<8x4xf32>
    %48 = tpu.matmul %47, %36, %cst_24 {dimension_numbers = #tpu.dot_dimension_numbers<[1], [0], [0], [1], [0, 0, 1, 1], [], []>} : vector<8x16xf32>, vector<16x4xf32>, vector<8x4xf32> -> vector<8x4xf32>
    %49 = vector.extract_strided_slice %10 {offsets = [0, 8], sizes = [8, 4], strides = [1, 1]} : vector<8x32xf32> to vector<8x4xf32>
    %50 = vector.extract_strided_slice %14 {offsets = [0, 8], sizes = [16, 4], strides = [1, 1]} : vector<16x32xf32> to vector<16x4xf32>
    %51 = vector.extract_strided_slice %18 {offsets = [0, 8], sizes = [16, 4], strides = [1, 1]} : vector<16x32xf32> to vector<16x4xf32>
    %cst_25 = arith.constant dense<0.000000e+00> : vector<8x16xf32>
    %52 = tpu.matmul %49, %50, %cst_25 {dimension_numbers = #tpu.dot_dimension_numbers<[1], [1], [0], [0], [0, 0, 1, 0], [], []>} : vector<8x4xf32>, vector<16x4xf32>, vector<8x16xf32> -> vector<8x16xf32>
    %cst_26 = arith.constant dense<0xFF800000> : vector<8xf32>
    %53 = vector.multi_reduction <maximumf>, %52, %cst_26 [1] : vector<8x16xf32> to vector<8xf32>
    %54 = vector.shape_cast %53 : vector<8xf32> to vector<8x1xf32>
    %55 = vector.broadcast %54 : vector<8x1xf32> to vector<8x16xf32>
    %56 = arith.subf %52, %55 : vector<8x16xf32>
    %57 = math.exp %56 : vector<8x16xf32>
    %cst_27 = arith.constant dense<0.000000e+00> : vector<8xf32>
    %58 = vector.multi_reduction <add>, %57, %cst_27 [1] : vector<8x16xf32> to vector<8xf32>
    %59 = vector.shape_cast %58 : vector<8xf32> to vector<8x1xf32>
    %60 = tpu.reciprocal %59 {approx = true} : vector<8x1xf32> -> vector<8x1xf32>
    %61 = vector.broadcast %60 : vector<8x1xf32> to vector<8x16xf32>
    %62 = arith.mulf %57, %61 : vector<8x16xf32>
    %cst_28 = arith.constant dense<0.000000e+00> : vector<8x4xf32>
    %63 = tpu.matmul %62, %51, %cst_28 {dimension_numbers = #tpu.dot_dimension_numbers<[1], [0], [0], [1], [0, 0, 1, 1], [], []>} : vector<8x16xf32>, vector<16x4xf32>, vector<8x4xf32> -> vector<8x4xf32>
    %64 = vector.extract_strided_slice %10 {offsets = [0, 12], sizes = [8, 4], strides = [1, 1]} : vector<8x32xf32> to vector<8x4xf32>
    %65 = vector.extract_strided_slice %14 {offsets = [0, 12], sizes = [16, 4], strides = [1, 1]} : vector<16x32xf32> to vector<16x4xf32>
    %66 = vector.extract_strided_slice %18 {offsets = [0, 12], sizes = [16, 4], strides = [1, 1]} : vector<16x32xf32> to vector<16x4xf32>
    %cst_29 = arith.constant dense<0.000000e+00> : vector<8x16xf32>
    %67 = tpu.matmul %64, %65, %cst_29 {dimension_numbers = #tpu.dot_dimension_numbers<[1], [1], [0], [0], [0, 0, 1, 0], [], []>} : vector<8x4xf32>, vector<16x4xf32>, vector<8x16xf32> -> vector<8x16xf32>
    %cst_30 = arith.constant dense<0xFF800000> : vector<8xf32>
    %68 = vector.multi_reduction <maximumf>, %67, %cst_30 [1] : vector<8x16xf32> to vector<8xf32>
    %69 = vector.shape_cast %68 : vector<8xf32> to vector<8x1xf32>
    %70 = vector.broadcast %69 : vector<8x1xf32> to vector<8x16xf32>
    %71 = arith.subf %67, %70 : vector<8x16xf32>
    %72 = math.exp %71 : vector<8x16xf32>
    %cst_31 = arith.constant dense<0.000000e+00> : vector<8xf32>
    %73 = vector.multi_reduction <add>, %72, %cst_31 [1] : vector<8x16xf32> to vector<8xf32>
    %74 = vector.shape_cast %73 : vector<8xf32> to vector<8x1xf32>
    %75 = tpu.reciprocal %74 {approx = true} : vector<8x1xf32> -> vector<8x1xf32>
    %76 = vector.broadcast %75 : vector<8x1xf32> to vector<8x16xf32>
    %77 = arith.mulf %72, %76 : vector<8x16xf32>
    %cst_32 = arith.constant dense<0.000000e+00> : vector<8x4xf32>
    %78 = tpu.matmul %77, %66, %cst_32 {dimension_numbers = #tpu.dot_dimension_numbers<[1], [0], [0], [1], [0, 0, 1, 1], [], []>} : vector<8x16xf32>, vector<16x4xf32>, vector<8x4xf32> -> vector<8x4xf32>
    %79 = vector.extract_strided_slice %10 {offsets = [0, 16], sizes = [8, 4], strides = [1, 1]} : vector<8x32xf32> to vector<8x4xf32>
    %80 = vector.extract_strided_slice %14 {offsets = [0, 16], sizes = [16, 4], strides = [1, 1]} : vector<16x32xf32> to vector<16x4xf32>
    %81 = vector.extract_strided_slice %18 {offsets = [0, 16], sizes = [16, 4], strides = [1, 1]} : vector<16x32xf32> to vector<16x4xf32>
    %cst_33 = arith.constant dense<0.000000e+00> : vector<8x16xf32>
    %82 = tpu.matmul %79, %80, %cst_33 {dimension_numbers = #tpu.dot_dimension_numbers<[1], [1], [0], [0], [0, 0, 1, 0], [], []>} : vector<8x4xf32>, vector<16x4xf32>, vector<8x16xf32> -> vector<8x16xf32>
    %cst_34 = arith.constant dense<0xFF800000> : vector<8xf32>
    %83 = vector.multi_reduction <maximumf>, %82, %cst_34 [1] : vector<8x16xf32> to vector<8xf32>
    %84 = vector.shape_cast %83 : vector<8xf32> to vector<8x1xf32>
    %85 = vector.broadcast %84 : vector<8x1xf32> to vector<8x16xf32>
    %86 = arith.subf %82, %85 : vector<8x16xf32>
    %87 = math.exp %86 : vector<8x16xf32>
    %cst_35 = arith.constant dense<0.000000e+00> : vector<8xf32>
    %88 = vector.multi_reduction <add>, %87, %cst_35 [1] : vector<8x16xf32> to vector<8xf32>
    %89 = vector.shape_cast %88 : vector<8xf32> to vector<8x1xf32>
    %90 = tpu.reciprocal %89 {approx = true} : vector<8x1xf32> -> vector<8x1xf32>
    %91 = vector.broadcast %90 : vector<8x1xf32> to vector<8x16xf32>
    %92 = arith.mulf %87, %91 : vector<8x16xf32>
    %cst_36 = arith.constant dense<0.000000e+00> : vector<8x4xf32>
    %93 = tpu.matmul %92, %81, %cst_36 {dimension_numbers = #tpu.dot_dimension_numbers<[1], [0], [0], [1], [0, 0, 1, 1], [], []>} : vector<8x16xf32>, vector<16x4xf32>, vector<8x4xf32> -> vector<8x4xf32>
    %94 = vector.extract_strided_slice %10 {offsets = [0, 20], sizes = [8, 4], strides = [1, 1]} : vector<8x32xf32> to vector<8x4xf32>
    %95 = vector.extract_strided_slice %14 {offsets = [0, 20], sizes = [16, 4], strides = [1, 1]} : vector<16x32xf32> to vector<16x4xf32>
    %96 = vector.extract_strided_slice %18 {offsets = [0, 20], sizes = [16, 4], strides = [1, 1]} : vector<16x32xf32> to vector<16x4xf32>
    %cst_37 = arith.constant dense<0.000000e+00> : vector<8x16xf32>
    %97 = tpu.matmul %94, %95, %cst_37 {dimension_numbers = #tpu.dot_dimension_numbers<[1], [1], [0], [0], [0, 0, 1, 0], [], []>} : vector<8x4xf32>, vector<16x4xf32>, vector<8x16xf32> -> vector<8x16xf32>
    %cst_38 = arith.constant dense<0xFF800000> : vector<8xf32>
    %98 = vector.multi_reduction <maximumf>, %97, %cst_38 [1] : vector<8x16xf32> to vector<8xf32>
    %99 = vector.shape_cast %98 : vector<8xf32> to vector<8x1xf32>
    %100 = vector.broadcast %99 : vector<8x1xf32> to vector<8x16xf32>
    %101 = arith.subf %97, %100 : vector<8x16xf32>
    %102 = math.exp %101 : vector<8x16xf32>
    %cst_39 = arith.constant dense<0.000000e+00> : vector<8xf32>
    %103 = vector.multi_reduction <add>, %102, %cst_39 [1] : vector<8x16xf32> to vector<8xf32>
    %104 = vector.shape_cast %103 : vector<8xf32> to vector<8x1xf32>
    %105 = tpu.reciprocal %104 {approx = true} : vector<8x1xf32> -> vector<8x1xf32>
    %106 = vector.broadcast %105 : vector<8x1xf32> to vector<8x16xf32>
    %107 = arith.mulf %102, %106 : vector<8x16xf32>
    %cst_40 = arith.constant dense<0.000000e+00> : vector<8x4xf32>
    %108 = tpu.matmul %107, %96, %cst_40 {dimension_numbers = #tpu.dot_dimension_numbers<[1], [0], [0], [1], [0, 0, 1, 1], [], []>} : vector<8x16xf32>, vector<16x4xf32>, vector<8x4xf32> -> vector<8x4xf32>
    %109 = vector.extract_strided_slice %10 {offsets = [0, 24], sizes = [8, 4], strides = [1, 1]} : vector<8x32xf32> to vector<8x4xf32>
    %110 = vector.extract_strided_slice %14 {offsets = [0, 24], sizes = [16, 4], strides = [1, 1]} : vector<16x32xf32> to vector<16x4xf32>
    %111 = vector.extract_strided_slice %18 {offsets = [0, 24], sizes = [16, 4], strides = [1, 1]} : vector<16x32xf32> to vector<16x4xf32>
    %cst_41 = arith.constant dense<0.000000e+00> : vector<8x16xf32>
    %112 = tpu.matmul %109, %110, %cst_41 {dimension_numbers = #tpu.dot_dimension_numbers<[1], [1], [0], [0], [0, 0, 1, 0], [], []>} : vector<8x4xf32>, vector<16x4xf32>, vector<8x16xf32> -> vector<8x16xf32>
    %cst_42 = arith.constant dense<0xFF800000> : vector<8xf32>
    %113 = vector.multi_reduction <maximumf>, %112, %cst_42 [1] : vector<8x16xf32> to vector<8xf32>
    %114 = vector.shape_cast %113 : vector<8xf32> to vector<8x1xf32>
    %115 = vector.broadcast %114 : vector<8x1xf32> to vector<8x16xf32>
    %116 = arith.subf %112, %115 : vector<8x16xf32>
    %117 = math.exp %116 : vector<8x16xf32>
    %cst_43 = arith.constant dense<0.000000e+00> : vector<8xf32>
    %118 = vector.multi_reduction <add>, %117, %cst_43 [1] : vector<8x16xf32> to vector<8xf32>
    %119 = vector.shape_cast %118 : vector<8xf32> to vector<8x1xf32>
    %120 = tpu.reciprocal %119 {approx = true} : vector<8x1xf32> -> vector<8x1xf32>
    %121 = vector.broadcast %120 : vector<8x1xf32> to vector<8x16xf32>
    %122 = arith.mulf %117, %121 : vector<8x16xf32>
    %cst_44 = arith.constant dense<0.000000e+00> : vector<8x4xf32>
    %123 = tpu.matmul %122, %111, %cst_44 {dimension_numbers = #tpu.dot_dimension_numbers<[1], [0], [0], [1], [0, 0, 1, 1], [], []>} : vector<8x16xf32>, vector<16x4xf32>, vector<8x4xf32> -> vector<8x4xf32>
    %124 = vector.extract_strided_slice %10 {offsets = [0, 28], sizes = [8, 4], strides = [1, 1]} : vector<8x32xf32> to vector<8x4xf32>
    %125 = vector.extract_strided_slice %14 {offsets = [0, 28], sizes = [16, 4], strides = [1, 1]} : vector<16x32xf32> to vector<16x4xf32>
    %126 = vector.extract_strided_slice %18 {offsets = [0, 28], sizes = [16, 4], strides = [1, 1]} : vector<16x32xf32> to vector<16x4xf32>
    %cst_45 = arith.constant dense<0.000000e+00> : vector<8x16xf32>
    %127 = tpu.matmul %124, %125, %cst_45 {dimension_numbers = #tpu.dot_dimension_numbers<[1], [1], [0], [0], [0, 0, 1, 0], [], []>} : vector<8x4xf32>, vector<16x4xf32>, vector<8x16xf32> -> vector<8x16xf32>
    %cst_46 = arith.constant dense<0xFF800000> : vector<8xf32>
    %128 = vector.multi_reduction <maximumf>, %127, %cst_46 [1] : vector<8x16xf32> to vector<8xf32>
    %129 = vector.shape_cast %128 : vector<8xf32> to vector<8x1xf32>
    %130 = vector.broadcast %129 : vector<8x1xf32> to vector<8x16xf32>
    %131 = arith.subf %127, %130 : vector<8x16xf32>
    %132 = math.exp %131 : vector<8x16xf32>
    %cst_47 = arith.constant dense<0.000000e+00> : vector<8xf32>
    %133 = vector.multi_reduction <add>, %132, %cst_47 [1] : vector<8x16xf32> to vector<8xf32>
    %134 = vector.shape_cast %133 : vector<8xf32> to vector<8x1xf32>
    %135 = tpu.reciprocal %134 {approx = true} : vector<8x1xf32> -> vector<8x1xf32>
    %136 = vector.broadcast %135 : vector<8x1xf32> to vector<8x16xf32>
    %137 = arith.mulf %132, %136 : vector<8x16xf32>
    %cst_48 = arith.constant dense<0.000000e+00> : vector<8x4xf32>
    %138 = tpu.matmul %137, %126, %cst_48 {dimension_numbers = #tpu.dot_dimension_numbers<[1], [0], [0], [1], [0, 0, 1, 1], [], []>} : vector<8x16xf32>, vector<16x4xf32>, vector<8x4xf32> -> vector<8x4xf32>
    %139 = tpu.concatenate %33, %48, %63, %78, %93, %108, %123, %138 in 1 : vector<8x4xf32>, vector<8x4xf32>, vector<8x4xf32>, vector<8x4xf32>, vector<8x4xf32>, vector<8x4xf32>, vector<8x4xf32>, vector<8x4xf32> -> vector<8x32xf32>
    %c0_49 = arith.constant 0 : index
    %c0_50 = arith.constant 0 : index
    %140 = vector.load %arg6[%c0_49, %c0_50] : memref<32x32xf32, #tpu.memory_space<vmem>>, vector<32x32xf32>
    %cst_51 = arith.constant dense<0.000000e+00> : vector<8x32xf32>
    %141 = tpu.matmul %139, %140, %cst_51 {dimension_numbers = #tpu.dot_dimension_numbers<[1], [0], [0], [1], [0, 0, 1, 1], [], []>} : vector<8x32xf32>, vector<32x32xf32>, vector<8x32xf32> -> vector<8x32xf32>
    %c0_52 = arith.constant 0 : index
    %c0_53 = arith.constant 0 : index
    %142 = vector.load %arg7[%c0_52, %c0_53] : memref<1x32xf32, #tpu.memory_space<vmem>>, vector<1x32xf32>
    %143 = vector.broadcast %142 : vector<1x32xf32> to vector<8x32xf32>
    %144 = arith.addf %141, %143 : vector<8x32xf32>
    %c0_54 = arith.constant 0 : index
    %c0_55 = arith.constant 0 : index
    %c0_56 = arith.constant 0 : index
    %145 = vector.load %arg8[%c0_54, %c0_55, %c0_56] : memref<1x8x32xf32, #tpu.memory_space<vmem>>, vector<1x8x32xf32>
    %146 = vector.shape_cast %145 : vector<1x8x32xf32> to vector<8x32xf32>
    %147 = vector.shape_cast %144 : vector<8x32xf32> to vector<1x8x32xf32>
    tpu.vector_store %arg8[%c0_54, %c0_55, %c0_56], %147 {strides = array<i32>} : memref<1x8x32xf32, #tpu.memory_space<vmem>>, vector<1x8x32xf32>,
    return
  }
  func.func @transform_0(%arg0: i32, %arg1: i32) -> (i32, i32, i32) {
    %c0_i32 = arith.constant 0 : i32
    %c0_i32_0 = arith.constant 0 : i32
    return %arg0, %arg1, %c0_i32 : i32, i32, i32
  }
  func.func @transform_1(%arg0: i32, %arg1: i32) -> (i32, i32, i32) {
    %c0_i32 = arith.constant 0 : i32
    %c0_i32_0 = arith.constant 0 : i32
    %c0_i32_1 = arith.constant 0 : i32
    return %arg0, %c0_i32, %c0_i32_0 : i32, i32, i32
  }
  func.func @transform_2(%arg0: i32, %arg1: i32) -> (i32, i32) {
    %c0_i32 = arith.constant 0 : i32
    %c0_i32_0 = arith.constant 0 : i32
    %c0_i32_1 = arith.constant 0 : i32
    return %c0_i32, %c0_i32_0 : i32, i32
  }
  func.func @transform_3(%arg0: i32, %arg1: i32) -> (i32, i32) {
    %c0_i32 = arith.constant 0 : i32
    %c0_i32_0 = arith.constant 0 : i32
    %c0_i32_1 = arith.constant 0 : i32
    return %c0_i32, %c0_i32_0 : i32, i32
  }
  func.func @transform_4(%arg0: i32, %arg1: i32) -> (i32, i32) {
    %c0_i32 = arith.constant 0 : i32
    %c0_i32_0 = arith.constant 0 : i32
    %c0_i32_1 = arith.constant 0 : i32
    return %c0_i32, %c0_i32_0 : i32, i32
  }
  func.func @transform_5(%arg0: i32, %arg1: i32) -> (i32, i32) {
    %c0_i32 = arith.constant 0 : i32
    %c0_i32_0 = arith.constant 0 : i32
    %c0_i32_1 = arith.constant 0 : i32
    return %c0_i32, %c0_i32_0 : i32, i32
  }
  func.func @transform_6(%arg0: i32, %arg1: i32) -> (i32, i32, i32) {
    %c0_i32 = arith.constant 0 : i32
    %c0_i32_0 = arith.constant 0 : i32
    return %arg0, %arg1, %c0_i32 : i32, i32, i32
  }
}

</mosaic_0001>

<bundles_post_ra>
// kernel: tpu_custom_call.1
= control target key start
LH: loop header
LB: loop body
LE: loop exit
PB: predicated region body
PF: predicated region fallthrough
CT: control target
= control target key end

     0   :  { %s5887_s0 = inlined_call_operand.hbm [shape: f32[2,16,32], index: 0, kind: input, shape index: {}]   ;;  %s5888_s1 = inlined_call_operand.hbm [shape: f32[2,16,32], index: 1, kind: input, shape index: {}]   ;;  %s5889_s2 = inlined_call_operand.hbm [shape: f32[32,96], index: 2, kind: input, shape index: {}]   ;;  %s5890_s3 = inlined_call_operand.vmem [shape: f32[1,96], index: 3, kind: input, shape index: {}]   ;;  %s5891_s4 = inlined_call_operand.hbm [shape: f32[32,32], index: 4, kind: input, shape index: {}]   ;;  %s5892_s5 = inlined_call_operand.vmem [shape: f32[1,32], index: 5, kind: input, shape index: {}]   ;;  %s5893_s6 = inlined_call_operand.hbm [shape: f32[2,16,32], index: 6, kind: output, shape index: {}]  }
   0x1   :  { %5905 = sst [smem:[#allocation22_spill]] %s5889_s2 }
   0x2   :  { %5906 = sst [smem:[#allocation23_spill]] %s5891_s4 }
   0x3   :  { %5907 = sst [smem:[#allocation24_spill]] %s5892_s5 }
   0x4   :  { %5908 = sst [smem:[#allocation25_spill]] %s5893_s6 }
   0x5   :  { %11 = vsyncpa [#allocation3], 0 }
   0x6   :  { %13 = vsyncpa [#allocation3 + $0x1], 0 }
   0x7   :  { %14 = vsyncpa [#allocation6], 0 }
   0x8   :  { %16 = vsyncpa [#allocation6 + $0x1], 0 }
   0x9   :  { %17 = vsyncpa [#allocation9], 0 }
   0xa   :  { %18 = vsyncpa [#allocation4], 0 }
   0xb   :  { %20 = vsyncpa [#allocation4 + $0x1], 0  ;;  %s4888_s21 = smov 0   ;;  %s4890_s22 = smov 0  }
   0xc   :  { %s4892_s23 = smov 0   ;;  %s4894_s24 = smov 0  }
   0xd   :  { %s4896_s25 = smov 0   ;;  %s4898_s26 = smov 0  }
   0xe   :  { %s4900_s27 = smov 0   ;;  %s4902_s28 = smov 0  }
   0xf   :  { %s4904_s29 = smov 0   ;;  %s4906_s30 = smov 0  }
  0x10   :  { %s4908_s7 = smov 0  }
  0x11 LB: > { %5909 = sst [smem:[#allocation16_spill]] %s4807_s27  ;;  %s4942_s8 = sadd.s32 4294967295, %s4823_s7   ;;  %s4823_s7 = sphi %s4908_s7, %s26_s7   ;;  %s4819_s30 = sphi %s4906_s30, %s5956_s30   ;;  %s4815_s29 = sphi %s4904_s29, %s5947_s29   ;;  %s4811_s28 = sphi %s4902_s28, %s5955_s28   ;;  %s4807_s27 = sphi %s4900_s27, %s5946_s27   ;;  %s4803_s26 = sphi %s4898_s26, %s5954_s26   ;;  %s4799_s25 = sphi %s4896_s25, %s5953_s25   ;;  %s4795_s24 = sphi %s4894_s24, %s5952_s24   ;;  %s4791_s23 = sphi %s4892_s23, %s5951_s23   ;;  %s4787_s22 = sphi %s4890_s22, %s5950_s22   ;;  %s4783_s21 = sphi %s4888_s21, %s5949_s21  }
  0x12   : > { %5910 = sst [smem:[#allocation17_spill]] %s4815_s29  ;;  %p86_p0 = scmp.ne.s32.totalorder %s4787_s22, %s4783_s21 }
  0x13   : > { %p5894_p1 = scmp.eq.s32.totalorder %s4942_s8, 0  ;;  %p3950_p2 = scmp.ge.s32.totalorder %s4823_s7, 1 }
  0x14   : > { %p209_p3 = scmp.lt.s32.totalorder %s4823_s7, 5  ;;  %s4825_s11 = smov [#allocation7]  }
  0x15   : > { %p4950_p4 = por %p86_p0, %p5894_p1  ;;  %s221_s12 = sshll.u32 %s4825_s11, 4  ;;  %s222_s12 = int_to_ptr.vmem [resolvable:$true] %s221_s12 }
  0x16   : > { %p4954_p5 = pnand %p3950_p2, %p209_p3  ;;  %s4826_s14 = smov [#allocation8]  }
  0x17   : > { %s5911_s9 = scalar_select %p4950_p4, 1, 0 }
  0x18   : > { %s5912_s10 = scalar_select %p4954_p5, 1, 0 }
  0x19   : > { %p4384_p6 = pneg %p4954_p5  ;;  %s237_s15 = sshll.u32 %s4826_s14, 4  ;;  %s4966_s15 = int_to_ptr.vmem [resolvable:$true] %s237_s15 }
  0x1a   : > { %s5914_s2 = sld [smem:[#allocation22_spill]] }
  0x1b   : > { %p4962_p7 = pnand %p4384_p6, %p5894_p1 }
  0x1d   : > { %p4575_p9 = pneg %p4962_p7 }
  0x20   : > { %s4573_s18 = scalar_lea.hbm %s5914_s2, 512 }
  0x21   : > { %p4574_p8 = scmp.ne.s32.totalorder %s5914_s2, %s4573_s18  ;;  %p4580_p12 = scmp.lt.u32.totalorder %s4573_s18, %s5914_s2 }
  0x23   : > { %p4576_p10 = pnand %p4575_p9, %p4574_p8 }
  0x25   : > { %p4577_p11 = pneg %p4576_p10 }
  0x27   : > { %p4582_p13 = pnand %p4580_p12, %p4577_p11 }
  0x29   : > { %4585 = shalt.err (!%p4582_p13)
}
  0x2a   : > { %s4586_s14 = scalar_lea.vmem %s222_s12, 512  ;;  %p4594_p6 = scmp.lt.s32.totalorder %s222_s12, %s222_s12 }
  0x2b   : > { %p4587_p0 = scmp.ne.s32.totalorder %s222_s12, %s4586_s14  ;;  %p4595_p1 = scmp.lt.s32.totalorder %s4586_s14, %s4586_s14 }
  0x2d   : > { %p4589_p2 = pnand %p4587_p0, %p4575_p9  ;;  %p4596_p4 = por %p4595_p1, %p4594_p6 }
  0x2f   : > { %p4590_p3 = pneg %p4589_p2 }
  0x31   : > { %p4597_p5 = pnand %p4596_p4, %p4590_p3 }
  0x33   : > { %4600 = shalt.err (!%p4597_p5)
}
  0x34   : > { %s5898_s16 = smov 128   ;;  %s5899_s17 = smov 8  }
  0x35   : > { %4387 = dma.hbm_to_vmem [thread:$0]  (!%p4962_p7), %s5914_s2, 512, %s222_s12, [#allocation6], %s5898_s16, %s5898_s16, %s5899_s17  }
  0x36   : > { %s5915_s4 = sld [smem:[#allocation23_spill]] }
  0x3c   : > { %s4601_s11 = scalar_lea.hbm %s5915_s4, 512 }
  0x3d   : > { %p4602_p1 = scmp.ne.s32.totalorder %s5915_s4, %s4601_s11  ;;  %p4608_p8 = scmp.lt.u32.totalorder %s4601_s11, %s5915_s4 }
  0x3f   : > { %p4604_p4 = pnand %p4602_p1, %p4575_p9 }
  0x41   : > { %p4605_p5 = pneg %p4604_p4 }
  0x43   : > { %p4610_p10 = pnand %p4608_p8, %p4605_p5 }
  0x45   : > { %4613 = shalt.err (!%p4610_p10)
}
  0x46   : > { %s4614_s12 = scalar_lea.vmem %s4966_s15, 512  ;;  %p4622_p0 = scmp.lt.s32.totalorder %s4966_s15, %s4966_s15 }
  0x47   : > { %p4615_p11 = scmp.ne.s32.totalorder %s4966_s15, %s4614_s12  ;;  %p4623_p2 = scmp.lt.s32.totalorder %s4614_s12, %s4614_s12 }
  0x49   : > { %p4617_p12 = pnand %p4615_p11, %p4575_p9  ;;  %p4624_p3 = por %p4623_p2, %p4622_p0 }
  0x4b   : > { %p4618_p13 = pneg %p4617_p12 }
  0x4d   : > { %p4625_p6 = pnand %p4624_p3, %p4618_p13 }
  0x4f   : > { %4628 = shalt.err (!%p4625_p6)
}
  0x50   : > { %4390 = dma.hbm_to_vmem [thread:$0]  (!%p4962_p7), %s5915_s4, 512, %s4966_s15, [#allocation9], %s5898_s16, %s5898_s16, %s5899_s17  }
  0x51   : > { %s3949_s27 = sadd.s32 4294967294, %s4823_s7   ;;  %s35_s13 = sadd.s32 1, %s4815_s29 }
  0x52   : > { %p36_p9 = scmp.ge.s32.totalorder %s35_s13, 2  ;;  %s38_s18 = sadd.s32 1, %s4819_s30 }
  0x53   : > { %s47_s19 = sadd.s32 1, %s4803_s26  ;;  %p54_p1 = scmp.ne.s32.totalorder %s4803_s26, %s4799_s25 }
  0x54   : > { %s5958_s13 = smov (%p36_p9, %s35_s13), 0  ;;  %s5960_s18 = smov (!%p36_p9, %s38_s18), %s4819_s30 }
  0x55   : > { %5916 = sst [smem:[#allocation18_spill]] %s5958_s13  ;;  %s43_s15 = ssub.s32 %s4815_s29, %s5958_s13 }
  0x56   : > { %p55_p7 = scmp.eq.s32.totalorder %s4823_s7, 0  ;;  %p40_p4 = scmp.ge.s32.totalorder %s5960_s18, 2 }
  0x57   : > { %p60_p5 = scmp.ne.s32.totalorder %s4799_s25, %s4795_s24  ;;  %s73_s21 = sadd.s32 1, %s4791_s23 }
  0x58   : > { %p5040_p8 = por %p55_p7, %p54_p1  ;;  %s5962_s18 = smov (%p40_p4, %s5960_s18), 0 }
  0x59   : > { %5918 = sst [smem:[#allocation19_spill]] %s5962_s18  ;;  %p5919_p10 = scmp.eq.s32.totalorder %s4942_s8, 0 }
  0x5a   : > { %p80_p12 = scmp.ne.s32.totalorder %s4791_s23, %s4787_s22  ;;  %s42_s14 = ssub.s32 %s4819_s30, %s5962_s18 }
  0x5b   : > { %p5052_p11 = por %p5919_p10, %p60_p5  ;;  %p196_p13 = scmp.eq.s32.totalorder %s4942_s8, 3 }
  0x5c   : > { %s44_s12 = sor.u32 %s43_s15, %s42_s14  ;;  %p71_p0 = scmp.eq.s32.totalorder %s42_s14, 0 }
  0x5d   : > { %s5920_s11 = scalar_select %p5052_p11, 1, 0 }
  0x5e   : > { %p45_p2 = scmp.eq.s32.totalorder %s44_s12, 0  ;;  %p5063_p3 = por %p80_p12, %p55_p7 }
  0x5f   : > { %s5068_s6 = scalar_select %p71_p0, %s4791_s23, %s73_s21  }
  0x60   : > { %s5071_s16 = scalar_select %p45_p2, %s4803_s26, %s47_s19  }
  0x61   : > { %5922 = sst [smem:[#allocation20_spill]] %s5068_s6  ;;  %p5076_p6 = por %p196_p13, %p54_p1 }
  0x62   : > { %5923 = sst [smem:[#allocation21_spill]] %s5071_s16  ;;  %p202_p9 = scmp.eq.s32.totalorder %s3949_s27, 3 }
  0x63   : > { %s5924_s17 = scalar_select %p5076_p6, 1, 0 }
  0x64   : > { %p4404_p4 = scmp.lt.s32.totalorder %s4823_s7, 4  ;;  %s254_s15 = sand.u32 1, %s4803_s26  }
  0x65   : > { %p5085_p7 = por %p202_p9, %p60_p5  ;;  %s3954_s21 = sshll.u32 %s254_s15, 3 }
  0x66   : > { %s3955_s12 = sshll.u32 %s4819_s30, 1  ;;  %s258_s4 = scalar_lea.vmem [#allocation2], %s3954_s21 }
  0x67   : > { %s5925_s14 = scalar_select %p5085_p7, 1, 0 }
  0x68   : > { %s263_s2 = sadd.s32 %s4815_s29, %s3955_s12  ;;  %s267_s18 = sshll.u32 %s258_s4, 4  ;;  %s5096_s18 = int_to_ptr.vmem [resolvable:$true] %s267_s18 }
  0x69   : > { %s3956_s19 = sshll.u32 %s263_s2, 7  ;;  %p5100_p1 = pnand %p4404_p4, %p5040_p8 }
  0x6a   : > { %s5094_s6 = scalar_lea.hbm %s5887_s0, %s3956_s19  ;;  %p5106_p5 = pnand %p4404_p4, %p5063_p3 }
  0x6b   : > { %s274_s4 = sand.u32 1, %s4823_s7   ;;  %s276_s16 = sand.u32 1, %s4791_s23  }
  0x6c   : > { %s255_s13 = scalar_lea.sflag [#allocation3], %s254_s15  ;;  %s4629_s21 = scalar_lea.hbm %s5094_s6, 128 }
  0x6d   : > { %p4630_p10 = scmp.ne.s32.totalorder %s5094_s6, %s4629_s21  ;;  %p4631_p12 = pneg %p5100_p1 }
  0x6e   : > { %s4634_s5 = scalar_lea.hbm %s5887_s0, 512  ;;  %p4635_p0 = scmp.lt.u32.totalorder %s5094_s6, %s5887_s0 }
  0x6f   : > { %p4632_p8 = pnand %p4631_p12, %p4630_p10  ;;  %p4636_p2 = scmp.lt.u32.totalorder %s4634_s5, %s4629_s21 }
  0x70   : > { %p4638_p9 = scmp.lt.u32.totalorder %s4629_s21, %s5094_s6 }
  0x71   : > { %p4633_p13 = pneg %p4632_p8  ;;  %p4637_p3 = por %p4636_p2, %p4635_p0 }
  0x73   : > { %p4639_p4 = por %p4638_p9, %p4637_p3 }
  0x75   : > { %p4640_p7 = pnand %p4639_p4, %p4633_p13 }
  0x77   : > { %4643 = shalt.err (!%p4640_p7)
}
  0x78   : > { %s4644_s15 = scalar_lea.vmem %s5096_s18, 128  ;;  %s4829_s20 = smov [#allocation2]  }
  0x79   : > { %p4645_p10 = scmp.ne.s32.totalorder %s5096_s18, %s4644_s15  ;;  %s4649_s12 = sshll.u32 %s4829_s20, 4  ;;  %s4650_s12 = int_to_ptr.vmem [resolvable:$false] %s4649_s12 }
  0x7a   : > { %s4651_s29 = scalar_lea.vmem %s4650_s12, 256  ;;  %p4652_p11 = scmp.lt.s32.totalorder %s5096_s18, %s4650_s12 }
  0x7b   : > { %p4647_p8 = pnand %p4645_p10, %p4631_p12  ;;  %p4653_p0 = scmp.lt.s32.totalorder %s4651_s29, %s4644_s15 }
  0x7d   : > { %p4648_p6 = pneg %p4647_p8  ;;  %p4654_p2 = por %p4653_p0, %p4652_p11 }
  0x7f   : > { %p4655_p3 = pnand %p4654_p2, %p4648_p6 }
  0x81   : > { %4658 = shalt.err (!%p4655_p3)
}
  0x82   : > { %4394 = dma.hbm_to_vmem [thread:$0]  (!%p5100_p1), %s5094_s6, 128, %s5096_s18, %s255_s13  }
  0x83   : > { %s3957_s21 = sshll.u32 %s276_s16, 4  ;;  %s4059_s5 = sshll.u32 %s4819_s30, 8 }
  0x84   : > { %s5143_s15 = scalar_lea.hbm %s5888_s1, %s4059_s5  ;;  %s278_s27 = scalar_lea.vmem [#allocation5], %s3957_s21 }
  0x85   : > { %s285_s12 = sshll.u32 %s278_s27, 4  ;;  %s5149_s29 = scalar_lea.sflag [#allocation6], %s274_s4  ;;  %s5145_s12 = int_to_ptr.vmem [resolvable:$true] %s285_s12 }
  0x86   : > { %s4659_s18 = scalar_lea.hbm %s5143_s15, 256  ;;  %p4661_p6 = pneg %p5106_p5 }
  0x87   : > { %p4660_p11 = scmp.ne.s32.totalorder %s5143_s15, %s4659_s18  ;;  %s4664_s13 = scalar_lea.hbm %s5888_s1, 512 }
  0x88   : > { %p4665_p12 = scmp.lt.u32.totalorder %s5143_s15, %s5888_s1  ;;  %p4666_p13 = scmp.lt.u32.totalorder %s4664_s13, %s4659_s18 }
  0x89   : > { %p4662_p7 = pnand %p4661_p6, %p4660_p11  ;;  %p4668_p4 = scmp.lt.u32.totalorder %s4659_s18, %s5143_s15 }
  0x8a   : > { %p4667_p9 = por %p4666_p13, %p4665_p12 }
  0x8b   : > { %p4663_p1 = pneg %p4662_p7 }
  0x8c   : > { %p4669_p10 = por %p4668_p4, %p4667_p9 }
  0x8e   : > { %p4670_p8 = pnand %p4669_p10, %p4663_p1 }
  0x90   : > { %4673 = shalt.err (!%p4670_p8)
}
  0x91   : > { %s4674_s4 = scalar_lea.vmem %s5145_s12, 256  ;;  %s4830_s19 = smov [#allocation5]  }
  0x92   : > { %p4675_p0 = scmp.ne.s32.totalorder %s5145_s12, %s4674_s4  ;;  %s4679_s20 = sshll.u32 %s4830_s19, 4  ;;  %s4680_s20 = int_to_ptr.vmem [resolvable:$false] %s4679_s20 }
  0x93   : > { %s4681_s27 = scalar_lea.vmem %s4680_s20, 512  ;;  %p4682_p11 = scmp.lt.s32.totalorder %s5145_s12, %s4680_s20 }
  0x94   : > { %p4677_p2 = pnand %p4675_p0, %p4661_p6  ;;  %p4683_p7 = scmp.lt.s32.totalorder %s4681_s27, %s4674_s4 }
  0x96   : > { %p4678_p3 = pneg %p4677_p2  ;;  %p4684_p12 = por %p4683_p7, %p4682_p11 }
  0x98   : > { %p4685_p13 = pnand %p4684_p12, %p4678_p3 }
  0x9a   : > { %4688 = shalt.err (!%p4685_p13)
}
  0x9b   : > { %s5928_s18 = smov 8   ;;  %s5929_s6 = smov 128  }
  0x9c   : > { %4397 = dma.hbm_to_vmem [thread:$0]  (!%p5106_p5), %s5143_s15, 256, %s5145_s12, %s5149_s29, %s5929_s6, %s5929_s6, %s5928_s18  }
  0x9d   : > { %p5930_p6 = scmp.ne.s32.totalorder %s5912_s10, 0 }
  0x9e   : > { %s5183_s16 = sand.u32 (!%p5930_p6), 1, %s4799_s25   ;;  %p5931_p1 = scmp.ne.s32.totalorder (!%p5930_p6), %s5920_s11, 0 }
  0x9f   : > { %297 = sbr.rel (%p5930_p6) target bundleno = 1858 (0x742), region = 44  ;;  %s3961_s13 = sshll.u32 (!%p5930_p6), %s5183_s16, 3 }
  0xa0   : > { %s300_s5 = scalar_lea.sflag (!%p5930_p6), [#allocation3], %s5183_s16  ;;  %s5189_s2 = scalar_lea.vmem (!%p5930_p6), [#allocation2], %s3961_s13 }
  0xa6   : > { %4762 = dma.done.wait (%p5931_p1), %s300_s5, 128  }
  0xa7   : > { %4764 = vsyncadd (%p5931_p1), %s300_s5, 4294967168  ;;  %s308_s10 = sand.u32 1, %s4942_s8   ;;  %s310_s15 = sand.u32 1, %s4787_s22  }
  0xa8   : > { %s5197_s12 = sshll.u32 %s310_s15, 4  ;;  %s309_s29 = scalar_lea.sflag [#allocation6], %s308_s10 }
  0xa9   : > { %s312_s21 = scalar_lea.vmem [#allocation5], %s5197_s12  ;;  %p5932_p5 = scmp.ne.s32.totalorder %s5911_s9, 0 }
  0xab   : > { %4766 = dma.done.wait (%p5932_p5), %s309_s29, 256  }
  0xac   : > { %4768 = vsyncadd (%p5932_p5), %s309_s29, 4294967040  ;;  %p5933_p9 = scmp.eq.s32.totalorder %s4942_s8, 0 }
  0xae   : > { %4770 = dma.done.wait (%p5933_p9), [#allocation6], 512   ;;  %p5934_p4 = pmov %p5933_p9 }
  0xb0   : > { %4772 = vsyncadd (%p5934_p4), [#allocation6], 4294966784  ;;  %p5935_p10 = pmov %p5934_p4 }
  0xb1   : > { %p5936_p8 = pmov %p5934_p4 }
  0xb2   : > { %4774 = dma.done.wait (%p5935_p10), [#allocation9], 512  }
  0xb3   : > { %4776 = vsyncadd (%p5936_p8), [#allocation9], 4294966784  ;;  %v4831_v0 = vmov 0.0|0.0   ;;  %vm4832_vm0 = vmmov 0   ;;  %v4833_v1 = vmov 0.0   ;;  %v357_v2 = vld [vmem:[#allocation7] sm:$0xff]  ;;  %v659_v43 = vlaneseq }
  0xb4   : > { %4286 = vmatprep.subr.bf16.mxu0 %v4831_v0  ;;  %4138 = vmatprep.mubr.msk.f32.mxu0 %vm4832_vm0, %v4833_v1  ;;  %v358_v3 = vld [vmem:[#allocation7 + $0x8] sm:$0xff]  ;;  %v359_v4 = vld [vmem:[#allocation7 + $0x10] sm:$0xff]  ;;  %v360_v7 = vld [vmem:[#allocation7 + $0x18] sm:$0xff]  ;;  %vm368_vm1 = vcmask 261120   ;;  %s4834_s11 = smov 96   ;;  %s4835_s4 = smov 64  }
  0xb5   : > { %v4521_v5 = vpack.i.bf16 %v358_v3, %v357_v2  ;;  %v4287_v6 = vpack.c.bf16 %v358_v3, %v357_v2  ;;  %v355_v8 = vld [vmem:[%s312_s21] sm:$0xff]  ;;  %v4526_v10 = vpack.i.bf16 %v360_v7, %v359_v4  ;;  %v4290_v11 = vpack.c.bf16 %v360_v7, %v359_v4  ;;  %v354_v12 = vld [vmem:[%s5189_s2] sm:$0xff]  ;;  %s4836_s19 = smov 120   ;;  %s4837_s20 = smov 124  }
  0xb6   : > { %4149 = vmatprep.mubr.msk.f32.mxu1 %vm368_vm1, %v355_v8  ;;  %v5221_v9 = vld [vmem:[%s5890_s3] ss:$0 sm:$0xff]  ;;  %v356_v29 = vld [vmem:[%s312_s21 + $0x8] sm:$0xff]  ;;  %s4838_s27 = smov 116   ;;  %s4839_s18 = smov 112   ;;  %v660_v46 = vshrl.u32 %v659_v43, 7 }
  0xb7   : > { %4522 = vrot.lane.b32.xlu0 %v4521_v5, %s4834_s11  ;;  %4288 = vmatpush3.bf16.msra.mxu0 %v4287_v6  ;;  %s4840_s6 = smov 108   ;;  %s4841_s5 = smov 104   ;;  %v4843_v41 = vmov 1983009808   ;;  %v4844_v48 = vmov 1934713408  }
  0xb8   : > { %4289 = vmatprep.subr.bf16.mxu0 %v4831_v0  ;;  %458 = vrot.lane.b32.xlu1 %v5221_v9, %s4834_s11  ;;  %s4842_s2 = smov 100   ;;  %v657_v42 = vunpack.c.l.s4 %v4843_v41  ;;  %v721_v49 = vunpack.c.l.s4 %v4844_v48  ;;  %vm2102_vm2 = vcmask 31744   ;;  %vm2735_vm4 = vcmask 130048   ;;  %s4845_s10 = smov 8  }
  0xb9   : > { %vm5478_vm3 = vmpackc.low %vm2102_vm2, %vm2102_vm2  ;;  %s4846_s15 = smov 4   ;;  %s4847_s12 = smov 12   ;;  %vm3709_vm5 = vcmask 64512   ;;  %vm3711_vm6 = vcmask 97280   ;;  %vm3714_vm7 = vcmask 162816   ;;  %vm3716_vm8 = vcmask 195584  }
  0xba   : > { %v658_v45 = vunpack.c.0.s8 %v657_v42  ;;  %v722_v55 = vunpack.c.0.s8 %v721_v49  ;;  %s4848_s29 = smov 20   ;;  %s4849_s21 = smov 16   ;;  %vm3718_vm9 = vcmask 228352  }
  0xbb   : > { %4527 = vrot.lane.b32.xlu0 %v4526_v10, %s4834_s11  ;;  %4291 = vmatpush3.bf16.msra.mxu0 %v4290_v11  ;;  %s4850_s8 = smov 28   ;;  %s4851_s9 = smov 24  }
  0xbc   : > { %4532 = vrot.lane.b32.xlu1 %v4521_v5, %s4835_s4  ;;  %v5286_v52 = vsub.s32 %v658_v45, %v660_v46  ;;  %v5292_v60 = vsub.s32 %v722_v55, %v660_v46  ;;  %s5939_s11 = sld [smem:[#allocation16_spill]]  ;;  %p5942_p2 = scmp.ne.s32.totalorder %s5924_s17, 0 }
  0xbe   : > { %4139 = vmatmul.mubr.msk.f32.vlgmr.msra.gmra.mrb[0].mxu0 %vm368_vm1, %v354_v12 }
  0xbf   : > { %4537 = vrot.lane.b32.xlu0 %v4526_v10, %s4835_s4  ;;  %4160 = vmatprep.mubr.msk.f32.mxu0 %vm368_vm1, %v355_v8 }
 0x129   : > { %v4523_v13 = vpop.permute.xlu0 %4522 }
 0x12a   : > { %v4525_v14 = vunpack.i.h.bf16 %v4523_v13  ;;  %v4524_v15 = vunpack.i.l.bf16 %v4523_v13  ;;  %v459_v16 = vpop.permute.xlu1 %458 }
 0x12c   : > { %v4292_v17 = vpack.c.bf16 %v4525_v14, %v4524_v15 }
 0x12d   : > { %v4528_v18 = vpop.permute.xlu0 %4527 }
 0x12e   : > { %v4530_v19 = vunpack.i.h.bf16 %v4528_v18  ;;  %v4529_v20 = vunpack.i.l.bf16 %v4528_v18  ;;  %4293 = vmatprep.subr.bf16.mxu1 %v4292_v17  ;;  %v4533_v21 = vpop.permute.xlu1 %4532 }
 0x12f   : > { %4295 = vmatpush3.bf16.msra.mxu1 %v4292_v17  ;;  %v4535_v22 = vunpack.i.h.bf16 %v4533_v21  ;;  %v4534_v23 = vunpack.i.l.bf16 %v4533_v21 }
 0x130   : > { %v4296_v24 = vpack.c.bf16 %v4530_v19, %v4529_v20 }
 0x131   : > { %v4300_v25 = vpack.c.bf16 %v4535_v22, %v4534_v23  ;;  %v4538_v26 = vpop.permute.xlu0 %4537 }
 0x132   : > { %4297 = vmatprep.subr.bf16.mxu1 %v4296_v24  ;;  %v4540_v27 = vunpack.i.h.bf16 %v4538_v26  ;;  %v4539_v28 = vunpack.i.l.bf16 %v4538_v26 }
 0x133   : > { %4299 = vmatpush3.bf16.msra.mxu1 %v4296_v24  ;;  %4301 = vmatprep.subr.bf16.mxu0 %v4300_v25 }
 0x134   : > { %v4304_v30 = vpack.c.bf16 %v4540_v27, %v4539_v28  ;;  %4303 = vmatpush3.bf16.msra.mxu0 %v4300_v25  ;;  %4308 = vmatprep.subr.bf16.mxu1 %v4831_v0 }
 0x136   : > { %4150 = vmatmul.mubr.msk.f32.vlgmr.msra.gmra.mrb[0].mxu1 %vm368_vm1, %v356_v29  ;;  %4305 = vmatprep.subr.bf16.mxu0 %v4304_v30 }
 0x137   : > { %4167 = vmatprep.mubr.msk.f32.mxu1 %vm4832_vm0, %v4833_v1 }
 0x138   : > { %4307 = vmatpush3.bf16.msra.mxu0 %v4304_v30 }
 0x139   : > { %4312 = vmatprep.subr.bf16.mxu0 %v4831_v0 }
 0x13b   : > { %4161 = vmatmul.mubr.msk.f32.vlgmr.msra.gmra.mrb[2].mxu0 %vm368_vm1, %v356_v29 }
 0x13c   : > { %4174 = vmatprep.mubr.msk.f32.mxu0 %vm4832_vm0, %v4833_v1 }
 0x191   : > { %v438_v31 = vpop.f32.mrb[0].mxu0 }
 0x192   : > { %v439_v32 = vadd.f32 %v5221_v9, %v438_v31  ;;  %v4140_v33 = vpop.f32.mrb[1].mxu0 }
 0x194   : > { %636 = vrot.lane.b32.xlu0 %v439_v32, %s4836_s19  ;;  %633 = vrot.lane.b32.xlu1 %v439_v32, %s4837_s20 }
 0x198   : > { %639 = vrot.lane.b32.xlu1 %v439_v32, %s4838_s27 }
 0x206   : > { %v634_v40 = vpop.permute.xlu1 %633  ;;  %v637_v47 = vpop.permute.xlu0 %636 }
 0x207   : > { %v654_v53 = vcombine.low %v439_v32, %v637_v47  ;;  %v655_v54 = vcombine.high %v439_v32, %v637_v47 }
 0x209   : > { %v4151_v34 = vpop.f32.mrb[0].mxu1  ;;  %v662_v58 = vrot.slane %v654_v53, %v5286_v52  ;;  %v669_v59 = vrot.slane %v655_v54, %v5286_v52 }
 0x20a   : > { %v5244_v35 = vadd.f32 %v4151_v34, %v459_v16  ;;  %v533_v36 = vpop.f32.mrb[1].mxu1  ;;  %v640_v44 = vpop.permute.xlu1 %639 }
 0x20b   : > { %v5246_v37 = vadd.f32 %v533_v36, %v459_v16  ;;  %v670_v50 = vcombine.low %v634_v40, %v640_v44  ;;  %v671_v51 = vcombine.high %v634_v40, %v640_v44 }
 0x20c   : > { %930 = vrot.lane.b32.xlu0 %v5244_v35, %s4837_s20 }
 0x20d   : > { %928 = vrot.lane.b32.xlu1 %v5246_v37, %s4837_s20  ;;  %v678_v56 = vrot.slane %v670_v50, %v5286_v52  ;;  %v685_v57 = vrot.slane %v671_v51, %v5286_v52 }
 0x20e   : > { %v5282_v38 = vpop.f32.mrb[2].mxu0 }
 0x20f   : > { %v5284_v39 = vpop.f32.mrb[3].mxu0  ;;  %v718_v61 = vcombine.low %v662_v58, %v678_v56  ;;  %v719_v62 = vcombine.high %v662_v58, %v678_v56  ;;  %v734_v63 = vcombine.low %v669_v59, %v685_v57  ;;  %v735_v2 = vcombine.high %v669_v59, %v685_v57 }
 0x210   : > { %936 = vrot.lane.b32.xlu0 %v5244_v35, %s4836_s19 }
 0x211   : > { %934 = vrot.lane.b32.xlu1 %v5246_v37, %s4836_s19  ;;  %v726_v4 = vrot.slane %v718_v61, %v5292_v60  ;;  %v733_v5 = vrot.slane %v719_v62, %v5292_v60  ;;  %v742_v7 = vrot.slane %v734_v63, %v5292_v60  ;;  %v749_v8 = vrot.slane %v735_v2, %v5292_v60 }
 0x213   : > { %v3972_v10 = vcombine.low %v726_v4, %v733_v5  ;;  %v3974_v11 = vcombine.high %v726_v4, %v733_v5  ;;  %v3976_v13 = vcombine.low %v742_v7, %v749_v8  ;;  %v3978_v14 = vcombine.high %v742_v7, %v749_v8 }
 0x214   : > { %942 = vrot.lane.b32.xlu0 %v5244_v35, %s4838_s27 }
 0x215   : > { %940 = vrot.lane.b32.xlu1 %v5246_v37, %s4838_s27  ;;  %v5303_v20 = vrot.slane %v3972_v10, %v5286_v52  ;;  %v5306_v21 = vrot.slane %v3974_v11, %v5286_v52  ;;  %v5309_v25 = vrot.slane %v3976_v13, %v5286_v52  ;;  %v5312_v26 = vrot.slane %v3978_v14, %v5286_v52 }
 0x218   : > { %946 = vrot.lane.b32.xlu0 %v5246_v37, %s4839_s18 }
 0x219   : > { %948 = vrot.lane.b32.xlu1 %v5244_v35, %s4839_s18 }
 0x21c   : > { %952 = vrot.lane.b32.xlu0 %v5246_v37, %s4840_s6 }
 0x21d   : > { %954 = vrot.lane.b32.xlu1 %v5244_v35, %s4840_s6 }
 0x220   : > { %958 = vrot.lane.b32.xlu0 %v5246_v37, %s4841_s5 }
 0x221   : > { %960 = vrot.lane.b32.xlu1 %v5244_v35, %s4841_s5 }
 0x224   : > { %964 = vrot.lane.b32.xlu0 %v5246_v37, %s4842_s2 }
 0x225   : > { %966 = vrot.lane.b32.xlu1 %v5244_v35, %s4842_s2 }
 0x228   : > { %642 = vrot.lane.b32.xlu0 %v439_v32, %s4839_s18 }
 0x229   : > { %645 = vrot.lane.b32.xlu1 %v439_v32, %s4840_s6 }
 0x22c   : > { %648 = vrot.lane.b32.xlu0 %v439_v32, %s4841_s5 }
 0x22d   : > { %651 = vrot.lane.b32.xlu1 %v439_v32, %s4842_s2 }
 0x231   : > { %554 = vrot.lane.b32.xlu1 %v5221_v9, %s4835_s4  ;;  %s4055_s4 = sshll.u32 %s4811_s28, 1  ;;  %s3806_s28 = scalar_lea.sflag [#allocation4], %s5183_s16 }
 0x27e   : > { %v931_v3 = vpop.permute.xlu0 %930 }
 0x27f   : > { %v929_v6 = vpop.permute.xlu1 %928 }
 0x282   : > { %v937_v9 = vpop.permute.xlu0 %936 }
 0x283   : > { %v935_v12 = vpop.permute.xlu1 %934  ;;  %v1106_v15 = vcombine.low %v5244_v35, %v937_v9  ;;  %v1107_v16 = vcombine.high %v5244_v35, %v937_v9 }
 0x284   : > { %v970_v17 = vcombine.low %v5246_v37, %v935_v12  ;;  %v971_v18 = vcombine.high %v5246_v37, %v935_v12 }
 0x285   : > { %v1114_v29 = vrot.slane %v1106_v15, %v5286_v52  ;;  %v1121_v30 = vrot.slane %v1107_v16, %v5286_v52 }
 0x286   : > { %v943_v19 = vpop.permute.xlu0 %942  ;;  %v978_v33 = vrot.slane %v970_v17, %v5286_v52  ;;  %v985_v34 = vrot.slane %v971_v18, %v5286_v52  ;;  %v854_v17 = vcombine.low %v5303_v20, %v5306_v21  ;;  %v855_v18 = vcombine.high %v5303_v20, %v5306_v21 }
 0x287   : > { %v1122_v22 = vcombine.low %v931_v3, %v943_v19  ;;  %v1123_v23 = vcombine.high %v931_v3, %v943_v19  ;;  %v941_v24 = vpop.permute.xlu1 %940  ;;  %v886_v19 = vcombine.low %v5309_v25, %v5312_v26 }
 0x288   : > { %v986_v27 = vcombine.low %v929_v6, %v941_v24  ;;  %v987_v28 = vcombine.high %v929_v6, %v941_v24 }
 0x289   : > { %v1130_v31 = vrot.slane %v1122_v22, %v5286_v52  ;;  %v1137_v32 = vrot.slane %v1123_v23, %v5286_v52 }
 0x28a   : > { %v994_v35 = vrot.slane %v986_v27, %v5286_v52  ;;  %v1001_v36 = vrot.slane %v987_v28, %v5286_v52  ;;  %v5322_v37 = vpop.permute.xlu0 %946 }
 0x28b   : > { %v1170_v40 = vcombine.low %v1114_v29, %v1130_v31  ;;  %v1171_v41 = vcombine.high %v1114_v29, %v1130_v31  ;;  %v1186_v42 = vcombine.low %v1121_v30, %v1137_v32  ;;  %v1187_v43 = vcombine.high %v1121_v30, %v1137_v32  ;;  %v5324_v44 = vpop.permute.xlu1 %948 }
 0x28c   : > { %v1034_v45 = vcombine.low %v978_v33, %v994_v35  ;;  %v1035_v46 = vcombine.high %v978_v33, %v994_v35  ;;  %v1050_v47 = vcombine.low %v985_v34, %v1001_v36  ;;  %v1051_v48 = vcombine.high %v985_v34, %v1001_v36 }
 0x28d   : > { %v1178_v49 = vrot.slane %v1170_v40, %v5292_v60  ;;  %v1185_v50 = vrot.slane %v1171_v41, %v5292_v60  ;;  %v1194_v51 = vrot.slane %v1186_v42, %v5292_v60  ;;  %v1201_v53 = vrot.slane %v1187_v43, %v5292_v60 }
 0x28e   : > { %v1042_v54 = vrot.slane %v1034_v45, %v5292_v60  ;;  %v1049_v55 = vrot.slane %v1035_v46, %v5292_v60  ;;  %v1058_v56 = vrot.slane %v1050_v47, %v5292_v60  ;;  %v1065_v57 = vrot.slane %v1051_v48, %v5292_v60  ;;  %v953_v58 = vpop.permute.xlu0 %952 }
 0x28f   : > { %v3988_v59 = vcombine.low %v1178_v49, %v1185_v50  ;;  %v3990_v61 = vcombine.high %v1178_v49, %v1185_v50  ;;  %v3992_v62 = vcombine.low %v1194_v51, %v1201_v53  ;;  %v3994_v63 = vcombine.high %v1194_v51, %v1201_v53  ;;  %v955_v2 = vpop.permute.xlu1 %954 }
 0x290   : > { %v3980_v3 = vcombine.low %v1042_v54, %v1049_v55  ;;  %v3982_v4 = vcombine.high %v1042_v54, %v1049_v55  ;;  %v3984_v5 = vcombine.low %v1058_v56, %v1065_v57  ;;  %v3986_v6 = vcombine.high %v1058_v56, %v1065_v57 }
 0x291   : > { %v5335_v7 = vrot.slane %v3988_v59, %v5286_v52  ;;  %v5338_v8 = vrot.slane %v3990_v61, %v5286_v52  ;;  %v5341_v9 = vrot.slane %v3992_v62, %v5286_v52  ;;  %v5344_v10 = vrot.slane %v3994_v63, %v5286_v52 }
 0x292   : > { %v5347_v11 = vrot.slane %v3980_v3, %v5286_v52  ;;  %v5350_v12 = vrot.slane %v3982_v4, %v5286_v52  ;;  %v5353_v13 = vrot.slane %v3984_v5, %v5286_v52  ;;  %v5356_v14 = vrot.slane %v3986_v6, %v5286_v52  ;;  %v959_v15 = vpop.permute.xlu0 %958 }
 0x293   : > { %v961_v16 = vpop.permute.xlu1 %960  ;;  %v1442_v22 = vcombine.low %v5335_v7, %v5338_v8  ;;  %v1443_v23 = vcombine.high %v5335_v7, %v5338_v8  ;;  %v1474_v24 = vcombine.low %v5341_v9, %v5344_v10  ;;  %v1475_v27 = vcombine.high %v5341_v9, %v5344_v10 }
 0x294   : > { %v1306_v28 = vcombine.low %v5347_v11, %v5350_v12  ;;  %v1307_v29 = vcombine.high %v5347_v11, %v5350_v12  ;;  %v1338_v30 = vcombine.low %v5353_v13, %v5356_v14  ;;  %v1339_v31 = vcombine.high %v5353_v13, %v5356_v14 }
 0x295   : > { %v1002_v33 = vcombine.low %v5322_v37, %v959_v15  ;;  %v1003_v34 = vcombine.high %v5322_v37, %v959_v15  ;;  %v1138_v35 = vcombine.low %v5324_v44, %v961_v16  ;;  %v1139_v36 = vcombine.high %v5324_v44, %v961_v16 }
 0x296   : > { %v965_v32 = vpop.permute.xlu0 %964  ;;  %v5385_v46 = vrot.slane %v1442_v22, %v5292_v60  ;;  %v5388_v47 = vrot.slane %v1474_v24, %v5292_v60  ;;  %v1314_v53 = vrot.slane %v1306_v28, %v5292_v60  ;;  %v1346_v54 = vrot.slane %v1338_v30, %v5292_v60 }
 0x297   : > { %v967_v40 = vpop.permute.xlu1 %966  ;;  %v1018_v41 = vcombine.low %v953_v58, %v965_v32  ;;  %v1019_v42 = vcombine.high %v953_v58, %v965_v32  ;;  %v1010_v48 = vrot.slane %v1002_v33, %v5286_v52  ;;  %v1017_v49 = vrot.slane %v1003_v34, %v5286_v52 }
 0x298   : > { %v1154_v43 = vcombine.low %v955_v2, %v967_v40  ;;  %v1155_v45 = vcombine.high %v955_v2, %v967_v40  ;;  %v1146_v55 = vrot.slane %v1138_v35, %v5286_v52  ;;  %v1153_v56 = vrot.slane %v1139_v36, %v5286_v52 }
 0x299   : > { %v1026_v37 = vrot.slane %v1018_v41, %v5286_v52  ;;  %v1033_v50 = vrot.slane %v1019_v42, %v5286_v52  ;;  %v1489_v7 = vrot.slane %v1475_v27, %v5292_v60  ;;  %v1321_v8 = vrot.slane %v1307_v29, %v5292_v60 }
 0x29a   : > { %v1162_v44 = vrot.slane %v1154_v43, %v5286_v52  ;;  %v1169_v51 = vrot.slane %v1155_v45, %v5286_v52  ;;  %v643_v30 = vpop.permute.xlu0 %642 }
 0x29b   : > { %v1066_v57 = vcombine.low %v1010_v48, %v1026_v37  ;;  %v1067_v58 = vcombine.high %v1010_v48, %v1026_v37  ;;  %v1082_v59 = vcombine.low %v1017_v49, %v1033_v50  ;;  %v1083_v61 = vcombine.high %v1017_v49, %v1033_v50  ;;  %v646_v36 = vpop.permute.xlu1 %645 }
 0x29c   : > { %v1202_v62 = vcombine.low %v1146_v55, %v1162_v44  ;;  %v1203_v63 = vcombine.high %v1146_v55, %v1162_v44  ;;  %v1218_v2 = vcombine.low %v1153_v56, %v1169_v51  ;;  %v1219_v3 = vcombine.high %v1153_v56, %v1169_v51 }
 0x29d   : > { %v1074_v4 = vrot.slane %v1066_v57, %v5292_v60  ;;  %v1081_v5 = vrot.slane %v1067_v58, %v5292_v60  ;;  %v1090_v6 = vrot.slane %v1082_v59, %v5292_v60  ;;  %v1097_v15 = vrot.slane %v1083_v61, %v5292_v60 }
 0x29e   : > { %v1210_v16 = vrot.slane %v1202_v62, %v5292_v60  ;;  %v1217_v22 = vrot.slane %v1203_v63, %v5292_v60  ;;  %v1226_v24 = vrot.slane %v1218_v2, %v5292_v60  ;;  %v1233_v28 = vrot.slane %v1219_v3, %v5292_v60  ;;  %v649_v2 = vpop.permute.xlu0 %648 }
 0x29f   : > { %v3981_v32 = vcombine.low %v1074_v4, %v1081_v5  ;;  %v3983_v33 = vcombine.high %v1074_v4, %v1081_v5  ;;  %v3985_v34 = vcombine.low %v1090_v6, %v1097_v15  ;;  %v3987_v35 = vcombine.high %v1090_v6, %v1097_v15 }
 0x2a0   : > { %v3989_v40 = vcombine.low %v1210_v16, %v1217_v22  ;;  %v3991_v41 = vcombine.high %v1210_v16, %v1217_v22  ;;  %v3993_v42 = vcombine.low %v1226_v24, %v1233_v28  ;;  %v3995_v43 = vcombine.high %v1226_v24, %v1233_v28 }
 0x2a1   : > { %v5409_v45 = vrot.slane %v3981_v32, %v5286_v52  ;;  %v5412_v48 = vrot.slane %v3983_v33, %v5286_v52  ;;  %v5415_v49 = vrot.slane %v3985_v34, %v5286_v52  ;;  %v5418_v37 = vrot.slane %v3987_v35, %v5286_v52 }
 0x2a2   : > { %v5421_v50 = vrot.slane %v3989_v40, %v5286_v52  ;;  %v5424_v44 = vrot.slane %v3991_v41, %v5286_v52  ;;  %v5427_v51 = vrot.slane %v3993_v42, %v5286_v52  ;;  %v5430_v55 = vrot.slane %v3995_v43, %v5286_v52 }
 0x2a3   : > { %v1370_v56 = vcombine.low %v1314_v53, %v1346_v54  ;;  %v1506_v57 = vcombine.low %v5385_v46, %v5388_v47  ;;  %v1371_v58 = vcombine.high %v1314_v53, %v1346_v54  ;;  %v1507_v59 = vcombine.high %v5385_v46, %v5388_v47  ;;  %v652_v53 = vpop.permute.xlu1 %651 }
 0x2a4   : > { %v887_v61 = vcombine.high %v5309_v25, %v5312_v26  ;;  %v1322_v62 = vcombine.low %v5409_v45, %v5412_v48  ;;  %v1354_v63 = vcombine.low %v5415_v49, %v5418_v37  ;;  %v862_v3 = vrot.slane %v854_v17, %v5292_v60 }
 0x2a5   : > { %v1457_v46 = vrot.slane %v1443_v23, %v5292_v60  ;;  %v1458_v47 = vcombine.low %v5421_v50, %v5424_v44  ;;  %v894_v54 = vrot.slane %v886_v19, %v5292_v60  ;;  %v5460_v4 = vrot.slane %v855_v18, %v5292_v60 }
 0x2a6   : > { %v1353_v25 = vrot.slane %v1339_v31, %v5292_v60  ;;  %v1490_v20 = vcombine.low %v5427_v51, %v5430_v55  ;;  %v4309_v26 = vpack.c.bf16 %v1506_v57, %v1370_v56  ;;  %v4313_v9 = vpack.c.bf16 %v1507_v59, %v1371_v58 }
 0x2a7   : > { %v686_v10 = vcombine.low %v643_v30, %v649_v2  ;;  %v687_v17 = vcombine.high %v643_v30, %v649_v2  ;;  %v5483_v11 = vrot.slane %v1322_v62, %v5292_v60  ;;  %v5486_v12 = vrot.slane %v1354_v63, %v5292_v60  ;;  %v555_v43 = vpop.permute.xlu1 %554 }
 0x2a8   : > { %v702_v13 = vcombine.low %v646_v36, %v652_v53  ;;  %v703_v14 = vcombine.high %v646_v36, %v652_v53  ;;  %v1466_v18 = vrot.slane %v1458_v47, %v5292_v60  ;;  %4311 = vmatpush3.bf16.xpose.msk.msra.mxu1 %vm5478_vm3, %v4309_v26  ;;  %4315 = vmatpush3.bf16.xpose.msk.msra.mxu0 %vm5478_vm3, %v4313_v9 }
 0x2a9   : > { %v694_v19 = vrot.slane %v686_v10, %v5286_v52  ;;  %v701_v23 = vrot.slane %v687_v17, %v5286_v52  ;;  %v1498_v27 = vrot.slane %v1490_v20, %v5292_v60  ;;  %4316 = vmatprep.subr.bf16.mxu1 %v4831_v0  ;;  %4320 = vmatprep.subr.bf16.mxu0 %v4831_v0 }
 0x2aa   : > { %v710_v29 = vrot.slane %v702_v13, %v5286_v52  ;;  %v717_v31 = vrot.slane %v703_v14, %v5286_v52  ;;  %v1372_v5 = vcombine.low %v1321_v8, %v1353_v25  ;;  %v1508_v6 = vcombine.low %v1457_v46, %v1489_v7 }
 0x2ab   : > { %v1373_v15 = vcombine.high %v1321_v8, %v1353_v25  ;;  %v1509_v16 = vcombine.high %v1457_v46, %v1489_v7  ;;  %v1323_v32 = vcombine.high %v5409_v45, %v5412_v48  ;;  %v918_v33 = vcombine.low %v862_v3, %v894_v54 }
 0x2ac   : > { %v750_v22 = vcombine.low %v694_v19, %v710_v29  ;;  %v751_v24 = vcombine.high %v694_v19, %v710_v29  ;;  %v766_v28 = vcombine.low %v701_v23, %v717_v31  ;;  %v767_v30 = vcombine.high %v701_v23, %v717_v31 }
 0x2ad   : > { %v919_v34 = vcombine.high %v862_v3, %v894_v54  ;;  %v901_v35 = vrot.slane %v887_v61, %v5292_v60  ;;  %v4317_v56 = vpack.c.bf16 %v1508_v6, %v1372_v5  ;;  %v4321_v57 = vpack.c.bf16 %v1509_v16, %v1373_v15 }
 0x2ae   : > { %v758_v36 = vrot.slane %v750_v22, %v5292_v60  ;;  %v765_v40 = vrot.slane %v751_v24, %v5292_v60  ;;  %v774_v41 = vrot.slane %v766_v28, %v5292_v60  ;;  %v781_v42 = vrot.slane %v767_v30, %v5292_v60 }
 0x2af   : > { %v1374_v58 = vcombine.low %v5483_v11, %v5486_v12  ;;  %v1510_v59 = vcombine.low %v1466_v18, %v1498_v27  ;;  %4168 = vmatmul.mubr.msk.f32.vlgmr.msra.gmra.mrb[2].mxu1 %vm2102_vm2, %v918_v33  ;;  %4175 = vmatmul.mubr.msk.f32.vlgmr.msra.gmra.mrb[4].mxu0 %vm2102_vm2, %v919_v34  ;;  %v1375_v61 = vcombine.high %v5483_v11, %v5486_v12 }
 0x2b0   : > { %v3973_v45 = vcombine.low %v758_v36, %v765_v40  ;;  %v3975_v48 = vcombine.high %v758_v36, %v765_v40  ;;  %v3977_v62 = vcombine.low %v774_v41, %v781_v42  ;;  %v3979_v63 = vcombine.high %v774_v41, %v781_v42  ;;  %4319 = vmatpush3.bf16.xpose.msk.msra.mxu1 %vm5478_vm3, %v4317_v56 }
 0x2b1   : > { %v1511_v2 = vcombine.high %v1466_v18, %v1498_v27  ;;  %v5516_v3 = vadd.f32 %v5282_v38, %v555_v43  ;;  %4323 = vmatpush3.bf16.xpose.msk.msra.mxu0 %vm5478_vm3, %v4321_v57  ;;  %v1355_v7 = vcombine.high %v5415_v49, %v5418_v37  ;;  %v1459_v8 = vcombine.high %v5421_v50, %v5424_v44 }
 0x2b2   : > { %v805_v46 = vrot.slane %v3973_v45, %v5286_v52  ;;  %v821_v47 = vrot.slane %v3975_v48, %v5286_v52  ;;  %v837_v53 = vrot.slane %v3977_v62, %v5286_v52  ;;  %v853_v54 = vrot.slane %v3979_v63, %v5286_v52  ;;  %4181 = vmatprep.mubr.msk.f32.mxu1 %vm4832_vm0, %v4833_v1 }
 0x2b3   : > { %v1491_v38 = vcombine.high %v5427_v51, %v5430_v55  ;;  %4188 = vmatprep.mubr.msk.f32.mxu0 %vm4832_vm0, %v4833_v1  ;;  %4324 = vmatprep.subr.bf16.mxu1 %v4831_v0  ;;  %v4325_v26 = vpack.c.bf16 %v1510_v59, %v1374_v58  ;;  %v920_v49 = vcombine.low %v5460_v4, %v901_v35 }
 0x2b4   : > { %v870_v25 = vcombine.low %v805_v46, %v821_v47  ;;  %v902_v20 = vcombine.low %v837_v53, %v853_v54  ;;  %4328 = vmatprep.subr.bf16.mxu0 %v4831_v0  ;;  %1518 = vrot.lane.b32.xlu1 %v5516_v3, %s4837_s20  ;;  %v921_v37 = vcombine.high %v5460_v4, %v901_v35 }
 0x2b5   : > { %v4329_v50 = vpack.c.bf16 %v1511_v2, %v1375_v61  ;;  %1542 = vrot.lane.b32.xlu0 %v5516_v3, %s4840_s6  ;;  %v1337_v44 = vrot.slane %v1323_v32, %v5292_v60  ;;  %v1369_v51 = vrot.slane %v1355_v7, %v5292_v60  ;;  %v1473_v55 = vrot.slane %v1459_v8, %v5292_v60 }
 0x2b6   : > { %v1505_v9 = vrot.slane %v1491_v38, %v5292_v60  ;;  %v878_v10 = vrot.slane %v870_v25, %v5292_v60  ;;  %v910_v17 = vrot.slane %v902_v20, %v5292_v60  ;;  %v5553_v4 = vadd.f32 %v5284_v39, %v555_v43 }
 0x2b7   : > { %4182 = vmatmul.mubr.msk.f32.vlgmr.msra.gmra.mrb[4].mxu1 %vm2102_vm2, %v920_v49  ;;  %v1376_v11 = vcombine.low %v1337_v44, %v1369_v51  ;;  %v1377_v14 = vcombine.high %v1337_v44, %v1369_v51  ;;  %v871_v19 = vcombine.high %v805_v46, %v821_v47  ;;  %v903_v23 = vcombine.high %v837_v53, %v853_v54 }
 0x2b8   : > { %4189 = vmatmul.mubr.msk.f32.vlgmr.msra.gmra.mrb[6].mxu0 %vm2102_vm2, %v921_v37  ;;  %4327 = vmatpush3.bf16.xpose.msk.msra.mxu1 %vm5478_vm3, %v4325_v26  ;;  %v1512_v12 = vcombine.low %v1473_v55, %v1505_v9  ;;  %v922_v13 = vcombine.low %v878_v10, %v910_v17  ;;  %v1513_v18 = vcombine.high %v1473_v55, %v1505_v9 }
 0x2b9   : > { %4331 = vmatpush3.bf16.xpose.msk.msra.mxu0 %vm5478_vm3, %v4329_v50  ;;  %4195 = vmatprep.mubr.msk.f32.mxu1 %vm4832_vm0, %v4833_v1  ;;  %v923_v39 = vcombine.high %v878_v10, %v910_v17  ;;  %v885_v31 = vrot.slane %v871_v19, %v5292_v60  ;;  %v917_v5 = vrot.slane %v903_v23, %v5292_v60 }
 0x2ba   : > { %4202 = vmatprep.mubr.msk.f32.mxu0 %vm4832_vm0, %v4833_v1  ;;  %4332 = vmatprep.subr.bf16.mxu1 %v4831_v0  ;;  %v4333_v27 = vpack.c.bf16 %v1512_v12, %v1376_v11  ;;  %v4337_v29 = vpack.c.bf16 %v1513_v18, %v1377_v14 }
 0x2bb   : > { %4336 = vmatprep.subr.bf16.mxu0 %v4831_v0  ;;  %1524 = vrot.lane.b32.xlu1 %v5516_v3, %s4836_s19  ;;  %v924_v21 = vcombine.low %v885_v31, %v917_v5  ;;  %v925_v6 = vcombine.high %v885_v31, %v917_v5 }
 0x2bc   : > { %1516 = vrot.lane.b32.xlu0 %v5553_v4, %s4837_s20 }
 0x2bf   : > { %4196 = vmatmul.mubr.msk.f32.vlgmr.msra.gmra.mrb[6].mxu1 %vm2102_vm2, %v922_v13  ;;  %1530 = vrot.lane.b32.xlu1 %v5516_v3, %s4838_s27 }
 0x2c0   : > { %4203 = vmatmul.mubr.msk.f32.vlgmr.msra.gmra.mrb[8].mxu0 %vm2102_vm2, %v923_v39  ;;  %4335 = vmatpush3.bf16.xpose.msk.msra.mxu1 %vm5478_vm3, %v4333_v27 }
 0x2c1   : > { %4339 = vmatpush3.bf16.xpose.msk.msra.mxu0 %vm5478_vm3, %v4337_v29  ;;  %4209 = vmatprep.mubr.msk.f32.mxu1 %vm4832_vm0, %v4833_v1 }
 0x2c2   : > { %4216 = vmatprep.mubr.msk.f32.mxu0 %vm4832_vm0, %v4833_v1  ;;  %1528 = vrot.lane.b32.xlu0 %v5553_v4, %s4838_s27 }
 0x2c3   : > { %1536 = vrot.lane.b32.xlu1 %v5516_v3, %s4839_s18  ;;  %4340 = vmatprep.subr.bf16.mxu1 %v4831_v0 }
 0x2c4   : > { %4352 = vmatprep.subr.bf16.mxu0 %v4831_v0 }
 0x2c6   : > { %1534 = vrot.lane.b32.xlu0 %v5553_v4, %s4839_s18  ;;  %s5940_s18 = sld [smem:[#allocation24_spill]] }
 0x2c7   : > { %4210 = vmatmul.mubr.msk.f32.vlgmr.msra.gmra.mrb[8].mxu1 %vm2102_vm2, %v924_v21  ;;  %1522 = vrot.lane.b32.xlu1 %v5553_v4, %s4836_s19  ;;  %s3817_s19 = sadd.s32 %s5939_s11, %s4055_s4 }
 0x2c8   : > { %4217 = vmatmul.mubr.msk.f32.vlgmr.msra.gmra.mrb[10].mxu0 %vm2102_vm2, %v925_v6  ;;  %4223 = vmatprep.mubr.msk.f32.mxu1 %vm4832_vm0, %v4833_v1 }
 0x2c9   : > { %4251 = vmatprep.mubr.msk.f32.mxu0 %vm4832_vm0, %v4833_v1 }
 0x2cb   : > { %1540 = vrot.lane.b32.xlu1 %v5553_v4, %s4840_s6  ;;  %s4056_s6 = sshll.u32 %s3817_s19, 7 }
 0x326   : > { %v1519_v15 = vpop.permute.xlu1 %1518 }
 0x327   : > { %v5599_v16 = vpop.permute.xlu0 %1542 }
 0x32d   : > { %v1525_v22 = vpop.permute.xlu1 %1524 }
 0x32e   : > { %v1694_v24 = vcombine.low %v5516_v3, %v1525_v22  ;;  %v1695_v28 = vcombine.high %v5516_v3, %v1525_v22  ;;  %v1517_v30 = vpop.permute.xlu0 %1516 }
 0x330   : > { %v1702_v33 = vrot.slane %v1694_v24, %v5286_v52  ;;  %v1709_v34 = vrot.slane %v1695_v28, %v5286_v52 }
 0x331   : > { %v1531_v32 = vpop.permute.xlu1 %1530 }
 0x332   : > { %v1710_v35 = vcombine.low %v1519_v15, %v1531_v32  ;;  %v1711_v36 = vcombine.high %v1519_v15, %v1531_v32 }
 0x334   : > { %v1718_v40 = vrot.slane %v1710_v35, %v5286_v52  ;;  %v1725_v41 = vrot.slane %v1711_v36, %v5286_v52  ;;  %v1529_v42 = vpop.permute.xlu0 %1528 }
 0x335   : > { %v5607_v43 = vpop.permute.xlu1 %1536  ;;  %v1574_v45 = vcombine.low %v1517_v30, %v1529_v42  ;;  %v1575_v48 = vcombine.high %v1517_v30, %v1529_v42 }
 0x336   : > { %v1758_v56 = vcombine.low %v1702_v33, %v1718_v40  ;;  %v1759_v57 = vcombine.high %v1702_v33, %v1718_v40  ;;  %v1774_v58 = vcombine.low %v1709_v34, %v1725_v41  ;;  %v1775_v59 = vcombine.high %v1709_v34, %v1725_v41 }
 0x337   : > { %v1582_v25 = vrot.slane %v1574_v45, %v5286_v52  ;;  %v1589_v20 = vrot.slane %v1575_v48, %v5286_v52 }
 0x338   : > { %v1766_v62 = vrot.slane %v1758_v56, %v5292_v60  ;;  %v1773_v63 = vrot.slane %v1759_v57, %v5292_v60  ;;  %v1782_v61 = vrot.slane %v1774_v58, %v5292_v60  ;;  %v1789_v2 = vrot.slane %v1775_v59, %v5292_v60 }
 0x339   : > { %v1523_v46 = vpop.permute.xlu1 %1522 }
 0x33a   : > { %v4004_v47 = vcombine.low %v1766_v62, %v1773_v63  ;;  %v4006_v53 = vcombine.high %v1766_v62, %v1773_v63  ;;  %v4008_v54 = vcombine.low %v1782_v61, %v1789_v2  ;;  %v4010_v7 = vcombine.high %v1782_v61, %v1789_v2 }
 0x33b   : > { %v1558_v8 = vcombine.low %v5553_v4, %v1523_v46  ;;  %v1559_v38 = vcombine.high %v5553_v4, %v1523_v46 }
 0x33c   : > { %v1974_v26 = vrot.slane %v4004_v47, %v5286_v52  ;;  %v1990_v49 = vrot.slane %v4006_v53, %v5286_v52  ;;  %v2006_v37 = vrot.slane %v4008_v54, %v5286_v52  ;;  %v2022_v50 = vrot.slane %v4010_v7, %v5286_v52 }
 0x33d   : > { %v1566_v44 = vrot.slane %v1558_v8, %v5286_v52  ;;  %v1573_v51 = vrot.slane %v1559_v38, %v5286_v52 }
 0x33e   : > { %v2030_v55 = vcombine.low %v1974_v26, %v1990_v49  ;;  %v2062_v9 = vcombine.low %v2006_v37, %v2022_v50  ;;  %v2031_v10 = vcombine.high %v1974_v26, %v1990_v49  ;;  %v2063_v17 = vcombine.high %v2006_v37, %v2022_v50 }
 0x33f   : > { %v1622_v11 = vcombine.low %v1566_v44, %v1582_v25  ;;  %v1623_v12 = vcombine.high %v1566_v44, %v1582_v25  ;;  %v1638_v13 = vcombine.low %v1573_v51, %v1589_v20  ;;  %v1639_v14 = vcombine.high %v1573_v51, %v1589_v20 }
 0x340   : > { %v2038_v18 = vrot.slane %v2030_v55, %v5292_v60  ;;  %v2070_v39 = vrot.slane %v2062_v9, %v5292_v60  ;;  %v2045_v19 = vrot.slane %v2031_v10, %v5292_v60  ;;  %v2077_v23 = vrot.slane %v2063_v17, %v5292_v60 }
 0x341   : > { %v1630_v27 = vrot.slane %v1622_v11, %v5292_v60  ;;  %v1637_v29 = vrot.slane %v1623_v12, %v5292_v60  ;;  %v1646_v31 = vrot.slane %v1638_v13, %v5292_v60  ;;  %v1653_v5 = vrot.slane %v1639_v14, %v5292_v60 }
 0x342   : > { %v2095_v21 = vcombine.high %v2038_v18, %v2070_v39  ;;  %v2096_v6 = vcombine.low %v2045_v19, %v2077_v23  ;;  %v2097_v15 = vcombine.high %v2045_v19, %v2077_v23  ;;  %v2094_v56 = vcombine.low %v2038_v18, %v2070_v39 }
 0x343   : > { %v3996_v22 = vcombine.low %v1630_v27, %v1637_v29  ;;  %v3998_v24 = vcombine.high %v1630_v27, %v1637_v29  ;;  %v4000_v28 = vcombine.low %v1646_v31, %v1653_v5  ;;  %v4002_v30 = vcombine.high %v1646_v31, %v1653_v5  ;;  %v5658_v27 = vpop.permute.xlu0 %1534  ;;  %v5660_v29 = vpop.permute.xlu1 %1540 }
 0x345   : > { %v1838_v32 = vrot.slane %v3996_v22, %v5286_v52  ;;  %v1854_v33 = vrot.slane %v3998_v24, %v5286_v52  ;;  %v1870_v34 = vrot.slane %v4000_v28, %v5286_v52  ;;  %v1886_v35 = vrot.slane %v4002_v30, %v5286_v52 }
 0x347   : > { %v1894_v36 = vcombine.low %v1838_v32, %v1854_v33  ;;  %v1926_v40 = vcombine.low %v1870_v34, %v1886_v35  ;;  %v1895_v41 = vcombine.high %v1838_v32, %v1854_v33  ;;  %v1927_v42 = vcombine.high %v1870_v34, %v1886_v35 }
 0x349   : > { %v1902_v57 = vrot.slane %v1894_v36, %v5292_v60  ;;  %v1934_v58 = vrot.slane %v1926_v40, %v5292_v60  ;;  %v1909_v59 = vrot.slane %v1895_v41, %v5292_v60  ;;  %v1941_v45 = vrot.slane %v1927_v42, %v5292_v60 }
 0x34b   : > { %v1958_v48 = vcombine.low %v1902_v57, %v1934_v58  ;;  %v1959_v62 = vcombine.high %v1902_v57, %v1934_v58  ;;  %v1960_v63 = vcombine.low %v1909_v59, %v1941_v45  ;;  %v1961_v61 = vcombine.high %v1909_v59, %v1941_v45 }
 0x34d   : > { %v4341_v2 = vpack.c.bf16 %v2094_v56, %v1958_v48  ;;  %v5639_v46 = vpack.c.bf16 %v2095_v21, %v1959_v62  ;;  %v5641_v47 = vpack.c.bf16 %v2096_v6, %v1960_v63  ;;  %v5643_v53 = vpack.c.bf16 %v2097_v15, %v1961_v61 }
 0x34f   : > { %4342 = vmatpush3.bf16.msra.mxu1 %v4341_v2 }
 0x350   : > { %4343 = vmatprep.subr.bf16.mxu1 %v4831_v0 }
 0x382   : > { %v2178_v54 = vpop.f32.mrb[2].mxu1  ;;  %v2257_v7 = vpop.f32.mrb[4].mxu0 }
 0x383   : > { %v4169_v8 = vpop.f32.mrb[3].mxu1  ;;  %v2736_v38 = vsel %vm2735_vm4, %v2178_v54, -inf  ;;  %v4176_v25 = vpop.f32.mrb[5].mxu0  ;;  %v2739_v20 = vsel %vm2735_vm4, %v2257_v7, -inf }
 0x384   : > { %2737 = vmax.xlane.f32.xlu0 %v2736_v38  ;;  %2740 = vmax.xlane.f32.xlu1 %v2739_v20 }
 0x38a   : > { %v2336_v26 = vpop.f32.mrb[4].mxu1 }
 0x38b   : > { %v2415_v49 = vpop.f32.mrb[6].mxu0  ;;  %v4183_v37 = vpop.f32.mrb[5].mxu1  ;;  %v2742_v50 = vsel %vm2735_vm4, %v2336_v26, -inf }
 0x38c   : > { %v4190_v44 = vpop.f32.mrb[7].mxu0  ;;  %2743 = vmax.xlane.f32.xlu0 %v2742_v50  ;;  %v2745_v51 = vsel %vm2735_vm4, %v2415_v49, -inf }
 0x390   : > { %2746 = vmax.xlane.f32.xlu0 %v2745_v51 }
 0x392   : > { %v2494_v55 = vpop.f32.mrb[6].mxu1 }
 0x393   : > { %v2573_v9 = vpop.f32.mrb[8].mxu0  ;;  %v4197_v10 = vpop.f32.mrb[7].mxu1  ;;  %v2748_v17 = vsel %vm2735_vm4, %v2494_v55, -inf }
 0x394   : > { %v4204_v11 = vpop.f32.mrb[9].mxu0  ;;  %2749 = vmax.xlane.f32.xlu1 %v2748_v17  ;;  %v2751_v12 = vsel %vm2735_vm4, %v2573_v9, -inf }
 0x395   : > { %2752 = vmax.xlane.f32.xlu0 %v2751_v12 }
 0x39a   : > { %v2652_v13 = vpop.f32.mrb[8].mxu1 }
 0x39b   : > { %v2731_v14 = vpop.f32.mrb[10].mxu0  ;;  %v4211_v18 = vpop.f32.mrb[9].mxu1  ;;  %v2754_v39 = vsel %vm2735_vm4, %v2652_v13, -inf }
 0x39c   : > { %v4218_v19 = vpop.f32.mrb[11].mxu0  ;;  %2755 = vmax.xlane.f32.xlu1 %v2754_v39  ;;  %v2757_v23 = vsel %vm2735_vm4, %v2731_v14, -inf }
 0x39d   : > { %2758 = vmax.xlane.f32.xlu0 %v2757_v23 }
 0x3ad   : > { %1546 = vrot.lane.b32.xlu1 %v5553_v4, %s4841_s5 }
 0x3b3   : > { %1548 = vrot.lane.b32.xlu0 %v5516_v3, %s4841_s5  ;;  %s353_s5 = scalar_lea.vmem [#allocation10], %s3961_s13  ;;  %s4852_s13 = smov [#allocation10]  }
 0x411   : > { %v2738_v31 = vpop.xlane.xlu0 %2737  ;;  %v2741_v5 = vpop.xlane.xlu1 %2740 }
 0x412   : > { %v2760_v21 = vsub.f32 %v2178_v54, %v2738_v31  ;;  %v2761_v6 = vsub.f32 %v2257_v7, %v2741_v5 }
 0x414   : > { %v2768_v15 = vmul.f32 1.442695, %v2760_v21  ;;  %v2770_v22 = vmul.f32 1.442695, %v2761_v6 }
 0x416   : > { %4541 = vpow2.f32 %v2768_v15 }
 0x417   : > { %4543 = vpow2.f32 %v2770_v22 }
 0x419   : > { %v2744_v24 = vpop.xlane.xlu0 %2743 }
 0x41a   : > { %v2762_v28 = vsub.f32 %v2336_v26, %v2744_v24 }
 0x41c   : > { %v2772_v30 = vmul.f32 1.442695, %v2762_v28 }
 0x41d   : > { %v2747_v41 = vpop.xlane.xlu0 %2746 }
 0x41e   : > { %4545 = vpow2.f32 %v2772_v30  ;;  %v2763_v42 = vsub.f32 %v2415_v49, %v2747_v41 }
 0x420   : > { %v5662_v32 = vpop.eup %4541  ;;  %v2774_v59 = vmul.f32 1.442695, %v2763_v42 }
 0x421   : > { %v2784_v33 = vsel %vm2735_vm4, %v5662_v32, 0.0  ;;  %v5666_v34 = vpop.eup %4543  ;;  %v2750_v56 = vpop.xlane.xlu1 %2749 }
 0x422   : > { %2785 = vadd.xlane.f32.xlu0 %v2784_v33  ;;  %v2787_v35 = vsel %vm2735_vm4, %v5666_v34, 0.0  ;;  %v2753_v57 = vpop.xlane.xlu0 %2752  ;;  %v2764_v58 = vsub.f32 %v2494_v55, %v2750_v56  ;;  %4547 = vpow2.f32 %v2774_v59 }
 0x423   : > { %v2765_v45 = vsub.f32 %v2573_v9, %v2753_v57 }
 0x424   : > { %v2776_v63 = vmul.f32 1.442695, %v2764_v58 }
 0x425   : > { %v2778_v2 = vmul.f32 1.442695, %v2765_v45 }
 0x426   : > { %2788 = vadd.xlane.f32.xlu0 %v2787_v35  ;;  %4549 = vpow2.f32 %v2776_v63 }
 0x427   : > { %4551 = vpow2.f32 %v2778_v2 }
 0x428   : > { %v5670_v36 = vpop.eup %4545 }
 0x429   : > { %v2790_v40 = vsel %vm2735_vm4, %v5670_v36, 0.0  ;;  %v2756_v48 = vpop.xlane.xlu1 %2755 }
 0x42a   : > { %2791 = vadd.xlane.f32.xlu1 %v2790_v40  ;;  %v2759_v62 = vpop.xlane.xlu0 %2758  ;;  %v2766_v61 = vsub.f32 %v2652_v13, %v2756_v48 }
 0x42b   : > { %v2767_v54 = vsub.f32 %v2731_v14, %v2759_v62 }
 0x42c   : > { %v2780_v7 = vmul.f32 1.442695, %v2766_v61 }
 0x42d   : > { %v1547_v9 = vpop.permute.xlu1 %1546 }
 0x42e   : > { %4553 = vpow2.f32 %v2780_v7  ;;  %v1549_v51 = vpop.permute.xlu0 %1548  ;;  %v1590_v39 = vcombine.low %v5658_v27, %v1547_v9  ;;  %v1591_v19 = vcombine.high %v5658_v27, %v1547_v9 }
 0x42f   : > { %v1726_v17 = vcombine.low %v5607_v43, %v1549_v51  ;;  %v1727_v11 = vcombine.high %v5607_v43, %v1549_v51 }
 0x430   : > { %v1598_v30 = vrot.slane %v1590_v39, %v5286_v52  ;;  %v1605_v27 = vrot.slane %v1591_v19, %v5286_v52 }
 0x431   : > { %v1734_v31 = vrot.slane %v1726_v17, %v5286_v52  ;;  %v1741_v5 = vrot.slane %v1727_v11, %v5286_v52 }
 0x43b   : > { %1552 = vrot.lane.b32.xlu1 %v5553_v4, %s4842_s2  ;;  %v2782_v4 = vmul.f32 1.442695, %v2767_v54 }
 0x43c   : > { %1554 = vrot.lane.b32.xlu0 %v5516_v3, %s4842_s2  ;;  %v5678_v3 = vpop.eup %4547  ;;  %s3821_s2 = sshll.u32 %s353_s5, 4  ;;  %s5825_s2 = int_to_ptr.vmem [resolvable:$true] %s3821_s2 }
 0x43d   : > { %4555 = vpow2.f32 %v2782_v4  ;;  %v5680_v8 = vpop.eup %4549  ;;  %v2793_v38 = vsel %vm2735_vm4, %v5678_v3, 0.0 }
 0x43e   : > { %v5684_v25 = vpop.eup %4551  ;;  %v2796_v26 = vsel %vm2735_vm4, %v5680_v8, 0.0 }
 0x43f   : > { %v5686_v20 = vpop.eup %4553  ;;  %v2799_v49 = vsel %vm2735_vm4, %v5684_v25, 0.0 }
 0x440   : > { %v2802_v50 = vsel %vm2735_vm4, %v5686_v20, 0.0 }
 0x447   : > { %v5692_v37 = vpop.eup %4555 }
 0x448   : > { %v2805_v44 = vsel %vm2735_vm4, %v5692_v37, 0.0 }
 0x45b   : > { %2794 = vadd.xlane.f32.xlu0 %v2793_v38 }
 0x45f   : > { %2797 = vadd.xlane.f32.xlu0 %v2796_v26  ;;  %2800 = vadd.xlane.f32.xlu1 %v2799_v49 }
 0x463   : > { %2803 = vadd.xlane.f32.xlu1 %v2802_v50  ;;  %2806 = vadd.xlane.f32.xlu0 %v2805_v44 }
 0x4af   : > { %v2786_v55 = vpop.xlane.xlu0 %2785 }
 0x4b0   : > { %4557 = vrcp.f32 %v2786_v55 }
 0x4b3   : > { %v2789_v10 = vpop.xlane.xlu0 %2788 }
 0x4b4   : > { %4559 = vrcp.f32 %v2789_v10 }
 0x4b7   : > { %v2792_v12 = vpop.xlane.xlu1 %2791  ;;  %v1555_v13 = vpop.permute.xlu0 %1554 }
 0x4b8   : > { %4561 = vrcp.f32 %v2792_v12  ;;  %v1742_v14 = vcombine.low %v5599_v16, %v1555_v13  ;;  %v1743_v18 = vcombine.high %v5599_v16, %v1555_v13 }
 0x4ba   : > { %v4558_v23 = vpop.eup %4557  ;;  %v1750_v21 = vrot.slane %v1742_v14, %v5286_v52  ;;  %v1757_v43 = vrot.slane %v1743_v18, %v5286_v52 }
 0x4bb   : > { %v2816_v6 = vmul.f32 %v4558_v23, %v5662_v32  ;;  %v1553_v15 = vpop.permute.xlu1 %1552 }
 0x4bc   : > { %v1790_v22 = vcombine.low %v1734_v31, %v1750_v21  ;;  %v1791_v24 = vcombine.high %v1734_v31, %v1750_v21  ;;  %v1806_v28 = vcombine.low %v1741_v5, %v1757_v43  ;;  %v1807_v16 = vcombine.high %v1741_v5, %v1757_v43 }
 0x4bd   : > { %v1606_v33 = vcombine.low %v5660_v29, %v1553_v15  ;;  %v1607_v35 = vcombine.high %v5660_v29, %v1553_v15  ;;  %4224 = vmatmul.mubr.msk.f32.vlgmr.msra.gmra.mrb[10].mxu1 %vm2735_vm4, %v2816_v6 }
 0x4be   : > { %v4560_v40 = vpop.eup %4559  ;;  %v1798_v41 = vrot.slane %v1790_v22, %v5292_v60  ;;  %v1805_v32 = vrot.slane %v1791_v24, %v5292_v60  ;;  %v1814_v42 = vrot.slane %v1806_v28, %v5292_v60  ;;  %v1821_v56 = vrot.slane %v1807_v16, %v5292_v60  ;;  %4345 = vmatpush3.bf16.msra.mxu1 %v5639_v46 }
 0x4bf   : > { %v2817_v57 = vmul.f32 %v4560_v40, %v5666_v34  ;;  %v1614_v58 = vrot.slane %v1606_v33, %v5286_v52  ;;  %v1621_v59 = vrot.slane %v1607_v35, %v5286_v52  ;;  %4230 = vmatprep.mubr.msk.f32.mxu1 %vm4832_vm0, %v4833_v1  ;;  %4346 = vmatprep.subr.bf16.mxu1 %v4831_v0 }
 0x4c0   : > { %v4005_v29 = vcombine.low %v1798_v41, %v1805_v32  ;;  %v4007_v45 = vcombine.high %v1798_v41, %v1805_v32  ;;  %v4009_v48 = vcombine.low %v1814_v42, %v1821_v56  ;;  %v4011_v62 = vcombine.high %v1814_v42, %v1821_v56 }
 0x4c1   : > { %v1654_v63 = vcombine.low %v1598_v30, %v1614_v58  ;;  %v1655_v61 = vcombine.high %v1598_v30, %v1614_v58  ;;  %v1670_v2 = vcombine.low %v1605_v27, %v1621_v59  ;;  %v1671_v54 = vcombine.high %v1605_v27, %v1621_v59  ;;  %4231 = vmatmul.mubr.msk.f32.vlgmr.msra.gmra.mrb[12].mxu1 %vm2735_vm4, %v2817_v57 }
 0x4c2   : > { %v4562_v46 = vpop.eup %4561  ;;  %v1981_v34 = vrot.slane %v4005_v29, %v5286_v52  ;;  %v1997_v7 = vrot.slane %v4007_v45, %v5286_v52  ;;  %v2013_v4 = vrot.slane %v4009_v48, %v5286_v52  ;;  %v2029_v38 = vrot.slane %v4011_v62, %v5286_v52  ;;  %4348 = vmatpush3.bf16.msra.mxu1 %v5641_v47 }
 0x4c3   : > { %v2818_v26 = vmul.f32 %v4562_v46, %v5670_v36  ;;  %v1662_v49 = vrot.slane %v1654_v63, %v5292_v60  ;;  %v1669_v50 = vrot.slane %v1655_v61, %v5292_v60  ;;  %v1678_v44 = vrot.slane %v1670_v2, %v5292_v60  ;;  %4237 = vmatprep.mubr.msk.f32.mxu1 %vm4832_vm0, %v4833_v1 }
 0x4c4   : > { %v1685_v51 = vrot.slane %v1671_v54, %v5292_v60  ;;  %4349 = vmatprep.subr.bf16.mxu1 %v4831_v0  ;;  %v2046_v36 = vcombine.low %v1981_v34, %v1997_v7  ;;  %v2078_v17 = vcombine.low %v2013_v4, %v2029_v38  ;;  %v2047_v16 = vcombine.high %v1981_v34, %v1997_v7 }
 0x4c5   : > { %v3997_v55 = vcombine.low %v1662_v49, %v1669_v50  ;;  %v3999_v9 = vcombine.high %v1662_v49, %v1669_v50  ;;  %4238 = vmatmul.mubr.msk.f32.vlgmr.msra.gmra.mrb[14].mxu1 %vm2735_vm4, %v2818_v26  ;;  %v2079_v30 = vcombine.high %v2013_v4, %v2029_v38 }
 0x4c6   : > { %v4001_v47 = vcombine.low %v1678_v44, %v1685_v51  ;;  %v4003_v10 = vcombine.high %v1678_v44, %v1685_v51  ;;  %4351 = vmatpush3.bf16.msra.mxu1 %v5643_v53  ;;  %4244 = vmatprep.mubr.msk.f32.mxu1 %vm4832_vm0, %v4833_v1  ;;  %v2054_v19 = vrot.slane %v2046_v36, %v5292_v60 }
 0x4c7   : > { %v1845_v11 = vrot.slane %v3997_v55, %v5286_v52  ;;  %v1861_v12 = vrot.slane %v3999_v9, %v5286_v52  ;;  %4355 = vmatprep.subr.bf16.mxu1 %v4831_v0  ;;  %v2086_v53 = vrot.slane %v2078_v17, %v5292_v60  ;;  %v2061_v56 = vrot.slane %v2047_v16, %v5292_v60 }
 0x4c8   : > { %v1877_v13 = vrot.slane %v4001_v47, %v5286_v52  ;;  %v1893_v14 = vrot.slane %v4003_v10, %v5286_v52  ;;  %v2093_v57 = vrot.slane %v2079_v30, %v5292_v60 }
 0x4c9   : > { %v1910_v18 = vcombine.low %v1845_v11, %v1861_v12  ;;  %v2098_v21 = vcombine.low %v2054_v19, %v2086_v53  ;;  %v1911_v24 = vcombine.high %v1845_v11, %v1861_v12  ;;  %v2099_v42 = vcombine.high %v2054_v19, %v2086_v53 }
 0x4ca   : > { %v1942_v39 = vcombine.low %v1877_v13, %v1893_v14  ;;  %v1943_v28 = vcombine.high %v1877_v13, %v1893_v14  ;;  %v2101_v62 = vcombine.high %v2061_v56, %v2093_v57  ;;  %v2100_v2 = vcombine.low %v2061_v56, %v2093_v57 }
 0x4cb   : > { %v1918_v23 = vrot.slane %v1910_v18, %v5292_v60  ;;  %v1925_v40 = vrot.slane %v1911_v24, %v5292_v60 }
 0x4cc   : > { %v1950_v31 = vrot.slane %v1942_v39, %v5292_v60  ;;  %v1957_v41 = vrot.slane %v1943_v28, %v5292_v60 }
 0x4ce   : > { %v1962_v5 = vcombine.low %v1918_v23, %v1950_v31  ;;  %v1963_v35 = vcombine.high %v1918_v23, %v1950_v31  ;;  %v1965_v29 = vcombine.high %v1925_v40, %v1957_v41  ;;  %v1964_v45 = vcombine.low %v1925_v40, %v1957_v41 }
 0x4d0   : > { %v4353_v43 = vpack.c.bf16 %v2098_v21, %v1962_v5  ;;  %v4356_v59 = vpack.c.bf16 %v2099_v42, %v1963_v35  ;;  %v4359_v46 = vpack.c.bf16 %v2100_v2, %v1964_v45 }
 0x4d2   : > { %4354 = vmatpush3.bf16.msra.mxu0 %v4353_v43 }
 0x4d3   : > { %4358 = vmatprep.subr.bf16.mxu0 %v4831_v0 }
 0x4e8   : > { %v2795_v6 = vpop.xlane.xlu0 %2794 }
 0x4e9   : > { %4563 = vrcp.f32 %v2795_v6 }
 0x4ec   : > { %v2801_v15 = vpop.xlane.xlu1 %2800  ;;  %v2798_v22 = vpop.xlane.xlu0 %2797 }
 0x4ed   : > { %4565 = vrcp.f32 %v2801_v15 }
 0x4ee   : > { %4567 = vrcp.f32 %v2798_v22 }
 0x4f0   : > { %v2804_v27 = vpop.xlane.xlu1 %2803  ;;  %v2807_v33 = vpop.xlane.xlu0 %2806 }
 0x4f1   : > { %4569 = vrcp.f32 %v2804_v27 }
 0x4f2   : > { %4571 = vrcp.f32 %v2807_v33 }
 0x4f3   : > { %v4564_v32 = vpop.eup %4563 }
 0x4f4   : > { %v2819_v58 = vmul.f32 %v4564_v32, %v5678_v3  ;;  %v4362_v3 = vpack.c.bf16 %v2101_v62, %v1965_v29 }
 0x4f6   : > { %4245 = vmatmul.mubr.msk.f32.vlgmr.msra.gmra.mrb[16].mxu1 %vm2735_vm4, %v2819_v58 }
 0x4f7   : > { %v4566_v48 = vpop.eup %4565  ;;  %4357 = vmatpush3.bf16.msra.mxu1 %v4356_v59  ;;  %4258 = vmatprep.mubr.msk.f32.mxu1 %vm4832_vm0, %v4833_v1 }
 0x4f8   : > { %v4568_v63 = vpop.eup %4567  ;;  %v2821_v61 = vmul.f32 %v4566_v48, %v5684_v25  ;;  %4361 = vmatprep.subr.bf16.mxu1 %v4831_v0 }
 0x4f9   : > { %v2820_v54 = vmul.f32 %v4568_v63, %v5680_v8 }
 0x4fa   : > { %4259 = vmatmul.mubr.msk.f32.vlgmr.msra.gmra.mrb[18].mxu1 %vm2735_vm4, %v2821_v61 }
 0x4fb   : > { %v4570_v34 = vpop.eup %4569  ;;  %4252 = vmatmul.mubr.msk.f32.vlgmr.msra.gmra.mrb[12].mxu0 %vm2735_vm4, %v2820_v54  ;;  %4363 = vmatpush3.bf16.msra.mxu1 %v4362_v3 }
 0x4fc   : > { %v4572_v7 = vpop.eup %4571  ;;  %v2822_v4 = vmul.f32 %v4570_v34, %v5686_v20  ;;  %4360 = vmatpush3.bf16.msra.mxu0 %v4359_v46  ;;  %4265 = vmatprep.mubr.msk.f32.mxu0 %vm4832_vm0, %v4833_v1 }
 0x4fd   : > { %v2823_v25 = vmul.f32 %v4572_v7, %v5692_v37  ;;  %4272 = vmatprep.mubr.msk.f32.mxu1 %vm4832_vm0, %v4833_v1  ;;  %4364 = vmatprep.subr.bf16.mxu0 %v4831_v0 }
 0x4ff   : > { %4266 = vmatmul.mubr.msk.f32.vlgmr.msra.gmra.mrb[14].mxu0 %vm2735_vm4, %v2822_v4  ;;  %4273 = vmatmul.mubr.msk.f32.vlgmr.msra.gmra.mrb[20].mxu1 %vm2735_vm4, %v2823_v25 }
 0x500   : > { %4283 = vmatprep.mubr.msk.f32.mxu0 %vm4832_vm0, %v4833_v1 }
 0x590   : > { %v2893_v8 = vpop.f32.mrb[10].mxu1 }
 0x591   : > { %v4225_v20 = vpop.f32.mrb[11].mxu1 }
 0x594   : > { %v2966_v38 = vpop.f32.mrb[12].mxu1 }
 0x595   : > { %v4232_v26 = vpop.f32.mrb[13].mxu1 }
 0x596   : > { %v3720_v26 = vld [vmem:[#allocation8] sm:$0xff] }
 0x598   : > { %v3039_v49 = vpop.f32.mrb[14].mxu1 }
 0x599   : > { %v3408_v50 = vcombine.low %v2893_v8, %v3039_v49  ;;  %v3409_v44 = vcombine.high %v2893_v8, %v3039_v49  ;;  %v4239_v37 = vpop.f32.mrb[15].mxu1  ;;  %v3721_v49 = vld [vmem:[#allocation8 + $0x8] sm:$0xff] }
 0x59b   : > { %v3416_v10 = vrot.slane %v3408_v50, %v5286_v52  ;;  %v3423_v36 = vrot.slane %v3409_v44, %v5286_v52 }
 0x5c9   : > { %v3112_v51 = vpop.f32.mrb[16].mxu1 }
 0x5ca   : > { %v3424_v55 = vcombine.low %v2966_v38, %v3112_v51  ;;  %v3425_v9 = vcombine.high %v2966_v38, %v3112_v51  ;;  %v4246_v47 = vpop.f32.mrb[17].mxu1 }
 0x5cc   : > { %v3432_v17 = vrot.slane %v3424_v55, %v5286_v52  ;;  %v3439_v1 = vrot.slane %v3425_v9, %v5286_v52 }
 0x5cd   : > { %v3258_v11 = vpop.f32.mrb[18].mxu1 }
 0x5ce   : > { %v3472_v12 = vcombine.low %v3416_v10, %v3432_v17  ;;  %v3473_v13 = vcombine.high %v3416_v10, %v3432_v17  ;;  %v3488_v14 = vcombine.low %v3423_v36, %v3439_v1  ;;  %v3489_v18 = vcombine.high %v3423_v36, %v3439_v1  ;;  %v3185_v39 = vpop.f32.mrb[12].mxu0  ;;  %v4260_v19 = vpop.f32.mrb[19].mxu1  ;;  %v3722_v36 = vld [vmem:[#allocation8 + $0x10] sm:$0xff]  ;;  %v3723_v17 = vld [vmem:[#allocation8 + $0x18] sm:$0xff] }
 0x5cf   : > { %v4253_v53 = vpop.f32.mrb[13].mxu0  ;;  %v4365_v1 = vpack.c.bf16 %v3721_v49, %v3720_v26 }
 0x5d0   : > { %v3480_v23 = vrot.slane %v3472_v12, %v5292_v60  ;;  %v3487_v31 = vrot.slane %v3473_v13, %v5292_v60  ;;  %v3496_v5 = vrot.slane %v3488_v14, %v5292_v60  ;;  %v3503_v21 = vrot.slane %v3489_v18, %v5292_v60 }
 0x5d1   : > { %4366 = vmatpush3.bf16.msra.mxu0 %v4365_v1  ;;  %v4368_v18 = vpack.c.bf16 %v3723_v17, %v3722_v36 }
 0x5d2   : > { %v4044_v43 = vcombine.low %v3480_v23, %v3487_v31  ;;  %v4046_v6 = vcombine.high %v3480_v23, %v3487_v31  ;;  %v4048_v15 = vcombine.low %v3496_v5, %v3503_v21  ;;  %v4050_v22 = vcombine.high %v3496_v5, %v3503_v21  ;;  %v3331_v24 = vpop.f32.mrb[14].mxu0  ;;  %v3404_v28 = vpop.f32.mrb[20].mxu1  ;;  %4367 = vmatprep.subr.bf16.mxu0 %v4831_v0 }
 0x5d3   : > { %v3440_v16 = vcombine.low %v3185_v39, %v3331_v24  ;;  %v3441_v30 = vcombine.high %v3185_v39, %v3331_v24  ;;  %v3456_v27 = vcombine.low %v3258_v11, %v3404_v28  ;;  %v3457_v33 = vcombine.high %v3258_v11, %v3404_v28  ;;  %v4267_v35 = vpop.f32.mrb[15].mxu0  ;;  %v4274_v40 = vpop.f32.mrb[21].mxu1 }
 0x5d4   : > { %v3552_v41 = vrot.slane %v4044_v43, %v5286_v52  ;;  %v3568_v32 = vrot.slane %v4046_v6, %v5286_v52  ;;  %v3584_v42 = vrot.slane %v4048_v15, %v5286_v52  ;;  %v3600_v56 = vrot.slane %v4050_v22, %v5286_v52 }
 0x5d5   : > { %v3448_v57 = vrot.slane %v3440_v16, %v5286_v52  ;;  %v3455_v58 = vrot.slane %v3441_v30, %v5286_v52  ;;  %v3464_v59 = vrot.slane %v3456_v27, %v5286_v52  ;;  %v3471_v29 = vrot.slane %v3457_v33, %v5286_v52  ;;  %4369 = vmatpush3.bf16.msra.mxu0 %v4368_v18 }
 0x5d6   : > { %v3609_v45 = vcombine.high %v3552_v41, %v3568_v32  ;;  %v3641_v48 = vcombine.high %v3584_v42, %v3600_v56  ;;  %v3608_v62 = vcombine.low %v3552_v41, %v3568_v32  ;;  %v3640_v63 = vcombine.low %v3584_v42, %v3600_v56 }
 0x5d7   : > { %v3504_v61 = vcombine.low %v3448_v57, %v3464_v59  ;;  %v3505_v2 = vcombine.high %v3448_v57, %v3464_v59  ;;  %v3520_v54 = vcombine.low %v3455_v58, %v3471_v29  ;;  %v3521_v3 = vcombine.high %v3455_v58, %v3471_v29  ;;  %v4052_v57 = vld [vmem:[%s5940_s18] ss:$0 sm:$0xff] }
 0x5d8   : > { %v3623_v46 = vrot.slane %v3609_v45, %v5292_v60  ;;  %v3655_v34 = vrot.slane %v3641_v48, %v5292_v60  ;;  %v3616_v7 = vrot.slane %v3608_v62, %v5292_v60  ;;  %v3648_v4 = vrot.slane %v3640_v63, %v5292_v60 }
 0x5d9   : > { %v3512_v25 = vrot.slane %v3504_v61, %v5292_v60  ;;  %v3519_v8 = vrot.slane %v3505_v2, %v5292_v60  ;;  %v3528_v20 = vrot.slane %v3520_v54, %v5292_v60  ;;  %v3535_v38 = vrot.slane %v3521_v3, %v5292_v60 }
 0x5da   : > { %v3674_v50 = vcombine.low %v3623_v46, %v3655_v34  ;;  %v3673_v44 = vcombine.high %v3616_v7, %v3648_v4  ;;  %v3675_v37 = vcombine.high %v3623_v46, %v3655_v34  ;;  %v3672_v51 = vcombine.low %v3616_v7, %v3648_v4 }
 0x5db   : > { %v4045_v55 = vcombine.low %v3512_v25, %v3519_v8  ;;  %v4047_v9 = vcombine.high %v3512_v25, %v3519_v8  ;;  %v4049_v47 = vcombine.low %v3528_v20, %v3535_v38  ;;  %v4051_v10 = vcombine.high %v3528_v20, %v3535_v38 }
 0x5dc   : > { %3685 = vrot.lane.b32.xlu1 %v3674_v50, %s4845_s10  ;;  %3681 = vrot.lane.b32.xlu0 %v3673_v44, %s4846_s15 }
 0x5dd   : > { %v3559_v11 = vrot.slane %v4045_v55, %v5286_v52  ;;  %v3575_v12 = vrot.slane %v4047_v9, %v5286_v52  ;;  %v3591_v13 = vrot.slane %v4049_v47, %v5286_v52  ;;  %v3607_v14 = vrot.slane %v4051_v10, %v5286_v52 }
 0x5df   : > { %v3624_v39 = vcombine.low %v3559_v11, %v3575_v12  ;;  %v3656_v19 = vcombine.low %v3591_v13, %v3607_v14  ;;  %v3625_v53 = vcombine.high %v3559_v11, %v3575_v12  ;;  %v3657_v23 = vcombine.high %v3591_v13, %v3607_v14 }
 0x5e0   : > { %3689 = vrot.lane.b32.xlu1 %v3675_v37, %s4847_s12  ;;  %s5941_s12 = sld [smem:[#allocation25_spill]] }
 0x5e1   : > { %v3632_v31 = vrot.slane %v3624_v39, %v5292_v60  ;;  %v3664_v5 = vrot.slane %v3656_v19, %v5292_v60  ;;  %v3639_v21 = vrot.slane %v3625_v53, %v5292_v60  ;;  %v3671_v43 = vrot.slane %v3657_v23, %v5292_v60 }
 0x5e3   : > { %v3677_v52 = vcombine.high %v3632_v31, %v3664_v5  ;;  %v3676_v6 = vcombine.low %v3632_v31, %v3664_v5  ;;  %v3679_v15 = vcombine.high %v3639_v21, %v3671_v43  ;;  %v3678_v22 = vcombine.low %v3639_v21, %v3671_v43 }
 0x5e5   : > { %3697 = vrot.lane.b32.xlu1 %v3677_v52, %s4848_s29  ;;  %3693 = vrot.lane.b32.xlu0 %v3676_v6, %s4849_s21  ;;  %s4689_s21 = scalar_lea.vmem %s5825_s2, 128 }
 0x5e6   : > { %s5823_s29 = scalar_lea.hbm %s5941_s12, %s4056_s6  ;;  %p4690_p0 = scmp.ne.s32.totalorder %s5825_s2, %s4689_s21 }
 0x5e8   : > { %p4691_p3 = pnand %p4690_p0, %p5942_p2 }
 0x5e9   : > { %3705 = vrot.lane.b32.xlu1 %v3679_v15, %s4850_s8  ;;  %3701 = vrot.lane.b32.xlu0 %v3678_v22, %s4851_s9  ;;  %s4693_s8 = sshll.u32 %s4852_s13, 4  ;;  %s4694_s8 = int_to_ptr.vmem [resolvable:$false] %s4693_s8 }
 0x5ea   : > { %p4692_p11 = pneg %p4691_p3  ;;  %s4695_s9 = scalar_lea.vmem %s4694_s8, 256 }
 0x5eb   : > { %p4696_p7 = scmp.lt.s32.totalorder %s5825_s2, %s4694_s8  ;;  %p4697_p12 = scmp.lt.s32.totalorder %s4695_s9, %s4689_s21 }
 0x5ed   : > { %p4698_p13 = por %p4697_p12, %p4696_p7 }
 0x5ef   : > { %p4699_p6 = pnand %p4698_p13, %p4692_p11 }
 0x64e   : > { %v3686_v0 = vpop.permute.xlu1 %3685  ;;  %v3682_v24 = vpop.permute.xlu0 %3681 }
 0x64f   : > { %v3708_v16 = vsel %vm2102_vm2, %v3672_v51, %v3682_v24 }
 0x650   : > { %v3710_v60 = vsel %vm3709_vm5, %v3708_v16, %v3686_v0 }
 0x652   : > { %v3690_v28 = vpop.permute.xlu1 %3689 }
 0x653   : > { %v3712_v30 = vsel %vm3711_vm6, %v3710_v60, %v3690_v28 }
 0x657   : > { %v3698_v27 = vpop.permute.xlu1 %3697  ;;  %v3694_v33 = vpop.permute.xlu0 %3693 }
 0x658   : > { %v3713_v35 = vsel %vm2735_vm4, %v3712_v30, %v3694_v33 }
 0x659   : > { %v3715_v41 = vsel %vm3714_vm7, %v3713_v35, %v3698_v27 }
 0x65b   : > { %v3706_v40 = vpop.permute.xlu1 %3705  ;;  %v3702_v32 = vpop.permute.xlu0 %3701 }
 0x65c   : > { %v3717_v42 = vsel %vm3716_vm8, %v3715_v41, %v3702_v32 }
 0x65d   : > { %v3719_v56 = vsel %vm3718_vm9, %v3717_v42, %v3706_v40 }
 0x65e   : > { %4284 = vmatmul.mubr.msk.f32.vlgmr.msra.gmra.mrb[16].mxu0 %vm368_vm1, %v3719_v56 }
 0x731   : > { %v3800_v58 = vpop.f32.mrb[16].mxu0 }
 0x732   : > { %v3801_v59 = vadd.f32 %v4052_v57, %v3800_v58  ;;  %v4285_v29 = vpop.f32.mrb[17].mxu0 }
 0x734   : > { %3804 = vst.msk [vmem:[%s353_s5] sm:$0xff] %vm368_vm1, %v3801_v59 }
 0x735   : > { %4702 = shalt.err (!%p4699_p6)
}
 0x736   : > { %s4703_s16 = scalar_lea.hbm %s5823_s29, 128  ;;  %s4707_s19 = scalar_lea.hbm %s5941_s12, 512 }
 0x737   : > { %p4704_p1 = scmp.ne.s32.totalorder %s5823_s29, %s4703_s16  ;;  %p4708_p4 = scmp.lt.u32.totalorder %s5823_s29, %s5941_s12 }
 0x738   : > { %p4709_p10 = scmp.lt.u32.totalorder %s4707_s19, %s4703_s16  ;;  %p4711_p0 = scmp.lt.u32.totalorder %s4703_s16, %s5823_s29 }
 0x739   : > { %p4705_p5 = pnand %p4704_p1, %p5942_p2 }
 0x73a   : > { %p4710_p8 = por %p4709_p10, %p4708_p4 }
 0x73b   : > { %p4706_p9 = pneg %p4705_p5 }
 0x73c   : > { %p4712_p3 = por %p4711_p0, %p4710_p8 }
 0x73e   : > { %p4713_p11 = pnand %p4712_p3, %p4706_p9 }
 0x740   : > { %4716 = shalt.err (!%p4713_p11)
}
 0x741   : > { %4382 = dma.vmem_to_hbm [thread:$0]  (%p5942_p2), %s5825_s2, 128, %s5823_s29, %s3806_s28  }
 0x742 PF: > { %p4407_p7 = scmp.ge.s32.totalorder %s4823_s7, 2  ;;  %s3833_s18 = sand.u32 1, %s4795_s24  }
 0x743   : > { %p5943_p12 = scmp.ne.s32.totalorder %s5925_s14, 0  ;;  %s3834_s6 = scalar_lea.sflag [#allocation4], %s3833_s18 }
 0x745   : > { %p4399_p13 = pnand %p4407_p7, %p5943_p12 }
 0x747   : > { %4778 = dma.done.wait (!%p4399_p13), %s3834_s6, 128  }
 0x748   : > { %4780 = vsyncadd (!%p4399_p13), %s3834_s6, 4294967168  ;;  %s26_s7 = sadd.s32 1, %s4823_s7   ;;  %s5944_s17 = sld [smem:[#allocation20_spill]] }
 0x749   : > { %p23_p6 = scmp.ge.s32.totalorder %s26_s7, 6   ;;  %s5945_s5 = sld [smem:[#allocation21_spill]] }
 0x74a   : > { %s5946_s27 = sld [smem:[#allocation17_spill]]  ;;  %s5947_s29 = sld [smem:[#allocation18_spill]] }
 0x74b   : > { %s5948_s2 = sld [smem:[#allocation19_spill]]  ;;  %s5949_s21 = smov %s4787_s22 }
 0x74c   : > { %s5950_s22 = smov %s4791_s23  ;;  %s5952_s24 = smov %s4799_s25 }
 0x74d   : > { %s5953_s25 = smov %s4803_s26  ;;  %s5955_s28 = smov %s4819_s30 }
 0x74e   : > { %s5951_s23 = smov %s5944_s17  ;;  %25 = sbr.rel (!%p23_p6) target bundleno = 17 (0x11), region = 110 }
 0x74f   : > { %s5954_s26 = smov %s5945_s5 }
 0x751   : > { %s5956_s30 = smov %s5948_s2 }
 0x755   :  { %3839 = vsyncpa [#allocation3], 1 }
 0x756   :  { %3841 = vsyncpa [#allocation3 + $0x1], 1 }
 0x757   :  { %3842 = vsyncpa [#allocation6], 1 }
 0x758   :  { %3844 = vsyncpa [#allocation6 + $0x1], 1 }
 0x759   :  { %3845 = vsyncpa [#allocation9], 1 }
 0x75a   :  { %3846 = vsyncpa [#allocation4], 1 }
 0x75b   :  { %3848 = vsyncpa [#allocation4 + $0x1], 1 }

// kernel: tpu_custom_call.1
= control target key start
LH: loop header
LB: loop body
LE: loop exit
PB: predicated region body
PF: predicated region fallthrough
CT: control target
= control target key end

     0   :  { %s5887_s0 = inlined_call_operand.hbm [shape: f32[2,16,32], index: 0, kind: input, shape index: {}]   ;;  %s5888_s1 = inlined_call_operand.hbm [shape: f32[2,16,32], index: 1, kind: input, shape index: {}]   ;;  %s5889_s2 = inlined_call_operand.hbm [shape: f32[32,96], index: 2, kind: input, shape index: {}]   ;;  %s5890_s3 = inlined_call_operand.vmem [shape: f32[1,96], index: 3, kind: input, shape index: {}]   ;;  %s5891_s4 = inlined_call_operand.hbm [shape: f32[32,32], index: 4, kind: input, shape index: {}]   ;;  %s5892_s5 = inlined_call_operand.vmem [shape: f32[1,32], index: 5, kind: input, shape index: {}]   ;;  %s5893_s6 = inlined_call_operand.hbm [shape: f32[2,16,32], index: 6, kind: output, shape index: {}]  }
   0x1   :  { %5905 = sst [smem:[#allocation22_spill]] %s5889_s2 }
   0x2   :  { %5906 = sst [smem:[#allocation23_spill]] %s5891_s4 }
   0x3   :  { %5907 = sst [smem:[#allocation24_spill]] %s5892_s5 }
   0x4   :  { %5908 = sst [smem:[#allocation25_spill]] %s5893_s6 }
   0x5   :  { %11 = vsyncpa [#allocation3], 0 }
   0x6   :  { %13 = vsyncpa [#allocation3 + $0x1], 0 }
   0x7   :  { %14 = vsyncpa [#allocation6], 0 }
   0x8   :  { %16 = vsyncpa [#allocation6 + $0x1], 0 }
   0x9   :  { %17 = vsyncpa [#allocation9], 0 }
   0xa   :  { %18 = vsyncpa [#allocation4], 0 }
   0xb   :  { %20 = vsyncpa [#allocation4 + $0x1], 0  ;;  %s4888_s21 = smov 0   ;;  %s4890_s22 = smov 0  }
   0xc   :  { %s4892_s23 = smov 0   ;;  %s4894_s24 = smov 0  }
   0xd   :  { %s4896_s25 = smov 0   ;;  %s4898_s26 = smov 0  }
   0xe   :  { %s4900_s27 = smov 0   ;;  %s4902_s28 = smov 0  }
   0xf   :  { %s4904_s29 = smov 0   ;;  %s4906_s30 = smov 0  }
  0x10   :  { %s4908_s7 = smov 0  }
  0x11 LB: > { %5909 = sst [smem:[#allocation16_spill]] %s4807_s27  ;;  %s4942_s8 = sadd.s32 4294967295, %s4823_s7   ;;  %s4823_s7 = sphi %s4908_s7, %s26_s7   ;;  %s4819_s30 = sphi %s4906_s30, %s5956_s30   ;;  %s4815_s29 = sphi %s4904_s29, %s5947_s29   ;;  %s4811_s28 = sphi %s4902_s28, %s5955_s28   ;;  %s4807_s27 = sphi %s4900_s27, %s5946_s27   ;;  %s4803_s26 = sphi %s4898_s26, %s5954_s26   ;;  %s4799_s25 = sphi %s4896_s25, %s5953_s25   ;;  %s4795_s24 = sphi %s4894_s24, %s5952_s24   ;;  %s4791_s23 = sphi %s4892_s23, %s5951_s23   ;;  %s4787_s22 = sphi %s4890_s22, %s5950_s22   ;;  %s4783_s21 = sphi %s4888_s21, %s5949_s21  }
  0x12   : > { %5910 = sst [smem:[#allocation17_spill]] %s4815_s29  ;;  %p86_p0 = scmp.ne.s32.totalorder %s4787_s22, %s4783_s21 }
  0x13   : > { %p5894_p1 = scmp.eq.s32.totalorder %s4942_s8, 0  ;;  %p3950_p2 = scmp.ge.s32.totalorder %s4823_s7, 1 }
  0x14   : > { %p209_p3 = scmp.lt.s32.totalorder %s4823_s7, 5  ;;  %s4825_s11 = smov [#allocation7]  }
  0x15   : > { %p4950_p4 = por %p86_p0, %p5894_p1  ;;  %s221_s12 = sshll.u32 %s4825_s11, 4  ;;  %s222_s12 = int_to_ptr.vmem [resolvable:$true] %s221_s12 }
  0x16   : > { %p4954_p5 = pnand %p3950_p2, %p209_p3  ;;  %s4826_s14 = smov [#allocation8]  }
  0x17   : > { %s5911_s9 = scalar_select %p4950_p4, 1, 0 }
  0x18   : > { %s5912_s10 = scalar_select %p4954_p5, 1, 0 }
  0x19   : > { %p4384_p6 = pneg %p4954_p5  ;;  %s237_s15 = sshll.u32 %s4826_s14, 4  ;;  %s4966_s15 = int_to_ptr.vmem [resolvable:$true] %s237_s15 }
  0x1a   : > { %s5914_s2 = sld [smem:[#allocation22_spill]] }
  0x1b   : > { %p4962_p7 = pnand %p4384_p6, %p5894_p1 }
  0x1d   : > { %p4575_p9 = pneg %p4962_p7 }
  0x20   : > { %s4573_s18 = scalar_lea.hbm %s5914_s2, 512 }
  0x21   : > { %p4574_p8 = scmp.ne.s32.totalorder %s5914_s2, %s4573_s18  ;;  %p4580_p12 = scmp.lt.u32.totalorder %s4573_s18, %s5914_s2 }
  0x23   : > { %p4576_p10 = pnand %p4575_p9, %p4574_p8 }
  0x25   : > { %p4577_p11 = pneg %p4576_p10 }
  0x27   : > { %p4582_p13 = pnand %p4580_p12, %p4577_p11 }
  0x29   : > { %4585 = shalt.err (!%p4582_p13)
}
  0x2a   : > { %s4586_s14 = scalar_lea.vmem %s222_s12, 512  ;;  %p4594_p6 = scmp.lt.s32.totalorder %s222_s12, %s222_s12 }
  0x2b   : > { %p4587_p0 = scmp.ne.s32.totalorder %s222_s12, %s4586_s14  ;;  %p4595_p1 = scmp.lt.s32.totalorder %s4586_s14, %s4586_s14 }
  0x2d   : > { %p4589_p2 = pnand %p4587_p0, %p4575_p9  ;;  %p4596_p4 = por %p4595_p1, %p4594_p6 }
  0x2f   : > { %p4590_p3 = pneg %p4589_p2 }
  0x31   : > { %p4597_p5 = pnand %p4596_p4, %p4590_p3 }
  0x33   : > { %4600 = shalt.err (!%p4597_p5)
}
  0x34   : > { %s5898_s16 = smov 128   ;;  %s5899_s17 = smov 8  }
  0x35   : > { %4387 = dma.hbm_to_vmem [thread:$0]  (!%p4962_p7), %s5914_s2, 512, %s222_s12, [#allocation6], %s5898_s16, %s5898_s16, %s5899_s17  }
  0x36   : > { %s5915_s4 = sld [smem:[#allocation23_spill]] }
  0x3c   : > { %s4601_s11 = scalar_lea.hbm %s5915_s4, 512 }
  0x3d   : > { %p4602_p1 = scmp.ne.s32.totalorder %s5915_s4, %s4601_s11  ;;  %p4608_p8 = scmp.lt.u32.totalorder %s4601_s11, %s5915_s4 }
  0x3f   : > { %p4604_p4 = pnand %p4602_p1, %p4575_p9 }
  0x41   : > { %p4605_p5 = pneg %p4604_p4 }
  0x43   : > { %p4610_p10 = pnand %p4608_p8, %p4605_p5 }
  0x45   : > { %4613 = shalt.err (!%p4610_p10)
}
  0x46   : > { %s4614_s12 = scalar_lea.vmem %s4966_s15, 512  ;;  %p4622_p0 = scmp.lt.s32.totalorder %s4966_s15, %s4966_s15 }
  0x47   : > { %p4615_p11 = scmp.ne.s32.totalorder %s4966_s15, %s4614_s12  ;;  %p4623_p2 = scmp.lt.s32.totalorder %s4614_s12, %s4614_s12 }
  0x49   : > { %p4617_p12 = pnand %p4615_p11, %p4575_p9  ;;  %p4624_p3 = por %p4623_p2, %p4622_p0 }
  0x4b   : > { %p4618_p13 = pneg %p4617_p12 }
  0x4d   : > { %p4625_p6 = pnand %p4624_p3, %p4618_p13 }
  0x4f   : > { %4628 = shalt.err (!%p4625_p6)
}
  0x50   : > { %4390 = dma.hbm_to_vmem [thread:$0]  (!%p4962_p7), %s5915_s4, 512, %s4966_s15, [#allocation9], %s5898_s16, %s5898_s16, %s5899_s17  }
  0x51   : > { %s3949_s27 = sadd.s32 4294967294, %s4823_s7   ;;  %s35_s13 = sadd.s32 1, %s4815_s29 }
  0x52   : > { %p36_p9 = scmp.ge.s32.totalorder %s35_s13, 2  ;;  %s38_s18 = sadd.s32 1, %s4819_s30 }
  0x53   : > { %s47_s19 = sadd.s32 1, %s4803_s26  ;;  %p54_p1 = scmp.ne.s32.totalorder %s4803_s26, %s4799_s25 }
  0x54   : > { %s5958_s13 = smov (%p36_p9, %s35_s13), 0  ;;  %s5960_s18 = smov (!%p36_p9, %s38_s18), %s4819_s30 }
  0x55   : > { %5916 = sst [smem:[#allocation18_spill]] %s5958_s13  ;;  %s43_s15 = ssub.s32 %s4815_s29, %s5958_s13 }
  0x56   : > { %p55_p7 = scmp.eq.s32.totalorder %s4823_s7, 0  ;;  %p40_p4 = scmp.ge.s32.totalorder %s5960_s18, 2 }
  0x57   : > { %p60_p5 = scmp.ne.s32.totalorder %s4799_s25, %s4795_s24  ;;  %s73_s21 = sadd.s32 1, %s4791_s23 }
  0x58   : > { %p5040_p8 = por %p55_p7, %p54_p1  ;;  %s5962_s18 = smov (%p40_p4, %s5960_s18), 0 }
  0x59   : > { %5918 = sst [smem:[#allocation19_spill]] %s5962_s18  ;;  %p5919_p10 = scmp.eq.s32.totalorder %s4942_s8, 0 }
  0x5a   : > { %p80_p12 = scmp.ne.s32.totalorder %s4791_s23, %s4787_s22  ;;  %s42_s14 = ssub.s32 %s4819_s30, %s5962_s18 }
  0x5b   : > { %p5052_p11 = por %p5919_p10, %p60_p5  ;;  %p196_p13 = scmp.eq.s32.totalorder %s4942_s8, 3 }
  0x5c   : > { %s44_s12 = sor.u32 %s43_s15, %s42_s14  ;;  %p71_p0 = scmp.eq.s32.totalorder %s42_s14, 0 }
  0x5d   : > { %s5920_s11 = scalar_select %p5052_p11, 1, 0 }
  0x5e   : > { %p45_p2 = scmp.eq.s32.totalorder %s44_s12, 0  ;;  %p5063_p3 = por %p80_p12, %p55_p7 }
  0x5f   : > { %s5068_s6 = scalar_select %p71_p0, %s4791_s23, %s73_s21  }
  0x60   : > { %s5071_s16 = scalar_select %p45_p2, %s4803_s26, %s47_s19  }
  0x61   : > { %5922 = sst [smem:[#allocation20_spill]] %s5068_s6  ;;  %p5076_p6 = por %p196_p13, %p54_p1 }
  0x62   : > { %5923 = sst [smem:[#allocation21_spill]] %s5071_s16  ;;  %p202_p9 = scmp.eq.s32.totalorder %s3949_s27, 3 }
  0x63   : > { %s5924_s17 = scalar_select %p5076_p6, 1, 0 }
  0x64   : > { %p4404_p4 = scmp.lt.s32.totalorder %s4823_s7, 4  ;;  %s254_s15 = sand.u32 1, %s4803_s26  }
  0x65   : > { %p5085_p7 = por %p202_p9, %p60_p5  ;;  %s3954_s21 = sshll.u32 %s254_s15, 3 }
  0x66   : > { %s3955_s12 = sshll.u32 %s4819_s30, 1  ;;  %s258_s4 = scalar_lea.vmem [#allocation2], %s3954_s21 }
  0x67   : > { %s5925_s14 = scalar_select %p5085_p7, 1, 0 }
  0x68   : > { %s263_s2 = sadd.s32 %s4815_s29, %s3955_s12  ;;  %s267_s18 = sshll.u32 %s258_s4, 4  ;;  %s5096_s18 = int_to_ptr.vmem [resolvable:$true] %s267_s18 }
  0x69   : > { %s3956_s19 = sshll.u32 %s263_s2, 7  ;;  %p5100_p1 = pnand %p4404_p4, %p5040_p8 }
  0x6a   : > { %s5094_s6 = scalar_lea.hbm %s5887_s0, %s3956_s19  ;;  %p5106_p5 = pnand %p4404_p4, %p5063_p3 }
  0x6b   : > { %s274_s4 = sand.u32 1, %s4823_s7   ;;  %s276_s16 = sand.u32 1, %s4791_s23  }
  0x6c   : > { %s255_s13 = scalar_lea.sflag [#allocation3], %s254_s15  ;;  %s4629_s21 = scalar_lea.hbm %s5094_s6, 128 }
  0x6d   : > { %p4630_p10 = scmp.ne.s32.totalorder %s5094_s6, %s4629_s21  ;;  %p4631_p12 = pneg %p5100_p1 }
  0x6e   : > { %s4634_s5 = scalar_lea.hbm %s5887_s0, 512  ;;  %p4635_p0 = scmp.lt.u32.totalorder %s5094_s6, %s5887_s0 }
  0x6f   : > { %p4632_p8 = pnand %p4631_p12, %p4630_p10  ;;  %p4636_p2 = scmp.lt.u32.totalorder %s4634_s5, %s4629_s21 }
  0x70   : > { %p4638_p9 = scmp.lt.u32.totalorder %s4629_s21, %s5094_s6 }
  0x71   : > { %p4633_p13 = pneg %p4632_p8  ;;  %p4637_p3 = por %p4636_p2, %p4635_p0 }
  0x73   : > { %p4639_p4 = por %p4638_p9, %p4637_p3 }
  0x75   : > { %p4640_p7 = pnand %p4639_p4, %p4633_p13 }
  0x77   : > { %4643 = shalt.err (!%p4640_p7)
}
  0x78   : > { %s4644_s15 = scalar_lea.vmem %s5096_s18, 128  ;;  %s4829_s20 = smov [#allocation2]  }
  0x79   : > { %p4645_p10 = scmp.ne.s32.totalorder %s5096_s18, %s4644_s15  ;;  %s4649_s12 = sshll.u32 %s4829_s20, 4  ;;  %s4650_s12 = int_to_ptr.vmem [resolvable:$false] %s4649_s12 }
  0x7a   : > { %s4651_s29 = scalar_lea.vmem %s4650_s12, 256  ;;  %p4652_p11 = scmp.lt.s32.totalorder %s5096_s18, %s4650_s12 }
  0x7b   : > { %p4647_p8 = pnand %p4645_p10, %p4631_p12  ;;  %p4653_p0 = scmp.lt.s32.totalorder %s4651_s29, %s4644_s15 }
  0x7d   : > { %p4648_p6 = pneg %p4647_p8  ;;  %p4654_p2 = por %p4653_p0, %p4652_p11 }
  0x7f   : > { %p4655_p3 = pnand %p4654_p2, %p4648_p6 }
  0x81   : > { %4658 = shalt.err (!%p4655_p3)
}
  0x82   : > { %4394 = dma.hbm_to_vmem [thread:$0]  (!%p5100_p1), %s5094_s6, 128, %s5096_s18, %s255_s13  }
  0x83   : > { %s3957_s21 = sshll.u32 %s276_s16, 4  ;;  %s4059_s5 = sshll.u32 %s4819_s30, 8 }
  0x84   : > { %s5143_s15 = scalar_lea.hbm %s5888_s1, %s4059_s5  ;;  %s278_s27 = scalar_lea.vmem [#allocation5], %s3957_s21 }
  0x85   : > { %s285_s12 = sshll.u32 %s278_s27, 4  ;;  %s5149_s29 = scalar_lea.sflag [#allocation6], %s274_s4  ;;  %s5145_s12 = int_to_ptr.vmem [resolvable:$true] %s285_s12 }
  0x86   : > { %s4659_s18 = scalar_lea.hbm %s5143_s15, 256  ;;  %p4661_p6 = pneg %p5106_p5 }
  0x87   : > { %p4660_p11 = scmp.ne.s32.totalorder %s5143_s15, %s4659_s18  ;;  %s4664_s13 = scalar_lea.hbm %s5888_s1, 512 }
  0x88   : > { %p4665_p12 = scmp.lt.u32.totalorder %s5143_s15, %s5888_s1  ;;  %p4666_p13 = scmp.lt.u32.totalorder %s4664_s13, %s4659_s18 }
  0x89   : > { %p4662_p7 = pnand %p4661_p6, %p4660_p11  ;;  %p4668_p4 = scmp.lt.u32.totalorder %s4659_s18, %s5143_s15 }
  0x8a   : > { %p4667_p9 = por %p4666_p13, %p4665_p12 }
  0x8b   : > { %p4663_p1 = pneg %p4662_p7 }
  0x8c   : > { %p4669_p10 = por %p4668_p4, %p4667_p9 }
  0x8e   : > { %p4670_p8 = pnand %p4669_p10, %p4663_p1 }
  0x90   : > { %4673 = shalt.err (!%p4670_p8)
}
  0x91   : > { %s4674_s4 = scalar_lea.vmem %s5145_s12, 256  ;;  %s4830_s19 = smov [#allocation5]  }
  0x92   : > { %p4675_p0 = scmp.ne.s32.totalorder %s5145_s12, %s4674_s4  ;;  %s4679_s20 = sshll.u32 %s4830_s19, 4  ;;  %s4680_s20 = int_to_ptr.vmem [resolvable:$false] %s4679_s20 }
  0x93   : > { %s4681_s27 = scalar_lea.vmem %s4680_s20, 512  ;;  %p4682_p11 = scmp.lt.s32.totalorder %s5145_s12, %s4680_s20 }
  0x94   : > { %p4677_p2 = pnand %p4675_p0, %p4661_p6  ;;  %p4683_p7 = scmp.lt.s32.totalorder %s4681_s27, %s4674_s4 }
  0x96   : > { %p4678_p3 = pneg %p4677_p2  ;;  %p4684_p12 = por %p4683_p7, %p4682_p11 }
  0x98   : > { %p4685_p13 = pnand %p4684_p12, %p4678_p3 }
  0x9a   : > { %4688 = shalt.err (!%p4685_p13)
}
  0x9b   : > { %s5928_s18 = smov 8   ;;  %s5929_s6 = smov 128  }
  0x9c   : > { %4397 = dma.hbm_to_vmem [thread:$0]  (!%p5106_p5), %s5143_s15, 256, %s5145_s12, %s5149_s29, %s5929_s6, %s5929_s6, %s5928_s18  }
  0x9d   : > { %p5930_p6 = scmp.ne.s32.totalorder %s5912_s10, 0 }
  0x9e   : > { %s5183_s16 = sand.u32 (!%p5930_p6), 1, %s4799_s25   ;;  %p5931_p1 = scmp.ne.s32.totalorder (!%p5930_p6), %s5920_s11, 0 }
  0x9f   : > { %297 = sbr.rel (%p5930_p6) target bundleno = 1858 (0x742), region = 44  ;;  %s3961_s13 = sshll.u32 (!%p5930_p6), %s5183_s16, 3 }
  0xa0   : > { %s300_s5 = scalar_lea.sflag (!%p5930_p6), [#allocation3], %s5183_s16  ;;  %s5189_s2 = scalar_lea.vmem (!%p5930_p6), [#allocation2], %s3961_s13 }
  0xa6   : > { %4762 = dma.done.wait (%p5931_p1), %s300_s5, 128  }
  0xa7   : > { %4764 = vsyncadd (%p5931_p1), %s300_s5, 4294967168  ;;  %s308_s10 = sand.u32 1, %s4942_s8   ;;  %s310_s15 = sand.u32 1, %s4787_s22  }
  0xa8   : > { %s5197_s12 = sshll.u32 %s310_s15, 4  ;;  %s309_s29 = scalar_lea.sflag [#allocation6], %s308_s10 }
  0xa9   : > { %s312_s21 = scalar_lea.vmem [#allocation5], %s5197_s12  ;;  %p5932_p5 = scmp.ne.s32.totalorder %s5911_s9, 0 }
  0xab   : > { %4766 = dma.done.wait (%p5932_p5), %s309_s29, 256  }
  0xac   : > { %4768 = vsyncadd (%p5932_p5), %s309_s29, 4294967040  ;;  %p5933_p9 = scmp.eq.s32.totalorder %s4942_s8, 0 }
  0xae   : > { %4770 = dma.done.wait (%p5933_p9), [#allocation6], 512   ;;  %p5934_p4 = pmov %p5933_p9 }
  0xb0   : > { %4772 = vsyncadd (%p5934_p4), [#allocation6], 4294966784  ;;  %p5935_p10 = pmov %p5934_p4 }
  0xb1   : > { %p5936_p8 = pmov %p5934_p4 }
  0xb2   : > { %4774 = dma.done.wait (%p5935_p10), [#allocation9], 512  }
  0xb3   : > { %4776 = vsyncadd (%p5936_p8), [#allocation9], 4294966784  ;;  %v4831_v0 = vmov 0.0|0.0   ;;  %vm4832_vm0 = vmmov 0   ;;  %v4833_v1 = vmov 0.0   ;;  %v357_v2 = vld [vmem:[#allocation7] sm:$0xff]  ;;  %v659_v43 = vlaneseq }
  0xb4   : > { %4286 = vmatprep.subr.bf16.mxu0 %v4831_v0  ;;  %4138 = vmatprep.mubr.msk.f32.mxu0 %vm4832_vm0, %v4833_v1  ;;  %v358_v3 = vld [vmem:[#allocation7 + $0x8] sm:$0xff]  ;;  %v359_v4 = vld [vmem:[#allocation7 + $0x10] sm:$0xff]  ;;  %v360_v7 = vld [vmem:[#allocation7 + $0x18] sm:$0xff]  ;;  %vm368_vm1 = vcmask 261120   ;;  %s4834_s11 = smov 96   ;;  %s4835_s4 = smov 64  }
  0xb5   : > { %v4521_v5 = vpack.i.bf16 %v358_v3, %v357_v2  ;;  %v4287_v6 = vpack.c.bf16 %v358_v3, %v357_v2  ;;  %v355_v8 = vld [vmem:[%s312_s21] sm:$0xff]  ;;  %v4526_v10 = vpack.i.bf16 %v360_v7, %v359_v4  ;;  %v4290_v11 = vpack.c.bf16 %v360_v7, %v359_v4  ;;  %v354_v12 = vld [vmem:[%s5189_s2] sm:$0xff]  ;;  %s4836_s19 = smov 120   ;;  %s4837_s20 = smov 124  }
  0xb6   : > { %4149 = vmatprep.mubr.msk.f32.mxu1 %vm368_vm1, %v355_v8  ;;  %v5221_v9 = vld [vmem:[%s5890_s3] ss:$0 sm:$0xff]  ;;  %v356_v29 = vld [vmem:[%s312_s21 + $0x8] sm:$0xff]  ;;  %s4838_s27 = smov 116   ;;  %s4839_s18 = smov 112   ;;  %v660_v46 = vshrl.u32 %v659_v43, 7 }
  0xb7   : > { %4522 = vrot.lane.b32.xlu0 %v4521_v5, %s4834_s11  ;;  %4288 = vmatpush3.bf16.msra.mxu0 %v4287_v6  ;;  %s4840_s6 = smov 108   ;;  %s4841_s5 = smov 104   ;;  %v4843_v41 = vmov 1983009808   ;;  %v4844_v48 = vmov 1934713408  }
  0xb8   : > { %4289 = vmatprep.subr.bf16.mxu0 %v4831_v0  ;;  %458 = vrot.lane.b32.xlu1 %v5221_v9, %s4834_s11  ;;  %s4842_s2 = smov 100   ;;  %v657_v42 = vunpack.c.l.s4 %v4843_v41  ;;  %v721_v49 = vunpack.c.l.s4 %v4844_v48  ;;  %vm2102_vm2 = vcmask 31744   ;;  %vm2735_vm4 = vcmask 130048   ;;  %s4845_s10 = smov 8  }
  0xb9   : > { %vm5478_vm3 = vmpackc.low %vm2102_vm2, %vm2102_vm2  ;;  %s4846_s15 = smov 4   ;;  %s4847_s12 = smov 12   ;;  %vm3709_vm5 = vcmask 64512   ;;  %vm3711_vm6 = vcmask 97280   ;;  %vm3714_vm7 = vcmask 162816   ;;  %vm3716_vm8 = vcmask 195584  }
  0xba   : > { %v658_v45 = vunpack.c.0.s8 %v657_v42  ;;  %v722_v55 = vunpack.c.0.s8 %v721_v49  ;;  %s4848_s29 = smov 20   ;;  %s4849_s21 = smov 16   ;;  %vm3718_vm9 = vcmask 228352  }
  0xbb   : > { %4527 = vrot.lane.b32.xlu0 %v4526_v10, %s4834_s11  ;;  %4291 = vmatpush3.bf16.msra.mxu0 %v4290_v11  ;;  %s4850_s8 = smov 28   ;;  %s4851_s9 = smov 24  }
  0xbc   : > { %4532 = vrot.lane.b32.xlu1 %v4521_v5, %s4835_s4  ;;  %v5286_v52 = vsub.s32 %v658_v45, %v660_v46  ;;  %v5292_v60 = vsub.s32 %v722_v55, %v660_v46  ;;  %s5939_s11 = sld [smem:[#allocation16_spill]]  ;;  %p5942_p2 = scmp.ne.s32.totalorder %s5924_s17, 0 }
  0xbe   : > { %4139 = vmatmul.mubr.msk.f32.vlgmr.msra.gmra.mrb[0].mxu0 %vm368_vm1, %v354_v12 }
  0xbf   : > { %4537 = vrot.lane.b32.xlu0 %v4526_v10, %s4835_s4  ;;  %4160 = vmatprep.mubr.msk.f32.mxu0 %vm368_vm1, %v355_v8 }
 0x129   : > { %v4523_v13 = vpop.permute.xlu0 %4522 }
 0x12a   : > { %v4525_v14 = vunpack.i.h.bf16 %v4523_v13  ;;  %v4524_v15 = vunpack.i.l.bf16 %v4523_v13  ;;  %v459_v16 = vpop.permute.xlu1 %458 }
 0x12c   : > { %v4292_v17 = vpack.c.bf16 %v4525_v14, %v4524_v15 }
 0x12d   : > { %v4528_v18 = vpop.permute.xlu0 %4527 }
 0x12e   : > { %v4530_v19 = vunpack.i.h.bf16 %v4528_v18  ;;  %v4529_v20 = vunpack.i.l.bf16 %v4528_v18  ;;  %4293 = vmatprep.subr.bf16.mxu1 %v4292_v17  ;;  %v4533_v21 = vpop.permute.xlu1 %4532 }
 0x12f   : > { %4295 = vmatpush3.bf16.msra.mxu1 %v4292_v17  ;;  %v4535_v22 = vunpack.i.h.bf16 %v4533_v21  ;;  %v4534_v23 = vunpack.i.l.bf16 %v4533_v21 }
 0x130   : > { %v4296_v24 = vpack.c.bf16 %v4530_v19, %v4529_v20 }
 0x131   : > { %v4300_v25 = vpack.c.bf16 %v4535_v22, %v4534_v23  ;;  %v4538_v26 = vpop.permute.xlu0 %4537 }
 0x132   : > { %4297 = vmatprep.subr.bf16.mxu1 %v4296_v24  ;;  %v4540_v27 = vunpack.i.h.bf16 %v4538_v26  ;;  %v4539_v28 = vunpack.i.l.bf16 %v4538_v26 }
 0x133   : > { %4299 = vmatpush3.bf16.msra.mxu1 %v4296_v24  ;;  %4301 = vmatprep.subr.bf16.mxu0 %v4300_v25 }
 0x134   : > { %v4304_v30 = vpack.c.bf16 %v4540_v27, %v4539_v28  ;;  %4303 = vmatpush3.bf16.msra.mxu0 %v4300_v25  ;;  %4308 = vmatprep.subr.bf16.mxu1 %v4831_v0 }
 0x136   : > { %4150 = vmatmul.mubr.msk.f32.vlgmr.msra.gmra.mrb[0].mxu1 %vm368_vm1, %v356_v29  ;;  %4305 = vmatprep.subr.bf16.mxu0 %v4304_v30 }
 0x137   : > { %4167 = vmatprep.mubr.msk.f32.mxu1 %vm4832_vm0, %v4833_v1 }
 0x138   : > { %4307 = vmatpush3.bf16.msra.mxu0 %v4304_v30 }
 0x139   : > { %4312 = vmatprep.subr.bf16.mxu0 %v4831_v0 }
 0x13b   : > { %4161 = vmatmul.mubr.msk.f32.vlgmr.msra.gmra.mrb[2].mxu0 %vm368_vm1, %v356_v29 }
 0x13c   : > { %4174 = vmatprep.mubr.msk.f32.mxu0 %vm4832_vm0, %v4833_v1 }
 0x191   : > { %v438_v31 = vpop.f32.mrb[0].mxu0 }
 0x192   : > { %v439_v32 = vadd.f32 %v5221_v9, %v438_v31  ;;  %v4140_v33 = vpop.f32.mrb[1].mxu0 }
 0x194   : > { %636 = vrot.lane.b32.xlu0 %v439_v32, %s4836_s19  ;;  %633 = vrot.lane.b32.xlu1 %v439_v32, %s4837_s20 }
 0x198   : > { %639 = vrot.lane.b32.xlu1 %v439_v32, %s4838_s27 }
 0x206   : > { %v634_v40 = vpop.permute.xlu1 %633  ;;  %v637_v47 = vpop.permute.xlu0 %636 }
 0x207   : > { %v654_v53 = vcombine.low %v439_v32, %v637_v47  ;;  %v655_v54 = vcombine.high %v439_v32, %v637_v47 }
 0x209   : > { %v4151_v34 = vpop.f32.mrb[0].mxu1  ;;  %v662_v58 = vrot.slane %v654_v53, %v5286_v52  ;;  %v669_v59 = vrot.slane %v655_v54, %v5286_v52 }
 0x20a   : > { %v5244_v35 = vadd.f32 %v4151_v34, %v459_v16  ;;  %v533_v36 = vpop.f32.mrb[1].mxu1  ;;  %v640_v44 = vpop.permute.xlu1 %639 }
 0x20b   : > { %v5246_v37 = vadd.f32 %v533_v36, %v459_v16  ;;  %v670_v50 = vcombine.low %v634_v40, %v640_v44  ;;  %v671_v51 = vcombine.high %v634_v40, %v640_v44 }
 0x20c   : > { %930 = vrot.lane.b32.xlu0 %v5244_v35, %s4837_s20 }
 0x20d   : > { %928 = vrot.lane.b32.xlu1 %v5246_v37, %s4837_s20  ;;  %v678_v56 = vrot.slane %v670_v50, %v5286_v52  ;;  %v685_v57 = vrot.slane %v671_v51, %v5286_v52 }
 0x20e   : > { %v5282_v38 = vpop.f32.mrb[2].mxu0 }
 0x20f   : > { %v5284_v39 = vpop.f32.mrb[3].mxu0  ;;  %v718_v61 = vcombine.low %v662_v58, %v678_v56  ;;  %v719_v62 = vcombine.high %v662_v58, %v678_v56  ;;  %v734_v63 = vcombine.low %v669_v59, %v685_v57  ;;  %v735_v2 = vcombine.high %v669_v59, %v685_v57 }
 0x210   : > { %936 = vrot.lane.b32.xlu0 %v5244_v35, %s4836_s19 }
 0x211   : > { %934 = vrot.lane.b32.xlu1 %v5246_v37, %s4836_s19  ;;  %v726_v4 = vrot.slane %v718_v61, %v5292_v60  ;;  %v733_v5 = vrot.slane %v719_v62, %v5292_v60  ;;  %v742_v7 = vrot.slane %v734_v63, %v5292_v60  ;;  %v749_v8 = vrot.slane %v735_v2, %v5292_v60 }
 0x213   : > { %v3972_v10 = vcombine.low %v726_v4, %v733_v5  ;;  %v3974_v11 = vcombine.high %v726_v4, %v733_v5  ;;  %v3976_v13 = vcombine.low %v742_v7, %v749_v8  ;;  %v3978_v14 = vcombine.high %v742_v7, %v749_v8 }
 0x214   : > { %942 = vrot.lane.b32.xlu0 %v5244_v35, %s4838_s27 }
 0x215   : > { %940 = vrot.lane.b32.xlu1 %v5246_v37, %s4838_s27  ;;  %v5303_v20 = vrot.slane %v3972_v10, %v5286_v52  ;;  %v5306_v21 = vrot.slane %v3974_v11, %v5286_v52  ;;  %v5309_v25 = vrot.slane %v3976_v13, %v5286_v52  ;;  %v5312_v26 = vrot.slane %v3978_v14, %v5286_v52 }
 0x218   : > { %946 = vrot.lane.b32.xlu0 %v5246_v37, %s4839_s18 }
 0x219   : > { %948 = vrot.lane.b32.xlu1 %v5244_v35, %s4839_s18 }
 0x21c   : > { %952 = vrot.lane.b32.xlu0 %v5246_v37, %s4840_s6 }
 0x21d   : > { %954 = vrot.lane.b32.xlu1 %v5244_v35, %s4840_s6 }
 0x220   : > { %958 = vrot.lane.b32.xlu0 %v5246_v37, %s4841_s5 }
 0x221   : > { %960 = vrot.lane.b32.xlu1 %v5244_v35, %s4841_s5 }
 0x224   : > { %964 = vrot.lane.b32.xlu0 %v5246_v37, %s4842_s2 }
 0x225   : > { %966 = vrot.lane.b32.xlu1 %v5244_v35, %s4842_s2 }
 0x228   : > { %642 = vrot.lane.b32.xlu0 %v439_v32, %s4839_s18 }
 0x229   : > { %645 = vrot.lane.b32.xlu1 %v439_v32, %s4840_s6 }
 0x22c   : > { %648 = vrot.lane.b32.xlu0 %v439_v32, %s4841_s5 }
 0x22d   : > { %651 = vrot.lane.b32.xlu1 %v439_v32, %s4842_s2 }
 0x231   : > { %554 = vrot.lane.b32.xlu1 %v5221_v9, %s4835_s4  ;;  %s4055_s4 = sshll.u32 %s4811_s28, 1  ;;  %s3806_s28 = scalar_lea.sflag [#allocation4], %s5183_s16 }
 0x27e   : > { %v931_v3 = vpop.permute.xlu0 %930 }
 0x27f   : > { %v929_v6 = vpop.permute.xlu1 %928 }
 0x282   : > { %v937_v9 = vpop.permute.xlu0 %936 }
 0x283   : > { %v935_v12 = vpop.permute.xlu1 %934  ;;  %v1106_v15 = vcombine.low %v5244_v35, %v937_v9  ;;  %v1107_v16 = vcombine.high %v5244_v35, %v937_v9 }
 0x284   : > { %v970_v17 = vcombine.low %v5246_v37, %v935_v12  ;;  %v971_v18 = vcombine.high %v5246_v37, %v935_v12 }
 0x285   : > { %v1114_v29 = vrot.slane %v1106_v15, %v5286_v52  ;;  %v1121_v30 = vrot.slane %v1107_v16, %v5286_v52 }
 0x286   : > { %v943_v19 = vpop.permute.xlu0 %942  ;;  %v978_v33 = vrot.slane %v970_v17, %v5286_v52  ;;  %v985_v34 = vrot.slane %v971_v18, %v5286_v52  ;;  %v854_v17 = vcombine.low %v5303_v20, %v5306_v21  ;;  %v855_v18 = vcombine.high %v5303_v20, %v5306_v21 }
 0x287   : > { %v1122_v22 = vcombine.low %v931_v3, %v943_v19  ;;  %v1123_v23 = vcombine.high %v931_v3, %v943_v19  ;;  %v941_v24 = vpop.permute.xlu1 %940  ;;  %v886_v19 = vcombine.low %v5309_v25, %v5312_v26 }
 0x288   : > { %v986_v27 = vcombine.low %v929_v6, %v941_v24  ;;  %v987_v28 = vcombine.high %v929_v6, %v941_v24 }
 0x289   : > { %v1130_v31 = vrot.slane %v1122_v22, %v5286_v52  ;;  %v1137_v32 = vrot.slane %v1123_v23, %v5286_v52 }
 0x28a   : > { %v994_v35 = vrot.slane %v986_v27, %v5286_v52  ;;  %v1001_v36 = vrot.slane %v987_v28, %v5286_v52  ;;  %v5322_v37 = vpop.permute.xlu0 %946 }
 0x28b   : > { %v1170_v40 = vcombine.low %v1114_v29, %v1130_v31  ;;  %v1171_v41 = vcombine.high %v1114_v29, %v1130_v31  ;;  %v1186_v42 = vcombine.low %v1121_v30, %v1137_v32  ;;  %v1187_v43 = vcombine.high %v1121_v30, %v1137_v32  ;;  %v5324_v44 = vpop.permute.xlu1 %948 }
 0x28c   : > { %v1034_v45 = vcombine.low %v978_v33, %v994_v35  ;;  %v1035_v46 = vcombine.high %v978_v33, %v994_v35  ;;  %v1050_v47 = vcombine.low %v985_v34, %v1001_v36  ;;  %v1051_v48 = vcombine.high %v985_v34, %v1001_v36 }
 0x28d   : > { %v1178_v49 = vrot.slane %v1170_v40, %v5292_v60  ;;  %v1185_v50 = vrot.slane %v1171_v41, %v5292_v60  ;;  %v1194_v51 = vrot.slane %v1186_v42, %v5292_v60  ;;  %v1201_v53 = vrot.slane %v1187_v43, %v5292_v60 }
 0x28e   : > { %v1042_v54 = vrot.slane %v1034_v45, %v5292_v60  ;;  %v1049_v55 = vrot.slane %v1035_v46, %v5292_v60  ;;  %v1058_v56 = vrot.slane %v1050_v47, %v5292_v60  ;;  %v1065_v57 = vrot.slane %v1051_v48, %v5292_v60  ;;  %v953_v58 = vpop.permute.xlu0 %952 }
 0x28f   : > { %v3988_v59 = vcombine.low %v1178_v49, %v1185_v50  ;;  %v3990_v61 = vcombine.high %v1178_v49, %v1185_v50  ;;  %v3992_v62 = vcombine.low %v1194_v51, %v1201_v53  ;;  %v3994_v63 = vcombine.high %v1194_v51, %v1201_v53  ;;  %v955_v2 = vpop.permute.xlu1 %954 }
 0x290   : > { %v3980_v3 = vcombine.low %v1042_v54, %v1049_v55  ;;  %v3982_v4 = vcombine.high %v1042_v54, %v1049_v55  ;;  %v3984_v5 = vcombine.low %v1058_v56, %v1065_v57  ;;  %v3986_v6 = vcombine.high %v1058_v56, %v1065_v57 }
 0x291   : > { %v5335_v7 = vrot.slane %v3988_v59, %v5286_v52  ;;  %v5338_v8 = vrot.slane %v3990_v61, %v5286_v52  ;;  %v5341_v9 = vrot.slane %v3992_v62, %v5286_v52  ;;  %v5344_v10 = vrot.slane %v3994_v63, %v5286_v52 }
 0x292   : > { %v5347_v11 = vrot.slane %v3980_v3, %v5286_v52  ;;  %v5350_v12 = vrot.slane %v3982_v4, %v5286_v52  ;;  %v5353_v13 = vrot.slane %v3984_v5, %v5286_v52  ;;  %v5356_v14 = vrot.slane %v3986_v6, %v5286_v52  ;;  %v959_v15 = vpop.permute.xlu0 %958 }
 0x293   : > { %v961_v16 = vpop.permute.xlu1 %960  ;;  %v1442_v22 = vcombine.low %v5335_v7, %v5338_v8  ;;  %v1443_v23 = vcombine.high %v5335_v7, %v5338_v8  ;;  %v1474_v24 = vcombine.low %v5341_v9, %v5344_v10  ;;  %v1475_v27 = vcombine.high %v5341_v9, %v5344_v10 }
 0x294   : > { %v1306_v28 = vcombine.low %v5347_v11, %v5350_v12  ;;  %v1307_v29 = vcombine.high %v5347_v11, %v5350_v12  ;;  %v1338_v30 = vcombine.low %v5353_v13, %v5356_v14  ;;  %v1339_v31 = vcombine.high %v5353_v13, %v5356_v14 }
 0x295   : > { %v1002_v33 = vcombine.low %v5322_v37, %v959_v15  ;;  %v1003_v34 = vcombine.high %v5322_v37, %v959_v15  ;;  %v1138_v35 = vcombine.low %v5324_v44, %v961_v16  ;;  %v1139_v36 = vcombine.high %v5324_v44, %v961_v16 }
 0x296   : > { %v965_v32 = vpop.permute.xlu0 %964  ;;  %v5385_v46 = vrot.slane %v1442_v22, %v5292_v60  ;;  %v5388_v47 = vrot.slane %v1474_v24, %v5292_v60  ;;  %v1314_v53 = vrot.slane %v1306_v28, %v5292_v60  ;;  %v1346_v54 = vrot.slane %v1338_v30, %v5292_v60 }
 0x297   : > { %v967_v40 = vpop.permute.xlu1 %966  ;;  %v1018_v41 = vcombine.low %v953_v58, %v965_v32  ;;  %v1019_v42 = vcombine.high %v953_v58, %v965_v32  ;;  %v1010_v48 = vrot.slane %v1002_v33, %v5286_v52  ;;  %v1017_v49 = vrot.slane %v1003_v34, %v5286_v52 }
 0x298   : > { %v1154_v43 = vcombine.low %v955_v2, %v967_v40  ;;  %v1155_v45 = vcombine.high %v955_v2, %v967_v40  ;;  %v1146_v55 = vrot.slane %v1138_v35, %v5286_v52  ;;  %v1153_v56 = vrot.slane %v1139_v36, %v5286_v52 }
 0x299   : > { %v1026_v37 = vrot.slane %v1018_v41, %v5286_v52  ;;  %v1033_v50 = vrot.slane %v1019_v42, %v5286_v52  ;;  %v1489_v7 = vrot.slane %v1475_v27, %v5292_v60  ;;  %v1321_v8 = vrot.slane %v1307_v29, %v5292_v60 }
 0x29a   : > { %v1162_v44 = vrot.slane %v1154_v43, %v5286_v52  ;;  %v1169_v51 = vrot.slane %v1155_v45, %v5286_v52  ;;  %v643_v30 = vpop.permute.xlu0 %642 }
 0x29b   : > { %v1066_v57 = vcombine.low %v1010_v48, %v1026_v37  ;;  %v1067_v58 = vcombine.high %v1010_v48, %v1026_v37  ;;  %v1082_v59 = vcombine.low %v1017_v49, %v1033_v50  ;;  %v1083_v61 = vcombine.high %v1017_v49, %v1033_v50  ;;  %v646_v36 = vpop.permute.xlu1 %645 }
 0x29c   : > { %v1202_v62 = vcombine.low %v1146_v55, %v1162_v44  ;;  %v1203_v63 = vcombine.high %v1146_v55, %v1162_v44  ;;  %v1218_v2 = vcombine.low %v1153_v56, %v1169_v51  ;;  %v1219_v3 = vcombine.high %v1153_v56, %v1169_v51 }
 0x29d   : > { %v1074_v4 = vrot.slane %v1066_v57, %v5292_v60  ;;  %v1081_v5 = vrot.slane %v1067_v58, %v5292_v60  ;;  %v1090_v6 = vrot.slane %v1082_v59, %v5292_v60  ;;  %v1097_v15 = vrot.slane %v1083_v61, %v5292_v60 }
 0x29e   : > { %v1210_v16 = vrot.slane %v1202_v62, %v5292_v60  ;;  %v1217_v22 = vrot.slane %v1203_v63, %v5292_v60  ;;  %v1226_v24 = vrot.slane %v1218_v2, %v5292_v60  ;;  %v1233_v28 = vrot.slane %v1219_v3, %v5292_v60  ;;  %v649_v2 = vpop.permute.xlu0 %648 }
 0x29f   : > { %v3981_v32 = vcombine.low %v1074_v4, %v1081_v5  ;;  %v3983_v33 = vcombine.high %v1074_v4, %v1081_v5  ;;  %v3985_v34 = vcombine.low %v1090_v6, %v1097_v15  ;;  %v3987_v35 = vcombine.high %v1090_v6, %v1097_v15 }
 0x2a0   : > { %v3989_v40 = vcombine.low %v1210_v16, %v1217_v22  ;;  %v3991_v41 = vcombine.high %v1210_v16, %v1217_v22  ;;  %v3993_v42 = vcombine.low %v1226_v24, %v1233_v28  ;;  %v3995_v43 = vcombine.high %v1226_v24, %v1233_v28 }
 0x2a1   : > { %v5409_v45 = vrot.slane %v3981_v32, %v5286_v52  ;;  %v5412_v48 = vrot.slane %v3983_v33, %v5286_v52  ;;  %v5415_v49 = vrot.slane %v3985_v34, %v5286_v52  ;;  %v5418_v37 = vrot.slane %v3987_v35, %v5286_v52 }
 0x2a2   : > { %v5421_v50 = vrot.slane %v3989_v40, %v5286_v52  ;;  %v5424_v44 = vrot.slane %v3991_v41, %v5286_v52  ;;  %v5427_v51 = vrot.slane %v3993_v42, %v5286_v52  ;;  %v5430_v55 = vrot.slane %v3995_v43, %v5286_v52 }
 0x2a3   : > { %v1370_v56 = vcombine.low %v1314_v53, %v1346_v54  ;;  %v1506_v57 = vcombine.low %v5385_v46, %v5388_v47  ;;  %v1371_v58 = vcombine.high %v1314_v53, %v1346_v54  ;;  %v1507_v59 = vcombine.high %v5385_v46, %v5388_v47  ;;  %v652_v53 = vpop.permute.xlu1 %651 }
 0x2a4   : > { %v887_v61 = vcombine.high %v5309_v25, %v5312_v26  ;;  %v1322_v62 = vcombine.low %v5409_v45, %v5412_v48  ;;  %v1354_v63 = vcombine.low %v5415_v49, %v5418_v37  ;;  %v862_v3 = vrot.slane %v854_v17, %v5292_v60 }
 0x2a5   : > { %v1457_v46 = vrot.slane %v1443_v23, %v5292_v60  ;;  %v1458_v47 = vcombine.low %v5421_v50, %v5424_v44  ;;  %v894_v54 = vrot.slane %v886_v19, %v5292_v60  ;;  %v5460_v4 = vrot.slane %v855_v18, %v5292_v60 }
 0x2a6   : > { %v1353_v25 = vrot.slane %v1339_v31, %v5292_v60  ;;  %v1490_v20 = vcombine.low %v5427_v51, %v5430_v55  ;;  %v4309_v26 = vpack.c.bf16 %v1506_v57, %v1370_v56  ;;  %v4313_v9 = vpack.c.bf16 %v1507_v59, %v1371_v58 }
 0x2a7   : > { %v686_v10 = vcombine.low %v643_v30, %v649_v2  ;;  %v687_v17 = vcombine.high %v643_v30, %v649_v2  ;;  %v5483_v11 = vrot.slane %v1322_v62, %v5292_v60  ;;  %v5486_v12 = vrot.slane %v1354_v63, %v5292_v60  ;;  %v555_v43 = vpop.permute.xlu1 %554 }
 0x2a8   : > { %v702_v13 = vcombine.low %v646_v36, %v652_v53  ;;  %v703_v14 = vcombine.high %v646_v36, %v652_v53  ;;  %v1466_v18 = vrot.slane %v1458_v47, %v5292_v60  ;;  %4311 = vmatpush3.bf16.xpose.msk.msra.mxu1 %vm5478_vm3, %v4309_v26  ;;  %4315 = vmatpush3.bf16.xpose.msk.msra.mxu0 %vm5478_vm3, %v4313_v9 }
 0x2a9   : > { %v694_v19 = vrot.slane %v686_v10, %v5286_v52  ;;  %v701_v23 = vrot.slane %v687_v17, %v5286_v52  ;;  %v1498_v27 = vrot.slane %v1490_v20, %v5292_v60  ;;  %4316 = vmatprep.subr.bf16.mxu1 %v4831_v0  ;;  %4320 = vmatprep.subr.bf16.mxu0 %v4831_v0 }
 0x2aa   : > { %v710_v29 = vrot.slane %v702_v13, %v5286_v52  ;;  %v717_v31 = vrot.slane %v703_v14, %v5286_v52  ;;  %v1372_v5 = vcombine.low %v1321_v8, %v1353_v25  ;;  %v1508_v6 = vcombine.low %v1457_v46, %v1489_v7 }
 0x2ab   : > { %v1373_v15 = vcombine.high %v1321_v8, %v1353_v25  ;;  %v1509_v16 = vcombine.high %v1457_v46, %v1489_v7  ;;  %v1323_v32 = vcombine.high %v5409_v45, %v5412_v48  ;;  %v918_v33 = vcombine.low %v862_v3, %v894_v54 }
 0x2ac   : > { %v750_v22 = vcombine.low %v694_v19, %v710_v29  ;;  %v751_v24 = vcombine.high %v694_v19, %v710_v29  ;;  %v766_v28 = vcombine.low %v701_v23, %v717_v31  ;;  %v767_v30 = vcombine.high %v701_v23, %v717_v31 }
 0x2ad   : > { %v919_v34 = vcombine.high %v862_v3, %v894_v54  ;;  %v901_v35 = vrot.slane %v887_v61, %v5292_v60  ;;  %v4317_v56 = vpack.c.bf16 %v1508_v6, %v1372_v5  ;;  %v4321_v57 = vpack.c.bf16 %v1509_v16, %v1373_v15 }
 0x2ae   : > { %v758_v36 = vrot.slane %v750_v22, %v5292_v60  ;;  %v765_v40 = vrot.slane %v751_v24, %v5292_v60  ;;  %v774_v41 = vrot.slane %v766_v28, %v5292_v60  ;;  %v781_v42 = vrot.slane %v767_v30, %v5292_v60 }
 0x2af   : > { %v1374_v58 = vcombine.low %v5483_v11, %v5486_v12  ;;  %v1510_v59 = vcombine.low %v1466_v18, %v1498_v27  ;;  %4168 = vmatmul.mubr.msk.f32.vlgmr.msra.gmra.mrb[2].mxu1 %vm2102_vm2, %v918_v33  ;;  %4175 = vmatmul.mubr.msk.f32.vlgmr.msra.gmra.mrb[4].mxu0 %vm2102_vm2, %v919_v34  ;;  %v1375_v61 = vcombine.high %v5483_v11, %v5486_v12 }
 0x2b0   : > { %v3973_v45 = vcombine.low %v758_v36, %v765_v40  ;;  %v3975_v48 = vcombine.high %v758_v36, %v765_v40  ;;  %v3977_v62 = vcombine.low %v774_v41, %v781_v42  ;;  %v3979_v63 = vcombine.high %v774_v41, %v781_v42  ;;  %4319 = vmatpush3.bf16.xpose.msk.msra.mxu1 %vm5478_vm3, %v4317_v56 }
 0x2b1   : > { %v1511_v2 = vcombine.high %v1466_v18, %v1498_v27  ;;  %v5516_v3 = vadd.f32 %v5282_v38, %v555_v43  ;;  %4323 = vmatpush3.bf16.xpose.msk.msra.mxu0 %vm5478_vm3, %v4321_v57  ;;  %v1355_v7 = vcombine.high %v5415_v49, %v5418_v37  ;;  %v1459_v8 = vcombine.high %v5421_v50, %v5424_v44 }
 0x2b2   : > { %v805_v46 = vrot.slane %v3973_v45, %v5286_v52  ;;  %v821_v47 = vrot.slane %v3975_v48, %v5286_v52  ;;  %v837_v53 = vrot.slane %v3977_v62, %v5286_v52  ;;  %v853_v54 = vrot.slane %v3979_v63, %v5286_v52  ;;  %4181 = vmatprep.mubr.msk.f32.mxu1 %vm4832_vm0, %v4833_v1 }
 0x2b3   : > { %v1491_v38 = vcombine.high %v5427_v51, %v5430_v55  ;;  %4188 = vmatprep.mubr.msk.f32.mxu0 %vm4832_vm0, %v4833_v1  ;;  %4324 = vmatprep.subr.bf16.mxu1 %v4831_v0  ;;  %v4325_v26 = vpack.c.bf16 %v1510_v59, %v1374_v58  ;;  %v920_v49 = vcombine.low %v5460_v4, %v901_v35 }
 0x2b4   : > { %v870_v25 = vcombine.low %v805_v46, %v821_v47  ;;  %v902_v20 = vcombine.low %v837_v53, %v853_v54  ;;  %4328 = vmatprep.subr.bf16.mxu0 %v4831_v0  ;;  %1518 = vrot.lane.b32.xlu1 %v5516_v3, %s4837_s20  ;;  %v921_v37 = vcombine.high %v5460_v4, %v901_v35 }
 0x2b5   : > { %v4329_v50 = vpack.c.bf16 %v1511_v2, %v1375_v61  ;;  %1542 = vrot.lane.b32.xlu0 %v5516_v3, %s4840_s6  ;;  %v1337_v44 = vrot.slane %v1323_v32, %v5292_v60  ;;  %v1369_v51 = vrot.slane %v1355_v7, %v5292_v60  ;;  %v1473_v55 = vrot.slane %v1459_v8, %v5292_v60 }
 0x2b6   : > { %v1505_v9 = vrot.slane %v1491_v38, %v5292_v60  ;;  %v878_v10 = vrot.slane %v870_v25, %v5292_v60  ;;  %v910_v17 = vrot.slane %v902_v20, %v5292_v60  ;;  %v5553_v4 = vadd.f32 %v5284_v39, %v555_v43 }
 0x2b7   : > { %4182 = vmatmul.mubr.msk.f32.vlgmr.msra.gmra.mrb[4].mxu1 %vm2102_vm2, %v920_v49  ;;  %v1376_v11 = vcombine.low %v1337_v44, %v1369_v51  ;;  %v1377_v14 = vcombine.high %v1337_v44, %v1369_v51  ;;  %v871_v19 = vcombine.high %v805_v46, %v821_v47  ;;  %v903_v23 = vcombine.high %v837_v53, %v853_v54 }
 0x2b8   : > { %4189 = vmatmul.mubr.msk.f32.vlgmr.msra.gmra.mrb[6].mxu0 %vm2102_vm2, %v921_v37  ;;  %4327 = vmatpush3.bf16.xpose.msk.msra.mxu1 %vm5478_vm3, %v4325_v26  ;;  %v1512_v12 = vcombine.low %v1473_v55, %v1505_v9  ;;  %v922_v13 = vcombine.low %v878_v10, %v910_v17  ;;  %v1513_v18 = vcombine.high %v1473_v55, %v1505_v9 }
 0x2b9   : > { %4331 = vmatpush3.bf16.xpose.msk.msra.mxu0 %vm5478_vm3, %v4329_v50  ;;  %4195 = vmatprep.mubr.msk.f32.mxu1 %vm4832_vm0, %v4833_v1  ;;  %v923_v39 = vcombine.high %v878_v10, %v910_v17  ;;  %v885_v31 = vrot.slane %v871_v19, %v5292_v60  ;;  %v917_v5 = vrot.slane %v903_v23, %v5292_v60 }
 0x2ba   : > { %4202 = vmatprep.mubr.msk.f32.mxu0 %vm4832_vm0, %v4833_v1  ;;  %4332 = vmatprep.subr.bf16.mxu1 %v4831_v0  ;;  %v4333_v27 = vpack.c.bf16 %v1512_v12, %v1376_v11  ;;  %v4337_v29 = vpack.c.bf16 %v1513_v18, %v1377_v14 }
 0x2bb   : > { %4336 = vmatprep.subr.bf16.mxu0 %v4831_v0  ;;  %1524 = vrot.lane.b32.xlu1 %v5516_v3, %s4836_s19  ;;  %v924_v21 = vcombine.low %v885_v31, %v917_v5  ;;  %v925_v6 = vcombine.high %v885_v31, %v917_v5 }
 0x2bc   : > { %1516 = vrot.lane.b32.xlu0 %v5553_v4, %s4837_s20 }
 0x2bf   : > { %4196 = vmatmul.mubr.msk.f32.vlgmr.msra.gmra.mrb[6].mxu1 %vm2102_vm2, %v922_v13  ;;  %1530 = vrot.lane.b32.xlu1 %v5516_v3, %s4838_s27 }
 0x2c0   : > { %4203 = vmatmul.mubr.msk.f32.vlgmr.msra.gmra.mrb[8].mxu0 %vm2102_vm2, %v923_v39  ;;  %4335 = vmatpush3.bf16.xpose.msk.msra.mxu1 %vm5478_vm3, %v4333_v27 }
 0x2c1   : > { %4339 = vmatpush3.bf16.xpose.msk.msra.mxu0 %vm5478_vm3, %v4337_v29  ;;  %4209 = vmatprep.mubr.msk.f32.mxu1 %vm4832_vm0, %v4833_v1 }
 0x2c2   : > { %4216 = vmatprep.mubr.msk.f32.mxu0 %vm4832_vm0, %v4833_v1  ;;  %1528 = vrot.lane.b32.xlu0 %v5553_v4, %s4838_s27 }
 0x2c3   : > { %1536 = vrot.lane.b32.xlu1 %v5516_v3, %s4839_s18  ;;  %4340 = vmatprep.subr.bf16.mxu1 %v4831_v0 }
 0x2c4   : > { %4352 = vmatprep.subr.bf16.mxu0 %v4831_v0 }
 0x2c6   : > { %1534 = vrot.lane.b32.xlu0 %v5553_v4, %s4839_s18  ;;  %s5940_s18 = sld [smem:[#allocation24_spill]] }
 0x2c7   : > { %4210 = vmatmul.mubr.msk.f32.vlgmr.msra.gmra.mrb[8].mxu1 %vm2102_vm2, %v924_v21  ;;  %1522 = vrot.lane.b32.xlu1 %v5553_v4, %s4836_s19  ;;  %s3817_s19 = sadd.s32 %s5939_s11, %s4055_s4 }
 0x2c8   : > { %4217 = vmatmul.mubr.msk.f32.vlgmr.msra.gmra.mrb[10].mxu0 %vm2102_vm2, %v925_v6  ;;  %4223 = vmatprep.mubr.msk.f32.mxu1 %vm4832_vm0, %v4833_v1 }
 0x2c9   : > { %4251 = vmatprep.mubr.msk.f32.mxu0 %vm4832_vm0, %v4833_v1 }
 0x2cb   : > { %1540 = vrot.lane.b32.xlu1 %v5553_v4, %s4840_s6  ;;  %s4056_s6 = sshll.u32 %s3817_s19, 7 }
 0x326   : > { %v1519_v15 = vpop.permute.xlu1 %1518 }
 0x327   : > { %v5599_v16 = vpop.permute.xlu0 %1542 }
 0x32d   : > { %v1525_v22 = vpop.permute.xlu1 %1524 }
 0x32e   : > { %v1694_v24 = vcombine.low %v5516_v3, %v1525_v22  ;;  %v1695_v28 = vcombine.high %v5516_v3, %v1525_v22  ;;  %v1517_v30 = vpop.permute.xlu0 %1516 }
 0x330   : > { %v1702_v33 = vrot.slane %v1694_v24, %v5286_v52  ;;  %v1709_v34 = vrot.slane %v1695_v28, %v5286_v52 }
 0x331   : > { %v1531_v32 = vpop.permute.xlu1 %1530 }
 0x332   : > { %v1710_v35 = vcombine.low %v1519_v15, %v1531_v32  ;;  %v1711_v36 = vcombine.high %v1519_v15, %v1531_v32 }
 0x334   : > { %v1718_v40 = vrot.slane %v1710_v35, %v5286_v52  ;;  %v1725_v41 = vrot.slane %v1711_v36, %v5286_v52  ;;  %v1529_v42 = vpop.permute.xlu0 %1528 }
 0x335   : > { %v5607_v43 = vpop.permute.xlu1 %1536  ;;  %v1574_v45 = vcombine.low %v1517_v30, %v1529_v42  ;;  %v1575_v48 = vcombine.high %v1517_v30, %v1529_v42 }
 0x336   : > { %v1758_v56 = vcombine.low %v1702_v33, %v1718_v40  ;;  %v1759_v57 = vcombine.high %v1702_v33, %v1718_v40  ;;  %v1774_v58 = vcombine.low %v1709_v34, %v1725_v41  ;;  %v1775_v59 = vcombine.high %v1709_v34, %v1725_v41 }
 0x337   : > { %v1582_v25 = vrot.slane %v1574_v45, %v5286_v52  ;;  %v1589_v20 = vrot.slane %v1575_v48, %v5286_v52 }
 0x338   : > { %v1766_v62 = vrot.slane %v1758_v56, %v5292_v60  ;;  %v1773_v63 = vrot.slane %v1759_v57, %v5292_v60  ;;  %v1782_v61 = vrot.slane %v1774_v58, %v5292_v60  ;;  %v1789_v2 = vrot.slane %v1775_v59, %v5292_v60 }
 0x339   : > { %v1523_v46 = vpop.permute.xlu1 %1522 }
 0x33a   : > { %v4004_v47 = vcombine.low %v1766_v62, %v1773_v63  ;;  %v4006_v53 = vcombine.high %v1766_v62, %v1773_v63  ;;  %v4008_v54 = vcombine.low %v1782_v61, %v1789_v2  ;;  %v4010_v7 = vcombine.high %v1782_v61, %v1789_v2 }
 0x33b   : > { %v1558_v8 = vcombine.low %v5553_v4, %v1523_v46  ;;  %v1559_v38 = vcombine.high %v5553_v4, %v1523_v46 }
 0x33c   : > { %v1974_v26 = vrot.slane %v4004_v47, %v5286_v52  ;;  %v1990_v49 = vrot.slane %v4006_v53, %v5286_v52  ;;  %v2006_v37 = vrot.slane %v4008_v54, %v5286_v52  ;;  %v2022_v50 = vrot.slane %v4010_v7, %v5286_v52 }
 0x33d   : > { %v1566_v44 = vrot.slane %v1558_v8, %v5286_v52  ;;  %v1573_v51 = vrot.slane %v1559_v38, %v5286_v52 }
 0x33e   : > { %v2030_v55 = vcombine.low %v1974_v26, %v1990_v49  ;;  %v2062_v9 = vcombine.low %v2006_v37, %v2022_v50  ;;  %v2031_v10 = vcombine.high %v1974_v26, %v1990_v49  ;;  %v2063_v17 = vcombine.high %v2006_v37, %v2022_v50 }
 0x33f   : > { %v1622_v11 = vcombine.low %v1566_v44, %v1582_v25  ;;  %v1623_v12 = vcombine.high %v1566_v44, %v1582_v25  ;;  %v1638_v13 = vcombine.low %v1573_v51, %v1589_v20  ;;  %v1639_v14 = vcombine.high %v1573_v51, %v1589_v20 }
 0x340   : > { %v2038_v18 = vrot.slane %v2030_v55, %v5292_v60  ;;  %v2070_v39 = vrot.slane %v2062_v9, %v5292_v60  ;;  %v2045_v19 = vrot.slane %v2031_v10, %v5292_v60  ;;  %v2077_v23 = vrot.slane %v2063_v17, %v5292_v60 }
 0x341   : > { %v1630_v27 = vrot.slane %v1622_v11, %v5292_v60  ;;  %v1637_v29 = vrot.slane %v1623_v12, %v5292_v60  ;;  %v1646_v31 = vrot.slane %v1638_v13, %v5292_v60  ;;  %v1653_v5 = vrot.slane %v1639_v14, %v5292_v60 }
 0x342   : > { %v2095_v21 = vcombine.high %v2038_v18, %v2070_v39  ;;  %v2096_v6 = vcombine.low %v2045_v19, %v2077_v23  ;;  %v2097_v15 = vcombine.high %v2045_v19, %v2077_v23  ;;  %v2094_v56 = vcombine.low %v2038_v18, %v2070_v39 }
 0x343   : > { %v3996_v22 = vcombine.low %v1630_v27, %v1637_v29  ;;  %v3998_v24 = vcombine.high %v1630_v27, %v1637_v29  ;;  %v4000_v28 = vcombine.low %v1646_v31, %v1653_v5  ;;  %v4002_v30 = vcombine.high %v1646_v31, %v1653_v5  ;;  %v5658_v27 = vpop.permute.xlu0 %1534  ;;  %v5660_v29 = vpop.permute.xlu1 %1540 }
 0x345   : > { %v1838_v32 = vrot.slane %v3996_v22, %v5286_v52  ;;  %v1854_v33 = vrot.slane %v3998_v24, %v5286_v52  ;;  %v1870_v34 = vrot.slane %v4000_v28, %v5286_v52  ;;  %v1886_v35 = vrot.slane %v4002_v30, %v5286_v52 }
 0x347   : > { %v1894_v36 = vcombine.low %v1838_v32, %v1854_v33  ;;  %v1926_v40 = vcombine.low %v1870_v34, %v1886_v35  ;;  %v1895_v41 = vcombine.high %v1838_v32, %v1854_v33  ;;  %v1927_v42 = vcombine.high %v1870_v34, %v1886_v35 }
 0x349   : > { %v1902_v57 = vrot.slane %v1894_v36, %v5292_v60  ;;  %v1934_v58 = vrot.slane %v1926_v40, %v5292_v60  ;;  %v1909_v59 = vrot.slane %v1895_v41, %v5292_v60  ;;  %v1941_v45 = vrot.slane %v1927_v42, %v5292_v60 }
 0x34b   : > { %v1958_v48 = vcombine.low %v1902_v57, %v1934_v58  ;;  %v1959_v62 = vcombine.high %v1902_v57, %v1934_v58  ;;  %v1960_v63 = vcombine.low %v1909_v59, %v1941_v45  ;;  %v1961_v61 = vcombine.high %v1909_v59, %v1941_v45 }
 0x34d   : > { %v4341_v2 = vpack.c.bf16 %v2094_v56, %v1958_v48  ;;  %v5639_v46 = vpack.c.bf16 %v2095_v21, %v1959_v62  ;;  %v5641_v47 = vpack.c.bf16 %v2096_v6, %v1960_v63  ;;  %v5643_v53 = vpack.c.bf16 %v2097_v15, %v1961_v61 }
 0x34f   : > { %4342 = vmatpush3.bf16.msra.mxu1 %v4341_v2 }
 0x350   : > { %4343 = vmatprep.subr.bf16.mxu1 %v4831_v0 }
 0x382   : > { %v2178_v54 = vpop.f32.mrb[2].mxu1  ;;  %v2257_v7 = vpop.f32.mrb[4].mxu0 }
 0x383   : > { %v4169_v8 = vpop.f32.mrb[3].mxu1  ;;  %v2736_v38 = vsel %vm2735_vm4, %v2178_v54, -inf  ;;  %v4176_v25 = vpop.f32.mrb[5].mxu0  ;;  %v2739_v20 = vsel %vm2735_vm4, %v2257_v7, -inf }
 0x384   : > { %2737 = vmax.xlane.f32.xlu0 %v2736_v38  ;;  %2740 = vmax.xlane.f32.xlu1 %v2739_v20 }
 0x38a   : > { %v2336_v26 = vpop.f32.mrb[4].mxu1 }
 0x38b   : > { %v2415_v49 = vpop.f32.mrb[6].mxu0  ;;  %v4183_v37 = vpop.f32.mrb[5].mxu1  ;;  %v2742_v50 = vsel %vm2735_vm4, %v2336_v26, -inf }
 0x38c   : > { %v4190_v44 = vpop.f32.mrb[7].mxu0  ;;  %2743 = vmax.xlane.f32.xlu0 %v2742_v50  ;;  %v2745_v51 = vsel %vm2735_vm4, %v2415_v49, -inf }
 0x390   : > { %2746 = vmax.xlane.f32.xlu0 %v2745_v51 }
 0x392   : > { %v2494_v55 = vpop.f32.mrb[6].mxu1 }
 0x393   : > { %v2573_v9 = vpop.f32.mrb[8].mxu0  ;;  %v4197_v10 = vpop.f32.mrb[7].mxu1  ;;  %v2748_v17 = vsel %vm2735_vm4, %v2494_v55, -inf }
 0x394   : > { %v4204_v11 = vpop.f32.mrb[9].mxu0  ;;  %2749 = vmax.xlane.f32.xlu1 %v2748_v17  ;;  %v2751_v12 = vsel %vm2735_vm4, %v2573_v9, -inf }
 0x395   : > { %2752 = vmax.xlane.f32.xlu0 %v2751_v12 }
 0x39a   : > { %v2652_v13 = vpop.f32.mrb[8].mxu1 }
 0x39b   : > { %v2731_v14 = vpop.f32.mrb[10].mxu0  ;;  %v4211_v18 = vpop.f32.mrb[9].mxu1  ;;  %v2754_v39 = vsel %vm2735_vm4, %v2652_v13, -inf }
 0x39c   : > { %v4218_v19 = vpop.f32.mrb[11].mxu0  ;;  %2755 = vmax.xlane.f32.xlu1 %v2754_v39  ;;  %v2757_v23 = vsel %vm2735_vm4, %v2731_v14, -inf }
 0x39d   : > { %2758 = vmax.xlane.f32.xlu0 %v2757_v23 }
 0x3ad   : > { %1546 = vrot.lane.b32.xlu1 %v5553_v4, %s4841_s5 }
 0x3b3   : > { %1548 = vrot.lane.b32.xlu0 %v5516_v3, %s4841_s5  ;;  %s353_s5 = scalar_lea.vmem [#allocation10], %s3961_s13  ;;  %s4852_s13 = smov [#allocation10]  }
 0x411   : > { %v2738_v31 = vpop.xlane.xlu0 %2737  ;;  %v2741_v5 = vpop.xlane.xlu1 %2740 }
 0x412   : > { %v2760_v21 = vsub.f32 %v2178_v54, %v2738_v31  ;;  %v2761_v6 = vsub.f32 %v2257_v7, %v2741_v5 }
 0x414   : > { %v2768_v15 = vmul.f32 1.442695, %v2760_v21  ;;  %v2770_v22 = vmul.f32 1.442695, %v2761_v6 }
 0x416   : > { %4541 = vpow2.f32 %v2768_v15 }
 0x417   : > { %4543 = vpow2.f32 %v2770_v22 }
 0x419   : > { %v2744_v24 = vpop.xlane.xlu0 %2743 }
 0x41a   : > { %v2762_v28 = vsub.f32 %v2336_v26, %v2744_v24 }
 0x41c   : > { %v2772_v30 = vmul.f32 1.442695, %v2762_v28 }
 0x41d   : > { %v2747_v41 = vpop.xlane.xlu0 %2746 }
 0x41e   : > { %4545 = vpow2.f32 %v2772_v30  ;;  %v2763_v42 = vsub.f32 %v2415_v49, %v2747_v41 }
 0x420   : > { %v5662_v32 = vpop.eup %4541  ;;  %v2774_v59 = vmul.f32 1.442695, %v2763_v42 }
 0x421   : > { %v2784_v33 = vsel %vm2735_vm4, %v5662_v32, 0.0  ;;  %v5666_v34 = vpop.eup %4543  ;;  %v2750_v56 = vpop.xlane.xlu1 %2749 }
 0x422   : > { %2785 = vadd.xlane.f32.xlu0 %v2784_v33  ;;  %v2787_v35 = vsel %vm2735_vm4, %v5666_v34, 0.0  ;;  %v2753_v57 = vpop.xlane.xlu0 %2752  ;;  %v2764_v58 = vsub.f32 %v2494_v55, %v2750_v56  ;;  %4547 = vpow2.f32 %v2774_v59 }
 0x423   : > { %v2765_v45 = vsub.f32 %v2573_v9, %v2753_v57 }
 0x424   : > { %v2776_v63 = vmul.f32 1.442695, %v2764_v58 }
 0x425   : > { %v2778_v2 = vmul.f32 1.442695, %v2765_v45 }
 0x426   : > { %2788 = vadd.xlane.f32.xlu0 %v2787_v35  ;;  %4549 = vpow2.f32 %v2776_v63 }
 0x427   : > { %4551 = vpow2.f32 %v2778_v2 }
 0x428   : > { %v5670_v36 = vpop.eup %4545 }
 0x429   : > { %v2790_v40 = vsel %vm2735_vm4, %v5670_v36, 0.0  ;;  %v2756_v48 = vpop.xlane.xlu1 %2755 }
 0x42a   : > { %2791 = vadd.xlane.f32.xlu1 %v2790_v40  ;;  %v2759_v62 = vpop.xlane.xlu0 %2758  ;;  %v2766_v61 = vsub.f32 %v2652_v13, %v2756_v48 }
 0x42b   : > { %v2767_v54 = vsub.f32 %v2731_v14, %v2759_v62 }
 0x42c   : > { %v2780_v7 = vmul.f32 1.442695, %v2766_v61 }
 0x42d   : > { %v1547_v9 = vpop.permute.xlu1 %1546 }
 0x42e   : > { %4553 = vpow2.f32 %v2780_v7  ;;  %v1549_v51 = vpop.permute.xlu0 %1548  ;;  %v1590_v39 = vcombine.low %v5658_v27, %v1547_v9  ;;  %v1591_v19 = vcombine.high %v5658_v27, %v1547_v9 }
 0x42f   : > { %v1726_v17 = vcombine.low %v5607_v43, %v1549_v51  ;;  %v1727_v11 = vcombine.high %v5607_v43, %v1549_v51 }
 0x430   : > { %v1598_v30 = vrot.slane %v1590_v39, %v5286_v52  ;;  %v1605_v27 = vrot.slane %v1591_v19, %v5286_v52 }
 0x431   : > { %v1734_v31 = vrot.slane %v1726_v17, %v5286_v52  ;;  %v1741_v5 = vrot.slane %v1727_v11, %v5286_v52 }
 0x43b   : > { %1552 = vrot.lane.b32.xlu1 %v5553_v4, %s4842_s2  ;;  %v2782_v4 = vmul.f32 1.442695, %v2767_v54 }
 0x43c   : > { %1554 = vrot.lane.b32.xlu0 %v5516_v3, %s4842_s2  ;;  %v5678_v3 = vpop.eup %4547  ;;  %s3821_s2 = sshll.u32 %s353_s5, 4  ;;  %s5825_s2 = int_to_ptr.vmem [resolvable:$true] %s3821_s2 }
 0x43d   : > { %4555 = vpow2.f32 %v2782_v4  ;;  %v5680_v8 = vpop.eup %4549  ;;  %v2793_v38 = vsel %vm2735_vm4, %v5678_v3, 0.0 }
 0x43e   : > { %v5684_v25 = vpop.eup %4551  ;;  %v2796_v26 = vsel %vm2735_vm4, %v5680_v8, 0.0 }
 0x43f   : > { %v5686_v20 = vpop.eup %4553  ;;  %v2799_v49 = vsel %vm2735_vm4, %v5684_v25, 0.0 }
 0x440   : > { %v2802_v50 = vsel %vm2735_vm4, %v5686_v20, 0.0 }
 0x447   : > { %v5692_v37 = vpop.eup %4555 }
 0x448   : > { %v2805_v44 = vsel %vm2735_vm4, %v5692_v37, 0.0 }
 0x45b   : > { %2794 = vadd.xlane.f32.xlu0 %v2793_v38 }
 0x45f   : > { %2797 = vadd.xlane.f32.xlu0 %v2796_v26  ;;  %2800 = vadd.xlane.f32.xlu1 %v2799_v49 }
 0x463   : > { %2803 = vadd.xlane.f32.xlu1 %v2802_v50  ;;  %2806 = vadd.xlane.f32.xlu0 %v2805_v44 }
 0x4af   : > { %v2786_v55 = vpop.xlane.xlu0 %2785 }
 0x4b0   : > { %4557 = vrcp.f32 %v2786_v55 }
 0x4b3   : > { %v2789_v10 = vpop.xlane.xlu0 %2788 }
 0x4b4   : > { %4559 = vrcp.f32 %v2789_v10 }
 0x4b7   : > { %v2792_v12 = vpop.xlane.xlu1 %2791  ;;  %v1555_v13 = vpop.permute.xlu0 %1554 }
 0x4b8   : > { %4561 = vrcp.f32 %v2792_v12  ;;  %v1742_v14 = vcombine.low %v5599_v16, %v1555_v13  ;;  %v1743_v18 = vcombine.high %v5599_v16, %v1555_v13 }
 0x4ba   : > { %v4558_v23 = vpop.eup %4557  ;;  %v1750_v21 = vrot.slane %v1742_v14, %v5286_v52  ;;  %v1757_v43 = vrot.slane %v1743_v18, %v5286_v52 }
 0x4bb   : > { %v2816_v6 = vmul.f32 %v4558_v23, %v5662_v32  ;;  %v1553_v15 = vpop.permute.xlu1 %1552 }
 0x4bc   : > { %v1790_v22 = vcombine.low %v1734_v31, %v1750_v21  ;;  %v1791_v24 = vcombine.high %v1734_v31, %v1750_v21  ;;  %v1806_v28 = vcombine.low %v1741_v5, %v1757_v43  ;;  %v1807_v16 = vcombine.high %v1741_v5, %v1757_v43 }
 0x4bd   : > { %v1606_v33 = vcombine.low %v5660_v29, %v1553_v15  ;;  %v1607_v35 = vcombine.high %v5660_v29, %v1553_v15  ;;  %4224 = vmatmul.mubr.msk.f32.vlgmr.msra.gmra.mrb[10].mxu1 %vm2735_vm4, %v2816_v6 }
 0x4be   : > { %v4560_v40 = vpop.eup %4559  ;;  %v1798_v41 = vrot.slane %v1790_v22, %v5292_v60  ;;  %v1805_v32 = vrot.slane %v1791_v24, %v5292_v60  ;;  %v1814_v42 = vrot.slane %v1806_v28, %v5292_v60  ;;  %v1821_v56 = vrot.slane %v1807_v16, %v5292_v60  ;;  %4345 = vmatpush3.bf16.msra.mxu1 %v5639_v46 }
 0x4bf   : > { %v2817_v57 = vmul.f32 %v4560_v40, %v5666_v34  ;;  %v1614_v58 = vrot.slane %v1606_v33, %v5286_v52  ;;  %v1621_v59 = vrot.slane %v1607_v35, %v5286_v52  ;;  %4230 = vmatprep.mubr.msk.f32.mxu1 %vm4832_vm0, %v4833_v1  ;;  %4346 = vmatprep.subr.bf16.mxu1 %v4831_v0 }
 0x4c0   : > { %v4005_v29 = vcombine.low %v1798_v41, %v1805_v32  ;;  %v4007_v45 = vcombine.high %v1798_v41, %v1805_v32  ;;  %v4009_v48 = vcombine.low %v1814_v42, %v1821_v56  ;;  %v4011_v62 = vcombine.high %v1814_v42, %v1821_v56 }
 0x4c1   : > { %v1654_v63 = vcombine.low %v1598_v30, %v1614_v58  ;;  %v1655_v61 = vcombine.high %v1598_v30, %v1614_v58  ;;  %v1670_v2 = vcombine.low %v1605_v27, %v1621_v59  ;;  %v1671_v54 = vcombine.high %v1605_v27, %v1621_v59  ;;  %4231 = vmatmul.mubr.msk.f32.vlgmr.msra.gmra.mrb[12].mxu1 %vm2735_vm4, %v2817_v57 }
 0x4c2   : > { %v4562_v46 = vpop.eup %4561  ;;  %v1981_v34 = vrot.slane %v4005_v29, %v5286_v52  ;;  %v1997_v7 = vrot.slane %v4007_v45, %v5286_v52  ;;  %v2013_v4 = vrot.slane %v4009_v48, %v5286_v52  ;;  %v2029_v38 = vrot.slane %v4011_v62, %v5286_v52  ;;  %4348 = vmatpush3.bf16.msra.mxu1 %v5641_v47 }
 0x4c3   : > { %v2818_v26 = vmul.f32 %v4562_v46, %v5670_v36  ;;  %v1662_v49 = vrot.slane %v1654_v63, %v5292_v60  ;;  %v1669_v50 = vrot.slane %v1655_v61, %v5292_v60  ;;  %v1678_v44 = vrot.slane %v1670_v2, %v5292_v60  ;;  %4237 = vmatprep.mubr.msk.f32.mxu1 %vm4832_vm0, %v4833_v1 }
 0x4c4   : > { %v1685_v51 = vrot.slane %v1671_v54, %v5292_v60  ;;  %4349 = vmatprep.subr.bf16.mxu1 %v4831_v0  ;;  %v2046_v36 = vcombine.low %v1981_v34, %v1997_v7  ;;  %v2078_v17 = vcombine.low %v2013_v4, %v2029_v38  ;;  %v2047_v16 = vcombine.high %v1981_v34, %v1997_v7 }
 0x4c5   : > { %v3997_v55 = vcombine.low %v1662_v49, %v1669_v50  ;;  %v3999_v9 = vcombine.high %v1662_v49, %v1669_v50  ;;  %4238 = vmatmul.mubr.msk.f32.vlgmr.msra.gmra.mrb[14].mxu1 %vm2735_vm4, %v2818_v26  ;;  %v2079_v30 = vcombine.high %v2013_v4, %v2029_v38 }
 0x4c6   : > { %v4001_v47 = vcombine.low %v1678_v44, %v1685_v51  ;;  %v4003_v10 = vcombine.high %v1678_v44, %v1685_v51  ;;  %4351 = vmatpush3.bf16.msra.mxu1 %v5643_v53  ;;  %4244 = vmatprep.mubr.msk.f32.mxu1 %vm4832_vm0, %v4833_v1  ;;  %v2054_v19 = vrot.slane %v2046_v36, %v5292_v60 }
 0x4c7   : > { %v1845_v11 = vrot.slane %v3997_v55, %v5286_v52  ;;  %v1861_v12 = vrot.slane %v3999_v9, %v5286_v52  ;;  %4355 = vmatprep.subr.bf16.mxu1 %v4831_v0  ;;  %v2086_v53 = vrot.slane %v2078_v17, %v5292_v60  ;;  %v2061_v56 = vrot.slane %v2047_v16, %v5292_v60 }
 0x4c8   : > { %v1877_v13 = vrot.slane %v4001_v47, %v5286_v52  ;;  %v1893_v14 = vrot.slane %v4003_v10, %v5286_v52  ;;  %v2093_v57 = vrot.slane %v2079_v30, %v5292_v60 }
 0x4c9   : > { %v1910_v18 = vcombine.low %v1845_v11, %v1861_v12  ;;  %v2098_v21 = vcombine.low %v2054_v19, %v2086_v53  ;;  %v1911_v24 = vcombine.high %v1845_v11, %v1861_v12  ;;  %v2099_v42 = vcombine.high %v2054_v19, %v2086_v53 }
 0x4ca   : > { %v1942_v39 = vcombine.low %v1877_v13, %v1893_v14  ;;  %v1943_v28 = vcombine.high %v1877_v13, %v1893_v14  ;;  %v2101_v62 = vcombine.high %v2061_v56, %v2093_v57  ;;  %v2100_v2 = vcombine.low %v2061_v56, %v2093_v57 }
 0x4cb   : > { %v1918_v23 = vrot.slane %v1910_v18, %v5292_v60  ;;  %v1925_v40 = vrot.slane %v1911_v24, %v5292_v60 }
 0x4cc   : > { %v1950_v31 = vrot.slane %v1942_v39, %v5292_v60  ;;  %v1957_v41 = vrot.slane %v1943_v28, %v5292_v60 }
 0x4ce   : > { %v1962_v5 = vcombine.low %v1918_v23, %v1950_v31  ;;  %v1963_v35 = vcombine.high %v1918_v23, %v1950_v31  ;;  %v1965_v29 = vcombine.high %v1925_v40, %v1957_v41  ;;  %v1964_v45 = vcombine.low %v1925_v40, %v1957_v41 }
 0x4d0   : > { %v4353_v43 = vpack.c.bf16 %v2098_v21, %v1962_v5  ;;  %v4356_v59 = vpack.c.bf16 %v2099_v42, %v1963_v35  ;;  %v4359_v46 = vpack.c.bf16 %v2100_v2, %v1964_v45 }
 0x4d2   : > { %4354 = vmatpush3.bf16.msra.mxu0 %v4353_v43 }
 0x4d3   : > { %4358 = vmatprep.subr.bf16.mxu0 %v4831_v0 }
 0x4e8   : > { %v2795_v6 = vpop.xlane.xlu0 %2794 }
 0x4e9   : > { %4563 = vrcp.f32 %v2795_v6 }
 0x4ec   : > { %v2801_v15 = vpop.xlane.xlu1 %2800  ;;  %v2798_v22 = vpop.xlane.xlu0 %2797 }
 0x4ed   : > { %4565 = vrcp.f32 %v2801_v15 }
 0x4ee   : > { %4567 = vrcp.f32 %v2798_v22 }
 0x4f0   : > { %v2804_v27 = vpop.xlane.xlu1 %2803  ;;  %v2807_v33 = vpop.xlane.xlu0 %2806 }
 0x4f1   : > { %4569 = vrcp.f32 %v2804_v27 }
 0x4f2   : > { %4571 = vrcp.f32 %v2807_v33 }
 0x4f3   : > { %v4564_v32 = vpop.eup %4563 }
 0x4f4   : > { %v2819_v58 = vmul.f32 %v4564_v32, %v5678_v3  ;;  %v4362_v3 = vpack.c.bf16 %v2101_v62, %v1965_v29 }
 0x4f6   : > { %4245 = vmatmul.mubr.msk.f32.vlgmr.msra.gmra.mrb[16].mxu1 %vm2735_vm4, %v2819_v58 }
 0x4f7   : > { %v4566_v48 = vpop.eup %4565  ;;  %4357 = vmatpush3.bf16.msra.mxu1 %v4356_v59  ;;  %4258 = vmatprep.mubr.msk.f32.mxu1 %vm4832_vm0, %v4833_v1 }
 0x4f8   : > { %v4568_v63 = vpop.eup %4567  ;;  %v2821_v61 = vmul.f32 %v4566_v48, %v5684_v25  ;;  %4361 = vmatprep.subr.bf16.mxu1 %v4831_v0 }
 0x4f9   : > { %v2820_v54 = vmul.f32 %v4568_v63, %v5680_v8 }
 0x4fa   : > { %4259 = vmatmul.mubr.msk.f32.vlgmr.msra.gmra.mrb[18].mxu1 %vm2735_vm4, %v2821_v61 }
 0x4fb   : > { %v4570_v34 = vpop.eup %4569  ;;  %4252 = vmatmul.mubr.msk.f32.vlgmr.msra.gmra.mrb[12].mxu0 %vm2735_vm4, %v2820_v54  ;;  %4363 = vmatpush3.bf16.msra.mxu1 %v4362_v3 }
 0x4fc   : > { %v4572_v7 = vpop.eup %4571  ;;  %v2822_v4 = vmul.f32 %v4570_v34, %v5686_v20  ;;  %4360 = vmatpush3.bf16.msra.mxu0 %v4359_v46  ;;  %4265 = vmatprep.mubr.msk.f32.mxu0 %vm4832_vm0, %v4833_v1 }
 0x4fd   : > { %v2823_v25 = vmul.f32 %v4572_v7, %v5692_v37  ;;  %4272 = vmatprep.mubr.msk.f32.mxu1 %vm4832_vm0, %v4833_v1  ;;  %4364 = vmatprep.subr.bf16.mxu0 %v4831_v0 }
 0x4ff   : > { %4266 = vmatmul.mubr.msk.f32.vlgmr.msra.gmra.mrb[14].mxu0 %vm2735_vm4, %v2822_v4  ;;  %4273 = vmatmul.mubr.msk.f32.vlgmr.msra.gmra.mrb[20].mxu1 %vm2735_vm4, %v2823_v25 }
 0x500   : > { %4283 = vmatprep.mubr.msk.f32.mxu0 %vm4832_vm0, %v4833_v1 }
 0x590   : > { %v2893_v8 = vpop.f32.mrb[10].mxu1 }
 0x591   : > { %v4225_v20 = vpop.f32.mrb[11].mxu1 }
 0x594   : > { %v2966_v38 = vpop.f32.mrb[12].mxu1 }
 0x595   : > { %v4232_v26 = vpop.f32.mrb[13].mxu1 }
 0x596   : > { %v3720_v26 = vld [vmem:[#allocation8] sm:$0xff] }
 0x598   : > { %v3039_v49 = vpop.f32.mrb[14].mxu1 }
 0x599   : > { %v3408_v50 = vcombine.low %v2893_v8, %v3039_v49  ;;  %v3409_v44 = vcombine.high %v2893_v8, %v3039_v49  ;;  %v4239_v37 = vpop.f32.mrb[15].mxu1  ;;  %v3721_v49 = vld [vmem:[#allocation8 + $0x8] sm:$0xff] }
 0x59b   : > { %v3416_v10 = vrot.slane %v3408_v50, %v5286_v52  ;;  %v3423_v36 = vrot.slane %v3409_v44, %v5286_v52 }
 0x5c9   : > { %v3112_v51 = vpop.f32.mrb[16].mxu1 }
 0x5ca   : > { %v3424_v55 = vcombine.low %v2966_v38, %v3112_v51  ;;  %v3425_v9 = vcombine.high %v2966_v38, %v3112_v51  ;;  %v4246_v47 = vpop.f32.mrb[17].mxu1 }
 0x5cc   : > { %v3432_v17 = vrot.slane %v3424_v55, %v5286_v52  ;;  %v3439_v1 = vrot.slane %v3425_v9, %v5286_v52 }
 0x5cd   : > { %v3258_v11 = vpop.f32.mrb[18].mxu1 }
 0x5ce   : > { %v3472_v12 = vcombine.low %v3416_v10, %v3432_v17  ;;  %v3473_v13 = vcombine.high %v3416_v10, %v3432_v17  ;;  %v3488_v14 = vcombine.low %v3423_v36, %v3439_v1  ;;  %v3489_v18 = vcombine.high %v3423_v36, %v3439_v1  ;;  %v3185_v39 = vpop.f32.mrb[12].mxu0  ;;  %v4260_v19 = vpop.f32.mrb[19].mxu1  ;;  %v3722_v36 = vld [vmem:[#allocation8 + $0x10] sm:$0xff]  ;;  %v3723_v17 = vld [vmem:[#allocation8 + $0x18] sm:$0xff] }
 0x5cf   : > { %v4253_v53 = vpop.f32.mrb[13].mxu0  ;;  %v4365_v1 = vpack.c.bf16 %v3721_v49, %v3720_v26 }
 0x5d0   : > { %v3480_v23 = vrot.slane %v3472_v12, %v5292_v60  ;;  %v3487_v31 = vrot.slane %v3473_v13, %v5292_v60  ;;  %v3496_v5 = vrot.slane %v3488_v14, %v5292_v60  ;;  %v3503_v21 = vrot.slane %v3489_v18, %v5292_v60 }
 0x5d1   : > { %4366 = vmatpush3.bf16.msra.mxu0 %v4365_v1  ;;  %v4368_v18 = vpack.c.bf16 %v3723_v17, %v3722_v36 }
 0x5d2   : > { %v4044_v43 = vcombine.low %v3480_v23, %v3487_v31  ;;  %v4046_v6 = vcombine.high %v3480_v23, %v3487_v31  ;;  %v4048_v15 = vcombine.low %v3496_v5, %v3503_v21  ;;  %v4050_v22 = vcombine.high %v3496_v5, %v3503_v21  ;;  %v3331_v24 = vpop.f32.mrb[14].mxu0  ;;  %v3404_v28 = vpop.f32.mrb[20].mxu1  ;;  %4367 = vmatprep.subr.bf16.mxu0 %v4831_v0 }
 0x5d3   : > { %v3440_v16 = vcombine.low %v3185_v39, %v3331_v24  ;;  %v3441_v30 = vcombine.high %v3185_v39, %v3331_v24  ;;  %v3456_v27 = vcombine.low %v3258_v11, %v3404_v28  ;;  %v3457_v33 = vcombine.high %v3258_v11, %v3404_v28  ;;  %v4267_v35 = vpop.f32.mrb[15].mxu0  ;;  %v4274_v40 = vpop.f32.mrb[21].mxu1 }
 0x5d4   : > { %v3552_v41 = vrot.slane %v4044_v43, %v5286_v52  ;;  %v3568_v32 = vrot.slane %v4046_v6, %v5286_v52  ;;  %v3584_v42 = vrot.slane %v4048_v15, %v5286_v52  ;;  %v3600_v56 = vrot.slane %v4050_v22, %v5286_v52 }
 0x5d5   : > { %v3448_v57 = vrot.slane %v3440_v16, %v5286_v52  ;;  %v3455_v58 = vrot.slane %v3441_v30, %v5286_v52  ;;  %v3464_v59 = vrot.slane %v3456_v27, %v5286_v52  ;;  %v3471_v29 = vrot.slane %v3457_v33, %v5286_v52  ;;  %4369 = vmatpush3.bf16.msra.mxu0 %v4368_v18 }
 0x5d6   : > { %v3609_v45 = vcombine.high %v3552_v41, %v3568_v32  ;;  %v3641_v48 = vcombine.high %v3584_v42, %v3600_v56  ;;  %v3608_v62 = vcombine.low %v3552_v41, %v3568_v32  ;;  %v3640_v63 = vcombine.low %v3584_v42, %v3600_v56 }
 0x5d7   : > { %v3504_v61 = vcombine.low %v3448_v57, %v3464_v59  ;;  %v3505_v2 = vcombine.high %v3448_v57, %v3464_v59  ;;  %v3520_v54 = vcombine.low %v3455_v58, %v3471_v29  ;;  %v3521_v3 = vcombine.high %v3455_v58, %v3471_v29  ;;  %v4052_v57 = vld [vmem:[%s5940_s18] ss:$0 sm:$0xff] }
 0x5d8   : > { %v3623_v46 = vrot.slane %v3609_v45, %v5292_v60  ;;  %v3655_v34 = vrot.slane %v3641_v48, %v5292_v60  ;;  %v3616_v7 = vrot.slane %v3608_v62, %v5292_v60  ;;  %v3648_v4 = vrot.slane %v3640_v63, %v5292_v60 }
 0x5d9   : > { %v3512_v25 = vrot.slane %v3504_v61, %v5292_v60  ;;  %v3519_v8 = vrot.slane %v3505_v2, %v5292_v60  ;;  %v3528_v20 = vrot.slane %v3520_v54, %v5292_v60  ;;  %v3535_v38 = vrot.slane %v3521_v3, %v5292_v60 }
 0x5da   : > { %v3674_v50 = vcombine.low %v3623_v46, %v3655_v34  ;;  %v3673_v44 = vcombine.high %v3616_v7, %v3648_v4  ;;  %v3675_v37 = vcombine.high %v3623_v46, %v3655_v34  ;;  %v3672_v51 = vcombine.low %v3616_v7, %v3648_v4 }
 0x5db   : > { %v4045_v55 = vcombine.low %v3512_v25, %v3519_v8  ;;  %v4047_v9 = vcombine.high %v3512_v25, %v3519_v8  ;;  %v4049_v47 = vcombine.low %v3528_v20, %v3535_v38  ;;  %v4051_v10 = vcombine.high %v3528_v20, %v3535_v38 }
 0x5dc   : > { %3685 = vrot.lane.b32.xlu1 %v3674_v50, %s4845_s10  ;;  %3681 = vrot.lane.b32.xlu0 %v3673_v44, %s4846_s15 }
 0x5dd   : > { %v3559_v11 = vrot.slane %v4045_v55, %v5286_v52  ;;  %v3575_v12 = vrot.slane %v4047_v9, %v5286_v52  ;;  %v3591_v13 = vrot.slane %v4049_v47, %v5286_v52  ;;  %v3607_v14 = vrot.slane %v4051_v10, %v5286_v52 }
 0x5df   : > { %v3624_v39 = vcombine.low %v3559_v11, %v3575_v12  ;;  %v3656_v19 = vcombine.low %v3591_v13, %v3607_v14  ;;  %v3625_v53 = vcombine.high %v3559_v11, %v3575_v12  ;;  %v3657_v23 = vcombine.high %v3591_v13, %v3607_v14 }
 0x5e0   : > { %3689 = vrot.lane.b32.xlu1 %v3675_v37, %s4847_s12  ;;  %s5941_s12 = sld [smem:[#allocation25_spill]] }
 0x5e1   : > { %v3632_v31 = vrot.slane %v3624_v39, %v5292_v60  ;;  %v3664_v5 = vrot.slane %v3656_v19, %v5292_v60  ;;  %v3639_v21 = vrot.slane %v3625_v53, %v5292_v60  ;;  %v3671_v43 = vrot.slane %v3657_v23, %v5292_v60 }
 0x5e3   : > { %v3677_v52 = vcombine.high %v3632_v31, %v3664_v5  ;;  %v3676_v6 = vcombine.low %v3632_v31, %v3664_v5  ;;  %v3679_v15 = vcombine.high %v3639_v21, %v3671_v43  ;;  %v3678_v22 = vcombine.low %v3639_v21, %v3671_v43 }
 0x5e5   : > { %3697 = vrot.lane.b32.xlu1 %v3677_v52, %s4848_s29  ;;  %3693 = vrot.lane.b32.xlu0 %v3676_v6, %s4849_s21  ;;  %s4689_s21 = scalar_lea.vmem %s5825_s2, 128 }
 0x5e6   : > { %s5823_s29 = scalar_lea.hbm %s5941_s12, %s4056_s6  ;;  %p4690_p0 = scmp.ne.s32.totalorder %s5825_s2, %s4689_s21 }
 0x5e8   : > { %p4691_p3 = pnand %p4690_p0, %p5942_p2 }
 0x5e9   : > { %3705 = vrot.lane.b32.xlu1 %v3679_v15, %s4850_s8  ;;  %3701 = vrot.lane.b32.xlu0 %v3678_v22, %s4851_s9  ;;  %s4693_s8 = sshll.u32 %s4852_s13, 4  ;;  %s4694_s8 = int_to_ptr.vmem [resolvable:$false] %s4693_s8 }
 0x5ea   : > { %p4692_p11 = pneg %p4691_p3  ;;  %s4695_s9 = scalar_lea.vmem %s4694_s8, 256 }
 0x5eb   : > { %p4696_p7 = scmp.lt.s32.totalorder %s5825_s2, %s4694_s8  ;;  %p4697_p12 = scmp.lt.s32.totalorder %s4695_s9, %s4689_s21 }
 0x5ed   : > { %p4698_p13 = por %p4697_p12, %p4696_p7 }
 0x5ef   : > { %p4699_p6 = pnand %p4698_p13, %p4692_p11 }
 0x64e   : > { %v3686_v0 = vpop.permute.xlu1 %3685  ;;  %v3682_v24 = vpop.permute.xlu0 %3681 }
 0x64f   : > { %v3708_v16 = vsel %vm2102_vm2, %v3672_v51, %v3682_v24 }
 0x650   : > { %v3710_v60 = vsel %vm3709_vm5, %v3708_v16, %v3686_v0 }
 0x652   : > { %v3690_v28 = vpop.permute.xlu1 %3689 }
 0x653   : > { %v3712_v30 = vsel %vm3711_vm6, %v3710_v60, %v3690_v28 }
 0x657   : > { %v3698_v27 = vpop.permute.xlu1 %3697  ;;  %v3694_v33 = vpop.permute.xlu0 %3693 }
 0x658   : > { %v3713_v35 = vsel %vm2735_vm4, %v3712_v30, %v3694_v33 }
 0x659   : > { %v3715_v41 = vsel %vm3714_vm7, %v3713_v35, %v3698_v27 }
 0x65b   : > { %v3706_v40 = vpop.permute.xlu1 %3705  ;;  %v3702_v32 = vpop.permute.xlu0 %3701 }
 0x65c   : > { %v3717_v42 = vsel %vm3716_vm8, %v3715_v41, %v3702_v32 }
 0x65d   : > { %v3719_v56 = vsel %vm3718_vm9, %v3717_v42, %v3706_v40 }
 0x65e   : > { %4284 = vmatmul.mubr.msk.f32.vlgmr.msra.gmra.mrb[16].mxu0 %vm368_vm1, %v3719_v56 }
 0x731   : > { %v3800_v58 = vpop.f32.mrb[16].mxu0 }
 0x732   : > { %v3801_v59 = vadd.f32 %v4052_v57, %v3800_v58  ;;  %v4285_v29 = vpop.f32.mrb[17].mxu0 }
 0x734   : > { %3804 = vst.msk [vmem:[%s353_s5] sm:$0xff] %vm368_vm1, %v3801_v59 }
 0x735   : > { %4702 = shalt.err (!%p4699_p6)
}
 0x736   : > { %s4703_s16 = scalar_lea.hbm %s5823_s29, 128  ;;  %s4707_s19 = scalar_lea.hbm %s5941_s12, 512 }
 0x737   : > { %p4704_p1 = scmp.ne.s32.totalorder %s5823_s29, %s4703_s16  ;;  %p4708_p4 = scmp.lt.u32.totalorder %s5823_s29, %s5941_s12 }
 0x738   : > { %p4709_p10 = scmp.lt.u32.totalorder %s4707_s19, %s4703_s16  ;;  %p4711_p0 = scmp.lt.u32.totalorder %s4703_s16, %s5823_s29 }
 0x739   : > { %p4705_p5 = pnand %p4704_p1, %p5942_p2 }
 0x73a   : > { %p4710_p8 = por %p4709_p10, %p4708_p4 }
 0x73b   : > { %p4706_p9 = pneg %p4705_p5 }
 0x73c   : > { %p4712_p3 = por %p4711_p0, %p4710_p8 }
 0x73e   : > { %p4713_p11 = pnand %p4712_p3, %p4706_p9 }
 0x740   : > { %4716 = shalt.err (!%p4713_p11)
}
 0x741   : > { %4382 = dma.vmem_to_hbm [thread:$0]  (%p5942_p2), %s5825_s2, 128, %s5823_s29, %s3806_s28  }
 0x742 PF: > { %p4407_p7 = scmp.ge.s32.totalorder %s4823_s7, 2  ;;  %s3833_s18 = sand.u32 1, %s4795_s24  }
 0x743   : > { %p5943_p12 = scmp.ne.s32.totalorder %s5925_s14, 0  ;;  %s3834_s6 = scalar_lea.sflag [#allocation4], %s3833_s18 }
 0x745   : > { %p4399_p13 = pnand %p4407_p7, %p5943_p12 }
 0x747   : > { %4778 = dma.done.wait (!%p4399_p13), %s3834_s6, 128  }
 0x748   : > { %4780 = vsyncadd (!%p4399_p13), %s3834_s6, 4294967168  ;;  %s26_s7 = sadd.s32 1, %s4823_s7   ;;  %s5944_s17 = sld [smem:[#allocation20_spill]] }
 0x749   : > { %p23_p6 = scmp.ge.s32.totalorder %s26_s7, 6   ;;  %s5945_s5 = sld [smem:[#allocation21_spill]] }
 0x74a   : > { %s5946_s27 = sld [smem:[#allocation17_spill]]  ;;  %s5947_s29 = sld [smem:[#allocation18_spill]] }
 0x74b   : > { %s5948_s2 = sld [smem:[#allocation19_spill]]  ;;  %s5949_s21 = smov %s4787_s22 }
 0x74c   : > { %s5950_s22 = smov %s4791_s23  ;;  %s5952_s24 = smov %s4799_s25 }
 0x74d   : > { %s5953_s25 = smov %s4803_s26  ;;  %s5955_s28 = smov %s4819_s30 }
 0x74e   : > { %s5951_s23 = smov %s5944_s17  ;;  %25 = sbr.rel (!%p23_p6) target bundleno = 17 (0x11), region = 110 }
 0x74f   : > { %s5954_s26 = smov %s5945_s5 }
 0x751   : > { %s5956_s30 = smov %s5948_s2 }
 0x755   :  { %3839 = vsyncpa [#allocation3], 1 }
 0x756   :  { %3841 = vsyncpa [#allocation3 + $0x1], 1 }
 0x757   :  { %3842 = vsyncpa [#allocation6], 1 }
 0x758   :  { %3844 = vsyncpa [#allocation6 + $0x1], 1 }
 0x759   :  { %3845 = vsyncpa [#allocation9], 1 }
 0x75a   :  { %3846 = vsyncpa [#allocation4], 1 }
 0x75b   :  { %3848 = vsyncpa [#allocation4 + $0x1], 1 }

// kernel: tpu_custom_call.1
= control target key start
LH: loop header
LB: loop body
LE: loop exit
PB: predicated region body
PF: predicated region fallthrough
CT: control target
= control target key end

     0   :  { %s3828_s0 = inlined_call_operand.hbm [shape: f32[2,16,32], index: 0, kind: input, shape index: {}]   ;;  %s3829_s1 = inlined_call_operand.hbm [shape: f32[2,16,32], index: 1, kind: input, shape index: {}]   ;;  %s3830_s2 = inlined_call_operand.hbm [shape: f32[32,96], index: 2, kind: input, shape index: {}]   ;;  %s3831_s3 = inlined_call_operand.vmem [shape: f32[1,96], index: 3, kind: input, shape index: {}]   ;;  %s3832_s4 = inlined_call_operand.hbm [shape: f32[32,32], index: 4, kind: input, shape index: {}]   ;;  %s3833_s5 = inlined_call_operand.vmem [shape: f32[1,32], index: 5, kind: input, shape index: {}]   ;;  %s3834_s6 = inlined_call_operand.hbm [shape: f32[2,16,32], index: 6, kind: output, shape index: {}]  }
   0x1   :  { %3846 = sst [smem:[#allocation22_spill]] %s3830_s2 }
   0x2   :  { %3847 = sst [smem:[#allocation23_spill]] %s3832_s4 }
   0x3   :  { %3848 = sst [smem:[#allocation24_spill]] %s3833_s5 }
   0x4   :  { %3849 = sst [smem:[#allocation25_spill]] %s3834_s6 }
   0x5   :  { %11 = vsyncpa [#allocation3], 0 }
   0x6   :  { %13 = vsyncpa [#allocation3 + $0x1], 0 }
   0x7   :  { %14 = vsyncpa [#allocation6], 0 }
   0x8   :  { %16 = vsyncpa [#allocation6 + $0x1], 0 }
   0x9   :  { %17 = vsyncpa [#allocation9], 0 }
   0xa   :  { %18 = vsyncpa [#allocation4], 0 }
   0xb   :  { %20 = vsyncpa [#allocation4 + $0x1], 0  ;;  %s3229_s21 = smov 0   ;;  %s3231_s22 = smov 0  }
   0xc   :  { %s3233_s23 = smov 0   ;;  %s3235_s24 = smov 0  }
   0xd   :  { %s3237_s25 = smov 0   ;;  %s3239_s26 = smov 0  }
   0xe   :  { %s3241_s27 = smov 0   ;;  %s3243_s28 = smov 0  }
   0xf   :  { %s3245_s29 = smov 0   ;;  %s3247_s30 = smov 0  }
  0x10   :  { %s3249_s7 = smov 0  }
  0x11 LB: > { %3850 = sst [smem:[#allocation16_spill]] %s3150_s27  ;;  %s3283_s8 = sadd.s32 4294967295, %s3166_s7   ;;  %s3166_s7 = sphi %s3249_s7, %s26_s7   ;;  %s3162_s30 = sphi %s3247_s30, %s3897_s30   ;;  %s3158_s29 = sphi %s3245_s29, %s3888_s29   ;;  %s3154_s28 = sphi %s3243_s28, %s3896_s28   ;;  %s3150_s27 = sphi %s3241_s27, %s3887_s27   ;;  %s3146_s26 = sphi %s3239_s26, %s3895_s26   ;;  %s3142_s25 = sphi %s3237_s25, %s3894_s25   ;;  %s3138_s24 = sphi %s3235_s24, %s3893_s24   ;;  %s3134_s23 = sphi %s3233_s23, %s3892_s23   ;;  %s3130_s22 = sphi %s3231_s22, %s3891_s22   ;;  %s3126_s21 = sphi %s3229_s21, %s3890_s21  }
  0x12   : > { %3851 = sst [smem:[#allocation17_spill]] %s3158_s29  ;;  %p86_p0 = scmp.ne.s32.totalorder %s3130_s22, %s3126_s21 }
  0x13   : > { %p3835_p1 = scmp.eq.s32.totalorder %s3283_s8, 0  ;;  %p2273_p2 = scmp.ge.s32.totalorder %s3166_s7, 1 }
  0x14   : > { %p209_p3 = scmp.lt.s32.totalorder %s3166_s7, 5  ;;  %s3168_s11 = smov [#allocation7]  }
  0x15   : > { %p3291_p4 = por %p86_p0, %p3835_p1  ;;  %s221_s12 = sshll.u32 %s3168_s11, 4  ;;  %s222_s12 = int_to_ptr.vmem [resolvable:$true] %s221_s12 }
  0x16   : > { %p3295_p5 = pnand %p2273_p2, %p209_p3  ;;  %s3169_s14 = smov [#allocation8]  }
  0x17   : > { %s3852_s9 = scalar_select %p3291_p4, 1, 0 }
  0x18   : > { %s3853_s10 = scalar_select %p3295_p5, 1, 0 }
  0x19   : > { %p2659_p6 = pneg %p3295_p5  ;;  %s237_s15 = sshll.u32 %s3169_s14, 4  ;;  %s3307_s15 = int_to_ptr.vmem [resolvable:$true] %s237_s15 }
  0x1a   : > { %s3855_s2 = sld [smem:[#allocation22_spill]] }
  0x1b   : > { %p3303_p7 = pnand %p2659_p6, %p3835_p1 }
  0x1d   : > { %p2918_p9 = pneg %p3303_p7 }
  0x20   : > { %s2916_s18 = scalar_lea.hbm %s3855_s2, 512 }
  0x21   : > { %p2917_p8 = scmp.ne.s32.totalorder %s3855_s2, %s2916_s18  ;;  %p2923_p12 = scmp.lt.u32.totalorder %s2916_s18, %s3855_s2 }
  0x23   : > { %p2919_p10 = pnand %p2918_p9, %p2917_p8 }
  0x25   : > { %p2920_p11 = pneg %p2919_p10 }
  0x27   : > { %p2925_p13 = pnand %p2923_p12, %p2920_p11 }
  0x29   : > { %2928 = shalt.err (!%p2925_p13)
}
  0x2a   : > { %s2929_s14 = scalar_lea.vmem %s222_s12, 512  ;;  %p2937_p6 = scmp.lt.s32.totalorder %s222_s12, %s222_s12 }
  0x2b   : > { %p2930_p0 = scmp.ne.s32.totalorder %s222_s12, %s2929_s14  ;;  %p2938_p1 = scmp.lt.s32.totalorder %s2929_s14, %s2929_s14 }
  0x2d   : > { %p2932_p2 = pnand %p2930_p0, %p2918_p9  ;;  %p2939_p4 = por %p2938_p1, %p2937_p6 }
  0x2f   : > { %p2933_p3 = pneg %p2932_p2 }
  0x31   : > { %p2940_p5 = pnand %p2939_p4, %p2933_p3 }
  0x33   : > { %2943 = shalt.err (!%p2940_p5)
}
  0x34   : > { %s3839_s16 = smov 128   ;;  %s3840_s17 = smov 8  }
  0x35   : > { %2662 = dma.hbm_to_vmem [thread:$0]  (!%p3303_p7), %s3855_s2, 512, %s222_s12, [#allocation6], %s3839_s16, %s3839_s16, %s3840_s17  }
  0x36   : > { %s3856_s4 = sld [smem:[#allocation23_spill]] }
  0x3c   : > { %s2944_s11 = scalar_lea.hbm %s3856_s4, 512 }
  0x3d   : > { %p2945_p1 = scmp.ne.s32.totalorder %s3856_s4, %s2944_s11  ;;  %p2951_p8 = scmp.lt.u32.totalorder %s2944_s11, %s3856_s4 }
  0x3f   : > { %p2947_p4 = pnand %p2945_p1, %p2918_p9 }
  0x41   : > { %p2948_p5 = pneg %p2947_p4 }
  0x43   : > { %p2953_p10 = pnand %p2951_p8, %p2948_p5 }
  0x45   : > { %2956 = shalt.err (!%p2953_p10)
}
  0x46   : > { %s2957_s12 = scalar_lea.vmem %s3307_s15, 512  ;;  %p2965_p0 = scmp.lt.s32.totalorder %s3307_s15, %s3307_s15 }
  0x47   : > { %p2958_p11 = scmp.ne.s32.totalorder %s3307_s15, %s2957_s12  ;;  %p2966_p2 = scmp.lt.s32.totalorder %s2957_s12, %s2957_s12 }
  0x49   : > { %p2960_p12 = pnand %p2958_p11, %p2918_p9  ;;  %p2967_p3 = por %p2966_p2, %p2965_p0 }
  0x4b   : > { %p2961_p13 = pneg %p2960_p12 }
  0x4d   : > { %p2968_p6 = pnand %p2967_p3, %p2961_p13 }
  0x4f   : > { %2971 = shalt.err (!%p2968_p6)
}
  0x50   : > { %2665 = dma.hbm_to_vmem [thread:$0]  (!%p3303_p7), %s3856_s4, 512, %s3307_s15, [#allocation9], %s3839_s16, %s3839_s16, %s3840_s17  }
  0x51   : > { %s2272_s27 = sadd.s32 4294967294, %s3166_s7   ;;  %s35_s13 = sadd.s32 1, %s3158_s29 }
  0x52   : > { %p36_p9 = scmp.ge.s32.totalorder %s35_s13, 2  ;;  %s38_s18 = sadd.s32 1, %s3162_s30 }
  0x53   : > { %s47_s19 = sadd.s32 1, %s3146_s26  ;;  %p54_p1 = scmp.ne.s32.totalorder %s3146_s26, %s3142_s25 }
  0x54   : > { %s3899_s13 = smov (%p36_p9, %s35_s13), 0  ;;  %s3901_s18 = smov (!%p36_p9, %s38_s18), %s3162_s30 }
  0x55   : > { %3857 = sst [smem:[#allocation18_spill]] %s3899_s13  ;;  %s43_s15 = ssub.s32 %s3158_s29, %s3899_s13 }
  0x56   : > { %p55_p7 = scmp.eq.s32.totalorder %s3166_s7, 0  ;;  %p40_p4 = scmp.ge.s32.totalorder %s3901_s18, 2 }
  0x57   : > { %p60_p5 = scmp.ne.s32.totalorder %s3142_s25, %s3138_s24  ;;  %s73_s21 = sadd.s32 1, %s3134_s23 }
  0x58   : > { %p3381_p8 = por %p55_p7, %p54_p1  ;;  %s3903_s18 = smov (%p40_p4, %s3901_s18), 0 }
  0x59   : > { %3859 = sst [smem:[#allocation19_spill]] %s3903_s18  ;;  %p3860_p10 = scmp.eq.s32.totalorder %s3283_s8, 0 }
  0x5a   : > { %p80_p12 = scmp.ne.s32.totalorder %s3134_s23, %s3130_s22  ;;  %s42_s14 = ssub.s32 %s3162_s30, %s3903_s18 }
  0x5b   : > { %p3393_p11 = por %p3860_p10, %p60_p5  ;;  %p196_p13 = scmp.eq.s32.totalorder %s3283_s8, 3 }
  0x5c   : > { %s44_s12 = sor.u32 %s43_s15, %s42_s14  ;;  %p71_p0 = scmp.eq.s32.totalorder %s42_s14, 0 }
  0x5d   : > { %s3861_s11 = scalar_select %p3393_p11, 1, 0 }
  0x5e   : > { %p45_p2 = scmp.eq.s32.totalorder %s44_s12, 0  ;;  %p3404_p3 = por %p80_p12, %p55_p7 }
  0x5f   : > { %s3409_s6 = scalar_select %p71_p0, %s3134_s23, %s73_s21  }
  0x60   : > { %s3412_s16 = scalar_select %p45_p2, %s3146_s26, %s47_s19  }
  0x61   : > { %3863 = sst [smem:[#allocation20_spill]] %s3409_s6  ;;  %p3417_p6 = por %p196_p13, %p54_p1 }
  0x62   : > { %3864 = sst [smem:[#allocation21_spill]] %s3412_s16  ;;  %p202_p9 = scmp.eq.s32.totalorder %s2272_s27, 3 }
  0x63   : > { %s3865_s17 = scalar_select %p3417_p6, 1, 0 }
  0x64   : > { %p2679_p4 = scmp.lt.s32.totalorder %s3166_s7, 4  ;;  %s254_s15 = sand.u32 1, %s3146_s26  }
  0x65   : > { %p3426_p7 = por %p202_p9, %p60_p5  ;;  %s2277_s21 = sshll.u32 %s254_s15, 3 }
  0x66   : > { %s2278_s12 = sshll.u32 %s3162_s30, 1  ;;  %s258_s4 = scalar_lea.vmem [#allocation2], %s2277_s21 }
  0x67   : > { %s3866_s14 = scalar_select %p3426_p7, 1, 0 }
  0x68   : > { %s263_s2 = sadd.s32 %s3158_s29, %s2278_s12  ;;  %s267_s18 = sshll.u32 %s258_s4, 4  ;;  %s3437_s18 = int_to_ptr.vmem [resolvable:$true] %s267_s18 }
  0x69   : > { %s2279_s19 = sshll.u32 %s263_s2, 7  ;;  %p3441_p1 = pnand %p2679_p4, %p3381_p8 }
  0x6a   : > { %s3435_s6 = scalar_lea.hbm %s3828_s0, %s2279_s19  ;;  %p3447_p5 = pnand %p2679_p4, %p3404_p3 }
  0x6b   : > { %s274_s4 = sand.u32 1, %s3166_s7   ;;  %s276_s16 = sand.u32 1, %s3134_s23  }
  0x6c   : > { %s255_s13 = scalar_lea.sflag [#allocation3], %s254_s15  ;;  %s2972_s21 = scalar_lea.hbm %s3435_s6, 128 }
  0x6d   : > { %p2973_p10 = scmp.ne.s32.totalorder %s3435_s6, %s2972_s21  ;;  %p2974_p12 = pneg %p3441_p1 }
  0x6e   : > { %s2977_s5 = scalar_lea.hbm %s3828_s0, 512  ;;  %p2978_p0 = scmp.lt.u32.totalorder %s3435_s6, %s3828_s0 }
  0x6f   : > { %p2975_p8 = pnand %p2974_p12, %p2973_p10  ;;  %p2979_p2 = scmp.lt.u32.totalorder %s2977_s5, %s2972_s21 }
  0x70   : > { %p2981_p9 = scmp.lt.u32.totalorder %s2972_s21, %s3435_s6 }
  0x71   : > { %p2976_p13 = pneg %p2975_p8  ;;  %p2980_p3 = por %p2979_p2, %p2978_p0 }
  0x73   : > { %p2982_p4 = por %p2981_p9, %p2980_p3 }
  0x75   : > { %p2983_p7 = pnand %p2982_p4, %p2976_p13 }
  0x77   : > { %2986 = shalt.err (!%p2983_p7)
}
  0x78   : > { %s2987_s15 = scalar_lea.vmem %s3437_s18, 128  ;;  %s3172_s20 = smov [#allocation2]  }
  0x79   : > { %p2988_p10 = scmp.ne.s32.totalorder %s3437_s18, %s2987_s15  ;;  %s2992_s12 = sshll.u32 %s3172_s20, 4  ;;  %s2993_s12 = int_to_ptr.vmem [resolvable:$false] %s2992_s12 }
  0x7a   : > { %s2994_s29 = scalar_lea.vmem %s2993_s12, 256  ;;  %p2995_p11 = scmp.lt.s32.totalorder %s3437_s18, %s2993_s12 }
  0x7b   : > { %p2990_p8 = pnand %p2988_p10, %p2974_p12  ;;  %p2996_p0 = scmp.lt.s32.totalorder %s2994_s29, %s2987_s15 }
  0x7d   : > { %p2991_p6 = pneg %p2990_p8  ;;  %p2997_p2 = por %p2996_p0, %p2995_p11 }
  0x7f   : > { %p2998_p3 = pnand %p2997_p2, %p2991_p6 }
  0x81   : > { %3001 = shalt.err (!%p2998_p3)
}
  0x82   : > { %2669 = dma.hbm_to_vmem [thread:$0]  (!%p3441_p1), %s3435_s6, 128, %s3437_s18, %s255_s13  }
  0x83   : > { %s2280_s21 = sshll.u32 %s276_s16, 4  ;;  %s2334_s5 = sshll.u32 %s3162_s30, 8 }
  0x84   : > { %s3484_s15 = scalar_lea.hbm %s3829_s1, %s2334_s5  ;;  %s278_s27 = scalar_lea.vmem [#allocation5], %s2280_s21 }
  0x85   : > { %s285_s12 = sshll.u32 %s278_s27, 4  ;;  %s3490_s29 = scalar_lea.sflag [#allocation6], %s274_s4  ;;  %s3486_s12 = int_to_ptr.vmem [resolvable:$true] %s285_s12 }
  0x86   : > { %s3002_s18 = scalar_lea.hbm %s3484_s15, 256  ;;  %p3004_p6 = pneg %p3447_p5 }
  0x87   : > { %p3003_p11 = scmp.ne.s32.totalorder %s3484_s15, %s3002_s18  ;;  %s3007_s13 = scalar_lea.hbm %s3829_s1, 512 }
  0x88   : > { %p3008_p12 = scmp.lt.u32.totalorder %s3484_s15, %s3829_s1  ;;  %p3009_p13 = scmp.lt.u32.totalorder %s3007_s13, %s3002_s18 }
  0x89   : > { %p3005_p7 = pnand %p3004_p6, %p3003_p11  ;;  %p3011_p4 = scmp.lt.u32.totalorder %s3002_s18, %s3484_s15 }
  0x8a   : > { %p3010_p9 = por %p3009_p13, %p3008_p12 }
  0x8b   : > { %p3006_p1 = pneg %p3005_p7 }
  0x8c   : > { %p3012_p10 = por %p3011_p4, %p3010_p9 }
  0x8e   : > { %p3013_p8 = pnand %p3012_p10, %p3006_p1 }
  0x90   : > { %3016 = shalt.err (!%p3013_p8)
}
  0x91   : > { %s3017_s4 = scalar_lea.vmem %s3486_s12, 256  ;;  %s3173_s19 = smov [#allocation5]  }
  0x92   : > { %p3018_p0 = scmp.ne.s32.totalorder %s3486_s12, %s3017_s4  ;;  %s3022_s20 = sshll.u32 %s3173_s19, 4  ;;  %s3023_s20 = int_to_ptr.vmem [resolvable:$false] %s3022_s20 }
  0x93   : > { %s3024_s27 = scalar_lea.vmem %s3023_s20, 512  ;;  %p3025_p11 = scmp.lt.s32.totalorder %s3486_s12, %s3023_s20 }
  0x94   : > { %p3020_p2 = pnand %p3018_p0, %p3004_p6  ;;  %p3026_p7 = scmp.lt.s32.totalorder %s3024_s27, %s3017_s4 }
  0x96   : > { %p3021_p3 = pneg %p3020_p2  ;;  %p3027_p12 = por %p3026_p7, %p3025_p11 }
  0x98   : > { %p3028_p13 = pnand %p3027_p12, %p3021_p3 }
  0x9a   : > { %3031 = shalt.err (!%p3028_p13)
}
  0x9b   : > { %s3869_s18 = smov 8   ;;  %s3870_s6 = smov 128  }
  0x9c   : > { %2672 = dma.hbm_to_vmem [thread:$0]  (!%p3447_p5), %s3484_s15, 256, %s3486_s12, %s3490_s29, %s3870_s6, %s3870_s6, %s3869_s18  }
  0x9d   : > { %p3871_p6 = scmp.ne.s32.totalorder %s3853_s10, 0 }
  0x9e   : > { %s3524_s16 = sand.u32 (!%p3871_p6), 1, %s3142_s25   ;;  %p3872_p1 = scmp.ne.s32.totalorder (!%p3871_p6), %s3861_s11, 0 }
  0x9f   : > { %297 = sbr.rel (%p3871_p6) target bundleno = 5365 (0x14f5), region = 44  ;;  %s2284_s13 = sshll.u32 (!%p3871_p6), %s3524_s16, 3 }
  0xa0   : > { %s300_s5 = scalar_lea.sflag (!%p3871_p6), [#allocation3], %s3524_s16  ;;  %s3530_s2 = scalar_lea.vmem (!%p3871_p6), [#allocation2], %s2284_s13 }
  0xa6   : > { %3105 = dma.done.wait (%p3872_p1), %s300_s5, 128  }
  0xa7   : > { %3107 = vsyncadd (%p3872_p1), %s300_s5, 4294967168  ;;  %s308_s10 = sand.u32 1, %s3283_s8   ;;  %s310_s15 = sand.u32 1, %s3130_s22  }
  0xa8   : > { %s3538_s12 = sshll.u32 %s310_s15, 4  ;;  %s309_s29 = scalar_lea.sflag [#allocation6], %s308_s10 }
  0xa9   : > { %s312_s21 = scalar_lea.vmem [#allocation5], %s3538_s12  ;;  %p3873_p5 = scmp.ne.s32.totalorder %s3852_s9, 0 }
  0xab   : > { %3109 = dma.done.wait (%p3873_p5), %s309_s29, 256  }
  0xac   : > { %3111 = vsyncadd (%p3873_p5), %s309_s29, 4294967040  ;;  %p3874_p9 = scmp.eq.s32.totalorder %s3283_s8, 0 }
  0xae   : > { %3113 = dma.done.wait (%p3874_p9), [#allocation6], 512   ;;  %p3875_p4 = pmov %p3874_p9 }
  0xb0   : > { %3115 = vsyncadd (%p3875_p4), [#allocation6], 4294966784  ;;  %p3876_p10 = pmov %p3875_p4 }
  0xb1   : > { %p3877_p8 = pmov %p3875_p4 }
  0xb2   : > { %3117 = dma.done.wait (%p3876_p10), [#allocation9], 512  }
  0xb3   : > { %3119 = vsyncadd (%p3877_p8), [#allocation9], 4294966784  ;;  %vm368_vm0 = vcmask 261120   ;;  %v357_v0 = vld [vmem:[#allocation7] sm:$0xff]  ;;  %v358_v1 = vld [vmem:[#allocation7 + $0x8] sm:$0xff]  ;;  %s3174_s8 = smov 96  }
  0xb4   : > { %v359_v2 = vld [vmem:[#allocation7 + $0x10] sm:$0xff]  ;;  %v2794_v3 = vpack.i.bf16 %v358_v1, %v357_v0  ;;  %v360_v4 = vld [vmem:[#allocation7 + $0x18] sm:$0xff]  ;;  %v2562_v6 = vpack.c.bf16 %v358_v1, %v357_v0  ;;  %v3175_v9 = vmov 0.0|0.0   ;;  %vm3176_vm1 = vmmov 0   ;;  %s3178_s4 = smov 64   ;;  %s3179_s19 = smov 124  }
  0xb5   : > { %v355_v5 = vld [vmem:[%s312_s21] sm:$0xff]  ;;  %v2799_v8 = vpack.i.bf16 %v360_v4, %v359_v2  ;;  %2561 = vmatprep.subr.bf16.mxu0 %v3175_v9  ;;  %v2565_v10 = vpack.c.bf16 %v360_v4, %v359_v2  ;;  %v3177_v11 = vmov 0.0   ;;  %v354_v12 = vld [vmem:[%s3530_s2] sm:$0xff]  ;;  %vm632_vm2 = vcmask 31744   ;;  %s3180_s20 = smov 120   ;;  %s3181_s27 = smov 116  }
  0xb6   : > { %2424 = vmatprep.mubr.msk.f32.mxu1 %vm368_vm0, %v355_v5  ;;  %v3559_v7 = vld [vmem:[%s3831_s3] ss:$0 sm:$0xff]  ;;  %2795 = vrot.lane.b32.xlu0 %v2794_v3, %s3174_s8  ;;  %v356_v21 = vld [vmem:[%s312_s21 + $0x8] sm:$0xff]  ;;  %vm3579_vm3 = vmpackc.low %vm632_vm2, %vm632_vm2  ;;  %vm712_vm4 = vcmask 130048   ;;  %s3182_s18 = smov 112   ;;  %s3183_s6 = smov 108  }
  0xb7   : > { %2563 = vmatpush3.bf16.msra.mxu0 %v2562_v6  ;;  %2413 = vmatprep.mubr.msk.f32.mxu0 %vm3176_vm1, %v3177_v11  ;;  %s3184_s5 = smov 104   ;;  %s3185_s2 = smov 100   ;;  %vm2032_vm5 = vcmask 64512   ;;  %vm2034_vm6 = vcmask 97280   ;;  %vm2037_vm7 = vcmask 162816   ;;  %vm2039_vm8 = vcmask 195584  }
  0xb8   : > { %2564 = vmatprep.subr.bf16.mxu0 %v3175_v9  ;;  %458 = vrot.lane.b32.xlu1 %v3559_v7, %s3174_s8  ;;  %s3186_s10 = smov 8   ;;  %s3187_s15 = smov 16   ;;  %vm2041_vm9 = vcmask 228352  }
  0xb9   : > { %s3188_s12 = smov 24   ;;  %s3189_s29 = smov 4  }
  0xba   : > { %2800 = vrot.lane.b32.xlu0 %v2799_v8, %s3174_s8  ;;  %s3190_s21 = smov 12   ;;  %s3191_s9 = smov 20  }
  0xbb   : > { %2566 = vmatpush3.bf16.msra.mxu0 %v2565_v10  ;;  %s3192_s11 = smov 28   ;;  %s3880_s8 = sld [smem:[#allocation16_spill]] }
  0xbc   : > { %2805 = vrot.lane.b32.xlu1 %v2794_v3, %s3178_s4  ;;  %p3883_p2 = scmp.ne.s32.totalorder %s3865_s17, 0 }
  0xbe   : > { %2414 = vmatmul.mubr.msk.f32.vlgmr.msra.gmra.mrb[0].mxu0 %vm368_vm0, %v354_v12  ;;  %2810 = vrot.lane.b32.xlu0 %v2799_v8, %s3178_s4 }
  0xbf   : > { %2435 = vmatprep.mubr.msk.f32.mxu0 %vm368_vm0, %v355_v5 }
 0x128   : > { %v2796_v13 = vpop.permute.xlu0 %2795 }
 0x129   : > { %v2798_v14 = vunpack.i.h.bf16 %v2796_v13  ;;  %v2797_v15 = vunpack.i.l.bf16 %v2796_v13 }
 0x12a   : > { %v459_v24 = vpop.permute.xlu1 %458 }
 0x12b   : > { %v2567_v16 = vpack.c.bf16 %v2798_v14, %v2797_v15 }
 0x12c   : > { %v2801_v17 = vpop.permute.xlu0 %2800 }
 0x12d   : > { %v2803_v18 = vunpack.i.h.bf16 %v2801_v17  ;;  %v2802_v19 = vunpack.i.l.bf16 %v2801_v17  ;;  %2568 = vmatprep.subr.bf16.mxu1 %v2567_v16 }
 0x12e   : > { %2570 = vmatpush3.bf16.msra.mxu1 %v2567_v16  ;;  %v2806_v33 = vpop.permute.xlu1 %2805 }
 0x12f   : > { %v2571_v20 = vpack.c.bf16 %v2803_v18, %v2802_v19  ;;  %v2808_v35 = vunpack.i.h.bf16 %v2806_v33  ;;  %v2807_v36 = vunpack.i.l.bf16 %v2806_v33 }
 0x130   : > { %v2811_v34 = vpop.permute.xlu0 %2810 }
 0x131   : > { %2572 = vmatprep.subr.bf16.mxu1 %v2571_v20  ;;  %v2813_v37 = vunpack.i.h.bf16 %v2811_v34  ;;  %v2812_v38 = vunpack.i.l.bf16 %v2811_v34  ;;  %v2575_v39 = vpack.c.bf16 %v2808_v35, %v2807_v36 }
 0x132   : > { %2574 = vmatpush3.bf16.msra.mxu1 %v2571_v20 }
 0x133   : > { %2583 = vmatprep.subr.bf16.mxu1 %v3175_v9  ;;  %v2579_v40 = vpack.c.bf16 %v2813_v37, %v2812_v38  ;;  %2576 = vmatprep.subr.bf16.mxu0 %v2575_v39 }
 0x134   : > { %2578 = vmatpush3.bf16.msra.mxu0 %v2575_v39 }
 0x135   : > { %2425 = vmatmul.mubr.msk.f32.vlgmr.msra.gmra.mrb[0].mxu1 %vm368_vm0, %v356_v21  ;;  %2580 = vmatprep.subr.bf16.mxu0 %v2579_v40 }
 0x136   : > { %2442 = vmatprep.mubr.msk.f32.mxu1 %vm3176_vm1, %v3177_v11 }
 0x138   : > { %2582 = vmatpush3.bf16.msra.mxu0 %v2579_v40 }
 0x139   : > { %2594 = vmatprep.subr.bf16.mxu0 %v3175_v9 }
 0x13b   : > { %2436 = vmatmul.mubr.msk.f32.vlgmr.msra.gmra.mrb[2].mxu0 %vm368_vm0, %v356_v21 }
 0x13c   : > { %2463 = vmatprep.mubr.msk.f32.mxu0 %vm3176_vm1, %v3177_v11 }
 0x191   : > { %v438_v22 = vpop.f32.mrb[0].mxu0 }
 0x192   : > { %v2415_v23 = vpop.f32.mrb[1].mxu0  ;;  %v3589_v32 = vadd.f32 %v3559_v7, %v438_v22 }
 0x208   : > { %v2426_v25 = vpop.f32.mrb[0].mxu1 }
 0x209   : > { %v539_v26 = vadd.f32 %v2426_v25, %v459_v24  ;;  %v533_v27 = vpop.f32.mrb[1].mxu1 }
 0x20a   : > { %v534_v28 = vadd.f32 %v533_v27, %v459_v24 }
 0x20c   : > { %v2584_v30 = vpack.c.bf16 %v539_v26, %v534_v28  ;;  %v3583_v31 = vpack.i.bf16 %v539_v26, %v534_v28 }
 0x20e   : > { %2586 = vmatpush3.bf16.xpose.msk.msra.mxu1 %vm3579_vm3, %v2584_v30  ;;  %v2437_v49 = vpop.f32.mrb[2].mxu0 }
 0x20f   : > { %2587 = vmatprep.subr.bf16.mxu1 %v3175_v9  ;;  %v623_v50 = vpop.f32.mrb[3].mxu0 }
 0x215   : > { %2443 = vmatmul.mubr.msk.f32.vlgmr.msra.gmra.mrb[2].mxu1 %vm632_vm2, %v3589_v32 }
 0x216   : > { %2449 = vmatprep.mubr.msk.f32.mxu1 %vm3176_vm1, %v3177_v11 }
 0x2e8   : > { %v708_v41 = vpop.f32.mrb[2].mxu1 }
 0x2e9   : > { %v2444_v42 = vpop.f32.mrb[3].mxu1  ;;  %v713_v43 = vsel %vm712_vm4, %v708_v41, -inf }
 0x2ea   : > { %714 = vmax.xlane.f32.xlu1 %v713_v43 }
 0x2fb   : > { %2815 = vrot.lane.b32.xlu1 %v3583_v31, %s3179_s19 }
 0x2ff   : > { %797 = vrot.lane.b32.xlu1 %v3589_v32, %s3179_s19 }
 0x377   : > { %v715_v44 = vpop.xlane.xlu1 %714 }
 0x378   : > { %v716_v45 = vsub.f32 %v708_v41, %v715_v44 }
 0x37a   : > { %v717_v46 = vmul.f32 1.442695, %v716_v45 }
 0x37b   : > { %v2816_v57 = vpop.permute.xlu1 %2815 }
 0x37c   : > { %2884 = vpow2.f32 %v717_v46  ;;  %v2818_v59 = vunpack.i.h.bf16 %v2816_v57  ;;  %v2817_v60 = vunpack.i.l.bf16 %v2816_v57 }
 0x37e   : > { %v2591_v62 = vpack.c.bf16 %v2818_v59, %v2817_v60 }
 0x37f   : > { %v798_v63 = vpop.permute.xlu1 %797 }
 0x386   : > { %v2885_v47 = vpop.eup %2884 }
 0x387   : > { %v719_v48 = vsel %vm712_vm4, %v2885_v47, 0.0 }
 0x388   : > { %720 = vadd.xlane.f32.xlu0 %v719_v48 }
 0x39e   : > { %554 = vrot.lane.b32.xlu0 %v3559_v7, %s3178_s4  ;;  %s2330_s4 = sshll.u32 %s3154_s28, 1  ;;  %s2129_s28 = scalar_lea.sflag [#allocation4], %s3524_s16 }
 0x415   : > { %v721_v51 = vpop.xlane.xlu0 %720 }
 0x416   : > { %2886 = vrcp.f32 %v721_v51 }
 0x419   : > { %v555_v52 = vpop.permute.xlu0 %554 }
 0x41a   : > { %v624_v53 = vadd.f32 %v623_v50, %v555_v52  ;;  %v629_v54 = vadd.f32 %v2437_v49, %v555_v52 }
 0x41c   : > { %v2588_v55 = vpack.c.bf16 %v629_v54, %v624_v53  ;;  %v3607_v56 = vpack.i.bf16 %v629_v54, %v624_v53 }
 0x41e   : > { %2589 = vmatpush3.bf16.msra.mxu1 %v2588_v55 }
 0x41f   : > { %2590 = vmatprep.subr.bf16.mxu1 %v3175_v9 }
 0x420   : > { %v2887_v58 = vpop.eup %2886 }
 0x421   : > { %v723_v61 = vmul.f32 %v2887_v58, %v2885_v47 }
 0x423   : > { %2450 = vmatmul.mubr.msk.f32.vlgmr.msra.gmra.mrb[4].mxu1 %vm712_vm4, %v723_v61 }
 0x424   : > { %2456 = vmatprep.mubr.msk.f32.mxu1 %vm3176_vm1, %v3177_v11 }
 0x427   : > { %2593 = vmatpush3.bf16.xpose.msk.msra.mxu1 %vm3579_vm3, %v2591_v62 }
 0x428   : > { %2601 = vmatprep.subr.bf16.mxu1 %v3175_v9 }
 0x42e   : > { %2457 = vmatmul.mubr.msk.f32.vlgmr.msra.gmra.mrb[6].mxu1 %vm632_vm2, %v798_v63 }
 0x42f   : > { %2477 = vmatprep.mubr.msk.f32.mxu1 %vm3176_vm1, %v3177_v11 }
 0x4f6   : > { %v3619_v0 = vpop.f32.mrb[4].mxu1 }
 0x4f7   : > { %v2451_v1 = vpop.f32.mrb[5].mxu1 }
 0x501   : > { %v875_v2 = vpop.f32.mrb[6].mxu1 }
 0x502   : > { %v2458_v3 = vpop.f32.mrb[7].mxu1  ;;  %v879_v4 = vsel %vm712_vm4, %v875_v2, -inf }
 0x503   : > { %880 = vmax.xlane.f32.xlu0 %v879_v4 }
 0x519   : > { %2820 = vrot.lane.b32.xlu0 %v3607_v56, %s3179_s19  ;;  %s2140_s19 = sadd.s32 %s3880_s8, %s2330_s4 }
 0x51d   : > { %971 = vrot.lane.b32.xlu0 %v3589_v32, %s3180_s20 }
 0x590   : > { %v881_v5 = vpop.xlane.xlu0 %880 }
 0x591   : > { %v882_v6 = vsub.f32 %v875_v2, %v881_v5 }
 0x593   : > { %v883_v7 = vmul.f32 1.442695, %v882_v6 }
 0x594   : > { %v2821_v8 = vpop.permute.xlu0 %2820 }
 0x595   : > { %2888 = vpow2.f32 %v883_v7  ;;  %v2823_v10 = vunpack.i.h.bf16 %v2821_v8  ;;  %v2822_v12 = vunpack.i.l.bf16 %v2821_v8 }
 0x597   : > { %v2595_v13 = vpack.c.bf16 %v2823_v10, %v2822_v12 }
 0x598   : > { %v972_v23 = vpop.permute.xlu0 %971 }
 0x599   : > { %2596 = vmatpush3.bf16.msra.mxu0 %v2595_v13 }
 0x59a   : > { %2597 = vmatprep.subr.bf16.mxu0 %v3175_v9 }
 0x59f   : > { %v2889_v14 = vpop.eup %2888 }
 0x5a0   : > { %v885_v15 = vsel %vm712_vm4, %v2889_v14, 0.0 }
 0x5a1   : > { %886 = vadd.xlane.f32.xlu1 %v885_v15 }
 0x5b2   : > { %2825 = vrot.lane.b32.xlu1 %v3583_v31, %s3180_s20 }
 0x62e   : > { %v887_v16 = vpop.xlane.xlu1 %886 }
 0x62f   : > { %2890 = vrcp.f32 %v887_v16 }
 0x632   : > { %v2826_v17 = vpop.permute.xlu1 %2825 }
 0x633   : > { %v2828_v18 = vunpack.i.h.bf16 %v2826_v17  ;;  %v2827_v19 = vunpack.i.l.bf16 %v2826_v17 }
 0x635   : > { %v2598_v22 = vpack.c.bf16 %v2828_v18, %v2827_v19 }
 0x639   : > { %v2891_v20 = vpop.eup %2890 }
 0x63a   : > { %v889_v21 = vmul.f32 %v2891_v20, %v2889_v14 }
 0x63c   : > { %2464 = vmatmul.mubr.msk.f32.vlgmr.msra.gmra.mrb[4].mxu0 %vm712_vm4, %v889_v21 }
 0x63d   : > { %2600 = vmatpush3.bf16.xpose.msk.msra.mxu0 %vm3579_vm3, %v2598_v22  ;;  %2470 = vmatprep.mubr.msk.f32.mxu0 %vm3176_vm1, %v3177_v11 }
 0x63e   : > { %2608 = vmatprep.subr.bf16.mxu0 %v3175_v9 }
 0x644   : > { %2471 = vmatmul.mubr.msk.f32.vlgmr.msra.gmra.mrb[6].mxu0 %vm632_vm2, %v972_v23 }
 0x645   : > { %2491 = vmatprep.mubr.msk.f32.mxu0 %vm3176_vm1, %v3177_v11 }
 0x70f   : > { %v3639_v24 = vpop.f32.mrb[4].mxu0 }
 0x710   : > { %v2465_v25 = vpop.f32.mrb[5].mxu0 }
 0x717   : > { %v1049_v26 = vpop.f32.mrb[6].mxu0 }
 0x718   : > { %v2472_v27 = vpop.f32.mrb[7].mxu0  ;;  %v1053_v28 = vsel %vm712_vm4, %v1049_v26, -inf }
 0x719   : > { %1054 = vmax.xlane.f32.xlu1 %v1053_v28 }
 0x72a   : > { %2835 = vrot.lane.b32.xlu1 %v3583_v31, %s3181_s27 }
 0x72e   : > { %1143 = vrot.lane.b32.xlu1 %v3589_v32, %s3181_s27 }
 0x7a6   : > { %v1055_v30 = vpop.xlane.xlu1 %1054 }
 0x7a7   : > { %v1056_v33 = vsub.f32 %v1049_v26, %v1055_v30 }
 0x7a9   : > { %v1057_v34 = vmul.f32 1.442695, %v1056_v33 }
 0x7aa   : > { %v2836_v42 = vpop.permute.xlu1 %2835 }
 0x7ab   : > { %2892 = vpow2.f32 %v1057_v34  ;;  %v2838_v44 = vunpack.i.h.bf16 %v2836_v42  ;;  %v2837_v45 = vunpack.i.l.bf16 %v2836_v42 }
 0x7ad   : > { %v2605_v47 = vpack.c.bf16 %v2838_v44, %v2837_v45 }
 0x7ae   : > { %v1144_v48 = vpop.permute.xlu1 %1143 }
 0x7b5   : > { %v2893_v35 = vpop.eup %2892 }
 0x7b6   : > { %v1059_v36 = vsel %vm712_vm4, %v2893_v35, 0.0 }
 0x7b7   : > { %1060 = vadd.xlane.f32.xlu0 %v1059_v36 }
 0x7cd   : > { %2830 = vrot.lane.b32.xlu0 %v3607_v56, %s3180_s20 }
 0x844   : > { %v1061_v37 = vpop.xlane.xlu0 %1060 }
 0x845   : > { %2894 = vrcp.f32 %v1061_v37 }
 0x848   : > { %v2831_v38 = vpop.permute.xlu0 %2830 }
 0x849   : > { %v2833_v39 = vunpack.i.h.bf16 %v2831_v38  ;;  %v2832_v40 = vunpack.i.l.bf16 %v2831_v38 }
 0x84b   : > { %v2602_v41 = vpack.c.bf16 %v2833_v39, %v2832_v40 }
 0x84d   : > { %2603 = vmatpush3.bf16.msra.mxu1 %v2602_v41 }
 0x84e   : > { %2604 = vmatprep.subr.bf16.mxu1 %v3175_v9 }
 0x84f   : > { %v2895_v43 = vpop.eup %2894 }
 0x850   : > { %v1063_v46 = vmul.f32 %v2895_v43, %v2893_v35 }
 0x852   : > { %2478 = vmatmul.mubr.msk.f32.vlgmr.msra.gmra.mrb[8].mxu1 %vm712_vm4, %v1063_v46 }
 0x853   : > { %2484 = vmatprep.mubr.msk.f32.mxu1 %vm3176_vm1, %v3177_v11 }
 0x856   : > { %2607 = vmatpush3.bf16.xpose.msk.msra.mxu1 %vm3579_vm3, %v2605_v47 }
 0x857   : > { %2615 = vmatprep.subr.bf16.mxu1 %v3175_v9 }
 0x85d   : > { %2485 = vmatmul.mubr.msk.f32.vlgmr.msra.gmra.mrb[10].mxu1 %vm632_vm2, %v1144_v48 }
 0x85e   : > { %2505 = vmatprep.mubr.msk.f32.mxu1 %vm3176_vm1, %v3177_v11 }
 0x925   : > { %v3659_v49 = vpop.f32.mrb[8].mxu1 }
 0x926   : > { %v2479_v50 = vpop.f32.mrb[9].mxu1 }
 0x930   : > { %v1221_v51 = vpop.f32.mrb[10].mxu1 }
 0x931   : > { %v2486_v52 = vpop.f32.mrb[11].mxu1  ;;  %v1225_v53 = vsel %vm712_vm4, %v1221_v51, -inf }
 0x932   : > { %1226 = vmax.xlane.f32.xlu0 %v1225_v53 }
 0x948   : > { %2840 = vrot.lane.b32.xlu0 %v3607_v56, %s3181_s27 }
 0x94c   : > { %1315 = vrot.lane.b32.xlu0 %v3589_v32, %s3182_s18 }
 0x9bf   : > { %v1227_v54 = vpop.xlane.xlu0 %1226 }
 0x9c0   : > { %v1228_v55 = vsub.f32 %v1221_v51, %v1227_v54 }
 0x9c2   : > { %v1229_v57 = vmul.f32 1.442695, %v1228_v55 }
 0x9c3   : > { %v2841_v58 = vpop.permute.xlu0 %2840 }
 0x9c4   : > { %2896 = vpow2.f32 %v1229_v57  ;;  %v2843_v59 = vunpack.i.h.bf16 %v2841_v58  ;;  %v2842_v60 = vunpack.i.l.bf16 %v2841_v58 }
 0x9c6   : > { %v2609_v61 = vpack.c.bf16 %v2843_v59, %v2842_v60 }
 0x9c7   : > { %v1316_v8 = vpop.permute.xlu0 %1315 }
 0x9c8   : > { %2610 = vmatpush3.bf16.msra.mxu0 %v2609_v61 }
 0x9c9   : > { %2611 = vmatprep.subr.bf16.mxu0 %v3175_v9 }
 0x9ce   : > { %v2897_v62 = vpop.eup %2896 }
 0x9cf   : > { %v1231_v63 = vsel %vm712_vm4, %v2897_v62, 0.0 }
 0x9d0   : > { %1232 = vadd.xlane.f32.xlu1 %v1231_v63 }
 0x9e1   : > { %2845 = vrot.lane.b32.xlu1 %v3583_v31, %s3182_s18 }
 0xa5d   : > { %v1233_v1 = vpop.xlane.xlu1 %1232 }
 0xa5e   : > { %2898 = vrcp.f32 %v1233_v1 }
 0xa61   : > { %v2846_v2 = vpop.permute.xlu1 %2845 }
 0xa62   : > { %v2848_v3 = vunpack.i.h.bf16 %v2846_v2  ;;  %v2847_v4 = vunpack.i.l.bf16 %v2846_v2 }
 0xa64   : > { %v2612_v7 = vpack.c.bf16 %v2848_v3, %v2847_v4 }
 0xa68   : > { %v2899_v5 = vpop.eup %2898 }
 0xa69   : > { %v1235_v6 = vmul.f32 %v2899_v5, %v2897_v62 }
 0xa6b   : > { %2492 = vmatmul.mubr.msk.f32.vlgmr.msra.gmra.mrb[8].mxu0 %vm712_vm4, %v1235_v6 }
 0xa6c   : > { %2614 = vmatpush3.bf16.xpose.msk.msra.mxu0 %vm3579_vm3, %v2612_v7  ;;  %2498 = vmatprep.mubr.msk.f32.mxu0 %vm3176_vm1, %v3177_v11 }
 0xa6d   : > { %2622 = vmatprep.subr.bf16.mxu0 %v3175_v9 }
 0xa73   : > { %2499 = vmatmul.mubr.msk.f32.vlgmr.msra.gmra.mrb[10].mxu0 %vm632_vm2, %v1316_v8 }
 0xa74   : > { %2519 = vmatprep.mubr.msk.f32.mxu0 %vm3176_vm1, %v3177_v11 }
 0xb3e   : > { %v3679_v10 = vpop.f32.mrb[8].mxu0 }
 0xb3f   : > { %v2493_v12 = vpop.f32.mrb[9].mxu0 }
 0xb46   : > { %v1393_v13 = vpop.f32.mrb[10].mxu0 }
 0xb47   : > { %v2500_v14 = vpop.f32.mrb[11].mxu0  ;;  %v1397_v15 = vsel %vm712_vm4, %v1393_v13, -inf }
 0xb48   : > { %1398 = vmax.xlane.f32.xlu1 %v1397_v15 }
 0xb59   : > { %2855 = vrot.lane.b32.xlu1 %v3583_v31, %s3183_s6 }
 0xb5d   : > { %1487 = vrot.lane.b32.xlu1 %v3589_v32, %s3183_s6 }
 0xbd5   : > { %v1399_v16 = vpop.xlane.xlu1 %1398 }
 0xbd6   : > { %v1400_v17 = vsub.f32 %v1393_v13, %v1399_v16 }
 0xbd8   : > { %v1401_v18 = vmul.f32 1.442695, %v1400_v17 }
 0xbd9   : > { %v2856_v27 = vpop.permute.xlu1 %2855 }
 0xbda   : > { %2900 = vpow2.f32 %v1401_v18  ;;  %v2858_v30 = vunpack.i.h.bf16 %v2856_v27  ;;  %v2857_v33 = vunpack.i.l.bf16 %v2856_v27 }
 0xbdc   : > { %v2619_v35 = vpack.c.bf16 %v2858_v30, %v2857_v33 }
 0xbdd   : > { %v1488_v36 = vpop.permute.xlu1 %1487 }
 0xbe4   : > { %v2901_v19 = vpop.eup %2900 }
 0xbe5   : > { %v1403_v20 = vsel %vm712_vm4, %v2901_v19, 0.0 }
 0xbe6   : > { %1404 = vadd.xlane.f32.xlu0 %v1403_v20 }
 0xbfc   : > { %2850 = vrot.lane.b32.xlu0 %v3607_v56, %s3182_s18  ;;  %s3881_s18 = sld [smem:[#allocation24_spill]] }
 0xc73   : > { %v1405_v21 = vpop.xlane.xlu0 %1404 }
 0xc74   : > { %2902 = vrcp.f32 %v1405_v21 }
 0xc77   : > { %v2851_v22 = vpop.permute.xlu0 %2850 }
 0xc78   : > { %v2853_v23 = vunpack.i.h.bf16 %v2851_v22  ;;  %v2852_v25 = vunpack.i.l.bf16 %v2851_v22 }
 0xc7a   : > { %v2616_v26 = vpack.c.bf16 %v2853_v23, %v2852_v25 }
 0xc7c   : > { %2617 = vmatpush3.bf16.msra.mxu1 %v2616_v26 }
 0xc7d   : > { %2618 = vmatprep.subr.bf16.mxu1 %v3175_v9 }
 0xc7e   : > { %v2903_v28 = vpop.eup %2902 }
 0xc7f   : > { %v1407_v34 = vmul.f32 %v2903_v28, %v2901_v19 }
 0xc81   : > { %2506 = vmatmul.mubr.msk.f32.vlgmr.msra.gmra.mrb[12].mxu1 %vm712_vm4, %v1407_v34 }
 0xc82   : > { %2512 = vmatprep.mubr.msk.f32.mxu1 %vm3176_vm1, %v3177_v11 }
 0xc85   : > { %2621 = vmatpush3.bf16.xpose.msk.msra.mxu1 %vm3579_vm3, %v2619_v35 }
 0xc86   : > { %2629 = vmatprep.subr.bf16.mxu1 %v3175_v9 }
 0xc8c   : > { %2513 = vmatmul.mubr.msk.f32.vlgmr.msra.gmra.mrb[14].mxu1 %vm632_vm2, %v1488_v36 }
 0xc8d   : > { %2533 = vmatprep.mubr.msk.f32.mxu1 %vm3176_vm1, %v3177_v11 }
 0xd54   : > { %v3699_v37 = vpop.f32.mrb[12].mxu1 }
 0xd55   : > { %v2507_v38 = vpop.f32.mrb[13].mxu1 }
 0xd5f   : > { %v1565_v39 = vpop.f32.mrb[14].mxu1 }
 0xd60   : > { %v2514_v40 = vpop.f32.mrb[15].mxu1  ;;  %v1569_v41 = vsel %vm712_vm4, %v1565_v39, -inf }
 0xd61   : > { %1570 = vmax.xlane.f32.xlu0 %v1569_v41  ;;  %v2044_v40 = vld [vmem:[#allocation8 + $0x8] sm:$0xff]  ;;  %v2045_v41 = vld [vmem:[#allocation8 + $0x10] sm:$0xff] }
 0xd77   : > { %2860 = vrot.lane.b32.xlu0 %v3607_v56, %s3183_s6  ;;  %s2331_s6 = sshll.u32 %s2140_s19, 7 }
 0xd7b   : > { %1659 = vrot.lane.b32.xlu0 %v3589_v32, %s3184_s5 }
 0xdee   : > { %v1571_v42 = vpop.xlane.xlu0 %1570 }
 0xdef   : > { %v1572_v43 = vsub.f32 %v1565_v39, %v1571_v42  ;;  %v2043_v39 = vld [vmem:[#allocation8] sm:$0xff] }
 0xdf0   : > { %v2640_v42 = vpack.c.bf16 %v2044_v40, %v2043_v39 }
 0xdf1   : > { %v1573_v44 = vmul.f32 1.442695, %v1572_v43 }
 0xdf2   : > { %v2861_v45 = vpop.permute.xlu0 %2860 }
 0xdf3   : > { %2904 = vpow2.f32 %v1573_v44  ;;  %v2863_v46 = vunpack.i.h.bf16 %v2861_v45  ;;  %v2862_v47 = vunpack.i.l.bf16 %v2861_v45 }
 0xdf5   : > { %v2623_v48 = vpack.c.bf16 %v2863_v46, %v2862_v47 }
 0xdf6   : > { %v1660_v60 = vpop.permute.xlu0 %1659 }
 0xdf7   : > { %2624 = vmatpush3.bf16.msra.mxu0 %v2623_v48 }
 0xdf8   : > { %2625 = vmatprep.subr.bf16.mxu0 %v3175_v9 }
 0xdfd   : > { %v2905_v50 = vpop.eup %2904 }
 0xdfe   : > { %v1575_v51 = vsel %vm712_vm4, %v2905_v50, 0.0 }
 0xdff   : > { %1576 = vadd.xlane.f32.xlu1 %v1575_v51 }
 0xe10   : > { %2865 = vrot.lane.b32.xlu1 %v3583_v31, %s3184_s5 }
 0xe8c   : > { %v1577_v52 = vpop.xlane.xlu1 %1576 }
 0xe8d   : > { %2906 = vrcp.f32 %v1577_v52 }
 0xe90   : > { %v2866_v53 = vpop.permute.xlu1 %2865 }
 0xe91   : > { %v2868_v54 = vunpack.i.h.bf16 %v2866_v53  ;;  %v2867_v55 = vunpack.i.l.bf16 %v2866_v53 }
 0xe93   : > { %v2626_v59 = vpack.c.bf16 %v2868_v54, %v2867_v55 }
 0xe97   : > { %v2907_v57 = vpop.eup %2906 }
 0xe98   : > { %v1579_v58 = vmul.f32 %v2907_v57, %v2905_v50 }
 0xe9a   : > { %2520 = vmatmul.mubr.msk.f32.vlgmr.msra.gmra.mrb[12].mxu0 %vm712_vm4, %v1579_v58  ;;  %v2327_v58 = vld [vmem:[%s3881_s18] ss:$0 sm:$0xff] }
 0xe9b   : > { %2628 = vmatpush3.bf16.xpose.msk.msra.mxu0 %vm3579_vm3, %v2626_v59  ;;  %2526 = vmatprep.mubr.msk.f32.mxu0 %vm3176_vm1, %v3177_v11 }
 0xe9c   : > { %2636 = vmatprep.subr.bf16.mxu0 %v3175_v9 }
 0xea2   : > { %2527 = vmatmul.mubr.msk.f32.vlgmr.msra.gmra.mrb[14].mxu0 %vm632_vm2, %v1660_v60 }
 0xea3   : > { %2547 = vmatprep.mubr.msk.f32.mxu0 %vm3176_vm1, %v3177_v11 }
 0xf6d   : > { %v3719_v61 = vpop.f32.mrb[12].mxu0 }
 0xf6e   : > { %v2521_v62 = vpop.f32.mrb[13].mxu0 }
 0xf75   : > { %v1737_v63 = vpop.f32.mrb[14].mxu0 }
 0xf76   : > { %v2528_v1 = vpop.f32.mrb[15].mxu0  ;;  %v1741_v2 = vsel %vm712_vm4, %v1737_v63, -inf }
 0xf77   : > { %1742 = vmax.xlane.f32.xlu1 %v1741_v2 }
 0xf88   : > { %2875 = vrot.lane.b32.xlu1 %v3583_v31, %s3185_s2 }
 0xf8c   : > { %1831 = vrot.lane.b32.xlu1 %v3589_v32, %s3185_s2 }
0x1004   : > { %v1743_v3 = vpop.xlane.xlu1 %1742 }
0x1005   : > { %v1744_v4 = vsub.f32 %v1737_v63, %v1743_v3 }
0x1007   : > { %v1745_v5 = vmul.f32 1.442695, %v1744_v4 }
0x1008   : > { %v2876_v15 = vpop.permute.xlu1 %2875 }
0x1009   : > { %2908 = vpow2.f32 %v1745_v5  ;;  %v2878_v16 = vunpack.i.h.bf16 %v2876_v15  ;;  %v2877_v17 = vunpack.i.l.bf16 %v2876_v15 }
0x100b   : > { %v2633_v19 = vpack.c.bf16 %v2878_v16, %v2877_v17 }
0x100c   : > { %v1832_v20 = vpop.permute.xlu1 %1831 }
0x1013   : > { %v2909_v6 = vpop.eup %2908 }
0x1014   : > { %v1747_v7 = vsel %vm712_vm4, %v2909_v6, 0.0 }
0x1015   : > { %1748 = vadd.xlane.f32.xlu0 %v1747_v7 }
0x102b   : > { %2870 = vrot.lane.b32.xlu0 %v3607_v56, %s3184_s5  ;;  %s353_s5 = scalar_lea.vmem [#allocation10], %s2284_s13  ;;  %s3193_s13 = smov [#allocation10]  }
0x10a2   : > { %v1749_v8 = vpop.xlane.xlu0 %1748 }
0x10a3   : > { %2910 = vrcp.f32 %v1749_v8 }
0x10a6   : > { %v2871_v12 = vpop.permute.xlu0 %2870 }
0x10a7   : > { %v2873_v13 = vunpack.i.h.bf16 %v2871_v12  ;;  %v2872_v14 = vunpack.i.l.bf16 %v2871_v12 }
0x10a9   : > { %v2630_v31 = vpack.c.bf16 %v2873_v13, %v2872_v14 }
0x10ab   : > { %2631 = vmatpush3.bf16.msra.mxu1 %v2630_v31 }
0x10ac   : > { %2632 = vmatprep.subr.bf16.mxu1 %v3175_v9 }
0x10ad   : > { %v2911_v32 = vpop.eup %2910 }
0x10ae   : > { %v1751_v18 = vmul.f32 %v2911_v32, %v2909_v6 }
0x10b0   : > { %2534 = vmatmul.mubr.msk.f32.vlgmr.msra.gmra.mrb[16].mxu1 %vm712_vm4, %v1751_v18 }
0x10b1   : > { %2540 = vmatprep.mubr.msk.f32.mxu1 %vm3176_vm1, %v3177_v11 }
0x10b4   : > { %2635 = vmatpush3.bf16.xpose.msk.msra.mxu1 %vm3579_vm3, %v2633_v19 }
0x10bb   : > { %2541 = vmatmul.mubr.msk.f32.vlgmr.msra.gmra.mrb[18].mxu1 %vm632_vm2, %v1832_v20 }
0x1183   : > { %v1827_v21 = vpop.f32.mrb[16].mxu1 }
0x1184   : > { %v2535_v22 = vpop.f32.mrb[17].mxu1 }
0x118e   : > { %v1909_v23 = vpop.f32.mrb[18].mxu1 }
0x118f   : > { %v2542_v25 = vpop.f32.mrb[19].mxu1  ;;  %v1913_v26 = vsel %vm712_vm4, %v1909_v23, -inf }
0x1190   : > { %1914 = vmax.xlane.f32.xlu0 %v1913_v26 }
0x11a6   : > { %2880 = vrot.lane.b32.xlu0 %v3607_v56, %s3185_s2  ;;  %s2144_s2 = sshll.u32 %s353_s5, 4  ;;  %s3766_s2 = int_to_ptr.vmem [resolvable:$true] %s2144_s2 }
0x11aa   : > { %2008 = vrot.lane.b32.xlu0 %v3659_v49, %s3186_s10 }
0x11ae   : > { %2016 = vrot.lane.b32.xlu0 %v3699_v37, %s3187_s15 }
0x11b2   : > { %2024 = vrot.lane.b32.xlu0 %v1827_v21, %s3188_s12  ;;  %s3882_s12 = sld [smem:[#allocation25_spill]] }
0x121d   : > { %v1915_v29 = vpop.xlane.xlu0 %1914 }
0x121e   : > { %v1916_v27 = vsub.f32 %v1909_v23, %v1915_v29 }
0x1220   : > { %v1917_v28 = vmul.f32 1.442695, %v1916_v27 }
0x1221   : > { %v2881_v30 = vpop.permute.xlu0 %2880 }
0x1222   : > { %2912 = vpow2.f32 %v1917_v28  ;;  %v2883_v33 = vunpack.i.h.bf16 %v2881_v30  ;;  %v2882_v34 = vunpack.i.l.bf16 %v2881_v30 }
0x1224   : > { %v2637_v35 = vpack.c.bf16 %v2883_v33, %v2882_v34 }
0x1225   : > { %v2009_v46 = vpop.permute.xlu0 %2008 }
0x1226   : > { %2638 = vmatpush3.bf16.msra.mxu0 %v2637_v35 }
0x1227   : > { %2639 = vmatprep.subr.bf16.mxu0 %v3175_v9 }
0x1229   : > { %v2017_v50 = vpop.permute.xlu0 %2016 }
0x122c   : > { %v2913_v56 = vpop.eup %2912 }
0x122d   : > { %v1919_v36 = vsel %vm712_vm4, %v2913_v56, 0.0  ;;  %v2025_v54 = vpop.permute.xlu0 %2024 }
0x122e   : > { %1920 = vadd.xlane.f32.xlu1 %v1919_v36 }
0x123f   : > { %2004 = vrot.lane.b32.xlu1 %v3639_v24, %s3189_s29  ;;  %v2046_v24 = vld [vmem:[#allocation8 + $0x18] sm:$0xff]  ;;  %s3764_s29 = scalar_lea.hbm %s3882_s12, %s2331_s6 }
0x1240   : > { %v2643_v43 = vpack.c.bf16 %v2046_v24, %v2045_v41 }
0x1243   : > { %2012 = vrot.lane.b32.xlu1 %v3679_v10, %s3190_s21  ;;  %s3032_s21 = scalar_lea.vmem %s3766_s2, 128 }
0x1244   : > { %p3033_p0 = scmp.ne.s32.totalorder %s3766_s2, %s3032_s21 }
0x1246   : > { %p3034_p3 = pnand %p3033_p0, %p3883_p2 }
0x1247   : > { %2020 = vrot.lane.b32.xlu1 %v3719_v61, %s3191_s9  ;;  %s3036_s9 = sshll.u32 %s3193_s13, 4  ;;  %s3037_s9 = int_to_ptr.vmem [resolvable:$false] %s3036_s9 }
0x1248   : > { %p3035_p11 = pneg %p3034_p3  ;;  %p3039_p7 = scmp.lt.s32.totalorder %s3766_s2, %s3037_s9 }
0x12bb   : > { %v1921_v49 = vpop.xlane.xlu1 %1920 }
0x12bc   : > { %2914 = vrcp.f32 %v1921_v49 }
0x12bf   : > { %v2005_v45 = vpop.permute.xlu1 %2004 }
0x12c3   : > { %v2013_v47 = vpop.permute.xlu1 %2012 }
0x12c6   : > { %v2915_v37 = vpop.eup %2914 }
0x12c7   : > { %v1923_v38 = vmul.f32 %v2915_v37, %v2913_v56 }
0x12c9   : > { %2548 = vmatmul.mubr.msk.f32.vlgmr.msra.gmra.mrb[16].mxu0 %vm712_vm4, %v1923_v38 }
0x12ca   : > { %2558 = vmatprep.mubr.msk.f32.mxu0 %vm3176_vm1, %v3177_v11  ;;  %2641 = vmatpush3.bf16.msra.mxu0 %v2640_v42  ;;  %v2031_v11 = vsel %vm632_vm2, %v3619_v0, %v2005_v45 }
0x12cb   : > { %2642 = vmatprep.subr.bf16.mxu0 %v3175_v9  ;;  %v2033_v48 = vsel %vm2032_vm5, %v2031_v11, %v2009_v46  ;;  %v2021_v9 = vpop.permute.xlu1 %2020 }
0x12cc   : > { %v2035_v51 = vsel %vm2034_vm6, %v2033_v48, %v2013_v47 }
0x12cd   : > { %v2036_v52 = vsel %vm712_vm4, %v2035_v51, %v2017_v50 }
0x12ce   : > { %2644 = vmatpush3.bf16.msra.mxu0 %v2643_v43  ;;  %v2038_v53 = vsel %vm2037_vm7, %v2036_v52, %v2021_v9 }
0x12cf   : > { %v2040_v55 = vsel %vm2039_vm8, %v2038_v53, %v2025_v54 }
0x139c   : > { %v1999_v10 = vpop.f32.mrb[16].mxu0 }
0x139d   : > { %2028 = vrot.lane.b32.xlu1 %v1999_v10, %s3192_s11  ;;  %v2549_v44 = vpop.f32.mrb[17].mxu0  ;;  %s3038_s11 = scalar_lea.vmem %s3037_s9, 256 }
0x139e   : > { %p3040_p12 = scmp.lt.s32.totalorder %s3038_s11, %s3032_s21 }
0x13a0   : > { %p3041_p13 = por %p3040_p12, %p3039_p7 }
0x13a2   : > { %p3042_p6 = pnand %p3041_p13, %p3035_p11 }
0x140f   : > { %v2029_v57 = vpop.permute.xlu1 %2028 }
0x1410   : > { %v2042_v0 = vsel %vm2041_vm9, %v2040_v55, %v2029_v57 }
0x1411   : > { %2559 = vmatmul.mubr.msk.f32.vlgmr.msra.gmra.mrb[18].mxu0 %vm368_vm0, %v2042_v0 }
0x14e4   : > { %v2123_v59 = vpop.f32.mrb[18].mxu0 }
0x14e5   : > { %v2124_v60 = vadd.f32 %v2327_v58, %v2123_v59  ;;  %v2560_v61 = vpop.f32.mrb[19].mxu0 }
0x14e7   : > { %2127 = vst.msk [vmem:[%s353_s5] sm:$0xff] %vm368_vm0, %v2124_v60 }
0x14e8   : > { %3045 = shalt.err (!%p3042_p6)
}
0x14e9   : > { %s3046_s16 = scalar_lea.hbm %s3764_s29, 128  ;;  %s3050_s19 = scalar_lea.hbm %s3882_s12, 512 }
0x14ea   : > { %p3047_p1 = scmp.ne.s32.totalorder %s3764_s29, %s3046_s16  ;;  %p3051_p4 = scmp.lt.u32.totalorder %s3764_s29, %s3882_s12 }
0x14eb   : > { %p3052_p10 = scmp.lt.u32.totalorder %s3050_s19, %s3046_s16  ;;  %p3054_p0 = scmp.lt.u32.totalorder %s3046_s16, %s3764_s29 }
0x14ec   : > { %p3048_p5 = pnand %p3047_p1, %p3883_p2 }
0x14ed   : > { %p3053_p8 = por %p3052_p10, %p3051_p4 }
0x14ee   : > { %p3049_p9 = pneg %p3048_p5 }
0x14ef   : > { %p3055_p3 = por %p3054_p0, %p3053_p8 }
0x14f1   : > { %p3056_p11 = pnand %p3055_p3, %p3049_p9 }
0x14f3   : > { %3059 = shalt.err (!%p3056_p11)
}
0x14f4   : > { %2657 = dma.vmem_to_hbm [thread:$0]  (%p3883_p2), %s3766_s2, 128, %s3764_s29, %s2129_s28  }
0x14f5 PF: > { %p2682_p7 = scmp.ge.s32.totalorder %s3166_s7, 2  ;;  %s2156_s18 = sand.u32 1, %s3138_s24  }
0x14f6   : > { %p3884_p12 = scmp.ne.s32.totalorder %s3866_s14, 0  ;;  %s2157_s6 = scalar_lea.sflag [#allocation4], %s2156_s18 }
0x14f8   : > { %p2674_p13 = pnand %p2682_p7, %p3884_p12 }
0x14fa   : > { %3121 = dma.done.wait (!%p2674_p13), %s2157_s6, 128  }
0x14fb   : > { %3123 = vsyncadd (!%p2674_p13), %s2157_s6, 4294967168  ;;  %s26_s7 = sadd.s32 1, %s3166_s7   ;;  %s3885_s17 = sld [smem:[#allocation20_spill]] }
0x14fc   : > { %p23_p6 = scmp.ge.s32.totalorder %s26_s7, 6   ;;  %s3886_s5 = sld [smem:[#allocation21_spill]] }
0x14fd   : > { %s3887_s27 = sld [smem:[#allocation17_spill]]  ;;  %s3888_s29 = sld [smem:[#allocation18_spill]] }
0x14fe   : > { %s3889_s2 = sld [smem:[#allocation19_spill]]  ;;  %s3890_s21 = smov %s3130_s22 }
0x14ff   : > { %s3891_s22 = smov %s3134_s23  ;;  %s3893_s24 = smov %s3142_s25 }
0x1500   : > { %s3894_s25 = smov %s3146_s26  ;;  %s3896_s28 = smov %s3162_s30 }
0x1501   : > { %s3892_s23 = smov %s3885_s17  ;;  %25 = sbr.rel (!%p23_p6) target bundleno = 17 (0x11), region = 110 }
0x1502   : > { %s3895_s26 = smov %s3886_s5 }
0x1504   : > { %s3897_s30 = smov %s3889_s2 }
0x1508   :  { %2162 = vsyncpa [#allocation3], 1 }
0x1509   :  { %2164 = vsyncpa [#allocation3 + $0x1], 1 }
0x150a   :  { %2165 = vsyncpa [#allocation6], 1 }
0x150b   :  { %2167 = vsyncpa [#allocation6 + $0x1], 1 }
0x150c   :  { %2168 = vsyncpa [#allocation9], 1 }
0x150d   :  { %2169 = vsyncpa [#allocation4], 1 }
0x150e   :  { %2171 = vsyncpa [#allocation4 + $0x1], 1 }

// kernel: tpu_custom_call.1
= control target key start
LH: loop header
LB: loop body
LE: loop exit
PB: predicated region body
PF: predicated region fallthrough
CT: control target
= control target key end

     0   :  { %s3828_s0 = inlined_call_operand.hbm [shape: f32[2,16,32], index: 0, kind: input, shape index: {}]   ;;  %s3829_s1 = inlined_call_operand.hbm [shape: f32[2,16,32], index: 1, kind: input, shape index: {}]   ;;  %s3830_s2 = inlined_call_operand.hbm [shape: f32[32,96], index: 2, kind: input, shape index: {}]   ;;  %s3831_s3 = inlined_call_operand.vmem [shape: f32[1,96], index: 3, kind: input, shape index: {}]   ;;  %s3832_s4 = inlined_call_operand.hbm [shape: f32[32,32], index: 4, kind: input, shape index: {}]   ;;  %s3833_s5 = inlined_call_operand.vmem [shape: f32[1,32], index: 5, kind: input, shape index: {}]   ;;  %s3834_s6 = inlined_call_operand.hbm [shape: f32[2,16,32], index: 6, kind: output, shape index: {}]  }
   0x1   :  { %3846 = sst [smem:[#allocation22_spill]] %s3830_s2 }
   0x2   :  { %3847 = sst [smem:[#allocation23_spill]] %s3832_s4 }
   0x3   :  { %3848 = sst [smem:[#allocation24_spill]] %s3833_s5 }
   0x4   :  { %3849 = sst [smem:[#allocation25_spill]] %s3834_s6 }
   0x5   :  { %11 = vsyncpa [#allocation3], 0 }
   0x6   :  { %13 = vsyncpa [#allocation3 + $0x1], 0 }
   0x7   :  { %14 = vsyncpa [#allocation6], 0 }
   0x8   :  { %16 = vsyncpa [#allocation6 + $0x1], 0 }
   0x9   :  { %17 = vsyncpa [#allocation9], 0 }
   0xa   :  { %18 = vsyncpa [#allocation4], 0 }
   0xb   :  { %20 = vsyncpa [#allocation4 + $0x1], 0  ;;  %s3229_s21 = smov 0   ;;  %s3231_s22 = smov 0  }
   0xc   :  { %s3233_s23 = smov 0   ;;  %s3235_s24 = smov 0  }
   0xd   :  { %s3237_s25 = smov 0   ;;  %s3239_s26 = smov 0  }
   0xe   :  { %s3241_s27 = smov 0   ;;  %s3243_s28 = smov 0  }
   0xf   :  { %s3245_s29 = smov 0   ;;  %s3247_s30 = smov 0  }
  0x10   :  { %s3249_s7 = smov 0  }
  0x11 LB: > { %3850 = sst [smem:[#allocation16_spill]] %s3150_s27  ;;  %s3283_s8 = sadd.s32 4294967295, %s3166_s7   ;;  %s3166_s7 = sphi %s3249_s7, %s26_s7   ;;  %s3162_s30 = sphi %s3247_s30, %s3897_s30   ;;  %s3158_s29 = sphi %s3245_s29, %s3888_s29   ;;  %s3154_s28 = sphi %s3243_s28, %s3896_s28   ;;  %s3150_s27 = sphi %s3241_s27, %s3887_s27   ;;  %s3146_s26 = sphi %s3239_s26, %s3895_s26   ;;  %s3142_s25 = sphi %s3237_s25, %s3894_s25   ;;  %s3138_s24 = sphi %s3235_s24, %s3893_s24   ;;  %s3134_s23 = sphi %s3233_s23, %s3892_s23   ;;  %s3130_s22 = sphi %s3231_s22, %s3891_s22   ;;  %s3126_s21 = sphi %s3229_s21, %s3890_s21  }
  0x12   : > { %3851 = sst [smem:[#allocation17_spill]] %s3158_s29  ;;  %p86_p0 = scmp.ne.s32.totalorder %s3130_s22, %s3126_s21 }
  0x13   : > { %p3835_p1 = scmp.eq.s32.totalorder %s3283_s8, 0  ;;  %p2273_p2 = scmp.ge.s32.totalorder %s3166_s7, 1 }
  0x14   : > { %p209_p3 = scmp.lt.s32.totalorder %s3166_s7, 5  ;;  %s3168_s11 = smov [#allocation7]  }
  0x15   : > { %p3291_p4 = por %p86_p0, %p3835_p1  ;;  %s221_s12 = sshll.u32 %s3168_s11, 4  ;;  %s222_s12 = int_to_ptr.vmem [resolvable:$true] %s221_s12 }
  0x16   : > { %p3295_p5 = pnand %p2273_p2, %p209_p3  ;;  %s3169_s14 = smov [#allocation8]  }
  0x17   : > { %s3852_s9 = scalar_select %p3291_p4, 1, 0 }
  0x18   : > { %s3853_s10 = scalar_select %p3295_p5, 1, 0 }
  0x19   : > { %p2659_p6 = pneg %p3295_p5  ;;  %s237_s15 = sshll.u32 %s3169_s14, 4  ;;  %s3307_s15 = int_to_ptr.vmem [resolvable:$true] %s237_s15 }
  0x1a   : > { %s3855_s2 = sld [smem:[#allocation22_spill]] }
  0x1b   : > { %p3303_p7 = pnand %p2659_p6, %p3835_p1 }
  0x1d   : > { %p2918_p9 = pneg %p3303_p7 }
  0x20   : > { %s2916_s18 = scalar_lea.hbm %s3855_s2, 512 }
  0x21   : > { %p2917_p8 = scmp.ne.s32.totalorder %s3855_s2, %s2916_s18  ;;  %p2923_p12 = scmp.lt.u32.totalorder %s2916_s18, %s3855_s2 }
  0x23   : > { %p2919_p10 = pnand %p2918_p9, %p2917_p8 }
  0x25   : > { %p2920_p11 = pneg %p2919_p10 }
  0x27   : > { %p2925_p13 = pnand %p2923_p12, %p2920_p11 }
  0x29   : > { %2928 = shalt.err (!%p2925_p13)
}
  0x2a   : > { %s2929_s14 = scalar_lea.vmem %s222_s12, 512  ;;  %p2937_p6 = scmp.lt.s32.totalorder %s222_s12, %s222_s12 }
  0x2b   : > { %p2930_p0 = scmp.ne.s32.totalorder %s222_s12, %s2929_s14  ;;  %p2938_p1 = scmp.lt.s32.totalorder %s2929_s14, %s2929_s14 }
  0x2d   : > { %p2932_p2 = pnand %p2930_p0, %p2918_p9  ;;  %p2939_p4 = por %p2938_p1, %p2937_p6 }
  0x2f   : > { %p2933_p3 = pneg %p2932_p2 }
  0x31   : > { %p2940_p5 = pnand %p2939_p4, %p2933_p3 }
  0x33   : > { %2943 = shalt.err (!%p2940_p5)
}
  0x34   : > { %s3839_s16 = smov 128   ;;  %s3840_s17 = smov 8  }
  0x35   : > { %2662 = dma.hbm_to_vmem [thread:$0]  (!%p3303_p7), %s3855_s2, 512, %s222_s12, [#allocation6], %s3839_s16, %s3839_s16, %s3840_s17  }
  0x36   : > { %s3856_s4 = sld [smem:[#allocation23_spill]] }
  0x3c   : > { %s2944_s11 = scalar_lea.hbm %s3856_s4, 512 }
  0x3d   : > { %p2945_p1 = scmp.ne.s32.totalorder %s3856_s4, %s2944_s11  ;;  %p2951_p8 = scmp.lt.u32.totalorder %s2944_s11, %s3856_s4 }
  0x3f   : > { %p2947_p4 = pnand %p2945_p1, %p2918_p9 }
  0x41   : > { %p2948_p5 = pneg %p2947_p4 }
  0x43   : > { %p2953_p10 = pnand %p2951_p8, %p2948_p5 }
  0x45   : > { %2956 = shalt.err (!%p2953_p10)
}
  0x46   : > { %s2957_s12 = scalar_lea.vmem %s3307_s15, 512  ;;  %p2965_p0 = scmp.lt.s32.totalorder %s3307_s15, %s3307_s15 }
  0x47   : > { %p2958_p11 = scmp.ne.s32.totalorder %s3307_s15, %s2957_s12  ;;  %p2966_p2 = scmp.lt.s32.totalorder %s2957_s12, %s2957_s12 }
  0x49   : > { %p2960_p12 = pnand %p2958_p11, %p2918_p9  ;;  %p2967_p3 = por %p2966_p2, %p2965_p0 }
  0x4b   : > { %p2961_p13 = pneg %p2960_p12 }
  0x4d   : > { %p2968_p6 = pnand %p2967_p3, %p2961_p13 }
  0x4f   : > { %2971 = shalt.err (!%p2968_p6)
}
  0x50   : > { %2665 = dma.hbm_to_vmem [thread:$0]  (!%p3303_p7), %s3856_s4, 512, %s3307_s15, [#allocation9], %s3839_s16, %s3839_s16, %s3840_s17  }
  0x51   : > { %s2272_s27 = sadd.s32 4294967294, %s3166_s7   ;;  %s35_s13 = sadd.s32 1, %s3158_s29 }
  0x52   : > { %p36_p9 = scmp.ge.s32.totalorder %s35_s13, 2  ;;  %s38_s18 = sadd.s32 1, %s3162_s30 }
  0x53   : > { %s47_s19 = sadd.s32 1, %s3146_s26  ;;  %p54_p1 = scmp.ne.s32.totalorder %s3146_s26, %s3142_s25 }
  0x54   : > { %s3899_s13 = smov (%p36_p9, %s35_s13), 0  ;;  %s3901_s18 = smov (!%p36_p9, %s38_s18), %s3162_s30 }
  0x55   : > { %3857 = sst [smem:[#allocation18_spill]] %s3899_s13  ;;  %s43_s15 = ssub.s32 %s3158_s29, %s3899_s13 }
  0x56   : > { %p55_p7 = scmp.eq.s32.totalorder %s3166_s7, 0  ;;  %p40_p4 = scmp.ge.s32.totalorder %s3901_s18, 2 }
  0x57   : > { %p60_p5 = scmp.ne.s32.totalorder %s3142_s25, %s3138_s24  ;;  %s73_s21 = sadd.s32 1, %s3134_s23 }
  0x58   : > { %p3381_p8 = por %p55_p7, %p54_p1  ;;  %s3903_s18 = smov (%p40_p4, %s3901_s18), 0 }
  0x59   : > { %3859 = sst [smem:[#allocation19_spill]] %s3903_s18  ;;  %p3860_p10 = scmp.eq.s32.totalorder %s3283_s8, 0 }
  0x5a   : > { %p80_p12 = scmp.ne.s32.totalorder %s3134_s23, %s3130_s22  ;;  %s42_s14 = ssub.s32 %s3162_s30, %s3903_s18 }
  0x5b   : > { %p3393_p11 = por %p3860_p10, %p60_p5  ;;  %p196_p13 = scmp.eq.s32.totalorder %s3283_s8, 3 }
  0x5c   : > { %s44_s12 = sor.u32 %s43_s15, %s42_s14  ;;  %p71_p0 = scmp.eq.s32.totalorder %s42_s14, 0 }
  0x5d   : > { %s3861_s11 = scalar_select %p3393_p11, 1, 0 }
  0x5e   : > { %p45_p2 = scmp.eq.s32.totalorder %s44_s12, 0  ;;  %p3404_p3 = por %p80_p12, %p55_p7 }
  0x5f   : > { %s3409_s6 = scalar_select %p71_p0, %s3134_s23, %s73_s21  }
  0x60   : > { %s3412_s16 = scalar_select %p45_p2, %s3146_s26, %s47_s19  }
  0x61   : > { %3863 = sst [smem:[#allocation20_spill]] %s3409_s6  ;;  %p3417_p6 = por %p196_p13, %p54_p1 }
  0x62   : > { %3864 = sst [smem:[#allocation21_spill]] %s3412_s16  ;;  %p202_p9 = scmp.eq.s32.totalorder %s2272_s27, 3 }
  0x63   : > { %s3865_s17 = scalar_select %p3417_p6, 1, 0 }
  0x64   : > { %p2679_p4 = scmp.lt.s32.totalorder %s3166_s7, 4  ;;  %s254_s15 = sand.u32 1, %s3146_s26  }
  0x65   : > { %p3426_p7 = por %p202_p9, %p60_p5  ;;  %s2277_s21 = sshll.u32 %s254_s15, 3 }
  0x66   : > { %s2278_s12 = sshll.u32 %s3162_s30, 1  ;;  %s258_s4 = scalar_lea.vmem [#allocation2], %s2277_s21 }
  0x67   : > { %s3866_s14 = scalar_select %p3426_p7, 1, 0 }
  0x68   : > { %s263_s2 = sadd.s32 %s3158_s29, %s2278_s12  ;;  %s267_s18 = sshll.u32 %s258_s4, 4  ;;  %s3437_s18 = int_to_ptr.vmem [resolvable:$true] %s267_s18 }
  0x69   : > { %s2279_s19 = sshll.u32 %s263_s2, 7  ;;  %p3441_p1 = pnand %p2679_p4, %p3381_p8 }
  0x6a   : > { %s3435_s6 = scalar_lea.hbm %s3828_s0, %s2279_s19  ;;  %p3447_p5 = pnand %p2679_p4, %p3404_p3 }
  0x6b   : > { %s274_s4 = sand.u32 1, %s3166_s7   ;;  %s276_s16 = sand.u32 1, %s3134_s23  }
  0x6c   : > { %s255_s13 = scalar_lea.sflag [#allocation3], %s254_s15  ;;  %s2972_s21 = scalar_lea.hbm %s3435_s6, 128 }
  0x6d   : > { %p2973_p10 = scmp.ne.s32.totalorder %s3435_s6, %s2972_s21  ;;  %p2974_p12 = pneg %p3441_p1 }
  0x6e   : > { %s2977_s5 = scalar_lea.hbm %s3828_s0, 512  ;;  %p2978_p0 = scmp.lt.u32.totalorder %s3435_s6, %s3828_s0 }
  0x6f   : > { %p2975_p8 = pnand %p2974_p12, %p2973_p10  ;;  %p2979_p2 = scmp.lt.u32.totalorder %s2977_s5, %s2972_s21 }
  0x70   : > { %p2981_p9 = scmp.lt.u32.totalorder %s2972_s21, %s3435_s6 }
  0x71   : > { %p2976_p13 = pneg %p2975_p8  ;;  %p2980_p3 = por %p2979_p2, %p2978_p0 }
  0x73   : > { %p2982_p4 = por %p2981_p9, %p2980_p3 }
  0x75   : > { %p2983_p7 = pnand %p2982_p4, %p2976_p13 }
  0x77   : > { %2986 = shalt.err (!%p2983_p7)
}
  0x78   : > { %s2987_s15 = scalar_lea.vmem %s3437_s18, 128  ;;  %s3172_s20 = smov [#allocation2]  }
  0x79   : > { %p2988_p10 = scmp.ne.s32.totalorder %s3437_s18, %s2987_s15  ;;  %s2992_s12 = sshll.u32 %s3172_s20, 4  ;;  %s2993_s12 = int_to_ptr.vmem [resolvable:$false] %s2992_s12 }
  0x7a   : > { %s2994_s29 = scalar_lea.vmem %s2993_s12, 256  ;;  %p2995_p11 = scmp.lt.s32.totalorder %s3437_s18, %s2993_s12 }
  0x7b   : > { %p2990_p8 = pnand %p2988_p10, %p2974_p12  ;;  %p2996_p0 = scmp.lt.s32.totalorder %s2994_s29, %s2987_s15 }
  0x7d   : > { %p2991_p6 = pneg %p2990_p8  ;;  %p2997_p2 = por %p2996_p0, %p2995_p11 }
  0x7f   : > { %p2998_p3 = pnand %p2997_p2, %p2991_p6 }
  0x81   : > { %3001 = shalt.err (!%p2998_p3)
}
  0x82   : > { %2669 = dma.hbm_to_vmem [thread:$0]  (!%p3441_p1), %s3435_s6, 128, %s3437_s18, %s255_s13  }
  0x83   : > { %s2280_s21 = sshll.u32 %s276_s16, 4  ;;  %s2334_s5 = sshll.u32 %s3162_s30, 8 }
  0x84   : > { %s3484_s15 = scalar_lea.hbm %s3829_s1, %s2334_s5  ;;  %s278_s27 = scalar_lea.vmem [#allocation5], %s2280_s21 }
  0x85   : > { %s285_s12 = sshll.u32 %s278_s27, 4  ;;  %s3490_s29 = scalar_lea.sflag [#allocation6], %s274_s4  ;;  %s3486_s12 = int_to_ptr.vmem [resolvable:$true] %s285_s12 }
  0x86   : > { %s3002_s18 = scalar_lea.hbm %s3484_s15, 256  ;;  %p3004_p6 = pneg %p3447_p5 }
  0x87   : > { %p3003_p11 = scmp.ne.s32.totalorder %s3484_s15, %s3002_s18  ;;  %s3007_s13 = scalar_lea.hbm %s3829_s1, 512 }
  0x88   : > { %p3008_p12 = scmp.lt.u32.totalorder %s3484_s15, %s3829_s1  ;;  %p3009_p13 = scmp.lt.u32.totalorder %s3007_s13, %s3002_s18 }
  0x89   : > { %p3005_p7 = pnand %p3004_p6, %p3003_p11  ;;  %p3011_p4 = scmp.lt.u32.totalorder %s3002_s18, %s3484_s15 }
  0x8a   : > { %p3010_p9 = por %p3009_p13, %p3008_p12 }
  0x8b   : > { %p3006_p1 = pneg %p3005_p7 }
  0x8c   : > { %p3012_p10 = por %p3011_p4, %p3010_p9 }
  0x8e   : > { %p3013_p8 = pnand %p3012_p10, %p3006_p1 }
  0x90   : > { %3016 = shalt.err (!%p3013_p8)
}
  0x91   : > { %s3017_s4 = scalar_lea.vmem %s3486_s12, 256  ;;  %s3173_s19 = smov [#allocation5]  }
  0x92   : > { %p3018_p0 = scmp.ne.s32.totalorder %s3486_s12, %s3017_s4  ;;  %s3022_s20 = sshll.u32 %s3173_s19, 4  ;;  %s3023_s20 = int_to_ptr.vmem [resolvable:$false] %s3022_s20 }
  0x93   : > { %s3024_s27 = scalar_lea.vmem %s3023_s20, 512  ;;  %p3025_p11 = scmp.lt.s32.totalorder %s3486_s12, %s3023_s20 }
  0x94   : > { %p3020_p2 = pnand %p3018_p0, %p3004_p6  ;;  %p3026_p7 = scmp.lt.s32.totalorder %s3024_s27, %s3017_s4 }
  0x96   : > { %p3021_p3 = pneg %p3020_p2  ;;  %p3027_p12 = por %p3026_p7, %p3025_p11 }
  0x98   : > { %p3028_p13 = pnand %p3027_p12, %p3021_p3 }
  0x9a   : > { %3031 = shalt.err (!%p3028_p13)
}
  0x9b   : > { %s3869_s18 = smov 8   ;;  %s3870_s6 = smov 128  }
  0x9c   : > { %2672 = dma.hbm_to_vmem [thread:$0]  (!%p3447_p5), %s3484_s15, 256, %s3486_s12, %s3490_s29, %s3870_s6, %s3870_s6, %s3869_s18  }
  0x9d   : > { %p3871_p6 = scmp.ne.s32.totalorder %s3853_s10, 0 }
  0x9e   : > { %s3524_s16 = sand.u32 (!%p3871_p6), 1, %s3142_s25   ;;  %p3872_p1 = scmp.ne.s32.totalorder (!%p3871_p6), %s3861_s11, 0 }
  0x9f   : > { %297 = sbr.rel (%p3871_p6) target bundleno = 5365 (0x14f5), region = 44  ;;  %s2284_s13 = sshll.u32 (!%p3871_p6), %s3524_s16, 3 }
  0xa0   : > { %s300_s5 = scalar_lea.sflag (!%p3871_p6), [#allocation3], %s3524_s16  ;;  %s3530_s2 = scalar_lea.vmem (!%p3871_p6), [#allocation2], %s2284_s13 }
  0xa6   : > { %3105 = dma.done.wait (%p3872_p1), %s300_s5, 128  }
  0xa7   : > { %3107 = vsyncadd (%p3872_p1), %s300_s5, 4294967168  ;;  %s308_s10 = sand.u32 1, %s3283_s8   ;;  %s310_s15 = sand.u32 1, %s3130_s22  }
  0xa8   : > { %s3538_s12 = sshll.u32 %s310_s15, 4  ;;  %s309_s29 = scalar_lea.sflag [#allocation6], %s308_s10 }
  0xa9   : > { %s312_s21 = scalar_lea.vmem [#allocation5], %s3538_s12  ;;  %p3873_p5 = scmp.ne.s32.totalorder %s3852_s9, 0 }
  0xab   : > { %3109 = dma.done.wait (%p3873_p5), %s309_s29, 256  }
  0xac   : > { %3111 = vsyncadd (%p3873_p5), %s309_s29, 4294967040  ;;  %p3874_p9 = scmp.eq.s32.totalorder %s3283_s8, 0 }
  0xae   : > { %3113 = dma.done.wait (%p3874_p9), [#allocation6], 512   ;;  %p3875_p4 = pmov %p3874_p9 }
  0xb0   : > { %3115 = vsyncadd (%p3875_p4), [#allocation6], 4294966784  ;;  %p3876_p10 = pmov %p3875_p4 }
  0xb1   : > { %p3877_p8 = pmov %p3875_p4 }
  0xb2   : > { %3117 = dma.done.wait (%p3876_p10), [#allocation9], 512  }
  0xb3   : > { %3119 = vsyncadd (%p3877_p8), [#allocation9], 4294966784  ;;  %vm368_vm0 = vcmask 261120   ;;  %v357_v0 = vld [vmem:[#allocation7] sm:$0xff]  ;;  %v358_v1 = vld [vmem:[#allocation7 + $0x8] sm:$0xff]  ;;  %s3174_s8 = smov 96  }
  0xb4   : > { %v359_v2 = vld [vmem:[#allocation7 + $0x10] sm:$0xff]  ;;  %v2794_v3 = vpack.i.bf16 %v358_v1, %v357_v0  ;;  %v360_v4 = vld [vmem:[#allocation7 + $0x18] sm:$0xff]  ;;  %v2562_v6 = vpack.c.bf16 %v358_v1, %v357_v0  ;;  %v3175_v9 = vmov 0.0|0.0   ;;  %vm3176_vm1 = vmmov 0   ;;  %s3178_s4 = smov 64   ;;  %s3179_s19 = smov 124  }
  0xb5   : > { %v355_v5 = vld [vmem:[%s312_s21] sm:$0xff]  ;;  %v2799_v8 = vpack.i.bf16 %v360_v4, %v359_v2  ;;  %2561 = vmatprep.subr.bf16.mxu0 %v3175_v9  ;;  %v2565_v10 = vpack.c.bf16 %v360_v4, %v359_v2  ;;  %v3177_v11 = vmov 0.0   ;;  %v354_v12 = vld [vmem:[%s3530_s2] sm:$0xff]  ;;  %vm632_vm2 = vcmask 31744   ;;  %s3180_s20 = smov 120   ;;  %s3181_s27 = smov 116  }
  0xb6   : > { %2424 = vmatprep.mubr.msk.f32.mxu1 %vm368_vm0, %v355_v5  ;;  %v3559_v7 = vld [vmem:[%s3831_s3] ss:$0 sm:$0xff]  ;;  %2795 = vrot.lane.b32.xlu0 %v2794_v3, %s3174_s8  ;;  %v356_v21 = vld [vmem:[%s312_s21 + $0x8] sm:$0xff]  ;;  %vm3579_vm3 = vmpackc.low %vm632_vm2, %vm632_vm2  ;;  %vm712_vm4 = vcmask 130048   ;;  %s3182_s18 = smov 112   ;;  %s3183_s6 = smov 108  }
  0xb7   : > { %2563 = vmatpush3.bf16.msra.mxu0 %v2562_v6  ;;  %2413 = vmatprep.mubr.msk.f32.mxu0 %vm3176_vm1, %v3177_v11  ;;  %s3184_s5 = smov 104   ;;  %s3185_s2 = smov 100   ;;  %vm2032_vm5 = vcmask 64512   ;;  %vm2034_vm6 = vcmask 97280   ;;  %vm2037_vm7 = vcmask 162816   ;;  %vm2039_vm8 = vcmask 195584  }
  0xb8   : > { %2564 = vmatprep.subr.bf16.mxu0 %v3175_v9  ;;  %458 = vrot.lane.b32.xlu1 %v3559_v7, %s3174_s8  ;;  %s3186_s10 = smov 8   ;;  %s3187_s15 = smov 16   ;;  %vm2041_vm9 = vcmask 228352  }
  0xb9   : > { %s3188_s12 = smov 24   ;;  %s3189_s29 = smov 4  }
  0xba   : > { %2800 = vrot.lane.b32.xlu0 %v2799_v8, %s3174_s8  ;;  %s3190_s21 = smov 12   ;;  %s3191_s9 = smov 20  }
  0xbb   : > { %2566 = vmatpush3.bf16.msra.mxu0 %v2565_v10  ;;  %s3192_s11 = smov 28   ;;  %s3880_s8 = sld [smem:[#allocation16_spill]] }
  0xbc   : > { %2805 = vrot.lane.b32.xlu1 %v2794_v3, %s3178_s4  ;;  %p3883_p2 = scmp.ne.s32.totalorder %s3865_s17, 0 }
  0xbe   : > { %2414 = vmatmul.mubr.msk.f32.vlgmr.msra.gmra.mrb[0].mxu0 %vm368_vm0, %v354_v12  ;;  %2810 = vrot.lane.b32.xlu0 %v2799_v8, %s3178_s4 }
  0xbf   : > { %2435 = vmatprep.mubr.msk.f32.mxu0 %vm368_vm0, %v355_v5 }
 0x128   : > { %v2796_v13 = vpop.permute.xlu0 %2795 }
 0x129   : > { %v2798_v14 = vunpack.i.h.bf16 %v2796_v13  ;;  %v2797_v15 = vunpack.i.l.bf16 %v2796_v13 }
 0x12a   : > { %v459_v24 = vpop.permute.xlu1 %458 }
 0x12b   : > { %v2567_v16 = vpack.c.bf16 %v2798_v14, %v2797_v15 }
 0x12c   : > { %v2801_v17 = vpop.permute.xlu0 %2800 }
 0x12d   : > { %v2803_v18 = vunpack.i.h.bf16 %v2801_v17  ;;  %v2802_v19 = vunpack.i.l.bf16 %v2801_v17  ;;  %2568 = vmatprep.subr.bf16.mxu1 %v2567_v16 }
 0x12e   : > { %2570 = vmatpush3.bf16.msra.mxu1 %v2567_v16  ;;  %v2806_v33 = vpop.permute.xlu1 %2805 }
 0x12f   : > { %v2571_v20 = vpack.c.bf16 %v2803_v18, %v2802_v19  ;;  %v2808_v35 = vunpack.i.h.bf16 %v2806_v33  ;;  %v2807_v36 = vunpack.i.l.bf16 %v2806_v33 }
 0x130   : > { %v2811_v34 = vpop.permute.xlu0 %2810 }
 0x131   : > { %2572 = vmatprep.subr.bf16.mxu1 %v2571_v20  ;;  %v2813_v37 = vunpack.i.h.bf16 %v2811_v34  ;;  %v2812_v38 = vunpack.i.l.bf16 %v2811_v34  ;;  %v2575_v39 = vpack.c.bf16 %v2808_v35, %v2807_v36 }
 0x132   : > { %2574 = vmatpush3.bf16.msra.mxu1 %v2571_v20 }
 0x133   : > { %2583 = vmatprep.subr.bf16.mxu1 %v3175_v9  ;;  %v2579_v40 = vpack.c.bf16 %v2813_v37, %v2812_v38  ;;  %2576 = vmatprep.subr.bf16.mxu0 %v2575_v39 }
 0x134   : > { %2578 = vmatpush3.bf16.msra.mxu0 %v2575_v39 }
 0x135   : > { %2425 = vmatmul.mubr.msk.f32.vlgmr.msra.gmra.mrb[0].mxu1 %vm368_vm0, %v356_v21  ;;  %2580 = vmatprep.subr.bf16.mxu0 %v2579_v40 }
 0x136   : > { %2442 = vmatprep.mubr.msk.f32.mxu1 %vm3176_vm1, %v3177_v11 }
 0x138   : > { %2582 = vmatpush3.bf16.msra.mxu0 %v2579_v40 }
 0x139   : > { %2594 = vmatprep.subr.bf16.mxu0 %v3175_v9 }
 0x13b   : > { %2436 = vmatmul.mubr.msk.f32.vlgmr.msra.gmra.mrb[2].mxu0 %vm368_vm0, %v356_v21 }
 0x13c   : > { %2463 = vmatprep.mubr.msk.f32.mxu0 %vm3176_vm1, %v3177_v11 }
 0x191   : > { %v438_v22 = vpop.f32.mrb[0].mxu0 }
 0x192   : > { %v2415_v23 = vpop.f32.mrb[1].mxu0  ;;  %v3589_v32 = vadd.f32 %v3559_v7, %v438_v22 }
 0x208   : > { %v2426_v25 = vpop.f32.mrb[0].mxu1 }
 0x209   : > { %v539_v26 = vadd.f32 %v2426_v25, %v459_v24  ;;  %v533_v27 = vpop.f32.mrb[1].mxu1 }
 0x20a   : > { %v534_v28 = vadd.f32 %v533_v27, %v459_v24 }
 0x20c   : > { %v2584_v30 = vpack.c.bf16 %v539_v26, %v534_v28  ;;  %v3583_v31 = vpack.i.bf16 %v539_v26, %v534_v28 }
 0x20e   : > { %2586 = vmatpush3.bf16.xpose.msk.msra.mxu1 %vm3579_vm3, %v2584_v30  ;;  %v2437_v49 = vpop.f32.mrb[2].mxu0 }
 0x20f   : > { %2587 = vmatprep.subr.bf16.mxu1 %v3175_v9  ;;  %v623_v50 = vpop.f32.mrb[3].mxu0 }
 0x215   : > { %2443 = vmatmul.mubr.msk.f32.vlgmr.msra.gmra.mrb[2].mxu1 %vm632_vm2, %v3589_v32 }
 0x216   : > { %2449 = vmatprep.mubr.msk.f32.mxu1 %vm3176_vm1, %v3177_v11 }
 0x2e8   : > { %v708_v41 = vpop.f32.mrb[2].mxu1 }
 0x2e9   : > { %v2444_v42 = vpop.f32.mrb[3].mxu1  ;;  %v713_v43 = vsel %vm712_vm4, %v708_v41, -inf }
 0x2ea   : > { %714 = vmax.xlane.f32.xlu1 %v713_v43 }
 0x2fb   : > { %2815 = vrot.lane.b32.xlu1 %v3583_v31, %s3179_s19 }
 0x2ff   : > { %797 = vrot.lane.b32.xlu1 %v3589_v32, %s3179_s19 }
 0x377   : > { %v715_v44 = vpop.xlane.xlu1 %714 }
 0x378   : > { %v716_v45 = vsub.f32 %v708_v41, %v715_v44 }
 0x37a   : > { %v717_v46 = vmul.f32 1.442695, %v716_v45 }
 0x37b   : > { %v2816_v57 = vpop.permute.xlu1 %2815 }
 0x37c   : > { %2884 = vpow2.f32 %v717_v46  ;;  %v2818_v59 = vunpack.i.h.bf16 %v2816_v57  ;;  %v2817_v60 = vunpack.i.l.bf16 %v2816_v57 }
 0x37e   : > { %v2591_v62 = vpack.c.bf16 %v2818_v59, %v2817_v60 }
 0x37f   : > { %v798_v63 = vpop.permute.xlu1 %797 }
 0x386   : > { %v2885_v47 = vpop.eup %2884 }
 0x387   : > { %v719_v48 = vsel %vm712_vm4, %v2885_v47, 0.0 }
 0x388   : > { %720 = vadd.xlane.f32.xlu0 %v719_v48 }
 0x39e   : > { %554 = vrot.lane.b32.xlu0 %v3559_v7, %s3178_s4  ;;  %s2330_s4 = sshll.u32 %s3154_s28, 1  ;;  %s2129_s28 = scalar_lea.sflag [#allocation4], %s3524_s16 }
 0x415   : > { %v721_v51 = vpop.xlane.xlu0 %720 }
 0x416   : > { %2886 = vrcp.f32 %v721_v51 }
 0x419   : > { %v555_v52 = vpop.permute.xlu0 %554 }
 0x41a   : > { %v624_v53 = vadd.f32 %v623_v50, %v555_v52  ;;  %v629_v54 = vadd.f32 %v2437_v49, %v555_v52 }
 0x41c   : > { %v2588_v55 = vpack.c.bf16 %v629_v54, %v624_v53  ;;  %v3607_v56 = vpack.i.bf16 %v629_v54, %v624_v53 }
 0x41e   : > { %2589 = vmatpush3.bf16.msra.mxu1 %v2588_v55 }
 0x41f   : > { %2590 = vmatprep.subr.bf16.mxu1 %v3175_v9 }
 0x420   : > { %v2887_v58 = vpop.eup %2886 }
 0x421   : > { %v723_v61 = vmul.f32 %v2887_v58, %v2885_v47 }
 0x423   : > { %2450 = vmatmul.mubr.msk.f32.vlgmr.msra.gmra.mrb[4].mxu1 %vm712_vm4, %v723_v61 }
 0x424   : > { %2456 = vmatprep.mubr.msk.f32.mxu1 %vm3176_vm1, %v3177_v11 }
 0x427   : > { %2593 = vmatpush3.bf16.xpose.msk.msra.mxu1 %vm3579_vm3, %v2591_v62 }
 0x428   : > { %2601 = vmatprep.subr.bf16.mxu1 %v3175_v9 }
 0x42e   : > { %2457 = vmatmul.mubr.msk.f32.vlgmr.msra.gmra.mrb[6].mxu1 %vm632_vm2, %v798_v63 }
 0x42f   : > { %2477 = vmatprep.mubr.msk.f32.mxu1 %vm3176_vm1, %v3177_v11 }
 0x4f6   : > { %v3619_v0 = vpop.f32.mrb[4].mxu1 }
 0x4f7   : > { %v2451_v1 = vpop.f32.mrb[5].mxu1 }
 0x501   : > { %v875_v2 = vpop.f32.mrb[6].mxu1 }
 0x502   : > { %v2458_v3 = vpop.f32.mrb[7].mxu1  ;;  %v879_v4 = vsel %vm712_vm4, %v875_v2, -inf }
 0x503   : > { %880 = vmax.xlane.f32.xlu0 %v879_v4 }
 0x519   : > { %2820 = vrot.lane.b32.xlu0 %v3607_v56, %s3179_s19  ;;  %s2140_s19 = sadd.s32 %s3880_s8, %s2330_s4 }
 0x51d   : > { %971 = vrot.lane.b32.xlu0 %v3589_v32, %s3180_s20 }
 0x590   : > { %v881_v5 = vpop.xlane.xlu0 %880 }
 0x591   : > { %v882_v6 = vsub.f32 %v875_v2, %v881_v5 }
 0x593   : > { %v883_v7 = vmul.f32 1.442695, %v882_v6 }
 0x594   : > { %v2821_v8 = vpop.permute.xlu0 %2820 }
 0x595   : > { %2888 = vpow2.f32 %v883_v7  ;;  %v2823_v10 = vunpack.i.h.bf16 %v2821_v8  ;;  %v2822_v12 = vunpack.i.l.bf16 %v2821_v8 }
 0x597   : > { %v2595_v13 = vpack.c.bf16 %v2823_v10, %v2822_v12 }
 0x598   : > { %v972_v23 = vpop.permute.xlu0 %971 }
 0x599   : > { %2596 = vmatpush3.bf16.msra.mxu0 %v2595_v13 }
 0x59a   : > { %2597 = vmatprep.subr.bf16.mxu0 %v3175_v9 }
 0x59f   : > { %v2889_v14 = vpop.eup %2888 }
 0x5a0   : > { %v885_v15 = vsel %vm712_vm4, %v2889_v14, 0.0 }
 0x5a1   : > { %886 = vadd.xlane.f32.xlu1 %v885_v15 }
 0x5b2   : > { %2825 = vrot.lane.b32.xlu1 %v3583_v31, %s3180_s20 }
 0x62e   : > { %v887_v16 = vpop.xlane.xlu1 %886 }
 0x62f   : > { %2890 = vrcp.f32 %v887_v16 }
 0x632   : > { %v2826_v17 = vpop.permute.xlu1 %2825 }
 0x633   : > { %v2828_v18 = vunpack.i.h.bf16 %v2826_v17  ;;  %v2827_v19 = vunpack.i.l.bf16 %v2826_v17 }
 0x635   : > { %v2598_v22 = vpack.c.bf16 %v2828_v18, %v2827_v19 }
 0x639   : > { %v2891_v20 = vpop.eup %2890 }
 0x63a   : > { %v889_v21 = vmul.f32 %v2891_v20, %v2889_v14 }
 0x63c   : > { %2464 = vmatmul.mubr.msk.f32.vlgmr.msra.gmra.mrb[4].mxu0 %vm712_vm4, %v889_v21 }
 0x63d   : > { %2600 = vmatpush3.bf16.xpose.msk.msra.mxu0 %vm3579_vm3, %v2598_v22  ;;  %2470 = vmatprep.mubr.msk.f32.mxu0 %vm3176_vm1, %v3177_v11 }
 0x63e   : > { %2608 = vmatprep.subr.bf16.mxu0 %v3175_v9 }
 0x644   : > { %2471 = vmatmul.mubr.msk.f32.vlgmr.msra.gmra.mrb[6].mxu0 %vm632_vm2, %v972_v23 }
 0x645   : > { %2491 = vmatprep.mubr.msk.f32.mxu0 %vm3176_vm1, %v3177_v11 }
 0x70f   : > { %v3639_v24 = vpop.f32.mrb[4].mxu0 }
 0x710   : > { %v2465_v25 = vpop.f32.mrb[5].mxu0 }
 0x717   : > { %v1049_v26 = vpop.f32.mrb[6].mxu0 }
 0x718   : > { %v2472_v27 = vpop.f32.mrb[7].mxu0  ;;  %v1053_v28 = vsel %vm712_vm4, %v1049_v26, -inf }
 0x719   : > { %1054 = vmax.xlane.f32.xlu1 %v1053_v28 }
 0x72a   : > { %2835 = vrot.lane.b32.xlu1 %v3583_v31, %s3181_s27 }
 0x72e   : > { %1143 = vrot.lane.b32.xlu1 %v3589_v32, %s3181_s27 }
 0x7a6   : > { %v1055_v30 = vpop.xlane.xlu1 %1054 }
 0x7a7   : > { %v1056_v33 = vsub.f32 %v1049_v26, %v1055_v30 }
 0x7a9   : > { %v1057_v34 = vmul.f32 1.442695, %v1056_v33 }
 0x7aa   : > { %v2836_v42 = vpop.permute.xlu1 %2835 }
 0x7ab   : > { %2892 = vpow2.f32 %v1057_v34  ;;  %v2838_v44 = vunpack.i.h.bf16 %v2836_v42  ;;  %v2837_v45 = vunpack.i.l.bf16 %v2836_v42 }
 0x7ad   : > { %v2605_v47 = vpack.c.bf16 %v2838_v44, %v2837_v45 }
 0x7ae   : > { %v1144_v48 = vpop.permute.xlu1 %1143 }
 0x7b5   : > { %v2893_v35 = vpop.eup %2892 }
 0x7b6   : > { %v1059_v36 = vsel %vm712_vm4, %v2893_v35, 0.0 }
 0x7b7   : > { %1060 = vadd.xlane.f32.xlu0 %v1059_v36 }
 0x7cd   : > { %2830 = vrot.lane.b32.xlu0 %v3607_v56, %s3180_s20 }
 0x844   : > { %v1061_v37 = vpop.xlane.xlu0 %1060 }
 0x845   : > { %2894 = vrcp.f32 %v1061_v37 }
 0x848   : > { %v2831_v38 = vpop.permute.xlu0 %2830 }
 0x849   : > { %v2833_v39 = vunpack.i.h.bf16 %v2831_v38  ;;  %v2832_v40 = vunpack.i.l.bf16 %v2831_v38 }
 0x84b   : > { %v2602_v41 = vpack.c.bf16 %v2833_v39, %v2832_v40 }
 0x84d   : > { %2603 = vmatpush3.bf16.msra.mxu1 %v2602_v41 }
 0x84e   : > { %2604 = vmatprep.subr.bf16.mxu1 %v3175_v9 }
 0x84f   : > { %v2895_v43 = vpop.eup %2894 }
 0x850   : > { %v1063_v46 = vmul.f32 %v2895_v43, %v2893_v35 }
 0x852   : > { %2478 = vmatmul.mubr.msk.f32.vlgmr.msra.gmra.mrb[8].mxu1 %vm712_vm4, %v1063_v46 }
 0x853   : > { %2484 = vmatprep.mubr.msk.f32.mxu1 %vm3176_vm1, %v3177_v11 }
 0x856   : > { %2607 = vmatpush3.bf16.xpose.msk.msra.mxu1 %vm3579_vm3, %v2605_v47 }
 0x857   : > { %2615 = vmatprep.subr.bf16.mxu1 %v3175_v9 }
 0x85d   : > { %2485 = vmatmul.mubr.msk.f32.vlgmr.msra.gmra.mrb[10].mxu1 %vm632_vm2, %v1144_v48 }
 0x85e   : > { %2505 = vmatprep.mubr.msk.f32.mxu1 %vm3176_vm1, %v3177_v11 }
 0x925   : > { %v3659_v49 = vpop.f32.mrb[8].mxu1 }
 0x926   : > { %v2479_v50 = vpop.f32.mrb[9].mxu1 }
 0x930   : > { %v1221_v51 = vpop.f32.mrb[10].mxu1 }
 0x931   : > { %v2486_v52 = vpop.f32.mrb[11].mxu1  ;;  %v1225_v53 = vsel %vm712_vm4, %v1221_v51, -inf }
 0x932   : > { %1226 = vmax.xlane.f32.xlu0 %v1225_v53 }
 0x948   : > { %2840 = vrot.lane.b32.xlu0 %v3607_v56, %s3181_s27 }
 0x94c   : > { %1315 = vrot.lane.b32.xlu0 %v3589_v32, %s3182_s18 }
 0x9bf   : > { %v1227_v54 = vpop.xlane.xlu0 %1226 }
 0x9c0   : > { %v1228_v55 = vsub.f32 %v1221_v51, %v1227_v54 }
 0x9c2   : > { %v1229_v57 = vmul.f32 1.442695, %v1228_v55 }
 0x9c3   : > { %v2841_v58 = vpop.permute.xlu0 %2840 }
 0x9c4   : > { %2896 = vpow2.f32 %v1229_v57  ;;  %v2843_v59 = vunpack.i.h.bf16 %v2841_v58  ;;  %v2842_v60 = vunpack.i.l.bf16 %v2841_v58 }
 0x9c6   : > { %v2609_v61 = vpack.c.bf16 %v2843_v59, %v2842_v60 }
 0x9c7   : > { %v1316_v8 = vpop.permute.xlu0 %1315 }
 0x9c8   : > { %2610 = vmatpush3.bf16.msra.mxu0 %v2609_v61 }
 0x9c9   : > { %2611 = vmatprep.subr.bf16.mxu0 %v3175_v9 }
 0x9ce   : > { %v2897_v62 = vpop.eup %2896 }
 0x9cf   : > { %v1231_v63 = vsel %vm712_vm4, %v2897_v62, 0.0 }
 0x9d0   : > { %1232 = vadd.xlane.f32.xlu1 %v1231_v63 }
 0x9e1   : > { %2845 = vrot.lane.b32.xlu1 %v3583_v31, %s3182_s18 }
 0xa5d   : > { %v1233_v1 = vpop.xlane.xlu1 %1232 }
 0xa5e   : > { %2898 = vrcp.f32 %v1233_v1 }
 0xa61   : > { %v2846_v2 = vpop.permute.xlu1 %2845 }
 0xa62   : > { %v2848_v3 = vunpack.i.h.bf16 %v2846_v2  ;;  %v2847_v4 = vunpack.i.l.bf16 %v2846_v2 }
 0xa64   : > { %v2612_v7 = vpack.c.bf16 %v2848_v3, %v2847_v4 }
 0xa68   : > { %v2899_v5 = vpop.eup %2898 }
 0xa69   : > { %v1235_v6 = vmul.f32 %v2899_v5, %v2897_v62 }
 0xa6b   : > { %2492 = vmatmul.mubr.msk.f32.vlgmr.msra.gmra.mrb[8].mxu0 %vm712_vm4, %v1235_v6 }
 0xa6c   : > { %2614 = vmatpush3.bf16.xpose.msk.msra.mxu0 %vm3579_vm3, %v2612_v7  ;;  %2498 = vmatprep.mubr.msk.f32.mxu0 %vm3176_vm1, %v3177_v11 }
 0xa6d   : > { %2622 = vmatprep.subr.bf16.mxu0 %v3175_v9 }
 0xa73   : > { %2499 = vmatmul.mubr.msk.f32.vlgmr.msra.gmra.mrb[10].mxu0 %vm632_vm2, %v1316_v8 }
 0xa74   : > { %2519 = vmatprep.mubr.msk.f32.mxu0 %vm3176_vm1, %v3177_v11 }
 0xb3e   : > { %v3679_v10 = vpop.f32.mrb[8].mxu0 }
 0xb3f   : > { %v2493_v12 = vpop.f32.mrb[9].mxu0 }
 0xb46   : > { %v1393_v13 = vpop.f32.mrb[10].mxu0 }
 0xb47   : > { %v2500_v14 = vpop.f32.mrb[11].mxu0  ;;  %v1397_v15 = vsel %vm712_vm4, %v1393_v13, -inf }
 0xb48   : > { %1398 = vmax.xlane.f32.xlu1 %v1397_v15 }
 0xb59   : > { %2855 = vrot.lane.b32.xlu1 %v3583_v31, %s3183_s6 }
 0xb5d   : > { %1487 = vrot.lane.b32.xlu1 %v3589_v32, %s3183_s6 }
 0xbd5   : > { %v1399_v16 = vpop.xlane.xlu1 %1398 }
 0xbd6   : > { %v1400_v17 = vsub.f32 %v1393_v13, %v1399_v16 }
 0xbd8   : > { %v1401_v18 = vmul.f32 1.442695, %v1400_v17 }
 0xbd9   : > { %v2856_v27 = vpop.permute.xlu1 %2855 }
 0xbda   : > { %2900 = vpow2.f32 %v1401_v18  ;;  %v2858_v30 = vunpack.i.h.bf16 %v2856_v27  ;;  %v2857_v33 = vunpack.i.l.bf16 %v2856_v27 }
 0xbdc   : > { %v2619_v35 = vpack.c.bf16 %v2858_v30, %v2857_v33 }
 0xbdd   : > { %v1488_v36 = vpop.permute.xlu1 %1487 }
 0xbe4   : > { %v2901_v19 = vpop.eup %2900 }
 0xbe5   : > { %v1403_v20 = vsel %vm712_vm4, %v2901_v19, 0.0 }
 0xbe6   : > { %1404 = vadd.xlane.f32.xlu0 %v1403_v20 }
 0xbfc   : > { %2850 = vrot.lane.b32.xlu0 %v3607_v56, %s3182_s18  ;;  %s3881_s18 = sld [smem:[#allocation24_spill]] }
 0xc73   : > { %v1405_v21 = vpop.xlane.xlu0 %1404 }
 0xc74   : > { %2902 = vrcp.f32 %v1405_v21 }
 0xc77   : > { %v2851_v22 = vpop.permute.xlu0 %2850 }
 0xc78   : > { %v2853_v23 = vunpack.i.h.bf16 %v2851_v22  ;;  %v2852_v25 = vunpack.i.l.bf16 %v2851_v22 }
 0xc7a   : > { %v2616_v26 = vpack.c.bf16 %v2853_v23, %v2852_v25 }
 0xc7c   : > { %2617 = vmatpush3.bf16.msra.mxu1 %v2616_v26 }
 0xc7d   : > { %2618 = vmatprep.subr.bf16.mxu1 %v3175_v9 }
 0xc7e   : > { %v2903_v28 = vpop.eup %2902 }
 0xc7f   : > { %v1407_v34 = vmul.f32 %v2903_v28, %v2901_v19 }
 0xc81   : > { %2506 = vmatmul.mubr.msk.f32.vlgmr.msra.gmra.mrb[12].mxu1 %vm712_vm4, %v1407_v34 }
 0xc82   : > { %2512 = vmatprep.mubr.msk.f32.mxu1 %vm3176_vm1, %v3177_v11 }
 0xc85   : > { %2621 = vmatpush3.bf16.xpose.msk.msra.mxu1 %vm3579_vm3, %v2619_v35 }
 0xc86   : > { %2629 = vmatprep.subr.bf16.mxu1 %v3175_v9 }
 0xc8c   : > { %2513 = vmatmul.mubr.msk.f32.vlgmr.msra.gmra.mrb[14].mxu1 %vm632_vm2, %v1488_v36 }
 0xc8d   : > { %2533 = vmatprep.mubr.msk.f32.mxu1 %vm3176_vm1, %v3177_v11 }
 0xd54   : > { %v3699_v37 = vpop.f32.mrb[12].mxu1 }
 0xd55   : > { %v2507_v38 = vpop.f32.mrb[13].mxu1 }
 0xd5f   : > { %v1565_v39 = vpop.f32.mrb[14].mxu1 }
 0xd60   : > { %v2514_v40 = vpop.f32.mrb[15].mxu1  ;;  %v1569_v41 = vsel %vm712_vm4, %v1565_v39, -inf }
 0xd61   : > { %1570 = vmax.xlane.f32.xlu0 %v1569_v41  ;;  %v2044_v40 = vld [vmem:[#allocation8 + $0x8] sm:$0xff]  ;;  %v2045_v41 = vld [vmem:[#allocation8 + $0x10] sm:$0xff] }
 0xd77   : > { %2860 = vrot.lane.b32.xlu0 %v3607_v56, %s3183_s6  ;;  %s2331_s6 = sshll.u32 %s2140_s19, 7 }
 0xd7b   : > { %1659 = vrot.lane.b32.xlu0 %v3589_v32, %s3184_s5 }
 0xdee   : > { %v1571_v42 = vpop.xlane.xlu0 %1570 }
 0xdef   : > { %v1572_v43 = vsub.f32 %v1565_v39, %v1571_v42  ;;  %v2043_v39 = vld [vmem:[#allocation8] sm:$0xff] }
 0xdf0   : > { %v2640_v42 = vpack.c.bf16 %v2044_v40, %v2043_v39 }
 0xdf1   : > { %v1573_v44 = vmul.f32 1.442695, %v1572_v43 }
 0xdf2   : > { %v2861_v45 = vpop.permute.xlu0 %2860 }
 0xdf3   : > { %2904 = vpow2.f32 %v1573_v44  ;;  %v2863_v46 = vunpack.i.h.bf16 %v2861_v45  ;;  %v2862_v47 = vunpack.i.l.bf16 %v2861_v45 }
 0xdf5   : > { %v2623_v48 = vpack.c.bf16 %v2863_v46, %v2862_v47 }
 0xdf6   : > { %v1660_v60 = vpop.permute.xlu0 %1659 }
 0xdf7   : > { %2624 = vmatpush3.bf16.msra.mxu0 %v2623_v48 }
 0xdf8   : > { %2625 = vmatprep.subr.bf16.mxu0 %v3175_v9 }
 0xdfd   : > { %v2905_v50 = vpop.eup %2904 }
 0xdfe   : > { %v1575_v51 = vsel %vm712_vm4, %v2905_v50, 0.0 }
 0xdff   : > { %1576 = vadd.xlane.f32.xlu1 %v1575_v51 }
 0xe10   : > { %2865 = vrot.lane.b32.xlu1 %v3583_v31, %s3184_s5 }
 0xe8c   : > { %v1577_v52 = vpop.xlane.xlu1 %1576 }
 0xe8d   : > { %2906 = vrcp.f32 %v1577_v52 }
 0xe90   : > { %v2866_v53 = vpop.permute.xlu1 %2865 }
 0xe91   : > { %v2868_v54 = vunpack.i.h.bf16 %v2866_v53  ;;  %v2867_v55 = vunpack.i.l.bf16 %v2866_v53 }
 0xe93   : > { %v2626_v59 = vpack.c.bf16 %v2868_v54, %v2867_v55 }
 0xe97   : > { %v2907_v57 = vpop.eup %2906 }
 0xe98   : > { %v1579_v58 = vmul.f32 %v2907_v57, %v2905_v50 }
 0xe9a   : > { %2520 = vmatmul.mubr.msk.f32.vlgmr.msra.gmra.mrb[12].mxu0 %vm712_vm4, %v1579_v58  ;;  %v2327_v58 = vld [vmem:[%s3881_s18] ss:$0 sm:$0xff] }
 0xe9b   : > { %2628 = vmatpush3.bf16.xpose.msk.msra.mxu0 %vm3579_vm3, %v2626_v59  ;;  %2526 = vmatprep.mubr.msk.f32.mxu0 %vm3176_vm1, %v3177_v11 }
 0xe9c   : > { %2636 = vmatprep.subr.bf16.mxu0 %v3175_v9 }
 0xea2   : > { %2527 = vmatmul.mubr.msk.f32.vlgmr.msra.gmra.mrb[14].mxu0 %vm632_vm2, %v1660_v60 }
 0xea3   : > { %2547 = vmatprep.mubr.msk.f32.mxu0 %vm3176_vm1, %v3177_v11 }
 0xf6d   : > { %v3719_v61 = vpop.f32.mrb[12].mxu0 }
 0xf6e   : > { %v2521_v62 = vpop.f32.mrb[13].mxu0 }
 0xf75   : > { %v1737_v63 = vpop.f32.mrb[14].mxu0 }
 0xf76   : > { %v2528_v1 = vpop.f32.mrb[15].mxu0  ;;  %v1741_v2 = vsel %vm712_vm4, %v1737_v63, -inf }
 0xf77   : > { %1742 = vmax.xlane.f32.xlu1 %v1741_v2 }
 0xf88   : > { %2875 = vrot.lane.b32.xlu1 %v3583_v31, %s3185_s2 }
 0xf8c   : > { %1831 = vrot.lane.b32.xlu1 %v3589_v32, %s3185_s2 }
0x1004   : > { %v1743_v3 = vpop.xlane.xlu1 %1742 }
0x1005   : > { %v1744_v4 = vsub.f32 %v1737_v63, %v1743_v3 }
0x1007   : > { %v1745_v5 = vmul.f32 1.442695, %v1744_v4 }
0x1008   : > { %v2876_v15 = vpop.permute.xlu1 %2875 }
0x1009   : > { %2908 = vpow2.f32 %v1745_v5  ;;  %v2878_v16 = vunpack.i.h.bf16 %v2876_v15  ;;  %v2877_v17 = vunpack.i.l.bf16 %v2876_v15 }
0x100b   : > { %v2633_v19 = vpack.c.bf16 %v2878_v16, %v2877_v17 }
0x100c   : > { %v1832_v20 = vpop.permute.xlu1 %1831 }
0x1013   : > { %v2909_v6 = vpop.eup %2908 }
0x1014   : > { %v1747_v7 = vsel %vm712_vm4, %v2909_v6, 0.0 }
0x1015   : > { %1748 = vadd.xlane.f32.xlu0 %v1747_v7 }
0x102b   : > { %2870 = vrot.lane.b32.xlu0 %v3607_v56, %s3184_s5  ;;  %s353_s5 = scalar_lea.vmem [#allocation10], %s2284_s13  ;;  %s3193_s13 = smov [#allocation10]  }
0x10a2   : > { %v1749_v8 = vpop.xlane.xlu0 %1748 }
0x10a3   : > { %2910 = vrcp.f32 %v1749_v8 }
0x10a6   : > { %v2871_v12 = vpop.permute.xlu0 %2870 }
0x10a7   : > { %v2873_v13 = vunpack.i.h.bf16 %v2871_v12  ;;  %v2872_v14 = vunpack.i.l.bf16 %v2871_v12 }
0x10a9   : > { %v2630_v31 = vpack.c.bf16 %v2873_v13, %v2872_v14 }
0x10ab   : > { %2631 = vmatpush3.bf16.msra.mxu1 %v2630_v31 }
0x10ac   : > { %2632 = vmatprep.subr.bf16.mxu1 %v3175_v9 }
0x10ad   : > { %v2911_v32 = vpop.eup %2910 }
0x10ae   : > { %v1751_v18 = vmul.f32 %v2911_v32, %v2909_v6 }
0x10b0   : > { %2534 = vmatmul.mubr.msk.f32.vlgmr.msra.gmra.mrb[16].mxu1 %vm712_vm4, %v1751_v18 }
0x10b1   : > { %2540 = vmatprep.mubr.msk.f32.mxu1 %vm3176_vm1, %v3177_v11 }
0x10b4   : > { %2635 = vmatpush3.bf16.xpose.msk.msra.mxu1 %vm3579_vm3, %v2633_v19 }
0x10bb   : > { %2541 = vmatmul.mubr.msk.f32.vlgmr.msra.gmra.mrb[18].mxu1 %vm632_vm2, %v1832_v20 }
0x1183   : > { %v1827_v21 = vpop.f32.mrb[16].mxu1 }
0x1184   : > { %v2535_v22 = vpop.f32.mrb[17].mxu1 }
0x118e   : > { %v1909_v23 = vpop.f32.mrb[18].mxu1 }
0x118f   : > { %v2542_v25 = vpop.f32.mrb[19].mxu1  ;;  %v1913_v26 = vsel %vm712_vm4, %v1909_v23, -inf }
0x1190   : > { %1914 = vmax.xlane.f32.xlu0 %v1913_v26 }
0x11a6   : > { %2880 = vrot.lane.b32.xlu0 %v3607_v56, %s3185_s2  ;;  %s2144_s2 = sshll.u32 %s353_s5, 4  ;;  %s3766_s2 = int_to_ptr.vmem [resolvable:$true] %s2144_s2 }
0x11aa   : > { %2008 = vrot.lane.b32.xlu0 %v3659_v49, %s3186_s10 }
0x11ae   : > { %2016 = vrot.lane.b32.xlu0 %v3699_v37, %s3187_s15 }
0x11b2   : > { %2024 = vrot.lane.b32.xlu0 %v1827_v21, %s3188_s12  ;;  %s3882_s12 = sld [smem:[#allocation25_spill]] }
0x121d   : > { %v1915_v29 = vpop.xlane.xlu0 %1914 }
0x121e   : > { %v1916_v27 = vsub.f32 %v1909_v23, %v1915_v29 }
0x1220   : > { %v1917_v28 = vmul.f32 1.442695, %v1916_v27 }
0x1221   : > { %v2881_v30 = vpop.permute.xlu0 %2880 }
0x1222   : > { %2912 = vpow2.f32 %v1917_v28  ;;  %v2883_v33 = vunpack.i.h.bf16 %v2881_v30  ;;  %v2882_v34 = vunpack.i.l.bf16 %v2881_v30 }
0x1224   : > { %v2637_v35 = vpack.c.bf16 %v2883_v33, %v2882_v34 }
0x1225   : > { %v2009_v46 = vpop.permute.xlu0 %2008 }
0x1226   : > { %2638 = vmatpush3.bf16.msra.mxu0 %v2637_v35 }
0x1227   : > { %2639 = vmatprep.subr.bf16.mxu0 %v3175_v9 }
0x1229   : > { %v2017_v50 = vpop.permute.xlu0 %2016 }
0x122c   : > { %v2913_v56 = vpop.eup %2912 }
0x122d   : > { %v1919_v36 = vsel %vm712_vm4, %v2913_v56, 0.0  ;;  %v2025_v54 = vpop.permute.xlu0 %2024 }
0x122e   : > { %1920 = vadd.xlane.f32.xlu1 %v1919_v36 }
0x123f   : > { %2004 = vrot.lane.b32.xlu1 %v3639_v24, %s3189_s29  ;;  %v2046_v24 = vld [vmem:[#allocation8 + $0x18] sm:$0xff]  ;;  %s3764_s29 = scalar_lea.hbm %s3882_s12, %s2331_s6 }
0x1240   : > { %v2643_v43 = vpack.c.bf16 %v2046_v24, %v2045_v41 }
0x1243   : > { %2012 = vrot.lane.b32.xlu1 %v3679_v10, %s3190_s21  ;;  %s3032_s21 = scalar_lea.vmem %s3766_s2, 128 }
0x1244   : > { %p3033_p0 = scmp.ne.s32.totalorder %s3766_s2, %s3032_s21 }
0x1246   : > { %p3034_p3 = pnand %p3033_p0, %p3883_p2 }
0x1247   : > { %2020 = vrot.lane.b32.xlu1 %v3719_v61, %s3191_s9  ;;  %s3036_s9 = sshll.u32 %s3193_s13, 4  ;;  %s3037_s9 = int_to_ptr.vmem [resolvable:$false] %s3036_s9 }
0x1248   : > { %p3035_p11 = pneg %p3034_p3  ;;  %p3039_p7 = scmp.lt.s32.totalorder %s3766_s2, %s3037_s9 }
0x12bb   : > { %v1921_v49 = vpop.xlane.xlu1 %1920 }
0x12bc   : > { %2914 = vrcp.f32 %v1921_v49 }
0x12bf   : > { %v2005_v45 = vpop.permute.xlu1 %2004 }
0x12c3   : > { %v2013_v47 = vpop.permute.xlu1 %2012 }
0x12c6   : > { %v2915_v37 = vpop.eup %2914 }
0x12c7   : > { %v1923_v38 = vmul.f32 %v2915_v37, %v2913_v56 }
0x12c9   : > { %2548 = vmatmul.mubr.msk.f32.vlgmr.msra.gmra.mrb[16].mxu0 %vm712_vm4, %v1923_v38 }
0x12ca   : > { %2558 = vmatprep.mubr.msk.f32.mxu0 %vm3176_vm1, %v3177_v11  ;;  %2641 = vmatpush3.bf16.msra.mxu0 %v2640_v42  ;;  %v2031_v11 = vsel %vm632_vm2, %v3619_v0, %v2005_v45 }
0x12cb   : > { %2642 = vmatprep.subr.bf16.mxu0 %v3175_v9  ;;  %v2033_v48 = vsel %vm2032_vm5, %v2031_v11, %v2009_v46  ;;  %v2021_v9 = vpop.permute.xlu1 %2020 }
0x12cc   : > { %v2035_v51 = vsel %vm2034_vm6, %v2033_v48, %v2013_v47 }
0x12cd   : > { %v2036_v52 = vsel %vm712_vm4, %v2035_v51, %v2017_v50 }
0x12ce   : > { %2644 = vmatpush3.bf16.msra.mxu0 %v2643_v43  ;;  %v2038_v53 = vsel %vm2037_vm7, %v2036_v52, %v2021_v9 }
0x12cf   : > { %v2040_v55 = vsel %vm2039_vm8, %v2038_v53, %v2025_v54 }
0x139c   : > { %v1999_v10 = vpop.f32.mrb[16].mxu0 }
0x139d   : > { %2028 = vrot.lane.b32.xlu1 %v1999_v10, %s3192_s11  ;;  %v2549_v44 = vpop.f32.mrb[17].mxu0  ;;  %s3038_s11 = scalar_lea.vmem %s3037_s9, 256 }
0x139e   : > { %p3040_p12 = scmp.lt.s32.totalorder %s3038_s11, %s3032_s21 }
0x13a0   : > { %p3041_p13 = por %p3040_p12, %p3039_p7 }
0x13a2   : > { %p3042_p6 = pnand %p3041_p13, %p3035_p11 }
0x140f   : > { %v2029_v57 = vpop.permute.xlu1 %2028 }
0x1410   : > { %v2042_v0 = vsel %vm2041_vm9, %v2040_v55, %v2029_v57 }
0x1411   : > { %2559 = vmatmul.mubr.msk.f32.vlgmr.msra.gmra.mrb[18].mxu0 %vm368_vm0, %v2042_v0 }
0x14e4   : > { %v2123_v59 = vpop.f32.mrb[18].mxu0 }
0x14e5   : > { %v2124_v60 = vadd.f32 %v2327_v58, %v2123_v59  ;;  %v2560_v61 = vpop.f32.mrb[19].mxu0 }
0x14e7   : > { %2127 = vst.msk [vmem:[%s353_s5] sm:$0xff] %vm368_vm0, %v2124_v60 }
0x14e8   : > { %3045 = shalt.err (!%p3042_p6)
}
0x14e9   : > { %s3046_s16 = scalar_lea.hbm %s3764_s29, 128  ;;  %s3050_s19 = scalar_lea.hbm %s3882_s12, 512 }
0x14ea   : > { %p3047_p1 = scmp.ne.s32.totalorder %s3764_s29, %s3046_s16  ;;  %p3051_p4 = scmp.lt.u32.totalorder %s3764_s29, %s3882_s12 }
0x14eb   : > { %p3052_p10 = scmp.lt.u32.totalorder %s3050_s19, %s3046_s16  ;;  %p3054_p0 = scmp.lt.u32.totalorder %s3046_s16, %s3764_s29 }
0x14ec   : > { %p3048_p5 = pnand %p3047_p1, %p3883_p2 }
0x14ed   : > { %p3053_p8 = por %p3052_p10, %p3051_p4 }
0x14ee   : > { %p3049_p9 = pneg %p3048_p5 }
0x14ef   : > { %p3055_p3 = por %p3054_p0, %p3053_p8 }
0x14f1   : > { %p3056_p11 = pnand %p3055_p3, %p3049_p9 }
0x14f3   : > { %3059 = shalt.err (!%p3056_p11)
}
0x14f4   : > { %2657 = dma.vmem_to_hbm [thread:$0]  (%p3883_p2), %s3766_s2, 128, %s3764_s29, %s2129_s28  }
0x14f5 PF: > { %p2682_p7 = scmp.ge.s32.totalorder %s3166_s7, 2  ;;  %s2156_s18 = sand.u32 1, %s3138_s24  }
0x14f6   : > { %p3884_p12 = scmp.ne.s32.totalorder %s3866_s14, 0  ;;  %s2157_s6 = scalar_lea.sflag [#allocation4], %s2156_s18 }
0x14f8   : > { %p2674_p13 = pnand %p2682_p7, %p3884_p12 }
0x14fa   : > { %3121 = dma.done.wait (!%p2674_p13), %s2157_s6, 128  }
0x14fb   : > { %3123 = vsyncadd (!%p2674_p13), %s2157_s6, 4294967168  ;;  %s26_s7 = sadd.s32 1, %s3166_s7   ;;  %s3885_s17 = sld [smem:[#allocation20_spill]] }
0x14fc   : > { %p23_p6 = scmp.ge.s32.totalorder %s26_s7, 6   ;;  %s3886_s5 = sld [smem:[#allocation21_spill]] }
0x14fd   : > { %s3887_s27 = sld [smem:[#allocation17_spill]]  ;;  %s3888_s29 = sld [smem:[#allocation18_spill]] }
0x14fe   : > { %s3889_s2 = sld [smem:[#allocation19_spill]]  ;;  %s3890_s21 = smov %s3130_s22 }
0x14ff   : > { %s3891_s22 = smov %s3134_s23  ;;  %s3893_s24 = smov %s3142_s25 }
0x1500   : > { %s3894_s25 = smov %s3146_s26  ;;  %s3896_s28 = smov %s3162_s30 }
0x1501   : > { %s3892_s23 = smov %s3885_s17  ;;  %25 = sbr.rel (!%p23_p6) target bundleno = 17 (0x11), region = 110 }
0x1502   : > { %s3895_s26 = smov %s3886_s5 }
0x1504   : > { %s3897_s30 = smov %s3889_s2 }
0x1508   :  { %2162 = vsyncpa [#allocation3], 1 }
0x1509   :  { %2164 = vsyncpa [#allocation3 + $0x1], 1 }
0x150a   :  { %2165 = vsyncpa [#allocation6], 1 }
0x150b   :  { %2167 = vsyncpa [#allocation6 + $0x1], 1 }
0x150c   :  { %2168 = vsyncpa [#allocation9], 1 }
0x150d   :  { %2169 = vsyncpa [#allocation4], 1 }
0x150e   :  { %2171 = vsyncpa [#allocation4 + $0x1], 1 }

</bundles_post_ra>
